<compile_context>
chip_gen: v7x
topology: tpu7x:2x2x1
jax: 0.10.0
libtpu: 0.0.40
codegen_flags: <defaults>
</compile_context>

<pallas_src>
import numpy as np

import jax
import jax.numpy as jnp
from jax import lax
from jax.experimental import pallas as pl
from jax.experimental.pallas import tpu as pltpu


# ----------------------------------------------------------------------------
# Fused LeNet kernel (one batch tile per grid step, batch lives in lanes)
# ----------------------------------------------------------------------------
def lenet_fused_kernel(x_ref, w1_ref, b1_ref, w2_ref, b2_ref,
                       fw1_ref, fb1_ref, fw2_ref, fb2_ref,
                       o_ref, y1_scr, a2_scr):
    """Fully fused LeNet forward for one batch tile.

    x_ref  : (784, bt)  bf16   input pixels, row = h*28 + w
    w1_ref : (480, 168) bf16   conv1 Toeplitz weights (4 pool offsets stacked)
    b1_ref : (120, 1)   f32    conv1 bias, row = c*12 + q
    w2_ref : (320, 720) bf16   conv2 Toeplitz weights (4 pool offsets stacked)
    b2_ref : (80, 1)    f32    conv2 bias, row = c2*4 + q2
    fw1_ref: (50, 320)  bf16   fc1 weights, column = h2*80 + c2*4 + w2
    fb1_ref: (50, 1)    f32
    fw2_ref: (10, 50)   bf16
    fb2_ref: (10, 1)    f32
    o_ref  : (10, bt)   f32    logits, one column per image in the tile
    y1_scr : (1440, bt) bf16   conv1 pooled output, row = h1*120 + c*12 + w1
    a2_scr : (320, bt)  bf16   conv2 pooled output, row = h2*80 + c2*4 + w2
    """
    # conv1 (1->10, k=5) + 2x2 maxpool + bias + ReLU : 28x28 -> 10 x 12x12
    w1 = w1_ref[...]
    b1 = b1_ref[...]
    for p in range(12):                          # pooled output row
        slab = x_ref[56 * p:56 * p + 168, :]     # 6 consecutive image rows
        y = jnp.dot(w1, slab, preferred_element_type=jnp.float32)   # (480, bt)
        m = jnp.maximum(jnp.maximum(y[0:120], y[120:240]),
                        jnp.maximum(y[240:360], y[360:480]))
        y1_scr[120 * p:120 * (p + 1), :] = (
            jnp.maximum(m + b1, 0.0).astype(y1_scr.dtype))

    # conv2 (10->20, k=5) + Dropout2d(eval) + 2x2 maxpool + bias + ReLU
    w2 = w2_ref[...]
    b2 = b2_ref[...]
    for p in range(4):                           # pooled output row
        slab = y1_scr[240 * p:240 * p + 720, :]  # 6 consecutive pooled rows
        y = jnp.dot(w2, slab, preferred_element_type=jnp.float32)   # (320, bt)
        m = jnp.maximum(jnp.maximum(y[0:80], y[80:160]),
                        jnp.maximum(y[160:240], y[240:320]))
        a2_scr[80 * p:80 * (p + 1), :] = (
            jnp.maximum(m + b2, 0.0).astype(a2_scr.dtype))

    # flatten (view(-1, 320) permutation is folded into fc1) + fc1 + ReLU + fc2
    # TODO(synk): training-mode Dropout2d / F.dropout not implemented
    # (identity in eval / inference mode).
    h = jnp.dot(fw1_ref[...], a2_scr[...], preferred_element_type=jnp.float32)
    h = jnp.maximum(h + fb1_ref[...], 0.0).astype(jnp.bfloat16)       # (50, bt)
    o_ref[...] = (jnp.dot(fw2_ref[...], h, preferred_element_type=jnp.float32)
                  + fb2_ref[...])


def _lenet_fused_call(xT, w1t, b1e, w2t, b2e, fw1, fb1, fw2, fb2):
    T, _, bt = xT.shape
    return pl.pallas_call(
        lenet_fused_kernel,
        out_shape=jax.ShapeDtypeStruct((T, 10, bt), jnp.float32),
        grid=(T,),
        in_specs=[
            pl.BlockSpec((None, 784, bt), lambda t: (t, 0, 0)),
            pl.BlockSpec((480, 168), lambda t: (0, 0)),
            pl.BlockSpec((120, 1), lambda t: (0, 0)),
            pl.BlockSpec((320, 720), lambda t: (0, 0)),
            pl.BlockSpec((80, 1), lambda t: (0, 0)),
            pl.BlockSpec((50, 320), lambda t: (0, 0)),
            pl.BlockSpec((50, 1), lambda t: (0, 0)),
            pl.BlockSpec((10, 50), lambda t: (0, 0)),
            pl.BlockSpec((10, 1), lambda t: (0, 0)),
        ],
        out_specs=pl.BlockSpec((None, 10, bt), lambda t: (t, 0, 0)),
        scratch_shapes=[
            pltpu.VMEM((1440, bt), jnp.bfloat16),   # conv1 pooled activations
            pltpu.VMEM((320, bt), jnp.bfloat16),    # conv2 pooled activations
        ],
        compiler_params=pltpu.CompilerParams(
            dimension_semantics=("parallel",)),
    )(xT, w1t, b1e, w2t, b2e, fw1, fb1, fw2, fb2)


# ----------------------------------------------------------------------------
# Host-side weight prep: banded Toeplitz conv matrices (tiny, built once)
# ----------------------------------------------------------------------------
def _toeplitz_conv1(w):
    """w: (10, 1, 5, 5) -> (480, 168).

    Row o*120 + c*12 + q (o = pool offset dy*2+dx), column rr*28 + ww:
      = w[c, 0, rr-dy, ww-2q-dx] when the tap is in range, else 0.
    """
    O, C, Q, KI, KJ = np.meshgrid(np.arange(4), np.arange(10), np.arange(12),
                                  np.arange(5), np.arange(5), indexing="ij")
    DY, DX = O // 2, O % 2
    rows = O * 120 + C * 12 + Q
    cols = (DY + KI) * 28 + (2 * Q + DX + KJ)
    src = C * 25 + KI * 5 + KJ
    idx = np.zeros((480, 168), np.int32)
    msk = np.zeros((480, 168), np.float32)
    idx[rows, cols] = src
    msk[rows, cols] = 1.0
    return w.reshape(250)[idx] * msk


def _toeplitz_conv2(w):
    """w: (20, 10, 5, 5) -> (320, 720).

    Row o*80 + c2*4 + q2, column rr*120 + cin*12 + ww:
      = w[c2, cin, rr-dy, ww-2*q2-dx] when the tap is in range, else 0.
    """
    O, C2, Q, CIN, KI, KJ = np.meshgrid(
        np.arange(4), np.arange(20), np.arange(4),
        np.arange(10), np.arange(5), np.arange(5), indexing="ij")
    DY, DX = O // 2, O % 2
    rows = O * 80 + C2 * 4 + Q
    cols = (DY + KI) * 120 + CIN * 12 + (2 * Q + DX + KJ)
    src = ((C2 * 10 + CIN) * 5 + KI) * 5 + KJ
    idx = np.zeros((320, 720), np.int32)
    msk = np.zeros((320, 720), np.float32)
    idx[rows, cols] = src
    msk[rows, cols] = 1.0
    return w.reshape(5000)[idx] * msk


def _round_up(n, m):
    return ((n + m - 1) // m) * m


# ----------------------------------------------------------------------------
# LeNet forward (classifier branch of Net for MNIST)
# ----------------------------------------------------------------------------
def lenet_forward(x, params):
    """x: (N, 1, 28, 28) float32 NCHW. Returns (N, 10) logits (eval mode)."""
    N = x.shape[0]
    bt = 128 if N >= 256 else 64          # >=2 grid steps once N > 64
    Np = _round_up(N, bt)
    T = Np // bt

    # Lane-dense input layout: (T, 784, bt), batch in lanes. This pad/cast/
    # transpose is the ONLY XLA glue on the activation path (<1 MB per tile).
    xp = jnp.pad(x, ((0, Np - N), (0, 0), (0, 0), (0, 0)))
    xT = xp.reshape(T, bt, 28 * 28).transpose(0, 2, 1).astype(jnp.bfloat16)

    w1t = _toeplitz_conv1(params["conv1_w"]).astype(jnp.bfloat16)
    b1e = jnp.repeat(params["conv1_b"], 12).reshape(120, 1).astype(jnp.float32)
    w2t = _toeplitz_conv2(params["conv2_w"]).astype(jnp.bfloat16)
    b2e = jnp.repeat(params["conv2_b"], 4).reshape(80, 1).astype(jnp.float32)

    # fc1 columns permuted from PyTorch's (c2, h2, w2) order to our (h2, c2, w2).
    fw1 = (params["fc1_w"].reshape(50, 20, 4, 4).transpose(0, 2, 1, 3)
           .reshape(50, 320).astype(jnp.bfloat16))
    fb1 = params["fc1_b"].reshape(50, 1).astype(jnp.float32)
    fw2 = params["fc2_w"].astype(jnp.bfloat16)
    fb2 = params["fc2_b"].reshape(10, 1).astype(jnp.float32)

    out = _lenet_fused_call(xT, w1t, b1e, w2t, b2e, fw1, fb1, fw2, fb2)
    return out.transpose(0, 2, 1).reshape(Np, 10)[:N]


# ----------------------------------------------------------------------------
# Pure-JAX reference (for a sanity check) and parameter init
# ----------------------------------------------------------------------------
def lenet_reference(x, params):
    dn = ("NCHW", "OIHW", "NCHW")
    y = lax.conv_general_dilated(x, params["conv1_w"], (1, 1), "VALID",
                                 dimension_numbers=dn)
    y = y + params["conv1_b"].reshape(1, 10, 1, 1)
    y = lax.reduce_window(y, -jnp.inf, lax.max, (1, 1, 2, 2), (1, 1, 2, 2),
                          "VALID")
    y = jax.nn.relu(y)
    y = lax.conv_general_dilated(y, params["conv2_w"], (1, 1), "VALID",
                                 dimension_numbers=dn)
    y = y + params["conv2_b"].reshape(1, 20, 1, 1)
    y = lax.reduce_window(y, -jnp.inf, lax.max, (1, 1, 2, 2), (1, 1, 2, 2),
                          "VALID")
    y = jax.nn.relu(y)
    y = y.reshape(y.shape[0], 320)
    y = jax.nn.relu(y @ params["fc1_w"].T + params["fc1_b"])
    return y @ params["fc2_w"].T + params["fc2_b"]


def init_params(key):
    ks = jax.random.split(key, 8)
    s = 0.1
    return {
        "conv1_w": s * jax.random.normal(ks[0], (10, 1, 5, 5), jnp.float32),
        "conv1_b": s * jax.random.normal(ks[1], (10,), jnp.float32),
        "conv2_w": s * jax.random.normal(ks[2], (20, 10, 5, 5), jnp.float32),
        "conv2_b": s * jax.random.normal(ks[3], (20,), jnp.float32),
        "fc1_w": s * jax.random.normal(ks[4], (50, 320), jnp.float32),
        "fc1_b": s * jax.random.normal(ks[5], (50,), jnp.float32),
        "fc2_w": s * jax.random.normal(ks[6], (10, 50), jnp.float32),
        "fc2_b": s * jax.random.normal(ks[7], (10,), jnp.float32),
    }


if __name__ == "__main__":
    key = jax.random.PRNGKey(0)
    k_param, k_x = jax.random.split(key)
    params = init_params(k_param)
    # 28x28 input is required by the hard-coded view(-1, 320) (20*4*4 = 320).
    x = jax.random.normal(k_x, (2, 1, 28, 28), jnp.float32)

    out = jax.jit(lenet_forward)(x, params)
    out = jax.block_until_ready(out)
    assert out.shape == (2, 10) and out.dtype == jnp.float32

    ref = jax.jit(lenet_reference)(x, params)
    np.testing.assert_allclose(np.asarray(out), np.asarray(ref),
                               rtol=7e-2, atol=7e-2)
    print("KERNEL_OK")
</pallas_src>

<mosaic_0001>
module attributes {stable_mosaic.version = 11 : i64} {
  func.func @lenet_fused_kernel(%arg0: i32, %arg1: memref<1x784x64xbf16, #tpu.memory_space<vmem>>, %arg2: memref<480x168xbf16, #tpu.memory_space<vmem>>, %arg3: memref<120x1xf32, #tpu.memory_space<vmem>>, %arg4: memref<320x720xbf16, #tpu.memory_space<vmem>>, %arg5: memref<80x1xf32, #tpu.memory_space<vmem>>, %arg6: memref<50x320xbf16, #tpu.memory_space<vmem>>, %arg7: memref<50x1xf32, #tpu.memory_space<vmem>>, %arg8: memref<10x50xbf16, #tpu.memory_space<vmem>>, %arg9: memref<10x1xf32, #tpu.memory_space<vmem>>, %arg10: memref<1x10x64xf32, #tpu.memory_space<vmem>>, %arg11: memref<1440x64xbf16, #tpu.memory_space<vmem>>, %arg12: memref<320x64xbf16, #tpu.memory_space<vmem>>) attributes {dimension_semantics = [#tpu.dimension_semantics<parallel>], iteration_bounds = array<i64: 1>, scalar_prefetch = 0 : i64, scratch_operands = 2 : i64, tpu.core_type = #tpu.core_type<tc>, window_params = [{transform_indices = @transform_0, window_bounds = array<i64: 1, 784, 64>}, {pipeline_mode = #tpu.pipeline_mode<synchronous>, transform_indices = @transform_1, window_bounds = array<i64: 480, 168>}, {pipeline_mode = #tpu.pipeline_mode<synchronous>, transform_indices = @transform_2, window_bounds = array<i64: 120, 1>}, {pipeline_mode = #tpu.pipeline_mode<synchronous>, transform_indices = @transform_3, window_bounds = array<i64: 320, 720>}, {pipeline_mode = #tpu.pipeline_mode<synchronous>, transform_indices = @transform_4, window_bounds = array<i64: 80, 1>}, {pipeline_mode = #tpu.pipeline_mode<synchronous>, transform_indices = @transform_5, window_bounds = array<i64: 50, 320>}, {pipeline_mode = #tpu.pipeline_mode<synchronous>, transform_indices = @transform_6, window_bounds = array<i64: 50, 1>}, {pipeline_mode = #tpu.pipeline_mode<synchronous>, transform_indices = @transform_7, window_bounds = array<i64: 10, 50>}, {pipeline_mode = #tpu.pipeline_mode<synchronous>, transform_indices = @transform_8, window_bounds = array<i64: 10, 1>}, {transform_indices = @transform_9, window_bounds = array<i64: 1, 10, 64>}]} {
    %c0 = arith.constant 0 : index
    %c0_0 = arith.constant 0 : index
    %0 = vector.load %arg2[%c0, %c0_0] : memref<480x168xbf16, #tpu.memory_space<vmem>>, vector<480x168xbf16>
    %c0_1 = arith.constant 0 : index
    %c0_2 = arith.constant 0 : index
    %1 = vector.load %arg3[%c0_1, %c0_2] : memref<120x1xf32, #tpu.memory_space<vmem>>, vector<120x1xf32>
    %c0_3 = arith.constant 0 : index
    %c0_4 = arith.constant 0 : index
    %c0_5 = arith.constant 0 : index
    %2 = vector.load %arg1[%c0_3, %c0_4, %c0_5] : memref<1x784x64xbf16, #tpu.memory_space<vmem>>, vector<1x168x64xbf16>
    %3 = vector.shape_cast %2 : vector<1x168x64xbf16> to vector<168x64xbf16>
    %cst = arith.constant dense<0.000000e+00> : vector<480x64xf32>
    %4 = tpu.matmul %0, %3, %cst {dimension_numbers = #tpu.dot_dimension_numbers<[1], [0], [0], [1], [0, 0, 1, 1], [], []>} : vector<480x168xbf16>, vector<168x64xbf16>, vector<480x64xf32> -> vector<480x64xf32>
    %5 = vector.extract_strided_slice %4 {offsets = [0, 0], sizes = [120, 64], strides = [1, 1]} : vector<480x64xf32> to vector<120x64xf32>
    %6 = vector.extract_strided_slice %4 {offsets = [120, 0], sizes = [120, 64], strides = [1, 1]} : vector<480x64xf32> to vector<120x64xf32>
    %7 = arith.maximumf %5, %6 : vector<120x64xf32>
    %8 = vector.extract_strided_slice %4 {offsets = [240, 0], sizes = [120, 64], strides = [1, 1]} : vector<480x64xf32> to vector<120x64xf32>
    %9 = vector.extract_strided_slice %4 {offsets = [360, 0], sizes = [120, 64], strides = [1, 1]} : vector<480x64xf32> to vector<120x64xf32>
    %10 = arith.maximumf %8, %9 : vector<120x64xf32>
    %11 = arith.maximumf %7, %10 : vector<120x64xf32>
    %12 = vector.broadcast %1 : vector<120x1xf32> to vector<120x64xf32>
    %13 = arith.addf %11, %12 : vector<120x64xf32>
    %cst_6 = arith.constant 0.000000e+00 : f32
    %14 = vector.broadcast %cst_6 : f32 to vector<120x64xf32>
    %15 = arith.maximumf %13, %14 : vector<120x64xf32>
    %16 = arith.truncf %15 : vector<120x64xf32> to vector<120x64xbf16>
    %c0_7 = arith.constant 0 : index
    %c0_8 = arith.constant 0 : index
    %17 = vector.load %arg11[%c0_7, %c0_8] : memref<1440x64xbf16, #tpu.memory_space<vmem>>, vector<120x64xbf16>
    tpu.vector_store %arg11[%c0_7, %c0_8], %16 {strides = array<i32>} : memref<1440x64xbf16, #tpu.memory_space<vmem>>, vector<120x64xbf16>,
    %c0_9 = arith.constant 0 : index
    %c56 = arith.constant 56 : index
    %c0_10 = arith.constant 0 : index
    %18 = vector.load %arg1[%c0_9, %c56, %c0_10] : memref<1x784x64xbf16, #tpu.memory_space<vmem>>, vector<1x168x64xbf16>
    %19 = vector.shape_cast %18 : vector<1x168x64xbf16> to vector<168x64xbf16>
    %cst_11 = arith.constant dense<0.000000e+00> : vector<480x64xf32>
    %20 = tpu.matmul %0, %19, %cst_11 {dimension_numbers = #tpu.dot_dimension_numbers<[1], [0], [0], [1], [0, 0, 1, 1], [], []>} : vector<480x168xbf16>, vector<168x64xbf16>, vector<480x64xf32> -> vector<480x64xf32>
    %21 = vector.extract_strided_slice %20 {offsets = [0, 0], sizes = [120, 64], strides = [1, 1]} : vector<480x64xf32> to vector<120x64xf32>
    %22 = vector.extract_strided_slice %20 {offsets = [120, 0], sizes = [120, 64], strides = [1, 1]} : vector<480x64xf32> to vector<120x64xf32>
    %23 = arith.maximumf %21, %22 : vector<120x64xf32>
    %24 = vector.extract_strided_slice %20 {offsets = [240, 0], sizes = [120, 64], strides = [1, 1]} : vector<480x64xf32> to vector<120x64xf32>
    %25 = vector.extract_strided_slice %20 {offsets = [360, 0], sizes = [120, 64], strides = [1, 1]} : vector<480x64xf32> to vector<120x64xf32>
    %26 = arith.maximumf %24, %25 : vector<120x64xf32>
    %27 = arith.maximumf %23, %26 : vector<120x64xf32>
    %28 = vector.broadcast %1 : vector<120x1xf32> to vector<120x64xf32>
    %29 = arith.addf %27, %28 : vector<120x64xf32>
    %cst_12 = arith.constant 0.000000e+00 : f32
    %30 = vector.broadcast %cst_12 : f32 to vector<120x64xf32>
    %31 = arith.maximumf %29, %30 : vector<120x64xf32>
    %32 = arith.truncf %31 : vector<120x64xf32> to vector<120x64xbf16>
    %c120 = arith.constant 120 : index
    %c0_13 = arith.constant 0 : index
    %33 = vector.load %arg11[%c120, %c0_13] : memref<1440x64xbf16, #tpu.memory_space<vmem>>, vector<120x64xbf16>
    tpu.vector_store %arg11[%c120, %c0_13], %32 {strides = array<i32>} : memref<1440x64xbf16, #tpu.memory_space<vmem>>, vector<120x64xbf16>,
    %c0_14 = arith.constant 0 : index
    %c112 = arith.constant 112 : index
    %c0_15 = arith.constant 0 : index
    %34 = vector.load %arg1[%c0_14, %c112, %c0_15] : memref<1x784x64xbf16, #tpu.memory_space<vmem>>, vector<1x168x64xbf16>
    %35 = vector.shape_cast %34 : vector<1x168x64xbf16> to vector<168x64xbf16>
    %cst_16 = arith.constant dense<0.000000e+00> : vector<480x64xf32>
    %36 = tpu.matmul %0, %35, %cst_16 {dimension_numbers = #tpu.dot_dimension_numbers<[1], [0], [0], [1], [0, 0, 1, 1], [], []>} : vector<480x168xbf16>, vector<168x64xbf16>, vector<480x64xf32> -> vector<480x64xf32>
    %37 = vector.extract_strided_slice %36 {offsets = [0, 0], sizes = [120, 64], strides = [1, 1]} : vector<480x64xf32> to vector<120x64xf32>
    %38 = vector.extract_strided_slice %36 {offsets = [120, 0], sizes = [120, 64], strides = [1, 1]} : vector<480x64xf32> to vector<120x64xf32>
    %39 = arith.maximumf %37, %38 : vector<120x64xf32>
    %40 = vector.extract_strided_slice %36 {offsets = [240, 0], sizes = [120, 64], strides = [1, 1]} : vector<480x64xf32> to vector<120x64xf32>
    %41 = vector.extract_strided_slice %36 {offsets = [360, 0], sizes = [120, 64], strides = [1, 1]} : vector<480x64xf32> to vector<120x64xf32>
    %42 = arith.maximumf %40, %41 : vector<120x64xf32>
    %43 = arith.maximumf %39, %42 : vector<120x64xf32>
    %44 = vector.broadcast %1 : vector<120x1xf32> to vector<120x64xf32>
    %45 = arith.addf %43, %44 : vector<120x64xf32>
    %cst_17 = arith.constant 0.000000e+00 : f32
    %46 = vector.broadcast %cst_17 : f32 to vector<120x64xf32>
    %47 = arith.maximumf %45, %46 : vector<120x64xf32>
    %48 = arith.truncf %47 : vector<120x64xf32> to vector<120x64xbf16>
    %c240 = arith.constant 240 : index
    %c0_18 = arith.constant 0 : index
    %49 = vector.load %arg11[%c240, %c0_18] : memref<1440x64xbf16, #tpu.memory_space<vmem>>, vector<120x64xbf16>
    tpu.vector_store %arg11[%c240, %c0_18], %48 {strides = array<i32>} : memref<1440x64xbf16, #tpu.memory_space<vmem>>, vector<120x64xbf16>,
    %c0_19 = arith.constant 0 : index
    %c168 = arith.constant 168 : index
    %c0_20 = arith.constant 0 : index
    %50 = vector.load %arg1[%c0_19, %c168, %c0_20] : memref<1x784x64xbf16, #tpu.memory_space<vmem>>, vector<1x168x64xbf16>
    %51 = vector.shape_cast %50 : vector<1x168x64xbf16> to vector<168x64xbf16>
    %cst_21 = arith.constant dense<0.000000e+00> : vector<480x64xf32>
    %52 = tpu.matmul %0, %51, %cst_21 {dimension_numbers = #tpu.dot_dimension_numbers<[1], [0], [0], [1], [0, 0, 1, 1], [], []>} : vector<480x168xbf16>, vector<168x64xbf16>, vector<480x64xf32> -> vector<480x64xf32>
    %53 = vector.extract_strided_slice %52 {offsets = [0, 0], sizes = [120, 64], strides = [1, 1]} : vector<480x64xf32> to vector<120x64xf32>
    %54 = vector.extract_strided_slice %52 {offsets = [120, 0], sizes = [120, 64], strides = [1, 1]} : vector<480x64xf32> to vector<120x64xf32>
    %55 = arith.maximumf %53, %54 : vector<120x64xf32>
    %56 = vector.extract_strided_slice %52 {offsets = [240, 0], sizes = [120, 64], strides = [1, 1]} : vector<480x64xf32> to vector<120x64xf32>
    %57 = vector.extract_strided_slice %52 {offsets = [360, 0], sizes = [120, 64], strides = [1, 1]} : vector<480x64xf32> to vector<120x64xf32>
    %58 = arith.maximumf %56, %57 : vector<120x64xf32>
    %59 = arith.maximumf %55, %58 : vector<120x64xf32>
    %60 = vector.broadcast %1 : vector<120x1xf32> to vector<120x64xf32>
    %61 = arith.addf %59, %60 : vector<120x64xf32>
    %cst_22 = arith.constant 0.000000e+00 : f32
    %62 = vector.broadcast %cst_22 : f32 to vector<120x64xf32>
    %63 = arith.maximumf %61, %62 : vector<120x64xf32>
    %64 = arith.truncf %63 : vector<120x64xf32> to vector<120x64xbf16>
    %c360 = arith.constant 360 : index
    %c0_23 = arith.constant 0 : index
    %65 = vector.load %arg11[%c360, %c0_23] : memref<1440x64xbf16, #tpu.memory_space<vmem>>, vector<120x64xbf16>
    tpu.vector_store %arg11[%c360, %c0_23], %64 {strides = array<i32>} : memref<1440x64xbf16, #tpu.memory_space<vmem>>, vector<120x64xbf16>,
    %c0_24 = arith.constant 0 : index
    %c224 = arith.constant 224 : index
    %c0_25 = arith.constant 0 : index
    %66 = vector.load %arg1[%c0_24, %c224, %c0_25] : memref<1x784x64xbf16, #tpu.memory_space<vmem>>, vector<1x168x64xbf16>
    %67 = vector.shape_cast %66 : vector<1x168x64xbf16> to vector<168x64xbf16>
    %cst_26 = arith.constant dense<0.000000e+00> : vector<480x64xf32>
    %68 = tpu.matmul %0, %67, %cst_26 {dimension_numbers = #tpu.dot_dimension_numbers<[1], [0], [0], [1], [0, 0, 1, 1], [], []>} : vector<480x168xbf16>, vector<168x64xbf16>, vector<480x64xf32> -> vector<480x64xf32>
    %69 = vector.extract_strided_slice %68 {offsets = [0, 0], sizes = [120, 64], strides = [1, 1]} : vector<480x64xf32> to vector<120x64xf32>
    %70 = vector.extract_strided_slice %68 {offsets = [120, 0], sizes = [120, 64], strides = [1, 1]} : vector<480x64xf32> to vector<120x64xf32>
    %71 = arith.maximumf %69, %70 : vector<120x64xf32>
    %72 = vector.extract_strided_slice %68 {offsets = [240, 0], sizes = [120, 64], strides = [1, 1]} : vector<480x64xf32> to vector<120x64xf32>
    %73 = vector.extract_strided_slice %68 {offsets = [360, 0], sizes = [120, 64], strides = [1, 1]} : vector<480x64xf32> to vector<120x64xf32>
    %74 = arith.maximumf %72, %73 : vector<120x64xf32>
    %75 = arith.maximumf %71, %74 : vector<120x64xf32>
    %76 = vector.broadcast %1 : vector<120x1xf32> to vector<120x64xf32>
    %77 = arith.addf %75, %76 : vector<120x64xf32>
    %cst_27 = arith.constant 0.000000e+00 : f32
    %78 = vector.broadcast %cst_27 : f32 to vector<120x64xf32>
    %79 = arith.maximumf %77, %78 : vector<120x64xf32>
    %80 = arith.truncf %79 : vector<120x64xf32> to vector<120x64xbf16>
    %c480 = arith.constant 480 : index
    %c0_28 = arith.constant 0 : index
    %81 = vector.load %arg11[%c480, %c0_28] : memref<1440x64xbf16, #tpu.memory_space<vmem>>, vector<120x64xbf16>
    tpu.vector_store %arg11[%c480, %c0_28], %80 {strides = array<i32>} : memref<1440x64xbf16, #tpu.memory_space<vmem>>, vector<120x64xbf16>,
    %c0_29 = arith.constant 0 : index
    %c280 = arith.constant 280 : index
    %c0_30 = arith.constant 0 : index
    %82 = vector.load %arg1[%c0_29, %c280, %c0_30] : memref<1x784x64xbf16, #tpu.memory_space<vmem>>, vector<1x168x64xbf16>
    %83 = vector.shape_cast %82 : vector<1x168x64xbf16> to vector<168x64xbf16>
    %cst_31 = arith.constant dense<0.000000e+00> : vector<480x64xf32>
    %84 = tpu.matmul %0, %83, %cst_31 {dimension_numbers = #tpu.dot_dimension_numbers<[1], [0], [0], [1], [0, 0, 1, 1], [], []>} : vector<480x168xbf16>, vector<168x64xbf16>, vector<480x64xf32> -> vector<480x64xf32>
    %85 = vector.extract_strided_slice %84 {offsets = [0, 0], sizes = [120, 64], strides = [1, 1]} : vector<480x64xf32> to vector<120x64xf32>
    %86 = vector.extract_strided_slice %84 {offsets = [120, 0], sizes = [120, 64], strides = [1, 1]} : vector<480x64xf32> to vector<120x64xf32>
    %87 = arith.maximumf %85, %86 : vector<120x64xf32>
    %88 = vector.extract_strided_slice %84 {offsets = [240, 0], sizes = [120, 64], strides = [1, 1]} : vector<480x64xf32> to vector<120x64xf32>
    %89 = vector.extract_strided_slice %84 {offsets = [360, 0], sizes = [120, 64], strides = [1, 1]} : vector<480x64xf32> to vector<120x64xf32>
    %90 = arith.maximumf %88, %89 : vector<120x64xf32>
    %91 = arith.maximumf %87, %90 : vector<120x64xf32>
    %92 = vector.broadcast %1 : vector<120x1xf32> to vector<120x64xf32>
    %93 = arith.addf %91, %92 : vector<120x64xf32>
    %cst_32 = arith.constant 0.000000e+00 : f32
    %94 = vector.broadcast %cst_32 : f32 to vector<120x64xf32>
    %95 = arith.maximumf %93, %94 : vector<120x64xf32>
    %96 = arith.truncf %95 : vector<120x64xf32> to vector<120x64xbf16>
    %c600 = arith.constant 600 : index
    %c0_33 = arith.constant 0 : index
    %97 = vector.load %arg11[%c600, %c0_33] : memref<1440x64xbf16, #tpu.memory_space<vmem>>, vector<120x64xbf16>
    tpu.vector_store %arg11[%c600, %c0_33], %96 {strides = array<i32>} : memref<1440x64xbf16, #tpu.memory_space<vmem>>, vector<120x64xbf16>,
    %c0_34 = arith.constant 0 : index
    %c336 = arith.constant 336 : index
    %c0_35 = arith.constant 0 : index
    %98 = vector.load %arg1[%c0_34, %c336, %c0_35] : memref<1x784x64xbf16, #tpu.memory_space<vmem>>, vector<1x168x64xbf16>
    %99 = vector.shape_cast %98 : vector<1x168x64xbf16> to vector<168x64xbf16>
    %cst_36 = arith.constant dense<0.000000e+00> : vector<480x64xf32>
    %100 = tpu.matmul %0, %99, %cst_36 {dimension_numbers = #tpu.dot_dimension_numbers<[1], [0], [0], [1], [0, 0, 1, 1], [], []>} : vector<480x168xbf16>, vector<168x64xbf16>, vector<480x64xf32> -> vector<480x64xf32>
    %101 = vector.extract_strided_slice %100 {offsets = [0, 0], sizes = [120, 64], strides = [1, 1]} : vector<480x64xf32> to vector<120x64xf32>
    %102 = vector.extract_strided_slice %100 {offsets = [120, 0], sizes = [120, 64], strides = [1, 1]} : vector<480x64xf32> to vector<120x64xf32>
    %103 = arith.maximumf %101, %102 : vector<120x64xf32>
    %104 = vector.extract_strided_slice %100 {offsets = [240, 0], sizes = [120, 64], strides = [1, 1]} : vector<480x64xf32> to vector<120x64xf32>
    %105 = vector.extract_strided_slice %100 {offsets = [360, 0], sizes = [120, 64], strides = [1, 1]} : vector<480x64xf32> to vector<120x64xf32>
    %106 = arith.maximumf %104, %105 : vector<120x64xf32>
    %107 = arith.maximumf %103, %106 : vector<120x64xf32>
    %108 = vector.broadcast %1 : vector<120x1xf32> to vector<120x64xf32>
    %109 = arith.addf %107, %108 : vector<120x64xf32>
    %cst_37 = arith.constant 0.000000e+00 : f32
    %110 = vector.broadcast %cst_37 : f32 to vector<120x64xf32>
    %111 = arith.maximumf %109, %110 : vector<120x64xf32>
    %112 = arith.truncf %111 : vector<120x64xf32> to vector<120x64xbf16>
    %c720 = arith.constant 720 : index
    %c0_38 = arith.constant 0 : index
    %113 = vector.load %arg11[%c720, %c0_38] : memref<1440x64xbf16, #tpu.memory_space<vmem>>, vector<120x64xbf16>
    tpu.vector_store %arg11[%c720, %c0_38], %112 {strides = array<i32>} : memref<1440x64xbf16, #tpu.memory_space<vmem>>, vector<120x64xbf16>,
    %c0_39 = arith.constant 0 : index
    %c392 = arith.constant 392 : index
    %c0_40 = arith.constant 0 : index
    %114 = vector.load %arg1[%c0_39, %c392, %c0_40] : memref<1x784x64xbf16, #tpu.memory_space<vmem>>, vector<1x168x64xbf16>
    %115 = vector.shape_cast %114 : vector<1x168x64xbf16> to vector<168x64xbf16>
    %cst_41 = arith.constant dense<0.000000e+00> : vector<480x64xf32>
    %116 = tpu.matmul %0, %115, %cst_41 {dimension_numbers = #tpu.dot_dimension_numbers<[1], [0], [0], [1], [0, 0, 1, 1], [], []>} : vector<480x168xbf16>, vector<168x64xbf16>, vector<480x64xf32> -> vector<480x64xf32>
    %117 = vector.extract_strided_slice %116 {offsets = [0, 0], sizes = [120, 64], strides = [1, 1]} : vector<480x64xf32> to vector<120x64xf32>
    %118 = vector.extract_strided_slice %116 {offsets = [120, 0], sizes = [120, 64], strides = [1, 1]} : vector<480x64xf32> to vector<120x64xf32>
    %119 = arith.maximumf %117, %118 : vector<120x64xf32>
    %120 = vector.extract_strided_slice %116 {offsets = [240, 0], sizes = [120, 64], strides = [1, 1]} : vector<480x64xf32> to vector<120x64xf32>
    %121 = vector.extract_strided_slice %116 {offsets = [360, 0], sizes = [120, 64], strides = [1, 1]} : vector<480x64xf32> to vector<120x64xf32>
    %122 = arith.maximumf %120, %121 : vector<120x64xf32>
    %123 = arith.maximumf %119, %122 : vector<120x64xf32>
    %124 = vector.broadcast %1 : vector<120x1xf32> to vector<120x64xf32>
    %125 = arith.addf %123, %124 : vector<120x64xf32>
    %cst_42 = arith.constant 0.000000e+00 : f32
    %126 = vector.broadcast %cst_42 : f32 to vector<120x64xf32>
    %127 = arith.maximumf %125, %126 : vector<120x64xf32>
    %128 = arith.truncf %127 : vector<120x64xf32> to vector<120x64xbf16>
    %c840 = arith.constant 840 : index
    %c0_43 = arith.constant 0 : index
    %129 = vector.load %arg11[%c840, %c0_43] : memref<1440x64xbf16, #tpu.memory_space<vmem>>, vector<120x64xbf16>
    tpu.vector_store %arg11[%c840, %c0_43], %128 {strides = array<i32>} : memref<1440x64xbf16, #tpu.memory_space<vmem>>, vector<120x64xbf16>,
    %c0_44 = arith.constant 0 : index
    %c448 = arith.constant 448 : index
    %c0_45 = arith.constant 0 : index
    %130 = vector.load %arg1[%c0_44, %c448, %c0_45] : memref<1x784x64xbf16, #tpu.memory_space<vmem>>, vector<1x168x64xbf16>
    %131 = vector.shape_cast %130 : vector<1x168x64xbf16> to vector<168x64xbf16>
    %cst_46 = arith.constant dense<0.000000e+00> : vector<480x64xf32>
    %132 = tpu.matmul %0, %131, %cst_46 {dimension_numbers = #tpu.dot_dimension_numbers<[1], [0], [0], [1], [0, 0, 1, 1], [], []>} : vector<480x168xbf16>, vector<168x64xbf16>, vector<480x64xf32> -> vector<480x64xf32>
    %133 = vector.extract_strided_slice %132 {offsets = [0, 0], sizes = [120, 64], strides = [1, 1]} : vector<480x64xf32> to vector<120x64xf32>
    %134 = vector.extract_strided_slice %132 {offsets = [120, 0], sizes = [120, 64], strides = [1, 1]} : vector<480x64xf32> to vector<120x64xf32>
    %135 = arith.maximumf %133, %134 : vector<120x64xf32>
    %136 = vector.extract_strided_slice %132 {offsets = [240, 0], sizes = [120, 64], strides = [1, 1]} : vector<480x64xf32> to vector<120x64xf32>
    %137 = vector.extract_strided_slice %132 {offsets = [360, 0], sizes = [120, 64], strides = [1, 1]} : vector<480x64xf32> to vector<120x64xf32>
    %138 = arith.maximumf %136, %137 : vector<120x64xf32>
    %139 = arith.maximumf %135, %138 : vector<120x64xf32>
    %140 = vector.broadcast %1 : vector<120x1xf32> to vector<120x64xf32>
    %141 = arith.addf %139, %140 : vector<120x64xf32>
    %cst_47 = arith.constant 0.000000e+00 : f32
    %142 = vector.broadcast %cst_47 : f32 to vector<120x64xf32>
    %143 = arith.maximumf %141, %142 : vector<120x64xf32>
    %144 = arith.truncf %143 : vector<120x64xf32> to vector<120x64xbf16>
    %c960 = arith.constant 960 : index
    %c0_48 = arith.constant 0 : index
    %145 = vector.load %arg11[%c960, %c0_48] : memref<1440x64xbf16, #tpu.memory_space<vmem>>, vector<120x64xbf16>
    tpu.vector_store %arg11[%c960, %c0_48], %144 {strides = array<i32>} : memref<1440x64xbf16, #tpu.memory_space<vmem>>, vector<120x64xbf16>,
    %c0_49 = arith.constant 0 : index
    %c504 = arith.constant 504 : index
    %c0_50 = arith.constant 0 : index
    %146 = vector.load %arg1[%c0_49, %c504, %c0_50] : memref<1x784x64xbf16, #tpu.memory_space<vmem>>, vector<1x168x64xbf16>
    %147 = vector.shape_cast %146 : vector<1x168x64xbf16> to vector<168x64xbf16>
    %cst_51 = arith.constant dense<0.000000e+00> : vector<480x64xf32>
    %148 = tpu.matmul %0, %147, %cst_51 {dimension_numbers = #tpu.dot_dimension_numbers<[1], [0], [0], [1], [0, 0, 1, 1], [], []>} : vector<480x168xbf16>, vector<168x64xbf16>, vector<480x64xf32> -> vector<480x64xf32>
    %149 = vector.extract_strided_slice %148 {offsets = [0, 0], sizes = [120, 64], strides = [1, 1]} : vector<480x64xf32> to vector<120x64xf32>
    %150 = vector.extract_strided_slice %148 {offsets = [120, 0], sizes = [120, 64], strides = [1, 1]} : vector<480x64xf32> to vector<120x64xf32>
    %151 = arith.maximumf %149, %150 : vector<120x64xf32>
    %152 = vector.extract_strided_slice %148 {offsets = [240, 0], sizes = [120, 64], strides = [1, 1]} : vector<480x64xf32> to vector<120x64xf32>
    %153 = vector.extract_strided_slice %148 {offsets = [360, 0], sizes = [120, 64], strides = [1, 1]} : vector<480x64xf32> to vector<120x64xf32>
    %154 = arith.maximumf %152, %153 : vector<120x64xf32>
    %155 = arith.maximumf %151, %154 : vector<120x64xf32>
    %156 = vector.broadcast %1 : vector<120x1xf32> to vector<120x64xf32>
    %157 = arith.addf %155, %156 : vector<120x64xf32>
    %cst_52 = arith.constant 0.000000e+00 : f32
    %158 = vector.broadcast %cst_52 : f32 to vector<120x64xf32>
    %159 = arith.maximumf %157, %158 : vector<120x64xf32>
    %160 = arith.truncf %159 : vector<120x64xf32> to vector<120x64xbf16>
    %c1080 = arith.constant 1080 : index
    %c0_53 = arith.constant 0 : index
    %161 = vector.load %arg11[%c1080, %c0_53] : memref<1440x64xbf16, #tpu.memory_space<vmem>>, vector<120x64xbf16>
    tpu.vector_store %arg11[%c1080, %c0_53], %160 {strides = array<i32>} : memref<1440x64xbf16, #tpu.memory_space<vmem>>, vector<120x64xbf16>,
    %c0_54 = arith.constant 0 : index
    %c560 = arith.constant 560 : index
    %c0_55 = arith.constant 0 : index
    %162 = vector.load %arg1[%c0_54, %c560, %c0_55] : memref<1x784x64xbf16, #tpu.memory_space<vmem>>, vector<1x168x64xbf16>
    %163 = vector.shape_cast %162 : vector<1x168x64xbf16> to vector<168x64xbf16>
    %cst_56 = arith.constant dense<0.000000e+00> : vector<480x64xf32>
    %164 = tpu.matmul %0, %163, %cst_56 {dimension_numbers = #tpu.dot_dimension_numbers<[1], [0], [0], [1], [0, 0, 1, 1], [], []>} : vector<480x168xbf16>, vector<168x64xbf16>, vector<480x64xf32> -> vector<480x64xf32>
    %165 = vector.extract_strided_slice %164 {offsets = [0, 0], sizes = [120, 64], strides = [1, 1]} : vector<480x64xf32> to vector<120x64xf32>
    %166 = vector.extract_strided_slice %164 {offsets = [120, 0], sizes = [120, 64], strides = [1, 1]} : vector<480x64xf32> to vector<120x64xf32>
    %167 = arith.maximumf %165, %166 : vector<120x64xf32>
    %168 = vector.extract_strided_slice %164 {offsets = [240, 0], sizes = [120, 64], strides = [1, 1]} : vector<480x64xf32> to vector<120x64xf32>
    %169 = vector.extract_strided_slice %164 {offsets = [360, 0], sizes = [120, 64], strides = [1, 1]} : vector<480x64xf32> to vector<120x64xf32>
    %170 = arith.maximumf %168, %169 : vector<120x64xf32>
    %171 = arith.maximumf %167, %170 : vector<120x64xf32>
    %172 = vector.broadcast %1 : vector<120x1xf32> to vector<120x64xf32>
    %173 = arith.addf %171, %172 : vector<120x64xf32>
    %cst_57 = arith.constant 0.000000e+00 : f32
    %174 = vector.broadcast %cst_57 : f32 to vector<120x64xf32>
    %175 = arith.maximumf %173, %174 : vector<120x64xf32>
    %176 = arith.truncf %175 : vector<120x64xf32> to vector<120x64xbf16>
    %c1200 = arith.constant 1200 : index
    %c0_58 = arith.constant 0 : index
    %177 = vector.load %arg11[%c1200, %c0_58] : memref<1440x64xbf16, #tpu.memory_space<vmem>>, vector<120x64xbf16>
    tpu.vector_store %arg11[%c1200, %c0_58], %176 {strides = array<i32>} : memref<1440x64xbf16, #tpu.memory_space<vmem>>, vector<120x64xbf16>,
    %c0_59 = arith.constant 0 : index
    %c616 = arith.constant 616 : index
    %c0_60 = arith.constant 0 : index
    %178 = vector.load %arg1[%c0_59, %c616, %c0_60] : memref<1x784x64xbf16, #tpu.memory_space<vmem>>, vector<1x168x64xbf16>
    %179 = vector.shape_cast %178 : vector<1x168x64xbf16> to vector<168x64xbf16>
    %cst_61 = arith.constant dense<0.000000e+00> : vector<480x64xf32>
    %180 = tpu.matmul %0, %179, %cst_61 {dimension_numbers = #tpu.dot_dimension_numbers<[1], [0], [0], [1], [0, 0, 1, 1], [], []>} : vector<480x168xbf16>, vector<168x64xbf16>, vector<480x64xf32> -> vector<480x64xf32>
    %181 = vector.extract_strided_slice %180 {offsets = [0, 0], sizes = [120, 64], strides = [1, 1]} : vector<480x64xf32> to vector<120x64xf32>
    %182 = vector.extract_strided_slice %180 {offsets = [120, 0], sizes = [120, 64], strides = [1, 1]} : vector<480x64xf32> to vector<120x64xf32>
    %183 = arith.maximumf %181, %182 : vector<120x64xf32>
    %184 = vector.extract_strided_slice %180 {offsets = [240, 0], sizes = [120, 64], strides = [1, 1]} : vector<480x64xf32> to vector<120x64xf32>
    %185 = vector.extract_strided_slice %180 {offsets = [360, 0], sizes = [120, 64], strides = [1, 1]} : vector<480x64xf32> to vector<120x64xf32>
    %186 = arith.maximumf %184, %185 : vector<120x64xf32>
    %187 = arith.maximumf %183, %186 : vector<120x64xf32>
    %188 = vector.broadcast %1 : vector<120x1xf32> to vector<120x64xf32>
    %189 = arith.addf %187, %188 : vector<120x64xf32>
    %cst_62 = arith.constant 0.000000e+00 : f32
    %190 = vector.broadcast %cst_62 : f32 to vector<120x64xf32>
    %191 = arith.maximumf %189, %190 : vector<120x64xf32>
    %192 = arith.truncf %191 : vector<120x64xf32> to vector<120x64xbf16>
    %c1320 = arith.constant 1320 : index
    %c0_63 = arith.constant 0 : index
    %193 = vector.load %arg11[%c1320, %c0_63] : memref<1440x64xbf16, #tpu.memory_space<vmem>>, vector<120x64xbf16>
    tpu.vector_store %arg11[%c1320, %c0_63], %192 {strides = array<i32>} : memref<1440x64xbf16, #tpu.memory_space<vmem>>, vector<120x64xbf16>,
    %c0_64 = arith.constant 0 : index
    %c0_65 = arith.constant 0 : index
    %194 = vector.load %arg4[%c0_64, %c0_65] : memref<320x720xbf16, #tpu.memory_space<vmem>>, vector<320x720xbf16>
    %c0_66 = arith.constant 0 : index
    %c0_67 = arith.constant 0 : index
    %195 = vector.load %arg5[%c0_66, %c0_67] : memref<80x1xf32, #tpu.memory_space<vmem>>, vector<80x1xf32>
    %c0_68 = arith.constant 0 : index
    %c0_69 = arith.constant 0 : index
    %196 = vector.load %arg11[%c0_68, %c0_69] : memref<1440x64xbf16, #tpu.memory_space<vmem>>, vector<720x64xbf16>
    %cst_70 = arith.constant dense<0.000000e+00> : vector<320x64xf32>
    %197 = tpu.matmul %194, %196, %cst_70 {dimension_numbers = #tpu.dot_dimension_numbers<[1], [0], [0], [1], [0, 0, 1, 1], [], []>} : vector<320x720xbf16>, vector<720x64xbf16>, vector<320x64xf32> -> vector<320x64xf32>
    %198 = vector.extract_strided_slice %197 {offsets = [0, 0], sizes = [80, 64], strides = [1, 1]} : vector<320x64xf32> to vector<80x64xf32>
    %199 = vector.extract_strided_slice %197 {offsets = [80, 0], sizes = [80, 64], strides = [1, 1]} : vector<320x64xf32> to vector<80x64xf32>
    %200 = arith.maximumf %198, %199 : vector<80x64xf32>
    %201 = vector.extract_strided_slice %197 {offsets = [160, 0], sizes = [80, 64], strides = [1, 1]} : vector<320x64xf32> to vector<80x64xf32>
    %202 = vector.extract_strided_slice %197 {offsets = [240, 0], sizes = [80, 64], strides = [1, 1]} : vector<320x64xf32> to vector<80x64xf32>
    %203 = arith.maximumf %201, %202 : vector<80x64xf32>
    %204 = arith.maximumf %200, %203 : vector<80x64xf32>
    %205 = vector.broadcast %195 : vector<80x1xf32> to vector<80x64xf32>
    %206 = arith.addf %204, %205 : vector<80x64xf32>
    %cst_71 = arith.constant 0.000000e+00 : f32
    %207 = vector.broadcast %cst_71 : f32 to vector<80x64xf32>
    %208 = arith.maximumf %206, %207 : vector<80x64xf32>
    %209 = arith.truncf %208 : vector<80x64xf32> to vector<80x64xbf16>
    %c0_72 = arith.constant 0 : index
    %c0_73 = arith.constant 0 : index
    %210 = vector.load %arg12[%c0_72, %c0_73] : memref<320x64xbf16, #tpu.memory_space<vmem>>, vector<80x64xbf16>
    tpu.vector_store %arg12[%c0_72, %c0_73], %209 {strides = array<i32>} : memref<320x64xbf16, #tpu.memory_space<vmem>>, vector<80x64xbf16>,
    %c240_74 = arith.constant 240 : index
    %c0_75 = arith.constant 0 : index
    %211 = vector.load %arg11[%c240_74, %c0_75] : memref<1440x64xbf16, #tpu.memory_space<vmem>>, vector<720x64xbf16>
    %cst_76 = arith.constant dense<0.000000e+00> : vector<320x64xf32>
    %212 = tpu.matmul %194, %211, %cst_76 {dimension_numbers = #tpu.dot_dimension_numbers<[1], [0], [0], [1], [0, 0, 1, 1], [], []>} : vector<320x720xbf16>, vector<720x64xbf16>, vector<320x64xf32> -> vector<320x64xf32>
    %213 = vector.extract_strided_slice %212 {offsets = [0, 0], sizes = [80, 64], strides = [1, 1]} : vector<320x64xf32> to vector<80x64xf32>
    %214 = vector.extract_strided_slice %212 {offsets = [80, 0], sizes = [80, 64], strides = [1, 1]} : vector<320x64xf32> to vector<80x64xf32>
    %215 = arith.maximumf %213, %214 : vector<80x64xf32>
    %216 = vector.extract_strided_slice %212 {offsets = [160, 0], sizes = [80, 64], strides = [1, 1]} : vector<320x64xf32> to vector<80x64xf32>
    %217 = vector.extract_strided_slice %212 {offsets = [240, 0], sizes = [80, 64], strides = [1, 1]} : vector<320x64xf32> to vector<80x64xf32>
    %218 = arith.maximumf %216, %217 : vector<80x64xf32>
    %219 = arith.maximumf %215, %218 : vector<80x64xf32>
    %220 = vector.broadcast %195 : vector<80x1xf32> to vector<80x64xf32>
    %221 = arith.addf %219, %220 : vector<80x64xf32>
    %cst_77 = arith.constant 0.000000e+00 : f32
    %222 = vector.broadcast %cst_77 : f32 to vector<80x64xf32>
    %223 = arith.maximumf %221, %222 : vector<80x64xf32>
    %224 = arith.truncf %223 : vector<80x64xf32> to vector<80x64xbf16>
    %c80 = arith.constant 80 : index
    %c0_78 = arith.constant 0 : index
    %225 = vector.load %arg12[%c80, %c0_78] : memref<320x64xbf16, #tpu.memory_space<vmem>>, vector<80x64xbf16>
    tpu.vector_store %arg12[%c80, %c0_78], %224 {strides = array<i32>} : memref<320x64xbf16, #tpu.memory_space<vmem>>, vector<80x64xbf16>,
    %c480_79 = arith.constant 480 : index
    %c0_80 = arith.constant 0 : index
    %226 = vector.load %arg11[%c480_79, %c0_80] : memref<1440x64xbf16, #tpu.memory_space<vmem>>, vector<720x64xbf16>
    %cst_81 = arith.constant dense<0.000000e+00> : vector<320x64xf32>
    %227 = tpu.matmul %194, %226, %cst_81 {dimension_numbers = #tpu.dot_dimension_numbers<[1], [0], [0], [1], [0, 0, 1, 1], [], []>} : vector<320x720xbf16>, vector<720x64xbf16>, vector<320x64xf32> -> vector<320x64xf32>
    %228 = vector.extract_strided_slice %227 {offsets = [0, 0], sizes = [80, 64], strides = [1, 1]} : vector<320x64xf32> to vector<80x64xf32>
    %229 = vector.extract_strided_slice %227 {offsets = [80, 0], sizes = [80, 64], strides = [1, 1]} : vector<320x64xf32> to vector<80x64xf32>
    %230 = arith.maximumf %228, %229 : vector<80x64xf32>
    %231 = vector.extract_strided_slice %227 {offsets = [160, 0], sizes = [80, 64], strides = [1, 1]} : vector<320x64xf32> to vector<80x64xf32>
    %232 = vector.extract_strided_slice %227 {offsets = [240, 0], sizes = [80, 64], strides = [1, 1]} : vector<320x64xf32> to vector<80x64xf32>
    %233 = arith.maximumf %231, %232 : vector<80x64xf32>
    %234 = arith.maximumf %230, %233 : vector<80x64xf32>
    %235 = vector.broadcast %195 : vector<80x1xf32> to vector<80x64xf32>
    %236 = arith.addf %234, %235 : vector<80x64xf32>
    %cst_82 = arith.constant 0.000000e+00 : f32
    %237 = vector.broadcast %cst_82 : f32 to vector<80x64xf32>
    %238 = arith.maximumf %236, %237 : vector<80x64xf32>
    %239 = arith.truncf %238 : vector<80x64xf32> to vector<80x64xbf16>
    %c160 = arith.constant 160 : index
    %c0_83 = arith.constant 0 : index
    %240 = vector.load %arg12[%c160, %c0_83] : memref<320x64xbf16, #tpu.memory_space<vmem>>, vector<80x64xbf16>
    tpu.vector_store %arg12[%c160, %c0_83], %239 {strides = array<i32>} : memref<320x64xbf16, #tpu.memory_space<vmem>>, vector<80x64xbf16>,
    %c720_84 = arith.constant 720 : index
    %c0_85 = arith.constant 0 : index
    %241 = vector.load %arg11[%c720_84, %c0_85] : memref<1440x64xbf16, #tpu.memory_space<vmem>>, vector<720x64xbf16>
    %cst_86 = arith.constant dense<0.000000e+00> : vector<320x64xf32>
    %242 = tpu.matmul %194, %241, %cst_86 {dimension_numbers = #tpu.dot_dimension_numbers<[1], [0], [0], [1], [0, 0, 1, 1], [], []>} : vector<320x720xbf16>, vector<720x64xbf16>, vector<320x64xf32> -> vector<320x64xf32>
    %243 = vector.extract_strided_slice %242 {offsets = [0, 0], sizes = [80, 64], strides = [1, 1]} : vector<320x64xf32> to vector<80x64xf32>
    %244 = vector.extract_strided_slice %242 {offsets = [80, 0], sizes = [80, 64], strides = [1, 1]} : vector<320x64xf32> to vector<80x64xf32>
    %245 = arith.maximumf %243, %244 : vector<80x64xf32>
    %246 = vector.extract_strided_slice %242 {offsets = [160, 0], sizes = [80, 64], strides = [1, 1]} : vector<320x64xf32> to vector<80x64xf32>
    %247 = vector.extract_strided_slice %242 {offsets = [240, 0], sizes = [80, 64], strides = [1, 1]} : vector<320x64xf32> to vector<80x64xf32>
    %248 = arith.maximumf %246, %247 : vector<80x64xf32>
    %249 = arith.maximumf %245, %248 : vector<80x64xf32>
    %250 = vector.broadcast %195 : vector<80x1xf32> to vector<80x64xf32>
    %251 = arith.addf %249, %250 : vector<80x64xf32>
    %cst_87 = arith.constant 0.000000e+00 : f32
    %252 = vector.broadcast %cst_87 : f32 to vector<80x64xf32>
    %253 = arith.maximumf %251, %252 : vector<80x64xf32>
    %254 = arith.truncf %253 : vector<80x64xf32> to vector<80x64xbf16>
    %c240_88 = arith.constant 240 : index
    %c0_89 = arith.constant 0 : index
    %255 = vector.load %arg12[%c240_88, %c0_89] : memref<320x64xbf16, #tpu.memory_space<vmem>>, vector<80x64xbf16>
    tpu.vector_store %arg12[%c240_88, %c0_89], %254 {strides = array<i32>} : memref<320x64xbf16, #tpu.memory_space<vmem>>, vector<80x64xbf16>,
    %c0_90 = arith.constant 0 : index
    %c0_91 = arith.constant 0 : index
    %256 = vector.load %arg6[%c0_90, %c0_91] : memref<50x320xbf16, #tpu.memory_space<vmem>>, vector<50x320xbf16>
    %c0_92 = arith.constant 0 : index
    %c0_93 = arith.constant 0 : index
    %257 = vector.load %arg12[%c0_92, %c0_93] : memref<320x64xbf16, #tpu.memory_space<vmem>>, vector<320x64xbf16>
    %cst_94 = arith.constant dense<0.000000e+00> : vector<50x64xf32>
    %258 = tpu.matmul %256, %257, %cst_94 {dimension_numbers = #tpu.dot_dimension_numbers<[1], [0], [0], [1], [0, 0, 1, 1], [], []>} : vector<50x320xbf16>, vector<320x64xbf16>, vector<50x64xf32> -> vector<50x64xf32>
    %c0_95 = arith.constant 0 : index
    %c0_96 = arith.constant 0 : index
    %259 = vector.load %arg7[%c0_95, %c0_96] : memref<50x1xf32, #tpu.memory_space<vmem>>, vector<50x1xf32>
    %260 = vector.broadcast %259 : vector<50x1xf32> to vector<50x64xf32>
    %261 = arith.addf %258, %260 : vector<50x64xf32>
    %cst_97 = arith.constant 0.000000e+00 : f32
    %262 = vector.broadcast %cst_97 : f32 to vector<50x64xf32>
    %263 = arith.maximumf %261, %262 : vector<50x64xf32>
    %264 = arith.truncf %263 : vector<50x64xf32> to vector<50x64xbf16>
    %c0_98 = arith.constant 0 : index
    %c0_99 = arith.constant 0 : index
    %265 = vector.load %arg8[%c0_98, %c0_99] : memref<10x50xbf16, #tpu.memory_space<vmem>>, vector<10x50xbf16>
    %cst_100 = arith.constant dense<0.000000e+00> : vector<10x64xf32>
    %266 = tpu.matmul %265, %264, %cst_100 {dimension_numbers = #tpu.dot_dimension_numbers<[1], [0], [0], [1], [0, 0, 1, 1], [], []>} : vector<10x50xbf16>, vector<50x64xbf16>, vector<10x64xf32> -> vector<10x64xf32>
    %c0_101 = arith.constant 0 : index
    %c0_102 = arith.constant 0 : index
    %267 = vector.load %arg9[%c0_101, %c0_102] : memref<10x1xf32, #tpu.memory_space<vmem>>, vector<10x1xf32>
    %268 = vector.broadcast %267 : vector<10x1xf32> to vector<10x64xf32>
    %269 = arith.addf %266, %268 : vector<10x64xf32>
    %c0_103 = arith.constant 0 : index
    %c0_104 = arith.constant 0 : index
    %c0_105 = arith.constant 0 : index
    %270 = vector.load %arg10[%c0_103, %c0_104, %c0_105] : memref<1x10x64xf32, #tpu.memory_space<vmem>>, vector<1x10x64xf32>
    %271 = vector.shape_cast %270 : vector<1x10x64xf32> to vector<10x64xf32>
    %272 = vector.shape_cast %269 : vector<10x64xf32> to vector<1x10x64xf32>
    tpu.vector_store %arg10[%c0_103, %c0_104, %c0_105], %272 {strides = array<i32>} : memref<1x10x64xf32, #tpu.memory_space<vmem>>, vector<1x10x64xf32>,
    return
  }
  func.func @transform_0(%arg0: i32) -> (i32, i32, i32) {
    %c0_i32 = arith.constant 0 : i32
    %c0_i32_0 = arith.constant 0 : i32
    %c0_i32_1 = arith.constant 0 : i32
    return %arg0, %c0_i32, %c0_i32_0 : i32, i32, i32
  }
  func.func @transform_1(%arg0: i32) -> (i32, i32) {
    %c0_i32 = arith.constant 0 : i32
    %c0_i32_0 = arith.constant 0 : i32
    %c0_i32_1 = arith.constant 0 : i32
    return %c0_i32, %c0_i32_0 : i32, i32
  }
  func.func @transform_2(%arg0: i32) -> (i32, i32) {
    %c0_i32 = arith.constant 0 : i32
    %c0_i32_0 = arith.constant 0 : i32
    %c0_i32_1 = arith.constant 0 : i32
    return %c0_i32, %c0_i32_0 : i32, i32
  }
  func.func @transform_3(%arg0: i32) -> (i32, i32) {
    %c0_i32 = arith.constant 0 : i32
    %c0_i32_0 = arith.constant 0 : i32
    %c0_i32_1 = arith.constant 0 : i32
    return %c0_i32, %c0_i32_0 : i32, i32
  }
  func.func @transform_4(%arg0: i32) -> (i32, i32) {
    %c0_i32 = arith.constant 0 : i32
    %c0_i32_0 = arith.constant 0 : i32
    %c0_i32_1 = arith.constant 0 : i32
    return %c0_i32, %c0_i32_0 : i32, i32
  }
  func.func @transform_5(%arg0: i32) -> (i32, i32) {
    %c0_i32 = arith.constant 0 : i32
    %c0_i32_0 = arith.constant 0 : i32
    %c0_i32_1 = arith.constant 0 : i32
    return %c0_i32, %c0_i32_0 : i32, i32
  }
  func.func @transform_6(%arg0: i32) -> (i32, i32) {
    %c0_i32 = arith.constant 0 : i32
    %c0_i32_0 = arith.constant 0 : i32
    %c0_i32_1 = arith.constant 0 : i32
    return %c0_i32, %c0_i32_0 : i32, i32
  }
  func.func @transform_7(%arg0: i32) -> (i32, i32) {
    %c0_i32 = arith.constant 0 : i32
    %c0_i32_0 = arith.constant 0 : i32
    %c0_i32_1 = arith.constant 0 : i32
    return %c0_i32, %c0_i32_0 : i32, i32
  }
  func.func @transform_8(%arg0: i32) -> (i32, i32) {
    %c0_i32 = arith.constant 0 : i32
    %c0_i32_0 = arith.constant 0 : i32
    %c0_i32_1 = arith.constant 0 : i32
    return %c0_i32, %c0_i32_0 : i32, i32
  }
  func.func @transform_9(%arg0: i32) -> (i32, i32, i32) {
    %c0_i32 = arith.constant 0 : i32
    %c0_i32_0 = arith.constant 0 : i32
    %c0_i32_1 = arith.constant 0 : i32
    return %arg0, %c0_i32, %c0_i32_0 : i32, i32, i32
  }
}

</mosaic_0001>

<bundles_post_ra>
// kernel: lenet_forward.1
= control target key start
LH: loop header
LB: loop body
LE: loop exit
PB: predicated region body
PF: predicated region fallthrough
CT: control target
= control target key end

     0   :  { %v18906_v0 = vmov 0   ;;  %vm462_vm0 = vcmask 326656   ;;  %vm553_vm1 = vcmask 1043456   ;;  %vm988_vm2 = vcmask 523264   ;;  %s18890_s0 = inlined_call_operand.vmem [shape: bf16[1,784,64], index: 0, kind: input, shape index: {}]   ;;  %s18891_s1 = inlined_call_operand.vmem [shape: bf16[480,168], index: 1, kind: input, shape index: {}]   ;;  %s18892_s2 = inlined_call_operand.vmem [shape: f32[120,1], index: 2, kind: input, shape index: {}]   ;;  %s18893_s4 = inlined_call_operand.vmem [shape: f32[80,1], index: 4, kind: input, shape index: {}]   ;;  %s18894_s6 = inlined_call_operand.vmem [shape: f32[50,1], index: 6, kind: input, shape index: {}]   ;;  %s18895_s8 = inlined_call_operand.vmem [shape: f32[10,1], index: 8, kind: input, shape index: {}]   ;;  %s18896_s3 = inlined_call_operand.vmem [shape: bf16[320,720], index: 3, kind: input, shape index: {}]   ;;  %s18897_s5 = inlined_call_operand.vmem [shape: bf16[50,320], index: 5, kind: input, shape index: {}]   ;;  %s18898_s7 = inlined_call_operand.vmem [shape: bf16[10,50], index: 7, kind: input, shape index: {}]   ;;  %s18899_s9 = inlined_call_operand.vmem [shape: f32[1,10,64], index: 9, kind: output, shape index: {}]  }
   0x1   :  { %557 = vmatprep.subr.bf16.mxu0 %v18906_v0  ;;  %1085 = vmatprep.subr.bf16.mxu1 %v18906_v0  ;;  %v11557_v1 = vld [vmem:[%s18890_s0] sm:$0xff]   ;;  %v11559_v3 = vld [vmem:[%s18890_s0 + $0x8] sm:$0xff]   ;;  %v11561_v5 = vld [vmem:[%s18890_s0 + $0x10] sm:$0xff]   ;;  %vm1473_vm3 = vcmask 523268   ;;  %vm996_vm4 = vcmask 519168   ;;  %vm6902_vm5 = vcmask 654336  }
   0x2   :  { %v11558_v2 = vld [vmem:[%s18890_s0 + $0x1c] sm:$0xff]   ;;  %11555 = vset.pattern.permute.xlu0 %v18906_v0  ;;  %11556 = vset.pattern.permute.xlu1 %v18906_v0  ;;  %v11560_v4 = vld [vmem:[%s18890_s0 + $0x24] sm:$0xff]   ;;  %v11562_v6 = vld [vmem:[%s18890_s0 + $0x2c] sm:$0xff]   ;;  %vm12361_vm6 = vmmov 0   ;;  %vm10009_vm7 = vcmask 1040384   ;;  %vm10005_vm8 = vcmask 408576  }
   0x3   :  { %558 = vmatpush1.bf16.msra.mxu0 %v11557_v1  ;;  %1086 = vmatpush1.bf16.msra.mxu1 %v11558_v2  ;;  %v11563_v7 = vld [vmem:[%s18890_s0 + $0x18] sm:$0xff]   ;;  %v11565_v9 = vld [vmem:[%s18890_s0 + $0x20] sm:$0xff]   ;;  %v11567_v11 = vld [vmem:[%s18890_s0 + $0x28] sm:$0xff]   ;;  %vm10055_vm9 = vcmask 517120  }
   0x4   :  { %559 = vmatprep.subr.bf16.mxu0 %v18906_v0  ;;  %1087 = vmatprep.subr.bf16.mxu1 %v18906_v0  ;;  %v11564_v8 = vld [vmem:[%s18890_s0 + $0x34] sm:$0xff]   ;;  %v11566_v10 = vld [vmem:[%s18890_s0 + $0x3c] sm:$0xff]   ;;  %v11568_v12 = vld [vmem:[%s18890_s0 + $0x44] sm:$0xff]  }
   0x5   :  { %v11569_v13 = vld [vmem:[%s18890_s0 + $0x30] sm:$0xff]   ;;  %v11579_v14 = vld [vmem:[%s18891_s1 + $0x4] ss:$8 sps:$4 sm:$0xff]   ;;  %v11571_v16 = vld [vmem:[%s18890_s0 + $0x38] sm:$0xff]  }
   0x6   :  { %v11570_v15 = vld [vmem:[%s18890_s0 + $0x4c] sm:$0xff]   ;;  %10132 = vmatprep.mubr.msk.bf16.mxu0 %vm462_vm0, %v11579_v14  ;;  %10173 = vmatprep.mubr.msk.bf16.mxu1 %vm462_vm0, %v11579_v14  ;;  %v11572_v17 = vld [vmem:[%s18890_s0 + $0x54] sm:$0xff]   ;;  %v11573_v18 = vld [vmem:[%s18890_s0 + $0x40] sm:$0xff]  }
   0x7   :  { %560 = vmatpush1.bf16.msra.mxu0 %v11559_v3  ;;  %1088 = vmatpush1.bf16.msra.mxu1 %v11560_v4  ;;  %v11574_v19 = vld [vmem:[%s18890_s0 + $0x5c] sm:$0xff]   ;;  %v11575_v20 = vld [vmem:[%s18890_s0 + $0x48] sm:$0xff]   ;;  %v11577_v22 = vld [vmem:[%s18890_s0 + $0x50] ss:$0 sps:$4 sm:$0xff]  }
   0x8   :  { %561 = vmatprep.subr.bf16.mxu0 %v18906_v0  ;;  %1089 = vmatprep.subr.bf16.mxu1 %v18906_v0  ;;  %v11576_v21 = vld [vmem:[%s18890_s0 + $0x64] sm:$0xff]   ;;  %v11578_v23 = vld [vmem:[%s18890_s0 + $0x6c] ss:$0 sps:$4 sm:$0xff]   ;;  %v555_v24 = vsel %vm553_vm1, %v11577_v22, 0  ;;  %v11582_v27 = vld [vmem:[%s18891_s1 + $0x14] ss:$8 sps:$4 sm:$0xff]  }
   0x9   :  { %v1083_v25 = vsel %vm553_vm1, %v11578_v23, 0  ;;  %v11581_v26 = vld [vmem:[%s18891_s1] ss:$8 sps:$4 sm:$0xff]   ;;  %v11624_v28 = vld [vmem:[%s18890_s0 + $0x38] sm:$0xff]   ;;  %v11585_v31 = vld [vmem:[%s18891_s1 + $0x24] ss:$8 sps:$4 sm:$0xff]  }
   0xa   :  { %v11631_v29 = vld [vmem:[%s18890_s0 + $0x54] sm:$0xff]   ;;  %v11635_v32 = vld [vmem:[%s18890_s0 + $0x40] sm:$0xff]   ;;  %v11643_v38 = vld [vmem:[%s18890_s0 + $0x48] sm:$0xff]  }
   0xb   :  { %562 = vmatpush1.bf16.msra.mxu0 %v11561_v5  ;;  %1090 = vmatpush1.bf16.msra.mxu1 %v11562_v6  ;;  %v11584_v30 = vld [vmem:[%s18891_s1 + $0x10] ss:$8 sps:$4 sm:$0xff]   ;;  %v11587_v33 = vld [vmem:[%s18891_s1 + $0x20] ss:$8 sps:$4 sm:$0xff]   ;;  %v11588_v34 = vld [vmem:[%s18891_s1 + $0x34] ss:$8 sps:$4 sm:$0xff]  }
   0xc   :  { %563 = vmatprep.subr.bf16.mxu0 %v18906_v0  ;;  %1091 = vmatprep.subr.bf16.mxu1 %v18906_v0  ;;  %v11590_v35 = vld [vmem:[%s18891_s1 + $0x30] ss:$8 sps:$4 sm:$0xff]   ;;  %v11591_v36 = vld [vmem:[%s18891_s1 + $0x44] ss:$8 sps:$4 sm:$0xff]   ;;  %v11642_v37 = vld [vmem:[%s18890_s0 + $0x5c] sm:$0xff]  }
   0xd   :  { %v12564_v39 = vld [vmem:[%s18891_s1 + $0x40] ss:$8 sps:$4 sm:$0xff]   ;;  %v12569_v40 = vld [vmem:[%s18891_s1 + $0x54] ss:$8 sps:$4 sm:$0xff]   ;;  %v12582_v41 = vld [vmem:[%s18891_s1 + $0x50] ss:$8 sps:$4 sm:$0xff]  }
   0xe   :  { %v12587_v42 = vld [vmem:[%s18891_s1 + $0x64] ss:$8 sps:$4 sm:$0xff]   ;;  %v12598_v43 = vld [vmem:[%s18891_s1 + $0x60] ss:$8 sps:$4 sm:$0xff]   ;;  %v12603_v44 = vld [vmem:[%s18891_s1 + $0x74] ss:$8 sps:$4 sm:$0xff]  }
   0xf   :  { %564 = vmatpush1.bf16.msra.mxu0 %v11563_v7  ;;  %1092 = vmatpush1.bf16.msra.mxu1 %v11564_v8  ;;  %v11653_v45 = vld [vmem:[%s18890_s0 + $0x64] sm:$0xff]   ;;  %v11654_v46 = vld [vmem:[%s18890_s0 + $0x50] sm:$0xff]   ;;  %v11665_v54 = vld [vmem:[%s18890_s0 + $0x58] sm:$0xff]  }
  0x10   :  { %565 = vmatprep.subr.bf16.mxu0 %v18906_v0  ;;  %1093 = vmatprep.subr.bf16.mxu1 %v18906_v0  ;;  %v12620_v47 = vld [vmem:[%s18891_s1 + $0x70] ss:$8 sps:$4 sm:$0xff]   ;;  %v12625_v48 = vld [vmem:[%s18891_s1 + $0x84] ss:$8 sps:$4 sm:$0xff]   ;;  %v12638_v49 = vld [vmem:[%s18891_s1 + $0x80] ss:$8 sps:$4 sm:$0xff]  }
  0x11   :  { %v12643_v50 = vld [vmem:[%s18891_s1 + $0x94] ss:$8 sps:$4 sm:$0xff]   ;;  %v12654_v51 = vld [vmem:[%s18891_s1 + $0x90] ss:$8 sps:$4 sm:$0xff]   ;;  %v12662_v53 = vld [vmem:[%s18891_s1 + $0xa4] ss:$8 sps:$4 sm:$0xff]  }
  0x12   :  { %v11663_v52 = vld [vmem:[%s18890_s0 + $0x6c] sm:$0xff]   ;;  %v12677_v55 = vld [vmem:[%s18891_s1 + $0xa0] ss:$8 sps:$4 sm:$0xff]   ;;  %v12682_v56 = vld [vmem:[%s18891_s1 + $0xb4] ss:$8 sps:$4 sm:$0xff]  }
  0x13   :  { %566 = vmatpush1.bf16.msra.mxu0 %v11565_v9  ;;  %1094 = vmatpush1.bf16.msra.mxu1 %v11566_v10  ;;  %v12694_v57 = vld [vmem:[%s18891_s1 + $0xb0] ss:$8 sps:$4 sm:$0xff]   ;;  %v12699_v58 = vld [vmem:[%s18891_s1 + $0xc4] ss:$8 sps:$4 sm:$0xff]   ;;  %v11674_v61 = vld [vmem:[%s18890_s0 + $0x7c] sm:$0xff]  }
  0x14   :  { %567 = vmatprep.subr.bf16.mxu0 %v18906_v0  ;;  %1095 = vmatprep.subr.bf16.mxu1 %v18906_v0  ;;  %v11669_v59 = vld [vmem:[%s18890_s0 + $0x74] sm:$0xff]   ;;  %v11673_v60 = vld [vmem:[%s18890_s0 + $0x60] sm:$0xff]   ;;  %v11675_v63 = vld [vmem:[%s18890_s0 + $0x68] sm:$0xff]  }
  0x15   :  { %v12721_v62 = vld [vmem:[%s18891_s1 + $0xc0] ss:$8 sps:$4 sm:$0xff]   ;;  %v12733_v2 = vld [vmem:[%s18891_s1 + $0xd4] ss:$8 sps:$4 sm:$0xff]   ;;  %v11681_v4 = vld [vmem:[%s18890_s0 + $0x8c] sm:$0xff]  }
  0x16   :  { %v11676_v1 = vld [vmem:[%s18890_s0 + $0x84] sm:$0xff]   ;;  %v11680_v3 = vld [vmem:[%s18890_s0 + $0x70] sm:$0xff]   ;;  %v11682_v6 = vld [vmem:[%s18890_s0 + $0x78] sm:$0xff]  }
  0x17   :  { %568 = vmatpush1.bf16.msra.mxu0 %v11567_v11  ;;  %1096 = vmatpush1.bf16.msra.mxu1 %v11568_v12  ;;  %v12753_v5 = vld [vmem:[%s18891_s1 + $0xd0] ss:$8 sps:$4 sm:$0xff]   ;;  %v12765_v8 = vld [vmem:[%s18891_s1 + $0xe4] ss:$8 sps:$4 sm:$0xff]   ;;  %v11688_v10 = vld [vmem:[%s18890_s0 + $0x9c] sm:$0xff]  }
  0x18   :  { %569 = vmatprep.subr.bf16.mxu0 %v18906_v0  ;;  %1097 = vmatprep.subr.bf16.mxu1 %v18906_v0  ;;  %v11683_v7 = vld [vmem:[%s18890_s0 + $0x94] sm:$0xff]   ;;  %v11687_v9 = vld [vmem:[%s18890_s0 + $0x80] sm:$0xff]   ;;  %v11689_v11 = vld [vmem:[%s18890_s0 + $0x88] ss:$0 sps:$4 sm:$0xff]  }
  0x19   :  { %v11690_v12 = vld [vmem:[%s18890_s0 + $0xa4] ss:$0 sps:$4 sm:$0xff]   ;;  %v12797_v14 = vld [vmem:[%s18891_s1 + $0xf4] ss:$8 sps:$4 sm:$0xff]  }
  0x1a   :  { %v12849_v22 = vld [vmem:[%s18891_s1 + $0x124] ss:$8 sps:$4 sm:$0xff]  }
  0x1b   :  { %570 = vmatpush1.bf16.msra.mxu0 %v11569_v13  ;;  %1098 = vmatpush1.bf16.msra.mxu1 %v11570_v15  ;;  %v12791_v13 = vld [vmem:[%s18891_s1 + $0xe0] ss:$8 sps:$4 sm:$0xff]   ;;  %v1567_v15 = vsel %vm553_vm1, %v11689_v11, 0  ;;  %19215 = vst [vmem:[#allocation6_spill] sm:$0xff] %v12849_v22 }
  0x1c   :  { %571 = vmatprep.subr.bf16.mxu0 %v18906_v0  ;;  %1099 = vmatprep.subr.bf16.mxu1 %v18906_v0  ;;  %v93_v23 = vld [vmem:[%s18892_s2] sm:$0xff] }
  0x1d   :  { %877 = vperm.xlu0 %11555, %v93_v23   ;;  %v11668_v11 = vld [vmem:[%s18891_s1 + $0x1a0] ss:$8 sps:$4 sm:$0xff]   ;;  %v11672_v23 = vld [vmem:[%s18891_s1 + $0x1b0] ss:$8 sps:$4 sm:$0xff]  }
  0x1f   :  { %572 = vmatpush1.bf16.msra.mxu0 %v11571_v16  ;;  %1100 = vmatpush1.bf16.msra.mxu1 %v11572_v17  ;;  %v2018_v16 = vsel %vm553_vm1, %v11690_v12, 0  ;;  %v12812_v17 = vld [vmem:[%s18891_s1 + $0xf0] ss:$8 sps:$4 sm:$0xff]   ;;  %v11670_v12 = vld [vmem:[%s18891_s1 + $0x1b4] ss:$8 sps:$4 sm:$0xff]  }
  0x20   :  { %573 = vmatprep.subr.bf16.mxu0 %v18906_v0  ;;  %1101 = vmatprep.subr.bf16.mxu1 %v18906_v0 }
  0x23   :  { %574 = vmatpush1.bf16.msra.mxu0 %v11573_v18  ;;  %1102 = vmatpush1.bf16.msra.mxu1 %v11574_v19  ;;  %v12817_v18 = vld [vmem:[%s18891_s1 + $0x104] ss:$8 sps:$4 sm:$0xff]   ;;  %v12828_v19 = vld [vmem:[%s18891_s1 + $0x100] ss:$8 sps:$4 sm:$0xff]  }
  0x24   :  { %575 = vmatprep.subr.bf16.mxu0 %v18906_v0  ;;  %1103 = vmatprep.subr.bf16.mxu1 %v18906_v0 }
  0x27   :  { %576 = vmatpush1.bf16.msra.mxu0 %v11575_v20  ;;  %1104 = vmatpush1.bf16.msra.mxu1 %v11576_v21  ;;  %v12833_v20 = vld [vmem:[%s18891_s1 + $0x114] ss:$8 sps:$4 sm:$0xff]   ;;  %v12844_v21 = vld [vmem:[%s18891_s1 + $0x110] ss:$8 sps:$4 sm:$0xff]  }
  0x28   :  { %577 = vmatprep.subr.bf16.mxu0 %v18906_v0  ;;  %1105 = vmatprep.subr.bf16.mxu1 %v18906_v0  ;;  %19213 = vst [vmem:[#allocation4_spill] sm:$0xff] %v12833_v20  ;;  %19214 = vst [vmem:[#allocation5_spill] sm:$0xff] %v12844_v21 }
  0x2b   :  { %578 = vmatpush1.bf16.msra.mxu0 %v555_v24  ;;  %1106 = vmatpush1.bf16.msra.mxu1 %v1083_v25  ;;  %v12863_v24 = vld [vmem:[%s18891_s1 + $0x120] ss:$8 sps:$4 sm:$0xff]   ;;  %v12868_v25 = vld [vmem:[%s18891_s1 + $0x134] ss:$8 sps:$4 sm:$0xff]  }
  0x2c   :  { %1569 = vmatprep.subr.bf16.mxu0 %v18906_v0  ;;  %2020 = vmatprep.subr.bf16.mxu1 %v18906_v0  ;;  %19216 = vst [vmem:[#allocation7_spill] sm:$0xff] %v12863_v24  ;;  %19217 = vst [vmem:[#allocation8_spill] sm:$0xff] %v12868_v25 }
  0x2e   :  { %590 = vmatmul.mubr.bf16.vlgmr.msra.gmra.mrb[0].mxu0 %v11581_v26  ;;  %1118 = vmatmul.mubr.bf16.vlgmr.msra.gmra.mrb[0].mxu1 %v11581_v26  ;;  %v94_v26 = vld [vmem:[%s18892_s2 + $0x8] sm:$0xff] }
  0x2f   :  { %10133 = vmatprep.mubr.msk.bf16.mxu0 %vm462_vm0, %v11582_v27  ;;  %10174 = vmatprep.mubr.msk.bf16.mxu1 %vm462_vm0, %v11582_v27  ;;  %v95_v27 = vld [vmem:[%s18892_s2 + $0x10] sm:$0xff] }
  0x30   :  { %1570 = vmatpush1.bf16.msra.mxu0 %v11624_v28  ;;  %2021 = vmatpush1.bf16.msra.mxu1 %v11631_v29  ;;  %v12885_v28 = vld [vmem:[%s18891_s1 + $0x130] ss:$8 sps:$4 sm:$0xff]   ;;  %v12890_v29 = vld [vmem:[%s18891_s1 + $0x144] ss:$8 sps:$4 sm:$0xff]  }
  0x31   :  { %1571 = vmatprep.subr.bf16.mxu0 %v18906_v0  ;;  %2022 = vmatprep.subr.bf16.mxu1 %v18906_v0  ;;  %19218 = vst [vmem:[#allocation9_spill] sm:$0xff] %v12885_v28  ;;  %19219 = vst [vmem:[#allocation10_spill] sm:$0xff] %v12890_v29 }
  0x32   :  { %882 = vperm.xlu0 %11555, %v94_v26   ;;  %887 = vperm.xlu1 %11556, %v95_v27  }
  0x34   :  { %1572 = vmatpush1.bf16.msra.mxu0 %v11635_v32  ;;  %2023 = vmatpush1.bf16.msra.mxu1 %v11642_v37  ;;  %v12907_v32 = vld [vmem:[%s18891_s1 + $0x140] ss:$8 sps:$4 sm:$0xff]   ;;  %v12934_v37 = vld [vmem:[%s18891_s1 + $0x164] ss:$8 sps:$4 sm:$0xff]  }
  0x35   :  { %1573 = vmatprep.subr.bf16.mxu0 %v18906_v0  ;;  %2024 = vmatprep.subr.bf16.mxu1 %v18906_v0  ;;  %19220 = vst [vmem:[#allocation11_spill] sm:$0xff] %v12907_v32  ;;  %19223 = vst [vmem:[#allocation14_spill] sm:$0xff] %v12934_v37 }
  0x36   :  { %598 = vmatmul.mubr.bf16.gmra.mrb[4].mxu0 %v11584_v30  ;;  %1126 = vmatmul.mubr.bf16.gmra.mrb[4].mxu1 %v11584_v30  ;;  %v96_v30 = vld [vmem:[%s18892_s2 + $0x18] sm:$0xff] }
  0x37   :  { %10134 = vmatprep.mubr.msk.bf16.mxu0 %vm462_vm0, %v11585_v31  ;;  %10175 = vmatprep.mubr.msk.bf16.mxu1 %vm462_vm0, %v11585_v31  ;;  %v97_v31 = vld [vmem:[%s18892_s2 + $0x20] sm:$0xff] }
  0x38   :  { %1574 = vmatpush1.bf16.msra.mxu0 %v11643_v38  ;;  %2025 = vmatpush1.bf16.msra.mxu1 %v11653_v45  ;;  %v100_v38 = vld [vmem:[%s18892_s2 + $0x38] sm:$0xff]  ;;  %v101_v45 = vld [vmem:[%s18892_s2 + $0x40] sm:$0xff] }
  0x39   :  { %1575 = vmatprep.subr.bf16.mxu0 %v18906_v0  ;;  %2026 = vmatprep.subr.bf16.mxu1 %v18906_v0 }
  0x3a   :  { %892 = vperm.xlu1 %11556, %v96_v30   ;;  %897 = vperm.xlu0 %11555, %v97_v31   ;;  %v11677_v30 = vld [vmem:[%s18891_s1 + $0x1c4] ss:$8 sps:$4 sm:$0xff]  }
  0x3c   :  { %1576 = vmatpush1.bf16.msra.mxu0 %v11654_v46  ;;  %2027 = vmatpush1.bf16.msra.mxu1 %v11663_v52  ;;  %v11652_v46 = vld [vmem:[%s18891_s1 + $0x160] ss:$8 sps:$4 sm:$0xff]   ;;  %v11655_v52 = vld [vmem:[%s18891_s1 + $0x174] ss:$8 sps:$4 sm:$0xff]  }
  0x3d   :  { %1577 = vmatprep.subr.bf16.mxu0 %v18906_v0  ;;  %2028 = vmatprep.subr.bf16.mxu1 %v18906_v0 }
  0x3e   :  { %606 = vmatmul.mubr.bf16.gmra.mrb[8].mxu0 %v11587_v33  ;;  %1134 = vmatmul.mubr.bf16.gmra.mrb[8].mxu1 %v11587_v33  ;;  %v12912_v33 = vld [vmem:[%s18891_s1 + $0x154] ss:$8 sps:$4 sm:$0xff]  }
  0x3f   :  { %10135 = vmatprep.mubr.msk.bf16.mxu0 %vm462_vm0, %v11588_v34  ;;  %10176 = vmatprep.mubr.msk.bf16.mxu1 %vm462_vm0, %v11588_v34  ;;  %19221 = vst [vmem:[#allocation12_spill] sm:$0xff] %v12912_v33  ;;  %v98_v34 = vld [vmem:[%s18892_s2 + $0x28] sm:$0xff] }
  0x40   :  { %1578 = vmatpush1.bf16.msra.mxu0 %v11665_v54  ;;  %2029 = vmatpush1.bf16.msra.mxu1 %v11669_v59  ;;  %v102_v54 = vld [vmem:[%s18892_s2 + $0x48] sm:$0xff]  ;;  %v103_v59 = vld [vmem:[%s18892_s2 + $0x50] sm:$0xff] }
  0x41   :  { %1579 = vmatprep.subr.bf16.mxu0 %v18906_v0  ;;  %2030 = vmatprep.subr.bf16.mxu1 %v18906_v0 }
  0x42   :  { %902 = vperm.xlu1 %11556, %v98_v34  }
  0x44   :  { %1580 = vmatpush1.bf16.msra.mxu0 %v11673_v60  ;;  %2031 = vmatpush1.bf16.msra.mxu1 %v11674_v61  ;;  %v11657_v60 = vld [vmem:[%s18891_s1 + $0x170] ss:$8 sps:$4 sm:$0xff]   ;;  %v11658_v61 = vld [vmem:[%s18891_s1 + $0x184] ss:$8 sps:$4 sm:$0xff]  }
  0x45   :  { %1581 = vmatprep.subr.bf16.mxu0 %v18906_v0  ;;  %2032 = vmatprep.subr.bf16.mxu1 %v18906_v0 }
  0x46   :  { %614 = vmatmul.mubr.bf16.gmra.mrb[12].mxu0 %v11590_v35  ;;  %1142 = vmatmul.mubr.bf16.gmra.mrb[12].mxu1 %v11590_v35  ;;  %v99_v35 = vld [vmem:[%s18892_s2 + $0x30] sm:$0xff] }
  0x47   :  { %10136 = vmatprep.mubr.msk.bf16.mxu0 %vm462_vm0, %v11591_v36  ;;  %10177 = vmatprep.mubr.msk.bf16.mxu1 %vm462_vm0, %v11591_v36  ;;  %v12929_v36 = vld [vmem:[%s18891_s1 + $0x150] ss:$8 sps:$4 sm:$0xff]  }
  0x48   :  { %1582 = vmatpush1.bf16.msra.mxu0 %v11675_v63  ;;  %2033 = vmatpush1.bf16.msra.mxu1 %v11676_v1  ;;  %19222 = vst [vmem:[#allocation13_spill] sm:$0xff] %v12929_v36  ;;  %v104_v63 = vld [vmem:[%s18892_s2 + $0x58] sm:$0xff]  ;;  %v105_v1 = vld [vmem:[%s18892_s2 + $0x60] sm:$0xff] }
  0x49   :  { %1583 = vmatprep.subr.bf16.mxu0 %v18906_v0  ;;  %2034 = vmatprep.subr.bf16.mxu1 %v18906_v0 }
  0x4a   :  { %907 = vperm.xlu0 %11555, %v99_v35   ;;  %912 = vperm.xlu1 %11556, %v100_v38  }
  0x4c   :  { %1584 = vmatpush1.bf16.msra.mxu0 %v11680_v3  ;;  %2035 = vmatpush1.bf16.msra.mxu1 %v11681_v4  ;;  %v11660_v3 = vld [vmem:[%s18891_s1 + $0x180] ss:$8 sps:$4 sm:$0xff]   ;;  %v11661_v4 = vld [vmem:[%s18891_s1 + $0x194] ss:$8 sps:$4 sm:$0xff]  }
  0x4d   :  { %1585 = vmatprep.subr.bf16.mxu0 %v18906_v0  ;;  %2036 = vmatprep.subr.bf16.mxu1 %v18906_v0 }
  0x4e   :  { %622 = vmatmul.mubr.bf16.gmra.mrb[16].mxu0 %v12564_v39  ;;  %1150 = vmatmul.mubr.bf16.gmra.mrb[16].mxu1 %v12564_v39 }
  0x4f   :  { %10137 = vmatprep.mubr.msk.bf16.mxu0 %vm462_vm0, %v12569_v40  ;;  %10178 = vmatprep.mubr.msk.bf16.mxu1 %vm462_vm0, %v12569_v40 }
  0x50   :  { %1586 = vmatpush1.bf16.msra.mxu0 %v11682_v6  ;;  %2037 = vmatpush1.bf16.msra.mxu1 %v11683_v7  ;;  %v106_v6 = vld [vmem:[%s18892_s2 + $0x68] sm:$0xff]  ;;  %v107_v7 = vld [vmem:[%s18892_s2 + $0x70] sm:$0xff] }
  0x51   :  { %1587 = vmatprep.subr.bf16.mxu0 %v18906_v0  ;;  %2038 = vmatprep.subr.bf16.mxu1 %v18906_v0 }
  0x52   :  { %917 = vperm.xlu0 %11555, %v101_v45   ;;  %922 = vperm.xlu1 %11556, %v102_v54  }
  0x54   :  { %1588 = vmatpush1.bf16.msra.mxu0 %v11687_v9  ;;  %2039 = vmatpush1.bf16.msra.mxu1 %v11688_v10  ;;  %v11664_v9 = vld [vmem:[%s18891_s1 + $0x190] ss:$8 sps:$4 sm:$0xff]   ;;  %v11666_v10 = vld [vmem:[%s18891_s1 + $0x1a4] ss:$8 sps:$4 sm:$0xff]  }
  0x55   :  { %1589 = vmatprep.subr.bf16.mxu0 %v18906_v0  ;;  %2040 = vmatprep.subr.bf16.mxu1 %v18906_v0 }
  0x56   :  { %630 = vmatmul.mubr.bf16.gmra.mrb[20].mxu0 %v12582_v41  ;;  %1158 = vmatmul.mubr.bf16.gmra.mrb[20].mxu1 %v12582_v41 }
  0x57   :  { %10138 = vmatprep.mubr.msk.bf16.mxu0 %vm462_vm0, %v12587_v42  ;;  %10179 = vmatprep.mubr.msk.bf16.mxu1 %vm462_vm0, %v12587_v42 }
  0x58   :  { %1590 = vmatpush1.bf16.msra.mxu0 %v1567_v15  ;;  %2041 = vmatpush1.bf16.msra.mxu1 %v2018_v16 }
  0x59   :  { %2502 = vmatprep.subr.bf16.mxu0 %v18906_v0  ;;  %2953 = vmatprep.subr.bf16.mxu1 %v18906_v0 }
  0x5a   :  { %927 = vperm.xlu0 %11555, %v103_v59   ;;  %932 = vperm.xlu1 %11556, %v104_v63  }
  0x5e   :  { %638 = vmatmul.mubr.bf16.gmra.mrb[24].mxu0 %v12598_v43  ;;  %1166 = vmatmul.mubr.bf16.gmra.mrb[24].mxu1 %v12598_v43 }
  0x5f   :  { %10139 = vmatprep.mubr.msk.bf16.mxu0 %vm462_vm0, %v12603_v44  ;;  %10180 = vmatprep.mubr.msk.bf16.mxu1 %vm462_vm0, %v12603_v44 }
  0x60   :  { %937 = vperm.xlu0 %11555, %v105_v1   ;;  %942 = vperm.xlu1 %11556, %v106_v6  }
  0x64   :  { %947 = vperm.xlu0 %11555, %v107_v7   ;;  %v11686_v7 = vld [vmem:[%s18891_s1 + $0x1d0] ss:$8 sps:$4 sm:$0xff]  }
  0x66   :  { %646 = vmatmul.mubr.bf16.gmra.mrb[28].mxu0 %v12620_v47  ;;  %1174 = vmatmul.mubr.bf16.gmra.mrb[28].mxu1 %v12620_v47 }
  0x67   :  { %10140 = vmatprep.mubr.msk.bf16.mxu0 %vm462_vm0, %v12625_v48  ;;  %10181 = vmatprep.mubr.msk.bf16.mxu1 %vm462_vm0, %v12625_v48 }
  0x6e   :  { %654 = vmatmul.mubr.bf16.gmra.mrb[32].mxu0 %v12638_v49  ;;  %1182 = vmatmul.mubr.bf16.gmra.mrb[32].mxu1 %v12638_v49 }
  0x6f   :  { %10141 = vmatprep.mubr.msk.bf16.mxu0 %vm462_vm0, %v12643_v50  ;;  %10182 = vmatprep.mubr.msk.bf16.mxu1 %vm462_vm0, %v12643_v50 }
  0x76   :  { %662 = vmatmul.mubr.bf16.gmra.mrb[36].mxu0 %v12654_v51  ;;  %1190 = vmatmul.mubr.bf16.gmra.mrb[36].mxu1 %v12654_v51 }
  0x77   :  { %10142 = vmatprep.mubr.msk.bf16.mxu0 %vm462_vm0, %v12662_v53  ;;  %10183 = vmatprep.mubr.msk.bf16.mxu1 %vm462_vm0, %v12662_v53 }
  0x7e   :  { %670 = vmatmul.mubr.bf16.gmra.mrb[40].mxu0 %v12677_v55  ;;  %1198 = vmatmul.mubr.bf16.gmra.mrb[40].mxu1 %v12677_v55 }
  0x7f   :  { %10143 = vmatprep.mubr.msk.bf16.mxu0 %vm462_vm0, %v12682_v56  ;;  %10184 = vmatprep.mubr.msk.bf16.mxu1 %vm462_vm0, %v12682_v56 }
  0x86   :  { %678 = vmatmul.mubr.bf16.gmra.mrb[44].mxu0 %v12694_v57  ;;  %1206 = vmatmul.mubr.bf16.gmra.mrb[44].mxu1 %v12694_v57 }
  0x87   :  { %10144 = vmatprep.mubr.msk.bf16.mxu0 %vm462_vm0, %v12699_v58  ;;  %10185 = vmatprep.mubr.msk.bf16.mxu1 %vm462_vm0, %v12699_v58 }
  0x8e   :  { %686 = vmatmul.mubr.bf16.gmra.mrb[48].mxu0 %v12721_v62  ;;  %1214 = vmatmul.mubr.bf16.gmra.mrb[48].mxu1 %v12721_v62 }
  0x8f   :  { %10145 = vmatprep.mubr.msk.bf16.mxu0 %vm462_vm0, %v12733_v2  ;;  %10186 = vmatprep.mubr.msk.bf16.mxu1 %vm462_vm0, %v12733_v2 }
  0x96   :  { %694 = vmatmul.mubr.bf16.gmra.mrb[52].mxu0 %v12753_v5  ;;  %1222 = vmatmul.mubr.bf16.gmra.mrb[52].mxu1 %v12753_v5 }
  0x97   :  { %10146 = vmatprep.mubr.msk.bf16.mxu0 %vm462_vm0, %v12765_v8  ;;  %10187 = vmatprep.mubr.msk.bf16.mxu1 %vm462_vm0, %v12765_v8 }
  0x9e   :  { %702 = vmatmul.mubr.bf16.gmra.mrb[56].mxu0 %v12791_v13  ;;  %1230 = vmatmul.mubr.bf16.gmra.mrb[56].mxu1 %v12791_v13 }
  0x9f   :  { %10147 = vmatprep.mubr.msk.bf16.mxu0 %vm462_vm0, %v12797_v14  ;;  %10188 = vmatprep.mubr.msk.bf16.mxu1 %vm462_vm0, %v12797_v14 }
  0xa6   :  { %710 = vmatmul.mubr.bf16.gmra.mrb[60].mxu0 %v12812_v17  ;;  %1238 = vmatmul.mubr.bf16.gmra.mrb[60].mxu1 %v12812_v17 }
  0xa7   :  { %10148 = vmatprep.mubr.msk.bf16.mxu0 %vm462_vm0, %v12817_v18  ;;  %10189 = vmatprep.mubr.msk.bf16.mxu1 %vm462_vm0, %v12817_v18 }
  0xae   :  { %718 = vmatmul.mubr.bf16.gmra.mrb[64].mxu0 %v12828_v19  ;;  %1246 = vmatmul.mubr.bf16.gmra.mrb[64].mxu1 %v12828_v19 }
  0xaf   :  { %10149 = vmatprep.mubr.msk.bf16.mxu0 %vm462_vm0, %v12833_v20  ;;  %10190 = vmatprep.mubr.msk.bf16.mxu1 %vm462_vm0, %v12833_v20 }
  0xb6   :  { %726 = vmatmul.mubr.bf16.gmra.mrb[68].mxu0 %v12844_v21  ;;  %1254 = vmatmul.mubr.bf16.gmra.mrb[68].mxu1 %v12844_v21 }
  0xb7   :  { %10150 = vmatprep.mubr.msk.bf16.mxu0 %vm462_vm0, %v12849_v22  ;;  %10191 = vmatprep.mubr.msk.bf16.mxu1 %vm462_vm0, %v12849_v22 }
  0xbe   :  { %734 = vmatmul.mubr.bf16.gmra.mrb[72].mxu0 %v12863_v24  ;;  %1262 = vmatmul.mubr.bf16.gmra.mrb[72].mxu1 %v12863_v24 }
  0xbf   :  { %10151 = vmatprep.mubr.msk.bf16.mxu0 %vm462_vm0, %v12868_v25  ;;  %10192 = vmatprep.mubr.msk.bf16.mxu1 %vm462_vm0, %v12868_v25 }
  0xc6   :  { %742 = vmatmul.mubr.bf16.gmra.mrb[76].mxu0 %v12885_v28  ;;  %1270 = vmatmul.mubr.bf16.gmra.mrb[76].mxu1 %v12885_v28  ;;  %v11982_v28 = vld [vmem:[%s18891_s1 + $0x30] ss:$8 sps:$4 sm:$0xff]  }
  0xc7   :  { %10152 = vmatprep.mubr.msk.bf16.mxu0 %vm462_vm0, %v12890_v29  ;;  %10193 = vmatprep.mubr.msk.bf16.mxu1 %vm462_vm0, %v12890_v29 }
  0xce   :  { %750 = vmatmul.mubr.bf16.gmra.mrb[80].mxu0 %v12907_v32  ;;  %1278 = vmatmul.mubr.bf16.gmra.mrb[80].mxu1 %v12907_v32 }
  0xcf   :  { %10153 = vmatprep.mubr.msk.bf16.mxu0 %vm462_vm0, %v12912_v33  ;;  %10194 = vmatprep.mubr.msk.bf16.mxu1 %vm462_vm0, %v12912_v33 }
  0xd6   :  { %758 = vmatmul.mubr.bf16.gmra.mrb[84].mxu0 %v12929_v36  ;;  %1286 = vmatmul.mubr.bf16.gmra.mrb[84].mxu1 %v12929_v36 }
  0xd7   :  { %10154 = vmatprep.mubr.msk.bf16.mxu0 %vm462_vm0, %v12934_v37  ;;  %10195 = vmatprep.mubr.msk.bf16.mxu1 %vm462_vm0, %v12934_v37 }
  0xde   :  { %766 = vmatmul.mubr.bf16.gmra.mrb[88].mxu0 %v11652_v46  ;;  %1294 = vmatmul.mubr.bf16.gmra.mrb[88].mxu1 %v11652_v46 }
  0xdf   :  { %10155 = vmatprep.mubr.msk.bf16.mxu0 %vm462_vm0, %v11655_v52  ;;  %10196 = vmatprep.mubr.msk.bf16.mxu1 %vm462_vm0, %v11655_v52  ;;  %v11679_v52 = vld [vmem:[%s18891_s1 + $0x1c0] ss:$8 sps:$4 sm:$0xff]  }
  0xe6   :  { %774 = vmatmul.mubr.bf16.gmra.mrb[92].mxu0 %v11657_v60  ;;  %1302 = vmatmul.mubr.bf16.gmra.mrb[92].mxu1 %v11657_v60  ;;  %v11684_v60 = vld [vmem:[%s18891_s1 + $0x1d4] ss:$8 sps:$4 sm:$0xff]  }
  0xe7   :  { %10156 = vmatprep.mubr.msk.bf16.mxu0 %vm462_vm0, %v11658_v61  ;;  %10197 = vmatprep.mubr.msk.bf16.mxu1 %vm462_vm0, %v11658_v61 }
  0xee   :  { %782 = vmatmul.mubr.bf16.gmra.mrb[96].mxu0 %v11660_v3  ;;  %1310 = vmatmul.mubr.bf16.gmra.mrb[96].mxu1 %v11660_v3 }
  0xef   :  { %10157 = vmatprep.mubr.msk.bf16.mxu0 %vm462_vm0, %v11661_v4  ;;  %10198 = vmatprep.mubr.msk.bf16.mxu1 %vm462_vm0, %v11661_v4 }
  0xf6   :  { %790 = vmatmul.mubr.bf16.gmra.mrb[100].mxu0 %v11664_v9  ;;  %1318 = vmatmul.mubr.bf16.gmra.mrb[100].mxu1 %v11664_v9 }
  0xf7   :  { %10158 = vmatprep.mubr.msk.bf16.mxu0 %vm462_vm0, %v11666_v10  ;;  %10199 = vmatprep.mubr.msk.bf16.mxu1 %vm462_vm0, %v11666_v10 }
  0xfe   :  { %798 = vmatmul.mubr.bf16.gmra.mrb[104].mxu0 %v11668_v11  ;;  %1326 = vmatmul.mubr.bf16.gmra.mrb[104].mxu1 %v11668_v11 }
  0xff   :  { %10159 = vmatprep.mubr.msk.bf16.mxu0 %vm462_vm0, %v11670_v12  ;;  %10200 = vmatprep.mubr.msk.bf16.mxu1 %vm462_vm0, %v11670_v12 }
 0x101   :  { %v13006_v15 = vpop.f32.mrb[0].mxu0  ;;  %v13008_v16 = vpop.f32.mrb[0].mxu1 }
 0x102   :  { %19224 = vst [vmem:[#allocation15_spill] sm:$0xff] %v13008_v16  ;;  %v593_v26 = vpop.f32.mrb[1].mxu0  ;;  %v1121_v27 = vpop.f32.mrb[1].mxu1 }
 0x103   :  { %v13016_v31 = vpop.f32.mrb[2].mxu0  ;;  %v13018_v34 = vpop.f32.mrb[2].mxu1  ;;  %v11975_v27 = vld [vmem:[%s18891_s1 + $0x4] ss:$8 sps:$4 sm:$0xff]  }
 0x104   :  { %v596_v35 = vpop.f32.mrb[3].mxu0  ;;  %v1124_v38 = vpop.f32.mrb[3].mxu1 }
 0x106   :  { %806 = vmatmul.mubr.bf16.gmra.mrb[108].mxu0 %v11672_v23  ;;  %1334 = vmatmul.mubr.bf16.gmra.mrb[108].mxu1 %v11672_v23 }
 0x107   :  { %10160 = vmatprep.mubr.msk.bf16.mxu0 %vm462_vm0, %v11677_v30  ;;  %10201 = vmatprep.mubr.msk.bf16.mxu1 %vm462_vm0, %v11677_v30 }
 0x109   :  { %v13022_v45 = vpop.f32.mrb[4].mxu0  ;;  %v13024_v46 = vpop.f32.mrb[4].mxu1 }
 0x10a   :  { %19225 = vst [vmem:[#allocation16_spill] sm:$0xff] %v13024_v46  ;;  %v601_v54 = vpop.f32.mrb[5].mxu0  ;;  %v1129_v59 = vpop.f32.mrb[5].mxu1 }
 0x10b   :  { %v13032_v61 = vpop.f32.mrb[6].mxu0  ;;  %v13034_v63 = vpop.f32.mrb[6].mxu1 }
 0x10c   :  { %v604_v1 = vpop.f32.mrb[7].mxu0  ;;  %v1132_v3 = vpop.f32.mrb[7].mxu1 }
 0x10d   :  { %v11691_v1 = vld [vmem:[%s18890_s0 + $0x70] sm:$0xff]  }
 0x10e   :  { %814 = vmatmul.mubr.bf16.gmra.mrb[112].mxu0 %v11679_v52  ;;  %1342 = vmatmul.mubr.bf16.gmra.mrb[112].mxu1 %v11679_v52 }
 0x10f   :  { %10161 = vmatprep.mubr.msk.bf16.mxu0 %vm462_vm0, %v11684_v60  ;;  %10202 = vmatprep.mubr.msk.bf16.mxu1 %vm462_vm0, %v11684_v60 }
 0x111   :  { %v13038_v4 = vpop.f32.mrb[8].mxu0  ;;  %v13040_v6 = vpop.f32.mrb[8].mxu1 }
 0x112   :  { %v609_v9 = vpop.f32.mrb[9].mxu0  ;;  %v1137_v10 = vpop.f32.mrb[9].mxu1 }
 0x113   :  { %v13045_v11 = vpop.f32.mrb[10].mxu0  ;;  %v13047_v12 = vpop.f32.mrb[10].mxu1  ;;  %v11977_v9 = vld [vmem:[%s18891_s1 + $0x14] ss:$8 sps:$4 sm:$0xff]  }
 0x114   :  { %v612_v23 = vpop.f32.mrb[11].mxu0  ;;  %v1140_v26 = vpop.f32.mrb[11].mxu1 }
 0x116   :  { %822 = vmatmul.mubr.bf16.gmra.mrb[116].mxu0 %v11686_v7  ;;  %1350 = vmatmul.mubr.bf16.gmra.mrb[116].mxu1 %v11686_v7  ;;  %v11976_v7 = vld [vmem:[%s18891_s1] ss:$8 sps:$4 sm:$0xff]  }
 0x117   :  { %10214 = vmatprep.mubr.msk.bf16.mxu0 %vm462_vm0, %v11975_v27  ;;  %10255 = vmatprep.mubr.msk.bf16.mxu1 %vm462_vm0, %v11975_v27 }
 0x119   :  { %v13054_v30 = vpop.f32.mrb[12].mxu0  ;;  %v13056_v35 = vpop.f32.mrb[12].mxu1 }
 0x11a   :  { %19226 = vst [vmem:[#allocation17_spill] sm:$0xff] %v13056_v35  ;;  %v617_v38 = vpop.f32.mrb[13].mxu0  ;;  %v1145_v52 = vpop.f32.mrb[13].mxu1 }
 0x11b   :  { %v13058_v54 = vpop.f32.mrb[14].mxu0  ;;  %v13060_v59 = vpop.f32.mrb[14].mxu1 }
 0x11c   :  { %v620_v60 = vpop.f32.mrb[15].mxu0  ;;  %v1148_v3 = vpop.f32.mrb[15].mxu1 }
 0x11d   :  { %v11692_v3 = vld [vmem:[%s18890_s0 + $0x8c] sm:$0xff]  }
 0x11e   :  { %1602 = vmatmul.mubr.bf16.vlgmr.msra.gmra.mrb[120].mxu0 %v11976_v7  ;;  %2053 = vmatmul.mubr.bf16.vlgmr.msra.gmra.mrb[120].mxu1 %v11976_v7 }
 0x11f   :  { %10215 = vmatprep.mubr.msk.bf16.mxu0 %vm462_vm0, %v11977_v9  ;;  %10256 = vmatprep.mubr.msk.bf16.mxu1 %vm462_vm0, %v11977_v9  ;;  %v11979_v9 = vld [vmem:[%s18891_s1 + $0x24] ss:$8 sps:$4 sm:$0xff]  }
 0x120   :  { %2503 = vmatpush1.bf16.msra.mxu0 %v11691_v1  ;;  %v11978_v1 = vld [vmem:[%s18891_s1 + $0x10] ss:$8 sps:$4 sm:$0xff]   ;;  %2954 = vmatpush1.bf16.msra.mxu1 %v11692_v3 }
 0x121   :  { %v13073_v10 = vpop.f32.mrb[16].mxu0  ;;  %2504 = vmatprep.subr.bf16.mxu0 %v18906_v0  ;;  %v13076_v23 = vpop.f32.mrb[16].mxu1  ;;  %2955 = vmatprep.subr.bf16.mxu1 %v18906_v0 }
 0x122   :  { %19227 = vst [vmem:[#allocation18_spill] sm:$0xff] %v13076_v23  ;;  %v625_v26 = vpop.f32.mrb[17].mxu0  ;;  %v1153_v27 = vpop.f32.mrb[17].mxu1 }
 0x123   :  { %v13078_v38 = vpop.f32.mrb[18].mxu0  ;;  %v13080_v52 = vpop.f32.mrb[18].mxu1  ;;  %v11693_v26 = vld [vmem:[%s18890_s0 + $0x78] sm:$0xff]  }
 0x124   :  { %v628_v60 = vpop.f32.mrb[19].mxu0  ;;  %v1156_v7 = vpop.f32.mrb[19].mxu1  ;;  %2505 = vmatpush1.bf16.msra.mxu0 %v11693_v26  ;;  %v11981_v26 = vld [vmem:[%s18891_s1 + $0x34] ss:$8 sps:$4 sm:$0xff]  }
 0x125   :  { %2506 = vmatprep.subr.bf16.mxu0 %v18906_v0 }
 0x126   :  { %1610 = vmatmul.mubr.bf16.gmra.mrb[124].mxu0 %v11978_v1  ;;  %2061 = vmatmul.mubr.bf16.gmra.mrb[124].mxu1 %v11978_v1 }
 0x127   :  { %10216 = vmatprep.mubr.msk.bf16.mxu0 %vm462_vm0, %v11979_v9  ;;  %10257 = vmatprep.mubr.msk.bf16.mxu1 %vm462_vm0, %v11979_v9  ;;  %v11980_v9 = vld [vmem:[%s18891_s1 + $0x20] ss:$8 sps:$4 sm:$0xff]  }
 0x129   :  { %v13097_v27 = vpop.f32.mrb[20].mxu0  ;;  %v13099_v60 = vpop.f32.mrb[20].mxu1 }
 0x12a   :  { %19228 = vst [vmem:[#allocation19_spill] sm:$0xff] %v13097_v27  ;;  %19229 = vst [vmem:[#allocation20_spill] sm:$0xff] %v13099_v60  ;;  %v633_v3 = vpop.f32.mrb[21].mxu0  ;;  %v1161_v7 = vpop.f32.mrb[21].mxu1  ;;  %v19272_v27 = vld [vmem:[#allocation9_spill] sm:$0xff] }
 0x12b   :  { %v13102_v1 = vpop.f32.mrb[22].mxu0  ;;  %v13104_v37 = vpop.f32.mrb[22].mxu1 }
 0x12c   :  { %19230 = vst [vmem:[#allocation21_spill] sm:$0xff] %v13102_v1  ;;  %19231 = vst [vmem:[#allocation22_spill] sm:$0xff] %v13104_v37  ;;  %v636_v36 = vpop.f32.mrb[23].mxu0  ;;  %v1164_v33 = vpop.f32.mrb[23].mxu1  ;;  %v19261_v37 = vld [vmem:[#allocation5_spill] sm:$0xff] }
 0x12d   :  { %v13484_v60 = vpop.permute.xlu0 %877 }
 0x12e   :  { %1618 = vmatmul.mubr.bf16.gmra.mrb[128].mxu0 %v11980_v9  ;;  %2069 = vmatmul.mubr.bf16.gmra.mrb[128].mxu1 %v11980_v9 }
 0x12f   :  { %10217 = vmatprep.mubr.msk.bf16.mxu0 %vm462_vm0, %v11981_v26  ;;  %10258 = vmatprep.mubr.msk.bf16.mxu1 %vm462_vm0, %v11981_v26  ;;  %v11983_v26 = vld [vmem:[%s18891_s1 + $0x44] ss:$8 sps:$4 sm:$0xff]  }
 0x131   :  { %v13114_v3 = vpop.f32.mrb[24].mxu0  ;;  %v13116_v7 = vpop.f32.mrb[24].mxu1 }
 0x132   :  { %19232 = vst [vmem:[#allocation23_spill] sm:$0xff] %v13114_v3  ;;  %19233 = vst [vmem:[#allocation24_spill] sm:$0xff] %v13116_v7  ;;  %v641_v36 = vpop.f32.mrb[25].mxu0  ;;  %v1169_v33 = vpop.f32.mrb[25].mxu1 }
 0x133   :  { %v13118_v0 = vpop.f32.mrb[26].mxu0  ;;  %v13120_v32 = vpop.f32.mrb[26].mxu1 }
 0x134   :  { %19234 = vst [vmem:[#allocation25_spill] sm:$0xff] %v13118_v0  ;;  %19235 = vst [vmem:[#allocation26_spill] sm:$0xff] %v13120_v32  ;;  %v644_v29 = vpop.f32.mrb[27].mxu0  ;;  %v1172_v9 = vpop.f32.mrb[27].mxu1 }
 0x136   :  { %1626 = vmatmul.mubr.bf16.gmra.mrb[132].mxu0 %v11982_v28  ;;  %2077 = vmatmul.mubr.bf16.gmra.mrb[132].mxu1 %v11982_v28 }
 0x137   :  { %10218 = vmatprep.mubr.msk.bf16.mxu0 %vm462_vm0, %v11983_v26  ;;  %10259 = vmatprep.mubr.msk.bf16.mxu1 %vm462_vm0, %v11983_v26  ;;  %v11694_v26 = vld [vmem:[%s18890_s0 + $0x94] sm:$0xff]  }
 0x138   :  { %2956 = vmatpush1.bf16.msra.mxu1 %v11694_v26 }
 0x139   :  { %v13130_v36 = vpop.f32.mrb[28].mxu0  ;;  %v13132_v33 = vpop.f32.mrb[28].mxu1 }
 0x13a   :  { %19236 = vst [vmem:[#allocation27_spill] sm:$0xff] %v13130_v36  ;;  %19237 = vst [vmem:[#allocation28_spill] sm:$0xff] %v13132_v33  ;;  %v649_v29 = vpop.f32.mrb[29].mxu0  ;;  %v1177_v9 = vpop.f32.mrb[29].mxu1 }
 0x13b   :  { %v13134_v25 = vpop.f32.mrb[30].mxu0  ;;  %v13138_v28 = vpop.f32.mrb[30].mxu1  ;;  %v11695_v29 = vld [vmem:[%s18890_s0 + $0x80] sm:$0xff]  }
 0x13c   :  { %19238 = vst [vmem:[#allocation29_spill] sm:$0xff] %v13138_v28  ;;  %v652_v22 = vpop.f32.mrb[31].mxu0  ;;  %v1180_v20 = vpop.f32.mrb[31].mxu1  ;;  %2507 = vmatpush1.bf16.msra.mxu0 %v11695_v29 }
 0x13d   :  { %v19240_v22 = vmov 0  }
 0x13e   :  { %1634 = vmatmul.mubr.bf16.gmra.mrb[136].mxu0 %v12564_v39  ;;  %2085 = vmatmul.mubr.bf16.gmra.mrb[136].mxu1 %v12564_v39 }
 0x13f   :  { %10219 = vmatprep.mubr.msk.bf16.mxu0 %vm462_vm0, %v12569_v40  ;;  %10260 = vmatprep.mubr.msk.bf16.mxu1 %vm462_vm0, %v12569_v40 }
 0x140   :  { %2957 = vmatprep.subr.bf16.mxu1 %v19240_v22  ;;  %2508 = vmatprep.subr.bf16.mxu0 %v19240_v22 }
 0x141   :  { %v13154_v20 = vpop.f32.mrb[32].mxu0  ;;  %v13159_v39 = vpop.f32.mrb[32].mxu1 }
 0x142   :  { %19239 = vst [vmem:[#allocation30_spill] sm:$0xff] %v13154_v20  ;;  %v657_v21 = vpop.f32.mrb[33].mxu0  ;;  %v1185_v28 = vpop.f32.mrb[33].mxu1 }
 0x143   :  { %v13164_v16 = vpop.f32.mrb[34].mxu0  ;;  %v13168_v26 = vpop.f32.mrb[34].mxu1 }
 0x144   :  { %19241 = vst [vmem:[#allocation31_spill] sm:$0xff] %v13164_v16  ;;  %19242 = vst [vmem:[#allocation32_spill] sm:$0xff] %v13168_v26  ;;  %v660_v29 = vpop.f32.mrb[35].mxu0  ;;  %v1188_v20 = vpop.f32.mrb[35].mxu1 }
 0x146   :  { %1642 = vmatmul.mubr.bf16.gmra.mrb[140].mxu0 %v12582_v41  ;;  %2093 = vmatmul.mubr.bf16.gmra.mrb[140].mxu1 %v12582_v41 }
 0x147   :  { %10220 = vmatprep.mubr.msk.bf16.mxu0 %vm462_vm0, %v12587_v42  ;;  %10261 = vmatprep.mubr.msk.bf16.mxu1 %vm462_vm0, %v12587_v42 }
 0x149   :  { %v13178_v21 = vpop.f32.mrb[36].mxu0  ;;  %v13182_v29 = vpop.f32.mrb[36].mxu1 }
 0x14a   :  { %v665_v40 = vpop.f32.mrb[37].mxu0  ;;  %v1193_v9 = vpop.f32.mrb[37].mxu1 }
 0x14b   :  { %v13186_v24 = vpop.f32.mrb[38].mxu0  ;;  %v13190_v26 = vpop.f32.mrb[38].mxu1 }
 0x14c   :  { %19243 = vst [vmem:[#allocation33_spill] sm:$0xff] %v13190_v26  ;;  %v668_v42 = vpop.f32.mrb[39].mxu0  ;;  %v1196_v16 = vpop.f32.mrb[39].mxu1 }
 0x14e   :  { %1650 = vmatmul.mubr.bf16.gmra.mrb[144].mxu0 %v12598_v43  ;;  %2101 = vmatmul.mubr.bf16.gmra.mrb[144].mxu1 %v12598_v43  ;;  %v11696_v43 = vld [vmem:[%s18890_s0 + $0x9c] sm:$0xff]  }
 0x14f   :  { %10221 = vmatprep.mubr.msk.bf16.mxu0 %vm462_vm0, %v12603_v44  ;;  %10262 = vmatprep.mubr.msk.bf16.mxu1 %vm462_vm0, %v12603_v44 }
 0x150   :  { %2958 = vmatpush1.bf16.msra.mxu1 %v11696_v43 }
 0x151   :  { %v13200_v9 = vpop.f32.mrb[40].mxu0  ;;  %v13204_v42 = vpop.f32.mrb[40].mxu1  ;;  %2959 = vmatprep.subr.bf16.mxu1 %v19240_v22 }
 0x152   :  { %v673_v41 = vpop.f32.mrb[41].mxu0  ;;  %v1201_v46 = vpop.f32.mrb[41].mxu1 }
 0x153   :  { %v13208_v20 = vpop.f32.mrb[42].mxu0  ;;  %v13215_v28 = vpop.f32.mrb[42].mxu1  ;;  %v11697_v46 = vld [vmem:[%s18890_s0 + $0x88] sm:$0xff]  }
 0x154   :  { %19244 = vst [vmem:[#allocation34_spill] sm:$0xff] %v13208_v20  ;;  %19245 = vst [vmem:[#allocation35_spill] sm:$0xff] %v13215_v28  ;;  %v676_v26 = vpop.f32.mrb[43].mxu0  ;;  %v1204_v41 = vpop.f32.mrb[43].mxu1  ;;  %2509 = vmatpush1.bf16.msra.mxu0 %v11697_v46 }
 0x155   :  { %2510 = vmatprep.subr.bf16.mxu0 %v19240_v22 }
 0x156   :  { %1658 = vmatmul.mubr.bf16.gmra.mrb[148].mxu0 %v12620_v47  ;;  %2109 = vmatmul.mubr.bf16.gmra.mrb[148].mxu1 %v12620_v47 }
 0x157   :  { %10222 = vmatprep.mubr.msk.bf16.mxu0 %vm462_vm0, %v12625_v48  ;;  %10263 = vmatprep.mubr.msk.bf16.mxu1 %vm462_vm0, %v12625_v48 }
 0x159   :  { %v13229_v26 = vpop.f32.mrb[44].mxu0  ;;  %v13234_v41 = vpop.f32.mrb[44].mxu1 }
 0x15a   :  { %v681_v40 = vpop.f32.mrb[45].mxu0  ;;  %v1209_v44 = vpop.f32.mrb[45].mxu1 }
 0x15b   :  { %v13238_v16 = vpop.f32.mrb[46].mxu0  ;;  %v13242_v46 = vpop.f32.mrb[46].mxu1 }
 0x15c   :  { %19246 = vst [vmem:[#allocation36_spill] sm:$0xff] %v13242_v46  ;;  %v684_v28 = vpop.f32.mrb[47].mxu0  ;;  %v1212_v20 = vpop.f32.mrb[47].mxu1 }
 0x15e   :  { %1666 = vmatmul.mubr.bf16.gmra.mrb[152].mxu0 %v12638_v49  ;;  %2117 = vmatmul.mubr.bf16.gmra.mrb[152].mxu1 %v12638_v49 }
 0x15f   :  { %10223 = vmatprep.mubr.msk.bf16.mxu0 %vm462_vm0, %v12643_v50  ;;  %10264 = vmatprep.mubr.msk.bf16.mxu1 %vm462_vm0, %v12643_v50 }
 0x161   :  { %v13252_v40 = vpop.f32.mrb[48].mxu0  ;;  %v13256_v28 = vpop.f32.mrb[48].mxu1 }
 0x162   :  { %v689_v48 = vpop.f32.mrb[49].mxu0  ;;  %v1217_v35 = vpop.f32.mrb[49].mxu1 }
 0x163   :  { %v13260_v47 = vpop.f32.mrb[50].mxu0  ;;  %v13264_v43 = vpop.f32.mrb[50].mxu1  ;;  %v11698_v48 = vld [vmem:[%s18890_s0 + $0xa4] sm:$0xff]  }
 0x164   :  { %19247 = vst [vmem:[#allocation37_spill] sm:$0xff] %v13260_v47  ;;  %19248 = vst [vmem:[#allocation38_spill] sm:$0xff] %v13264_v43  ;;  %v692_v50 = vpop.f32.mrb[51].mxu0  ;;  %v1220_v23 = vpop.f32.mrb[51].mxu1  ;;  %2960 = vmatpush1.bf16.msra.mxu1 %v11698_v48  ;;  %v19271_v47 = vmax.f32 %v13006_v15, %v13134_v25 }
 0x165   :  { %2961 = vmatprep.subr.bf16.mxu1 %v19240_v22 }
 0x166   :  { %1674 = vmatmul.mubr.bf16.gmra.mrb[156].mxu0 %v12654_v51  ;;  %2125 = vmatmul.mubr.bf16.gmra.mrb[156].mxu1 %v12654_v51 }
 0x167   :  { %10224 = vmatprep.mubr.msk.bf16.mxu0 %vm462_vm0, %v12662_v53  ;;  %10265 = vmatprep.mubr.msk.bf16.mxu1 %vm462_vm0, %v12662_v53  ;;  %v11699_v53 = vld [vmem:[%s18890_s0 + $0x90] sm:$0xff]  }
 0x168   :  { %2511 = vmatpush1.bf16.msra.mxu0 %v11699_v53  ;;  %v11700_v53 = vld [vmem:[%s18890_s0 + $0xac] sm:$0xff]  }
 0x169   :  { %v13274_v35 = vpop.f32.mrb[52].mxu0  ;;  %v13281_v23 = vpop.f32.mrb[52].mxu1  ;;  %2512 = vmatprep.subr.bf16.mxu0 %v19240_v22  ;;  %2962 = vmatpush1.bf16.msra.mxu1 %v11700_v53 }
 0x16a   :  { %19249 = vst [vmem:[#allocation39_spill] sm:$0xff] %v13274_v35  ;;  %19250 = vst [vmem:[#allocation40_spill] sm:$0xff] %v13281_v23  ;;  %v697_v46 = vpop.f32.mrb[53].mxu0  ;;  %v1225_v49 = vpop.f32.mrb[53].mxu1  ;;  %2963 = vmatprep.subr.bf16.mxu1 %v19240_v22 }
 0x16b   :  { %v13285_v20 = vpop.f32.mrb[54].mxu0  ;;  %v13292_v43 = vpop.f32.mrb[54].mxu1 }
 0x16c   :  { %19251 = vst [vmem:[#allocation41_spill] sm:$0xff] %v13285_v20  ;;  %19252 = vst [vmem:[#allocation42_spill] sm:$0xff] %v13292_v43  ;;  %v700_v50 = vpop.f32.mrb[55].mxu0  ;;  %v1228_v51 = vpop.f32.mrb[55].mxu1 }
 0x16e   :  { %1682 = vmatmul.mubr.bf16.gmra.mrb[160].mxu0 %v12677_v55  ;;  %2133 = vmatmul.mubr.bf16.gmra.mrb[160].mxu1 %v12677_v55 }
 0x16f   :  { %10225 = vmatprep.mubr.msk.bf16.mxu0 %vm462_vm0, %v12682_v56  ;;  %10266 = vmatprep.mubr.msk.bf16.mxu1 %vm462_vm0, %v12682_v56  ;;  %v11702_v56 = vld [vmem:[%s18890_s0 + $0xb4] sm:$0xff]  }
 0x170   :  { %2964 = vmatpush1.bf16.msra.mxu1 %v11702_v56 }
 0x171   :  { %v13304_v49 = vpop.f32.mrb[56].mxu0  ;;  %v13308_v50 = vpop.f32.mrb[56].mxu1  ;;  %2965 = vmatprep.subr.bf16.mxu1 %v19240_v22 }
 0x172   :  { %19253 = vst [vmem:[#allocation43_spill] sm:$0xff] %v13304_v49  ;;  %19254 = vst [vmem:[#allocation44_spill] sm:$0xff] %v13308_v50  ;;  %v705_v51 = vpop.f32.mrb[57].mxu0  ;;  %v1233_v46 = vpop.f32.mrb[57].mxu1 }
 0x173   :  { %v13315_v44 = vpop.f32.mrb[58].mxu0  ;;  %v13319_v43 = vpop.f32.mrb[58].mxu1  ;;  %v11701_v46 = vld [vmem:[%s18890_s0 + $0x98] sm:$0xff]  }
 0x174   :  { %19255 = vst [vmem:[#allocation45_spill] sm:$0xff] %v13315_v44  ;;  %19256 = vst [vmem:[#allocation46_spill] sm:$0xff] %v13319_v43  ;;  %v708_v7 = vpop.f32.mrb[59].mxu0  ;;  %v1236_v48 = vpop.f32.mrb[59].mxu1  ;;  %2513 = vmatpush1.bf16.msra.mxu0 %v11701_v46  ;;  %v11704_v51 = vld [vmem:[%s18890_s0 + $0xbc] sm:$0xff]  }
 0x175   :  { %2514 = vmatprep.subr.bf16.mxu0 %v19240_v22  ;;  %2966 = vmatpush1.bf16.msra.mxu1 %v11704_v51 }
 0x176   :  { %1690 = vmatmul.mubr.bf16.gmra.mrb[164].mxu0 %v12694_v57  ;;  %2141 = vmatmul.mubr.bf16.gmra.mrb[164].mxu1 %v12694_v57  ;;  %v11703_v57 = vld [vmem:[%s18890_s0 + $0xa0] sm:$0xff]  }
 0x177   :  { %10226 = vmatprep.mubr.msk.bf16.mxu0 %vm462_vm0, %v12699_v58  ;;  %10267 = vmatprep.mubr.msk.bf16.mxu1 %vm462_vm0, %v12699_v58 }
 0x178   :  { %2515 = vmatpush1.bf16.msra.mxu0 %v11703_v57  ;;  %2967 = vmatprep.subr.bf16.mxu1 %v19240_v22 }
 0x179   :  { %v13336_v7 = vpop.f32.mrb[60].mxu0  ;;  %v13339_v48 = vpop.f32.mrb[60].mxu1  ;;  %2516 = vmatprep.subr.bf16.mxu0 %v19240_v22 }
 0x17a   :  { %v713_v53 = vpop.f32.mrb[61].mxu0  ;;  %v1241_v58 = vpop.f32.mrb[61].mxu1 }
 0x17b   :  { %v13348_v46 = vpop.f32.mrb[62].mxu0  ;;  %v13350_v55 = vpop.f32.mrb[62].mxu1  ;;  %v11705_v53 = vld [vmem:[%s18890_s0 + $0xa8] sm:$0xff]  }
 0x17c   :  { %v716_v56 = vpop.f32.mrb[63].mxu0  ;;  %v1244_v43 = vpop.f32.mrb[63].mxu1  ;;  %v11706_v58 = vld [vmem:[%s18890_s0 + $0xc4] sm:$0xff]   ;;  %2517 = vmatpush1.bf16.msra.mxu0 %v11705_v53 }
 0x17d   :  { %2968 = vmatpush1.bf16.msra.mxu1 %v11706_v58  ;;  %2518 = vmatprep.subr.bf16.mxu0 %v19240_v22  ;;  %v11708_v56 = vld [vmem:[%s18890_s0 + $0xcc] sm:$0xff]  }
 0x17e   :  { %1698 = vmatmul.mubr.bf16.gmra.mrb[168].mxu0 %v12721_v62  ;;  %2149 = vmatmul.mubr.bf16.gmra.mrb[168].mxu1 %v12721_v62  ;;  %v11707_v62 = vld [vmem:[%s18890_s0 + $0xb0] sm:$0xff]  }
 0x17f   :  { %10227 = vmatprep.mubr.msk.bf16.mxu0 %vm462_vm0, %v12733_v2  ;;  %10268 = vmatprep.mubr.msk.bf16.mxu1 %vm462_vm0, %v12733_v2 }
 0x180   :  { %2969 = vmatprep.subr.bf16.mxu1 %v19240_v22  ;;  %2519 = vmatpush1.bf16.msra.mxu0 %v11707_v62  ;;  %v11711_v62 = vld [vmem:[%s18890_s0 + $0xc0] ss:$0 sps:$4 sm:$0xff]  }
 0x181   :  { %v13366_v43 = vpop.f32.mrb[64].mxu0  ;;  %v13369_v51 = vpop.f32.mrb[64].mxu1  ;;  %2970 = vmatpush1.bf16.msra.mxu1 %v11708_v56  ;;  %2520 = vmatprep.subr.bf16.mxu0 %v19240_v22 }
 0x182   :  { %v721_v57 = vpop.f32.mrb[65].mxu0  ;;  %v1249_v2 = vpop.f32.mrb[65].mxu1  ;;  %2971 = vmatprep.subr.bf16.mxu1 %v19240_v22 }
 0x183   :  { %v13378_v53 = vpop.f32.mrb[66].mxu0  ;;  %v13380_v33 = vpop.f32.mrb[66].mxu1  ;;  %v11709_v57 = vld [vmem:[%s18890_s0 + $0xb8] sm:$0xff]  }
 0x184   :  { %v724_v58 = vpop.f32.mrb[67].mxu0  ;;  %v1252_v44 = vpop.f32.mrb[67].mxu1  ;;  %v11710_v2 = vld [vmem:[%s18890_s0 + $0xd4] sm:$0xff]   ;;  %2521 = vmatpush1.bf16.msra.mxu0 %v11709_v57 }
 0x185   :  { %2972 = vmatpush1.bf16.msra.mxu1 %v11710_v2  ;;  %2522 = vmatprep.subr.bf16.mxu0 %v19240_v22  ;;  %v2500_v2 = vsel %vm553_vm1, %v11711_v62, 0 }
 0x186   :  { %1706 = vmatmul.mubr.bf16.gmra.mrb[172].mxu0 %v12753_v5  ;;  %2157 = vmatmul.mubr.bf16.gmra.mrb[172].mxu1 %v12753_v5  ;;  %v11712_v5 = vld [vmem:[%s18890_s0 + $0xdc] ss:$0 sps:$4 sm:$0xff]  }
 0x187   :  { %10228 = vmatprep.mubr.msk.bf16.mxu0 %vm462_vm0, %v12765_v8  ;;  %10269 = vmatprep.mubr.msk.bf16.mxu1 %vm462_vm0, %v12765_v8  ;;  %v2951_v36 = vsel %vm553_vm1, %v11712_v5, 0 }
 0x188   :  { %2973 = vmatprep.subr.bf16.mxu1 %v19240_v22  ;;  %2523 = vmatpush1.bf16.msra.mxu0 %v2500_v2 }
 0x189   :  { %v13396_v44 = vpop.f32.mrb[68].mxu0  ;;  %v13405_v56 = vpop.f32.mrb[68].mxu1  ;;  %2974 = vmatpush1.bf16.msra.mxu1 %v2951_v36  ;;  %3435 = vmatprep.subr.bf16.mxu0 %v19240_v22 }
 0x18a   :  { %v729_v58 = vpop.f32.mrb[69].mxu0  ;;  %v1257_v8 = vpop.f32.mrb[69].mxu1  ;;  %3886 = vmatprep.subr.bf16.mxu1 %v19240_v22 }
 0x18b   :  { %v13408_v57 = vpop.f32.mrb[70].mxu0  ;;  %v13412_v50 = vpop.f32.mrb[70].mxu1 }
 0x18c   :  { %v732_v32 = vpop.f32.mrb[71].mxu0  ;;  %v1260_v49 = vpop.f32.mrb[71].mxu1 }
 0x18e   :  { %1714 = vmatmul.mubr.bf16.gmra.mrb[176].mxu0 %v12791_v13  ;;  %2165 = vmatmul.mubr.bf16.gmra.mrb[176].mxu1 %v12791_v13 }
 0x18f   :  { %10229 = vmatprep.mubr.msk.bf16.mxu0 %vm462_vm0, %v12797_v14  ;;  %10270 = vmatprep.mubr.msk.bf16.mxu1 %vm462_vm0, %v12797_v14 }
 0x191   :  { %v13422_v62 = vpop.f32.mrb[72].mxu0  ;;  %v13424_v32 = vpop.f32.mrb[72].mxu1 }
 0x192   :  { %v737_v49 = vpop.f32.mrb[73].mxu0  ;;  %v1265_v36 = vpop.f32.mrb[73].mxu1 }
 0x193   :  { %v13426_v5 = vpop.f32.mrb[74].mxu0  ;;  %v13428_v58 = vpop.f32.mrb[74].mxu1 }
 0x194   :  { %v740_v8 = vpop.f32.mrb[75].mxu0  ;;  %v1268_v2 = vpop.f32.mrb[75].mxu1 }
 0x196   :  { %1722 = vmatmul.mubr.bf16.gmra.mrb[180].mxu0 %v12812_v17  ;;  %2173 = vmatmul.mubr.bf16.gmra.mrb[180].mxu1 %v12812_v17  ;;  %v19257_v17 = vld [vmem:[#allocation4_spill] sm:$0xff] }
 0x197   :  { %10230 = vmatprep.mubr.msk.bf16.mxu0 %vm462_vm0, %v12817_v18  ;;  %10271 = vmatprep.mubr.msk.bf16.mxu1 %vm462_vm0, %v12817_v18 }
 0x199   :  { %v13436_v13 = vpop.f32.mrb[76].mxu0  ;;  %v13438_v14 = vpop.f32.mrb[76].mxu1 }
 0x19a   :  { %v745_v49 = vpop.f32.mrb[77].mxu0  ;;  %v1273_v36 = vpop.f32.mrb[77].mxu1 }
 0x19b   :  { %v13440_v22 = vpop.f32.mrb[78].mxu0  ;;  %v13442_v8 = vpop.f32.mrb[78].mxu1 }
 0x19c   :  { %v748_v2 = vpop.f32.mrb[79].mxu0  ;;  %v1276_v0 = vpop.f32.mrb[79].mxu1 }
 0x19e   :  { %1730 = vmatmul.mubr.bf16.gmra.mrb[184].mxu0 %v12828_v19  ;;  %2181 = vmatmul.mubr.bf16.gmra.mrb[184].mxu1 %v12828_v19  ;;  %v19262_v19 = vld [vmem:[#allocation6_spill] sm:$0xff] }
 0x19f   :  { %10231 = vmatprep.mubr.msk.bf16.mxu0 %vm462_vm0, %v19257_v17  ;;  %10272 = vmatprep.mubr.msk.bf16.mxu1 %vm462_vm0, %v19257_v17 }
 0x1a1   :  { %v13450_v18 = vpop.f32.mrb[80].mxu0  ;;  %v13452_v49 = vpop.f32.mrb[80].mxu1 }
 0x1a2   :  { %19258 = vst [vmem:[#allocation4_spill] sm:$0xff] %v13452_v49  ;;  %v753_v36 = vpop.f32.mrb[81].mxu0  ;;  %v1281_v20 = vpop.f32.mrb[81].mxu1  ;;  %v19279_v49 = vmax.f32 %v13018_v34, %v13159_v39  ;;  %v19286_v39 = vld [vmem:[#allocation12_spill] sm:$0xff] }
 0x1a3   :  { %v13454_v3 = vpop.f32.mrb[82].mxu0  ;;  %v13456_v2 = vpop.f32.mrb[82].mxu1 }
 0x1a4   :  { %19259 = vst [vmem:[#allocation47_spill] sm:$0xff] %v13454_v3  ;;  %19260 = vst [vmem:[#allocation48_spill] sm:$0xff] %v13456_v2  ;;  %v756_v0 = vpop.f32.mrb[83].mxu0  ;;  %v1284_v23 = vpop.f32.mrb[83].mxu1  ;;  %v19267_v3 = vld [vmem:[#allocation7_spill] sm:$0xff] }
 0x1a6   :  { %1738 = vmatmul.mubr.bf16.gmra.mrb[188].mxu0 %v19261_v37  ;;  %2189 = vmatmul.mubr.bf16.gmra.mrb[188].mxu1 %v19261_v37  ;;  %v19268_v37 = vld [vmem:[#allocation8_spill] sm:$0xff] }
 0x1a7   :  { %10232 = vmatprep.mubr.msk.bf16.mxu0 %vm462_vm0, %v19262_v19  ;;  %10273 = vmatprep.mubr.msk.bf16.mxu1 %vm462_vm0, %v19262_v19 }
 0x1a9   :  { %v13464_v17 = vpop.f32.mrb[84].mxu0  ;;  %v13466_v36 = vpop.f32.mrb[84].mxu1 }
 0x1aa   :  { %19263 = vst [vmem:[#allocation5_spill] sm:$0xff] %v13464_v17  ;;  %19264 = vst [vmem:[#allocation6_spill] sm:$0xff] %v13466_v36  ;;  %v761_v20 = vpop.f32.mrb[85].mxu0  ;;  %v1289_v35 = vpop.f32.mrb[85].mxu1 }
 0x1ab   :  { %v13468_v1 = vpop.f32.mrb[86].mxu0  ;;  %v13470_v0 = vpop.f32.mrb[86].mxu1 }
 0x1ac   :  { %19265 = vst [vmem:[#allocation49_spill] sm:$0xff] %v13468_v1  ;;  %19266 = vst [vmem:[#allocation50_spill] sm:$0xff] %v13470_v0  ;;  %v764_v23 = vpop.f32.mrb[87].mxu0  ;;  %v1292_v2 = vpop.f32.mrb[87].mxu1 }
 0x1ae   :  { %1746 = vmatmul.mubr.bf16.gmra.mrb[192].mxu0 %v19267_v3  ;;  %2197 = vmatmul.mubr.bf16.gmra.mrb[192].mxu1 %v19267_v3 }
 0x1af   :  { %10233 = vmatprep.mubr.msk.bf16.mxu0 %vm462_vm0, %v19268_v37  ;;  %10274 = vmatprep.mubr.msk.bf16.mxu1 %vm462_vm0, %v19268_v37 }
 0x1b1   :  { %v13478_v19 = vpop.f32.mrb[88].mxu0  ;;  %v13480_v20 = vpop.f32.mrb[88].mxu1 }
 0x1b2   :  { %19269 = vst [vmem:[#allocation7_spill] sm:$0xff] %v13478_v19  ;;  %19270 = vst [vmem:[#allocation8_spill] sm:$0xff] %v13480_v20  ;;  %v769_v35 = vpop.f32.mrb[89].mxu0  ;;  %v1297_v1 = vpop.f32.mrb[89].mxu1  ;;  %v19273_v19 = vld [vmem:[#allocation15_spill] sm:$0xff]  ;;  %v19274_v20 = vld [vmem:[#allocation29_spill] sm:$0xff] }
 0x1b3   :  { %v770_v36 = vpop.f32.mrb[90].mxu0  ;;  %v1298_v2 = vpop.f32.mrb[90].mxu1  ;;  %v19275_v35 = vmax.f32 %v19273_v19, %v19274_v20 }
 0x1b4   :  { %v845_v23 = vmax.f32 %v13336_v7, %v770_v36  ;;  %v772_v0 = vpop.f32.mrb[91].mxu0  ;;  %v1373_v17 = vmax.f32 %v13339_v48, %v1298_v2  ;;  %v1300_v3 = vpop.f32.mrb[91].mxu1  ;;  %v19276_v7 = vld [vmem:[#allocation10_spill] sm:$0xff] }
 0x1b5   :  { %v13498_v36 = vpop.permute.xlu0 %882 }
 0x1b6   :  { %v860_v37 = vmax.f32 %v19271_v47, %v845_v23  ;;  %1754 = vmatmul.mubr.bf16.gmra.mrb[196].mxu0 %v19272_v27  ;;  %v1388_v1 = vmax.f32 %v19275_v35, %v1373_v17  ;;  %2205 = vmatmul.mubr.bf16.gmra.mrb[196].mxu1 %v19272_v27  ;;  %v19277_v17 = vld [vmem:[#allocation30_spill] sm:$0xff] }
 0x1b7   :  { %10234 = vmatprep.mubr.msk.bf16.mxu0 %vm462_vm0, %v19276_v7  ;;  %10275 = vmatprep.mubr.msk.bf16.mxu1 %vm462_vm0, %v19276_v7  ;;  %v19278_v27 = vmax.f32 %v13016_v31, %v19277_v17  ;;  %v19280_v31 = vld [vmem:[#allocation31_spill] sm:$0xff]  ;;  %v19284_v17 = vld [vmem:[#allocation32_spill] sm:$0xff] }
 0x1b8   :  { %v950_v7 = vadd.f32 %v13484_v60, %v860_v37  ;;  %v19283_v37 = vld [vmem:[#allocation16_spill] sm:$0xff] }
 0x1b9   :  { %v775_v48 = vpop.f32.mrb[92].mxu0  ;;  %v1303_v15 = vpop.f32.mrb[92].mxu1 }
 0x1ba   :  { %v846_v25 = vmax.f32 %v13348_v46, %v775_v48  ;;  %v777_v47 = vpop.f32.mrb[93].mxu0  ;;  %v1374_v0 = vmax.f32 %v13350_v55, %v1303_v15  ;;  %v1305_v23 = vpop.f32.mrb[93].mxu1  ;;  %v1403_v15 = vadd.f32 %v1388_v1, %v13484_v60 }
 0x1bb   :  { %v778_v19 = vpop.f32.mrb[94].mxu0  ;;  %v1306_v3 = vpop.f32.mrb[94].mxu1 }
 0x1bc   :  { %v861_v20 = vmax.f32 %v19278_v27, %v846_v25  ;;  %v847_v2 = vmax.f32 %v13366_v43, %v778_v19  ;;  %v780_v35 = vpop.f32.mrb[95].mxu0  ;;  %v1389_v46 = vmax.f32 %v19279_v49, %v1374_v0  ;;  %v1375_v48 = vmax.f32 %v13369_v51, %v1306_v3  ;;  %v1308_v47 = vpop.f32.mrb[95].mxu1  ;;  %v19282_v43 = vld [vmem:[#allocation11_spill] sm:$0xff] }
 0x1bd   :  { %v13511_v55 = vpop.permute.xlu1 %887  ;;  %v19281_v25 = vmax.f32 %v13022_v45, %v19280_v31  ;;  %v19285_v27 = vmax.f32 %v19283_v37, %v19284_v17  ;;  %v965_v45 = vmax.f32 %v950_v7, 0.0  ;;  %v19287_v7 = vmax.f32 %v13032_v61, %v13178_v21 }
 0x1be   :  { %1762 = vmatmul.mubr.bf16.gmra.mrb[200].mxu0 %v19282_v43  ;;  %v951_v19 = vadd.f32 %v13498_v36, %v861_v20  ;;  %2213 = vmatmul.mubr.bf16.gmra.mrb[200].mxu1 %v19282_v43  ;;  %v1404_v51 = vadd.f32 %v1389_v46, %v13498_v36  ;;  %v1418_v20 = vmax.f32 %v1403_v15, 0.0  ;;  %v19289_v21 = vmax.f32 %v13038_v4, %v13186_v24 }
 0x1bf   :  { %v862_v23 = vmax.f32 %v19281_v25, %v847_v2  ;;  %v1390_v34 = vmax.f32 %v19285_v27, %v1375_v48  ;;  %10235 = vmatprep.mubr.msk.bf16.mxu0 %vm462_vm0, %v19286_v39  ;;  %10276 = vmatprep.mubr.msk.bf16.mxu1 %vm462_vm0, %v19286_v39 }
 0x1c0   :  { %v966_v49 = vmax.f32 %v951_v19, 0.0  ;;  %v1419_v2 = vmax.f32 %v1404_v51, 0.0 }
 0x1c1   :  { %v783_v1 = vpop.f32.mrb[96].mxu0  ;;  %v13528_v0 = vpop.permute.xlu1 %892  ;;  %v1405_v15 = vadd.f32 %v1390_v34, %v13511_v55 }
 0x1c2   :  { %v848_v3 = vmax.f32 %v13378_v53, %v783_v1  ;;  %v1311_v35 = vpop.f32.mrb[96].mxu1  ;;  %v785_v48 = vpop.f32.mrb[97].mxu0  ;;  %v980_v47 = vpack.c.bf16 %v966_v49, %v965_v45  ;;  %v1433_v43 = vpack.c.bf16 %v1419_v2, %v1418_v20  ;;  %v952_v53 = vadd.f32 %v13511_v55, %v862_v23  ;;  %v19290_v49 = vld [vmem:[#allocation13_spill] sm:$0xff] }
 0x1c3   :  { %v1376_v31 = vmax.f32 %v13380_v33, %v1311_v35  ;;  %v1313_v25 = vpop.f32.mrb[97].mxu1  ;;  %v786_v46 = vpop.f32.mrb[98].mxu0  ;;  %v19288_v33 = vmax.f32 %v13034_v63, %v13182_v29  ;;  %v19291_v23 = vld [vmem:[#allocation33_spill] sm:$0xff]  ;;  %v19293_v63 = vld [vmem:[#allocation14_spill] sm:$0xff] }
 0x1c4   :  { %v863_v19 = vmax.f32 %v19287_v7, %v848_v3  ;;  %v849_v37 = vmax.f32 %v13396_v44, %v786_v46  ;;  %v1314_v17 = vpop.f32.mrb[98].mxu1  ;;  %v788_v27 = vpop.f32.mrb[99].mxu0  ;;  %989 = vst.msk [vmem:[#allocation2] sm:$0xff] %vm988_vm2, %v980_v47  ;;  %v1450_v61 = vrot.slane %v1433_v43, 4  ;;  %v19292_v20 = vmax.f32 %v13040_v6, %v19291_v23  ;;  %v19300_v23 = vld [vmem:[#allocation35_spill] sm:$0xff] }
 0x1c5   :  { %v1391_v39 = vmax.f32 %v19288_v33, %v1376_v31  ;;  %v1377_v51 = vmax.f32 %v13405_v56, %v1314_v17  ;;  %v1316_v45 = vpop.f32.mrb[99].mxu1  ;;  %v13556_v29 = vpop.permute.xlu0 %897  ;;  %v967_v24 = vmax.f32 %v952_v53, 0.0  ;;  %v1420_v56 = vmax.f32 %v1405_v15, 0.0 }
 0x1c6   :  { %v864_v44 = vmax.f32 %v19289_v21, %v849_v37  ;;  %1770 = vmatmul.mubr.bf16.gmra.mrb[204].mxu0 %v19290_v49  ;;  %v953_v1 = vadd.f32 %v13528_v0, %v863_v19  ;;  %2221 = vmatmul.mubr.bf16.gmra.mrb[204].mxu1 %v19290_v49  ;;  %1474 = vst.msk [vmem:[#allocation2 + $0x38] sm:$0xf0] %vm1473_vm3, %v1450_v61  ;;  %v13560_v35 = vpop.permute.xlu1 %902  ;;  %v11984_v49 = vld [vmem:[%s18891_s1 + $0x160] ss:$8 sps:$4 sm:$0xff]  }
 0x1c7   :  { %v1392_v34 = vmax.f32 %v19292_v20, %v1377_v51  ;;  %v1406_v2 = vadd.f32 %v1391_v39, %v13528_v0  ;;  %10236 = vmatprep.mubr.msk.bf16.mxu0 %vm462_vm0, %v19293_v63  ;;  %10277 = vmatprep.mubr.msk.bf16.mxu1 %vm462_vm0, %v19293_v63  ;;  %19294 = vst [vmem:[#allocation9_spill] sm:$0xff] %v13560_v35 }
 0x1c8   :  { %v968_v4 = vmax.f32 %v953_v1, 0.0  ;;  %v19295_v37 = vmax.f32 %v13045_v11, %v13200_v9  ;;  %v19297_v11 = vld [vmem:[#allocation34_spill] sm:$0xff]  ;;  %v19299_v1 = vld [vmem:[#allocation17_spill] sm:$0xff] }
 0x1c9   :  { %v1421_v3 = vmax.f32 %v1406_v2, 0.0  ;;  %v791_v6 = vpop.f32.mrb[100].mxu0  ;;  %v1319_v47 = vpop.f32.mrb[100].mxu1  ;;  %v1407_v33 = vadd.f32 %v1392_v34, %v13556_v29  ;;  %v19298_v9 = vmax.f32 %v13054_v30, %v19297_v11  ;;  %v19301_v20 = vmax.f32 %v19299_v1, %v19300_v23 }
 0x1ca   :  { %v850_v48 = vmax.f32 %v13408_v57, %v791_v6  ;;  %v793_v31 = vpop.f32.mrb[101].mxu0  ;;  %v981_v25 = vpack.c.bf16 %v968_v4, %v967_v24  ;;  %v1378_v46 = vmax.f32 %v13412_v50, %v1319_v47  ;;  %v1321_v43 = vpop.f32.mrb[101].mxu1  ;;  %v954_v57 = vadd.f32 %v13556_v29, %v864_v44 }
 0x1cb   :  { %v794_v7 = vpop.f32.mrb[102].mxu0  ;;  %v1434_v19 = vpack.c.bf16 %v1421_v3, %v1420_v56  ;;  %v1322_v53 = vpop.f32.mrb[102].mxu1  ;;  %v19296_v50 = vmax.f32 %v13047_v12, %v13204_v42  ;;  %v1422_v24 = vmax.f32 %v1407_v33, 0.0 }
 0x1cc   :  { %v865_v17 = vmax.f32 %v19295_v37, %v850_v48  ;;  %v851_v27 = vmax.f32 %v13422_v62, %v794_v7  ;;  %v796_v15 = vpop.f32.mrb[103].mxu0  ;;  %990 = vst.msk [vmem:[#allocation2 + $0x8] sm:$0xff] %vm988_vm2, %v981_v25  ;;  %v1379_v51 = vmax.f32 %v13424_v32, %v1322_v53  ;;  %v1324_v45 = vpop.f32.mrb[103].mxu1  ;;  %v11985_v32 = vld [vmem:[%s18891_s1 + $0x174] ss:$8 sps:$4 sm:$0xff]   ;;  %v969_v2 = vmax.f32 %v954_v57, 0.0 }
 0x1cd   :  { %v1393_v39 = vmax.f32 %v19296_v50, %v1378_v46  ;;  %v1451_v21 = vrot.slane %v1434_v19, 4  ;;  %v13591_v34 = vpop.permute.xlu0 %907  ;;  %v13595_v3 = vpop.permute.xlu1 %912  ;;  %v19304_v7 = vmax.f32 %v13058_v54, %v13229_v26  ;;  %v19306_v54 = vmax.f32 %v13073_v10, %v13238_v16  ;;  %v19308_v45 = vld [vmem:[#allocation36_spill] sm:$0xff] }
 0x1ce   :  { %v866_v62 = vmax.f32 %v19298_v9, %v851_v27  ;;  %1778 = vmatmul.mubr.bf16.gmra.mrb[208].mxu0 %v11984_v49  ;;  %v955_v44 = vadd.f32 %v13560_v35, %v865_v17  ;;  %v1394_v12 = vmax.f32 %v19301_v20, %v1379_v51  ;;  %2229 = vmatmul.mubr.bf16.gmra.mrb[208].mxu1 %v11984_v49  ;;  %v19307_v51 = vld [vmem:[#allocation18_spill] sm:$0xff] }
 0x1cf   :  { %v1408_v42 = vadd.f32 %v1393_v39, %v13560_v35  ;;  %10237 = vmatprep.mubr.msk.bf16.mxu0 %vm462_vm0, %v11985_v32  ;;  %v1452_v30 = vsel %vm553_vm1, %v1450_v61, %v1451_v21  ;;  %19302 = vst [vmem:[#allocation15_spill] sm:$0xff] %v13591_v34  ;;  %10278 = vmatprep.mubr.msk.bf16.mxu1 %vm462_vm0, %v11985_v32  ;;  %19303 = vst [vmem:[#allocation29_spill] sm:$0xff] %v13595_v3 }
 0x1d0   :  { %v970_v63 = vmax.f32 %v955_v44, 0.0  ;;  %1475 = vst.msk [vmem:[#allocation2 + $0x40] sm:$0xff] %vm988_vm2, %v1452_v30  ;;  %v1409_v53 = vadd.f32 %v1394_v12, %v13591_v34  ;;  %v19309_v11 = vmax.f32 %v19307_v51, %v19308_v45  ;;  %v19323_v51 = vld [vmem:[#allocation47_spill] sm:$0xff] }
 0x1d1   :  { %v1423_v4 = vmax.f32 %v1408_v42, 0.0  ;;  %v799_v56 = vpop.f32.mrb[104].mxu0  ;;  %v1327_v48 = vpop.f32.mrb[104].mxu1 }
 0x1d2   :  { %v852_v6 = vmax.f32 %v13426_v5, %v799_v56  ;;  %v801_v47 = vpop.f32.mrb[105].mxu0  ;;  %v982_v31 = vpack.c.bf16 %v970_v63, %v969_v2  ;;  %v1380_v61 = vmax.f32 %v13428_v58, %v1327_v48  ;;  %v1329_v25 = vpop.f32.mrb[105].mxu1  ;;  %v956_v5 = vadd.f32 %v13591_v34, %v866_v62 }
 0x1d3   :  { %v802_v46 = vpop.f32.mrb[106].mxu0  ;;  %v1435_v43 = vpack.c.bf16 %v1423_v4, %v1422_v24  ;;  %v1330_v17 = vpop.f32.mrb[106].mxu1  ;;  %v19305_v58 = vmax.f32 %v13060_v59, %v13234_v41  ;;  %v1424_v49 = vmax.f32 %v1409_v53, 0.0  ;;  %v19312_v24 = vmax.f32 %v13078_v38, %v13252_v40  ;;  %v19315_v38 = vld [vmem:[#allocation19_spill] sm:$0xff]  ;;  %v19316_v40 = vld [vmem:[#allocation37_spill] sm:$0xff] }
 0x1d4   :  { %v867_v19 = vmax.f32 %v19304_v7, %v852_v6  ;;  %v853_v37 = vmax.f32 %v13436_v13, %v802_v46  ;;  %v804_v27 = vpop.f32.mrb[107].mxu0  ;;  %991 = vst.msk [vmem:[#allocation2 + $0x10] sm:$0xff] %vm988_vm2, %v982_v31  ;;  %v1381_v57 = vmax.f32 %v13438_v14, %v1330_v17  ;;  %v1332_v33 = vpop.f32.mrb[107].mxu1  ;;  %v11986_v13 = vld [vmem:[%s18891_s1 + $0x170] ss:$8 sps:$4 sm:$0xff]   ;;  %v971_v9 = vmax.f32 %v956_v5, 0.0 }
 0x1d5   :  { %v1395_v15 = vmax.f32 %v19305_v58, %v1380_v61  ;;  %v1453_v50 = vrot.slane %v1435_v43, 4  ;;  %v11987_v14 = vld [vmem:[%s18891_s1 + $0x184] ss:$8 sps:$4 sm:$0xff]   ;;  %v13626_v16 = vpop.permute.xlu0 %917  ;;  %v13630_v23 = vpop.permute.xlu1 %922  ;;  %v19314_v61 = vld [vmem:[#allocation4_spill] sm:$0xff]  ;;  %v19317_v7 = vmax.f32 %v19315_v38, %v19316_v40 }
 0x1d6   :  { %v868_v26 = vmax.f32 %v19306_v54, %v853_v37  ;;  %1786 = vmatmul.mubr.bf16.gmra.mrb[212].mxu0 %v11986_v13  ;;  %v957_v39 = vadd.f32 %v13595_v3, %v867_v19  ;;  %v1396_v59 = vmax.f32 %v19309_v11, %v1381_v57  ;;  %2237 = vmatmul.mubr.bf16.gmra.mrb[212].mxu1 %v11986_v13  ;;  %v11988_v19 = vld [vmem:[%s18891_s1 + $0x180] ss:$8 sps:$4 sm:$0xff]   ;;  %v19318_v17 = vld [vmem:[#allocation20_spill] sm:$0xff] }
 0x1d7   :  { %v1410_v41 = vadd.f32 %v1395_v15, %v13595_v3  ;;  %10238 = vmatprep.mubr.msk.bf16.mxu0 %vm462_vm0, %v11987_v14  ;;  %v1454_v10 = vsel %vm553_vm1, %v1451_v21, %v1453_v50  ;;  %19310 = vst [vmem:[#allocation10_spill] sm:$0xff] %v13626_v16  ;;  %10279 = vmatprep.mubr.msk.bf16.mxu1 %vm462_vm0, %v11987_v14  ;;  %19311 = vst [vmem:[#allocation30_spill] sm:$0xff] %v13630_v23  ;;  %v19319_v27 = vld [vmem:[#allocation38_spill] sm:$0xff]  ;;  %v11989_v53 = vld [vmem:[%s18891_s1 + $0x194] ss:$8 sps:$4 sm:$0xff]  }
 0x1d8   :  { %v972_v62 = vmax.f32 %v957_v39, 0.0  ;;  %1476 = vst.msk [vmem:[#allocation2 + $0x48] sm:$0xff] %vm988_vm2, %v1454_v10  ;;  %v1411_v47 = vadd.f32 %v1396_v59, %v13626_v16  ;;  %v19320_v5 = vmax.f32 %v19318_v17, %v19319_v27  ;;  %v19324_v14 = vld [vmem:[#allocation48_spill] sm:$0xff]  ;;  %v11991_v17 = vld [vmem:[%s18891_s1 + $0x1a4] ss:$8 sps:$4 sm:$0xff]  }
 0x1d9   :  { %v1425_v44 = vmax.f32 %v1410_v41, 0.0  ;;  %v807_v1 = vpop.f32.mrb[108].mxu0  ;;  %v1335_v12 = vpop.f32.mrb[108].mxu1  ;;  %v19336_v40 = vld [vmem:[#allocation24_spill] sm:$0xff] }
 0x1da   :  { %v854_v20 = vmax.f32 %v13440_v22, %v807_v1  ;;  %v809_v42 = vpop.f32.mrb[109].mxu0  ;;  %v983_v32 = vpack.c.bf16 %v972_v62, %v971_v9  ;;  %v1382_v21 = vmax.f32 %v13442_v8, %v1335_v12  ;;  %v1337_v30 = vpop.f32.mrb[109].mxu1  ;;  %v958_v22 = vadd.f32 %v13626_v16, %v868_v26  ;;  %v19328_v12 = vld [vmem:[#allocation5_spill] sm:$0xff] }
 0x1db   :  { %v810_v2 = vpop.f32.mrb[110].mxu0  ;;  %v1436_v63 = vpack.c.bf16 %v1425_v44, %v1424_v49  ;;  %v1338_v6 = vpop.f32.mrb[110].mxu1  ;;  %v19313_v8 = vmax.f32 %v13080_v52, %v13256_v28  ;;  %v1426_v54 = vmax.f32 %v1411_v47, 0.0  ;;  %v19325_v49 = vld [vmem:[#allocation21_spill] sm:$0xff]  ;;  %v19326_v44 = vld [vmem:[#allocation39_spill] sm:$0xff] }
 0x1dc   :  { %v869_v4 = vmax.f32 %v19312_v24, %v854_v20  ;;  %v855_v56 = vmax.f32 %v13450_v18, %v810_v2  ;;  %v812_v48 = vpop.f32.mrb[111].mxu0  ;;  %992 = vst.msk [vmem:[#allocation2 + $0x18] sm:$0xff] %vm988_vm2, %v983_v32  ;;  %v1383_v25 = vmax.f32 %v19314_v61, %v1338_v6  ;;  %v1340_v46 = vpop.f32.mrb[111].mxu1  ;;  %v973_v57 = vmax.f32 %v958_v22, 0.0  ;;  %v19330_v24 = vld [vmem:[#allocation40_spill] sm:$0xff]  ;;  %v19332_v6 = vld [vmem:[#allocation6_spill] sm:$0xff] }
 0x1dd   :  { %v1397_v31 = vmax.f32 %v19313_v8, %v1382_v21  ;;  %v1455_v43 = vrot.slane %v1436_v63, 4  ;;  %v13661_v15 = vpop.permute.xlu0 %927  ;;  %v13665_v39 = vpop.permute.xlu1 %932  ;;  %v19327_v1 = vmax.f32 %v19325_v49, %v19326_v44  ;;  %v19329_v63 = vld [vmem:[#allocation22_spill] sm:$0xff]  ;;  %v19333_v8 = vld [vmem:[#allocation23_spill] sm:$0xff]  ;;  %v11990_v46 = vld [vmem:[%s18891_s1 + $0x190] ss:$8 sps:$4 sm:$0xff]  }
 0x1de   :  { %v870_v18 = vmax.f32 %v19317_v7, %v855_v56  ;;  %1794 = vmatmul.mubr.bf16.gmra.mrb[216].mxu0 %v11988_v19  ;;  %v959_v37 = vadd.f32 %v13630_v23, %v869_v4  ;;  %v1398_v52 = vmax.f32 %v19320_v5, %v1383_v25  ;;  %2245 = vmatmul.mubr.bf16.gmra.mrb[216].mxu1 %v11988_v19  ;;  %v19337_v7 = vld [vmem:[#allocation42_spill] sm:$0xff]  ;;  %v19346_v49 = vld [vmem:[#allocation7_spill] sm:$0xff] }
 0x1df   :  { %v1412_v28 = vadd.f32 %v1397_v31, %v13630_v23  ;;  %10239 = vmatprep.mubr.msk.bf16.mxu0 %vm462_vm0, %v11989_v53  ;;  %v1456_v58 = vsel %vm553_vm1, %v1453_v50, %v1455_v43  ;;  %19321 = vst [vmem:[#allocation31_spill] sm:$0xff] %v13661_v15  ;;  %10280 = vmatprep.mubr.msk.bf16.mxu1 %vm462_vm0, %v11989_v53  ;;  %19322 = vst [vmem:[#allocation11_spill] sm:$0xff] %v13665_v39  ;;  %v19334_v31 = vld [vmem:[#allocation41_spill] sm:$0xff] }
 0x1e0   :  { %v974_v33 = vmax.f32 %v959_v37, 0.0  ;;  %1477 = vst.msk [vmem:[#allocation2 + $0x50] sm:$0xff] %vm988_vm2, %v1456_v58  ;;  %v960_v30 = vadd.f32 %v13661_v15, %v870_v18  ;;  %v1413_v2 = vadd.f32 %v1398_v52, %v13661_v15  ;;  %v19331_v4 = vmax.f32 %v19329_v63, %v19330_v24  ;;  %v19350_v63 = vld [vmem:[#allocation8_spill] sm:$0xff] }
 0x1e1   :  { %v1427_v26 = vmax.f32 %v1412_v28, 0.0  ;;  %v815_v13 = vpop.f32.mrb[112].mxu0  ;;  %v1343_v11 = vpop.f32.mrb[112].mxu1  ;;  %v19335_v61 = vmax.f32 %v19333_v8, %v19334_v31  ;;  %v19338_v18 = vmax.f32 %v19336_v40, %v19337_v7 }
 0x1e2   :  { %v856_v45 = vmax.f32 %v19323_v51, %v815_v13  ;;  %v817_v59 = vpop.f32.mrb[113].mxu0  ;;  %v984_v41 = vpack.c.bf16 %v974_v33, %v973_v57  ;;  %v1384_v50 = vmax.f32 %v19324_v14, %v1343_v11  ;;  %v1345_v10 = vpop.f32.mrb[113].mxu1  ;;  %v975_v52 = vmax.f32 %v960_v30, 0.0  ;;  %v19342_v11 = vld [vmem:[#allocation50_spill] sm:$0xff] }
 0x1e3   :  { %v818_v9 = vpop.f32.mrb[114].mxu0  ;;  %v1437_v62 = vpack.c.bf16 %v1427_v26, %v1426_v54  ;;  %v1346_v32 = vpop.f32.mrb[114].mxu1  ;;  %v1428_v53 = vmax.f32 %v1413_v2, 0.0  ;;  %v19341_v54 = vld [vmem:[#allocation49_spill] sm:$0xff]  ;;  %v19344_v10 = vld [vmem:[#allocation43_spill] sm:$0xff] }
 0x1e4   :  { %v871_v20 = vmax.f32 %v19327_v1, %v856_v45  ;;  %v857_v42 = vmax.f32 %v19328_v12, %v818_v9  ;;  %v820_v21 = vpop.f32.mrb[115].mxu0  ;;  %993 = vst.msk [vmem:[#allocation2 + $0x20] sm:$0xff] %vm988_vm2, %v984_v41  ;;  %v1399_v56 = vmax.f32 %v19331_v4, %v1384_v50  ;;  %v1385_v48 = vmax.f32 %v19332_v6, %v1346_v32  ;;  %v1348_v22 = vpop.f32.mrb[115].mxu1  ;;  %v19343_v50 = vld [vmem:[#allocation25_spill] sm:$0xff]  ;;  %v19347_v32 = vld [vmem:[#allocation26_spill] sm:$0xff] }
 0x1e5   :  { %v1457_v47 = vrot.slane %v1437_v62, 4  ;;  %v13696_v5 = vpop.permute.xlu0 %937  ;;  %v13700_v33 = vpop.permute.xlu1 %942  ;;  %v19345_v9 = vmax.f32 %v19343_v50, %v19344_v10  ;;  %v19348_v21 = vld [vmem:[#allocation44_spill] sm:$0xff]  ;;  %v19353_v22 = vld [vmem:[#allocation45_spill] sm:$0xff] }
 0x1e6   :  { %v872_v25 = vmax.f32 %v19335_v61, %v857_v42  ;;  %1802 = vmatmul.mubr.bf16.gmra.mrb[220].mxu0 %v11990_v46  ;;  %v961_v38 = vadd.f32 %v13665_v39, %v871_v20  ;;  %v1400_v19 = vmax.f32 %v19338_v18, %v1385_v48  ;;  %v1414_v37 = vadd.f32 %v1399_v56, %v13665_v39  ;;  %v19352_v48 = vld [vmem:[#allocation27_spill] sm:$0xff] }
 0x1e7   :  { %2253 = vmatmul.mubr.bf16.gmra.mrb[220].mxu1 %v11990_v46  ;;  %10240 = vmatprep.mubr.msk.bf16.mxu0 %vm462_vm0, %v11991_v17  ;;  %v1458_v27 = vsel %vm553_vm1, %v1455_v43, %v1457_v47  ;;  %19339 = vst [vmem:[#allocation16_spill] sm:$0xff] %v13696_v5  ;;  %19340 = vst [vmem:[#allocation32_spill] sm:$0xff] %v13700_v33  ;;  %v19349_v30 = vmax.f32 %v19347_v32, %v19348_v21  ;;  %v11992_v61 = vld [vmem:[%s18891_s1 + $0x1a0] ss:$8 sps:$4 sm:$0xff]   ;;  %v19355_v46 = vld [vmem:[#allocation28_spill] sm:$0xff] }
 0x1e8   :  { %10281 = vmatprep.mubr.msk.bf16.mxu1 %vm462_vm0, %v11991_v17  ;;  %v976_v28 = vmax.f32 %v961_v38, 0.0  ;;  %1478 = vst.msk [vmem:[#allocation2 + $0x58] sm:$0xff] %vm988_vm2, %v1458_v27  ;;  %v1429_v58 = vmax.f32 %v1414_v37, 0.0  ;;  %v962_v12 = vadd.f32 %v13696_v5, %v872_v25  ;;  %v1415_v42 = vadd.f32 %v1400_v19, %v13696_v5  ;;  %v19356_v38 = vld [vmem:[#allocation46_spill] sm:$0xff]  ;;  %v11993_v19 = vld [vmem:[%s18891_s1 + $0x1b4] ss:$8 sps:$4 sm:$0xff]  }
 0x1e9   :  { %v823_v57 = vpop.f32.mrb[116].mxu0  ;;  %v1351_v13 = vpop.f32.mrb[116].mxu1  ;;  %v19354_v8 = vmax.f32 %v19352_v48, %v19353_v22  ;;  %v19357_v40 = vmax.f32 %v19355_v46, %v19356_v38 }
 0x1ea   :  { %v858_v26 = vmax.f32 %v19341_v54, %v823_v57  ;;  %v825_v51 = vpop.f32.mrb[117].mxu0  ;;  %v985_v45 = vpack.c.bf16 %v976_v28, %v975_v52  ;;  %v1386_v43 = vmax.f32 %v19342_v11, %v1351_v13  ;;  %v1353_v59 = vpop.f32.mrb[117].mxu1  ;;  %v1438_v14 = vpack.c.bf16 %v1429_v58, %v1428_v53 }
 0x1eb   :  { %v826_v41 = vpop.f32.mrb[118].mxu0  ;;  %v1354_v1 = vpop.f32.mrb[118].mxu1  ;;  %v977_v27 = vmax.f32 %v962_v12, 0.0  ;;  %v1430_v28 = vmax.f32 %v1415_v42, 0.0 }
 0x1ec   :  { %v873_v62 = vmax.f32 %v19345_v9, %v858_v26  ;;  %v859_v44 = vmax.f32 %v19346_v49, %v826_v41  ;;  %v828_v20 = vpop.f32.mrb[119].mxu0  ;;  %994 = vst.msk [vmem:[#allocation2 + $0x28] sm:$0xff] %vm988_vm2, %v985_v45  ;;  %v1401_v2 = vmax.f32 %v19349_v30, %v1386_v43  ;;  %v1387_v24 = vmax.f32 %v19350_v63, %v1354_v1  ;;  %v1356_v4 = vpop.f32.mrb[119].mxu1  ;;  %v11995_v49 = vld [vmem:[%s18891_s1 + $0x1c4] ss:$8 sps:$4 sm:$0xff]  }
 0x1ed   :  { %v13715_v56 = vpop.permute.xlu0 %947  ;;  %v1459_v6 = vrot.slane %v1438_v14, 4  ;;  %v11996_v4 = vld [vmem:[%s18891_s1 + $0x1c0] ss:$8 sps:$4 sm:$0xff]  }
 0x1ee   :  { %19351 = vst [vmem:[#allocation12_spill] sm:$0xff] %v13715_v56  ;;  %v874_v31 = vmax.f32 %v19354_v8, %v859_v44  ;;  %1810 = vmatmul.mubr.bf16.gmra.mrb[224].mxu0 %v11992_v61  ;;  %v963_v25 = vadd.f32 %v13700_v33, %v873_v62  ;;  %v1402_v7 = vmax.f32 %v19357_v40, %v1387_v24  ;;  %v11994_v62 = vld [vmem:[%s18891_s1 + $0x1b0] ss:$8 sps:$4 sm:$0xff]  }
 0x1ef   :  { %v1416_v18 = vadd.f32 %v1401_v2, %v13700_v33  ;;  %2261 = vmatmul.mubr.bf16.gmra.mrb[224].mxu1 %v11992_v61  ;;  %10241 = vmatprep.mubr.msk.bf16.mxu0 %vm462_vm0, %v11993_v19  ;;  %v1460_v37 = vsel %vm553_vm1, %v1457_v47, %v1459_v6  ;;  %v11998_v40 = vld [vmem:[%s18891_s1 + $0x1d0] ss:$8 sps:$4 sm:$0xff]  }
 0x1f0   :  { %10282 = vmatprep.mubr.msk.bf16.mxu1 %vm462_vm0, %v11993_v19  ;;  %v964_v17 = vadd.f32 %v13715_v56, %v874_v31  ;;  %v978_v52 = vmax.f32 %v963_v25, 0.0  ;;  %1479 = vst.msk [vmem:[#allocation2 + $0x60] sm:$0xff] %vm988_vm2, %v1460_v37  ;;  %v1417_v58 = vadd.f32 %v1402_v7, %v13715_v56  ;;  %v11999_v7 = vld [vmem:[%s18891_s1 + $0x4] ss:$8 sps:$4 sm:$0xff]  }
 0x1f1   :  { %v1431_v53 = vmax.f32 %v1416_v18, 0.0  ;;  %v13737_v57 = vpop.f32.mrb[120].mxu0  ;;  %v13739_v54 = vpop.f32.mrb[120].mxu1 }
 0x1f2   :  { %v1605_v26 = vpop.f32.mrb[121].mxu0  ;;  %v979_v13 = vmax.f32 %v964_v17, 0.0  ;;  %v986_v51 = vpack.c.bf16 %v978_v52, %v977_v27  ;;  %v2056_v47 = vpop.f32.mrb[121].mxu1  ;;  %v1432_v43 = vmax.f32 %v1417_v58, 0.0 }
 0x1f3   :  { %v13741_v45 = vpop.f32.mrb[122].mxu0  ;;  %v1439_v11 = vpack.c.bf16 %v1431_v53, %v1430_v28  ;;  %v13743_v59 = vpop.f32.mrb[122].mxu1  ;;  %v11713_v53 = vld [vmem:[%s18890_s0 + $0xa8] sm:$0xff]   ;;  %v19361_v47 = vmov 0  }
 0x1f4   :  { %v1608_v41 = vpop.f32.mrb[123].mxu0  ;;  %v987_v14 = vpack.c.bf16 %v979_v13, %v979_v13  ;;  %995 = vst.msk [vmem:[#allocation2 + $0x30] sm:$0xff] %vm988_vm2, %v986_v51  ;;  %v2059_v50 = vpop.f32.mrb[123].mxu1  ;;  %v1440_v9 = vpack.c.bf16 %v1432_v43, %v1432_v43  ;;  %v12000_v26 = vld [vmem:[%s18891_s1] ss:$8 sps:$4 sm:$0xff]  }
 0x1f5   :  { %v1461_v10 = vrot.slane %v1439_v11, 4  ;;  %v12001_v13 = vld [vmem:[%s18891_s1 + $0x14] ss:$8 sps:$4 sm:$0xff]  }
 0x1f6   :  { %1818 = vmatmul.mubr.bf16.gmra.mrb[228].mxu0 %v11994_v62  ;;  %997 = vst.msk [vmem:[#allocation2 + $0x38] sm:$0xf] %vm996_vm4, %v987_v14  ;;  %v1463_v1 = vrot.slane %v1440_v9, 4  ;;  %v11714_v9 = vld [vmem:[%s18890_s0 + $0xc4] sm:$0xff]  }
 0x1f7   :  { %2269 = vmatmul.mubr.bf16.gmra.mrb[228].mxu1 %v11994_v62  ;;  %10242 = vmatprep.mubr.msk.bf16.mxu0 %vm462_vm0, %v11995_v49  ;;  %v1462_v44 = vsel %vm553_vm1, %v1459_v6, %v1461_v10  ;;  %v11997_v6 = vld [vmem:[%s18891_s1 + $0x1d4] ss:$8 sps:$4 sm:$0xff]  }
 0x1f8   :  { %10283 = vmatprep.mubr.msk.bf16.mxu1 %vm462_vm0, %v11995_v49  ;;  %1480 = vst.msk [vmem:[#allocation2 + $0x68] sm:$0xff] %vm988_vm2, %v1462_v44  ;;  %v1464_v12 = vsel %vm553_vm1, %v1461_v10, %v1463_v1  ;;  %v12002_v49 = vld [vmem:[%s18891_s1 + $0x10] ss:$8 sps:$4 sm:$0xff]   ;;  %v12003_v44 = vld [vmem:[%s18891_s1 + $0x24] ss:$8 sps:$4 sm:$0xff]  }
 0x1f9   :  { %v13757_v20 = vpop.f32.mrb[124].mxu0  ;;  %v13760_v42 = vpop.f32.mrb[124].mxu1  ;;  %1481 = vst.msk [vmem:[#allocation2 + $0x70] sm:$0xff] %vm988_vm2, %v1464_v12  ;;  %v11715_v1 = vld [vmem:[%s18890_s0 + $0xb0] sm:$0xff]  }
 0x1fa   :  { %v1613_v32 = vpop.f32.mrb[125].mxu0  ;;  %v2064_v21 = vpop.f32.mrb[125].mxu1 }
 0x1fb   :  { %v13763_v30 = vpop.f32.mrb[126].mxu0  ;;  %v13765_v2 = vpop.f32.mrb[126].mxu1 }
 0x1fc   :  { %v1616_v63 = vpop.f32.mrb[127].mxu0  ;;  %v2067_v24 = vpop.f32.mrb[127].mxu1 }
 0x1fe   :  { %1826 = vmatmul.mubr.bf16.gmra.mrb[232].mxu0 %v11996_v4 }
 0x1ff   :  { %2277 = vmatmul.mubr.bf16.gmra.mrb[232].mxu1 %v11996_v4  ;;  %10243 = vmatprep.mubr.msk.bf16.mxu0 %vm462_vm0, %v11997_v6 }
 0x200   :  { %10284 = vmatprep.mubr.msk.bf16.mxu1 %vm462_vm0, %v11997_v6 }
 0x201   :  { %v13775_v48 = vpop.f32.mrb[128].mxu0  ;;  %v13777_v22 = vpop.f32.mrb[128].mxu1 }
 0x202   :  { %v1621_v8 = vpop.f32.mrb[129].mxu0  ;;  %v2072_v31 = vpop.f32.mrb[129].mxu1 }
 0x203   :  { %v13779_v61 = vpop.f32.mrb[130].mxu0  ;;  %v13781_v25 = vpop.f32.mrb[130].mxu1  ;;  %v12004_v31 = vld [vmem:[%s18891_s1 + $0x20] ss:$8 sps:$4 sm:$0xff]  }
 0x204   :  { %v1624_v46 = vpop.f32.mrb[131].mxu0  ;;  %v2075_v38 = vpop.f32.mrb[131].mxu1 }
 0x205   :  { %v12005_v46 = vld [vmem:[%s18891_s1 + $0x34] ss:$8 sps:$4 sm:$0xff]  }
 0x206   :  { %1834 = vmatmul.mubr.bf16.gmra.mrb[236].mxu0 %v11998_v40 }
 0x207   :  { %2285 = vmatmul.mubr.bf16.gmra.mrb[236].mxu1 %v11998_v40  ;;  %10296 = vmatprep.mubr.msk.bf16.mxu0 %vm462_vm0, %v11999_v7 }
 0x208   :  { %10337 = vmatprep.mubr.msk.bf16.mxu1 %vm462_vm0, %v11999_v7 }
 0x209   :  { %v13791_v18 = vpop.f32.mrb[132].mxu0  ;;  %v13793_v19 = vpop.f32.mrb[132].mxu1 }
 0x20a   :  { %v1629_v37 = vpop.f32.mrb[133].mxu0  ;;  %v2080_v17 = vpop.f32.mrb[133].mxu1 }
 0x20b   :  { %v13795_v27 = vpop.f32.mrb[134].mxu0  ;;  %v13797_v52 = vpop.f32.mrb[134].mxu1 }
 0x20c   :  { %19358 = vst [vmem:[#allocation13_spill] sm:$0xff] %v13795_v27  ;;  %19359 = vst [vmem:[#allocation33_spill] sm:$0xff] %v13797_v52  ;;  %v1632_v28 = vpop.f32.mrb[135].mxu0  ;;  %v2083_v58 = vpop.f32.mrb[135].mxu1  ;;  %v12034_v52 = vld [vmem:[%s18891_s1 + $0x110] ss:$8 sps:$4 sm:$0xff]  }
 0x20e   :  { %2535 = vmatmul.mubr.bf16.vlgmr.msra.gmra.mrb[240].mxu0 %v12000_v26 }
 0x20f   :  { %2986 = vmatmul.mubr.bf16.vlgmr.msra.gmra.mrb[240].mxu1 %v12000_v26  ;;  %10297 = vmatprep.mubr.msk.bf16.mxu0 %vm462_vm0, %v12001_v13  ;;  %v12006_v26 = vld [vmem:[%s18891_s1 + $0x30] ss:$8 sps:$4 sm:$0xff]  }
 0x210   :  { %10338 = vmatprep.mubr.msk.bf16.mxu1 %vm462_vm0, %v12001_v13  ;;  %3436 = vmatpush1.bf16.msra.mxu0 %v11713_v53  ;;  %v12007_v13 = vld [vmem:[%s18891_s1 + $0x44] ss:$8 sps:$4 sm:$0xff]  }
 0x211   :  { %v13810_v51 = vpop.f32.mrb[136].mxu0  ;;  %3437 = vmatprep.subr.bf16.mxu0 %v19361_v47  ;;  %v13813_v11 = vpop.f32.mrb[136].mxu1  ;;  %3887 = vmatpush1.bf16.msra.mxu1 %v11714_v9 }
 0x212   :  { %19360 = vst [vmem:[#allocation14_spill] sm:$0xff] %v13810_v51  ;;  %19362 = vst [vmem:[#allocation34_spill] sm:$0xff] %v13813_v11  ;;  %v1637_v43 = vpop.f32.mrb[137].mxu0  ;;  %v2088_v41 = vpop.f32.mrb[137].mxu1  ;;  %3888 = vmatprep.subr.bf16.mxu1 %v19361_v47 }
 0x213   :  { %v13815_v14 = vpop.f32.mrb[138].mxu0  ;;  %v13817_v50 = vpop.f32.mrb[138].mxu1 }
 0x214   :  { %19363 = vst [vmem:[#allocation17_spill] sm:$0xff] %v13815_v14  ;;  %19364 = vst [vmem:[#allocation35_spill] sm:$0xff] %v13817_v50  ;;  %v1640_v10 = vpop.f32.mrb[139].mxu0  ;;  %v2091_v62 = vpop.f32.mrb[139].mxu1  ;;  %3438 = vmatpush1.bf16.msra.mxu0 %v11715_v1 }
 0x215   :  { %3439 = vmatprep.subr.bf16.mxu0 %v19361_v47 }
 0x216   :  { %2543 = vmatmul.mubr.bf16.gmra.mrb[244].mxu0 %v12002_v49 }
 0x217   :  { %2994 = vmatmul.mubr.bf16.gmra.mrb[244].mxu1 %v12002_v49  ;;  %10298 = vmatprep.mubr.msk.bf16.mxu0 %vm462_vm0, %v12003_v44 }
 0x218   :  { %10339 = vmatprep.mubr.msk.bf16.mxu1 %vm462_vm0, %v12003_v44 }
 0x219   :  { %v13834_v12 = vpop.f32.mrb[140].mxu0  ;;  %v13836_v32 = vpop.f32.mrb[140].mxu1 }
 0x21a   :  { %19365 = vst [vmem:[#allocation18_spill] sm:$0xff] %v13834_v12  ;;  %19366 = vst [vmem:[#allocation36_spill] sm:$0xff] %v13836_v32  ;;  %v1645_v21 = vpop.f32.mrb[141].mxu0  ;;  %v2096_v63 = vpop.f32.mrb[141].mxu1 }
 0x21b   :  { %v13839_v24 = vpop.f32.mrb[142].mxu0  ;;  %v13841_v4 = vpop.f32.mrb[142].mxu1  ;;  %v12012_v21 = vld [vmem:[%s18891_s1 + $0x60] ss:$8 sps:$4 sm:$0xff]  }
 0x21c   :  { %19367 = vst [vmem:[#allocation4_spill] sm:$0xff] %v13839_v24  ;;  %19368 = vst [vmem:[#allocation19_spill] sm:$0xff] %v13841_v4  ;;  %v1648_v6 = vpop.f32.mrb[143].mxu0  ;;  %v2099_v8 = vpop.f32.mrb[143].mxu1 }
 0x21d   :  { %v12008_v6 = vld [vmem:[%s18891_s1 + $0x40] ss:$8 sps:$4 sm:$0xff]   ;;  %v12009_v8 = vld [vmem:[%s18891_s1 + $0x54] ss:$8 sps:$4 sm:$0xff]  }
 0x21e   :  { %2551 = vmatmul.mubr.bf16.gmra.mrb[248].mxu0 %v12004_v31 }
 0x21f   :  { %3002 = vmatmul.mubr.bf16.gmra.mrb[248].mxu1 %v12004_v31  ;;  %10299 = vmatprep.mubr.msk.bf16.mxu0 %vm462_vm0, %v12005_v46 }
 0x220   :  { %10340 = vmatprep.mubr.msk.bf16.mxu1 %vm462_vm0, %v12005_v46 }
 0x221   :  { %v13851_v38 = vpop.f32.mrb[144].mxu0  ;;  %v13853_v40 = vpop.f32.mrb[144].mxu1 }
 0x222   :  { %19369 = vst [vmem:[#allocation37_spill] sm:$0xff] %v13851_v38  ;;  %19370 = vst [vmem:[#allocation20_spill] sm:$0xff] %v13853_v40  ;;  %v1653_v7 = vpop.f32.mrb[145].mxu0  ;;  %v2104_v37 = vpop.f32.mrb[145].mxu1 }
 0x223   :  { %v13855_v17 = vpop.f32.mrb[146].mxu0  ;;  %v13857_v28 = vpop.f32.mrb[146].mxu1 }
 0x224   :  { %19371 = vst [vmem:[#allocation38_spill] sm:$0xff] %v13855_v17  ;;  %19372 = vst [vmem:[#allocation47_spill] sm:$0xff] %v13857_v28  ;;  %v1656_v53 = vpop.f32.mrb[147].mxu0  ;;  %v2107_v58 = vpop.f32.mrb[147].mxu1 }
 0x226   :  { %2559 = vmatmul.mubr.bf16.gmra.mrb[252].mxu0 %v12006_v26 }
 0x227   :  { %3010 = vmatmul.mubr.bf16.gmra.mrb[252].mxu1 %v12006_v26  ;;  %10300 = vmatprep.mubr.msk.bf16.mxu0 %vm462_vm0, %v12007_v13 }
 0x228   :  { %10341 = vmatprep.mubr.msk.bf16.mxu1 %vm462_vm0, %v12007_v13 }
 0x229   :  { %v13867_v43 = vpop.f32.mrb[148].mxu0  ;;  %v13869_v41 = vpop.f32.mrb[148].mxu1 }
 0x22a   :  { %19373 = vst [vmem:[#allocation48_spill] sm:$0xff] %v13867_v43  ;;  %19374 = vst [vmem:[#allocation21_spill] sm:$0xff] %v13869_v41  ;;  %v1661_v10 = vpop.f32.mrb[149].mxu0  ;;  %v2112_v9 = vpop.f32.mrb[149].mxu1 }
 0x22b   :  { %v13871_v62 = vpop.f32.mrb[150].mxu0  ;;  %v13875_v44 = vpop.f32.mrb[150].mxu1 }
 0x22c   :  { %v1664_v1 = vpop.f32.mrb[151].mxu0  ;;  %v2115_v63 = vpop.f32.mrb[151].mxu1 }
 0x22e   :  { %2567 = vmatmul.mubr.bf16.gmra.mrb[0].mxu0 %v12008_v6 }
 0x22f   :  { %3018 = vmatmul.mubr.bf16.gmra.mrb[0].mxu1 %v12008_v6  ;;  %10301 = vmatprep.mubr.msk.bf16.mxu0 %vm462_vm0, %v12009_v8  ;;  %v12010_v6 = vld [vmem:[%s18891_s1 + $0x50] ss:$8 sps:$4 sm:$0xff]  }
 0x230   :  { %10342 = vmatprep.mubr.msk.bf16.mxu1 %vm462_vm0, %v12009_v8  ;;  %v12011_v8 = vld [vmem:[%s18891_s1 + $0x64] ss:$8 sps:$4 sm:$0xff]  }
 0x231   :  { %v13887_v31 = vpop.f32.mrb[152].mxu0  ;;  %v13891_v7 = vpop.f32.mrb[152].mxu1 }
 0x232   :  { %v1669_v37 = vpop.f32.mrb[153].mxu0  ;;  %v2120_v58 = vpop.f32.mrb[153].mxu1 }
 0x233   :  { %v13895_v26 = vpop.f32.mrb[154].mxu0  ;;  %v13899_v10 = vpop.f32.mrb[154].mxu1  ;;  %v11716_v37 = vld [vmem:[%s18890_s0 + $0xcc] sm:$0xff]   ;;  %v11717_v58 = vld [vmem:[%s18890_s0 + $0xb8] sm:$0xff]  }
 0x234   :  { %v1672_v9 = vpop.f32.mrb[155].mxu0  ;;  %v2123_v63 = vpop.f32.mrb[155].mxu1  ;;  %3889 = vmatpush1.bf16.msra.mxu1 %v11716_v37  ;;  %3440 = vmatpush1.bf16.msra.mxu0 %v11717_v58 }
 0x235   :  { %3890 = vmatprep.subr.bf16.mxu1 %v19361_v47  ;;  %3441 = vmatprep.subr.bf16.mxu0 %v19361_v47 }
 0x236   :  { %2575 = vmatmul.mubr.bf16.gmra.mrb[4].mxu0 %v12010_v6 }
 0x237   :  { %3026 = vmatmul.mubr.bf16.gmra.mrb[4].mxu1 %v12010_v6  ;;  %10302 = vmatprep.mubr.msk.bf16.mxu0 %vm462_vm0, %v12011_v8 }
 0x238   :  { %10343 = vmatprep.mubr.msk.bf16.mxu1 %vm462_vm0, %v12011_v8 }
 0x239   :  { %v13917_v9 = vpop.f32.mrb[156].mxu0  ;;  %v13921_v6 = vpop.f32.mrb[156].mxu1 }
 0x23a   :  { %v1677_v1 = vpop.f32.mrb[157].mxu0  ;;  %v2128_v53 = vpop.f32.mrb[157].mxu1 }
 0x23b   :  { %v13927_v46 = vpop.f32.mrb[158].mxu0  ;;  %v13931_v37 = vpop.f32.mrb[158].mxu1  ;;  %v12013_v53 = vld [vmem:[%s18891_s1 + $0x74] ss:$8 sps:$4 sm:$0xff]  }
 0x23c   :  { %v1680_v58 = vpop.f32.mrb[159].mxu0  ;;  %v2131_v1 = vpop.f32.mrb[159].mxu1 }
 0x23e   :  { %2583 = vmatmul.mubr.bf16.gmra.mrb[8].mxu0 %v12012_v21 }
 0x23f   :  { %3034 = vmatmul.mubr.bf16.gmra.mrb[8].mxu1 %v12012_v21  ;;  %10303 = vmatprep.mubr.msk.bf16.mxu0 %vm462_vm0, %v12013_v53 }
 0x240   :  { %10344 = vmatprep.mubr.msk.bf16.mxu1 %vm462_vm0, %v12013_v53 }
 0x241   :  { %v13943_v8 = vpop.f32.mrb[160].mxu0  ;;  %v13947_v1 = vpop.f32.mrb[160].mxu1 }
 0x242   :  { %v1685_v63 = vpop.f32.mrb[161].mxu0  ;;  %v2136_v21 = vpop.f32.mrb[161].mxu1 }
 0x243   :  { %v13951_v49 = vpop.f32.mrb[162].mxu0  ;;  %v13955_v33 = vpop.f32.mrb[162].mxu1  ;;  %v12014_v63 = vld [vmem:[%s18891_s1 + $0x70] ss:$8 sps:$4 sm:$0xff]   ;;  %v12015_v21 = vld [vmem:[%s18891_s1 + $0x84] ss:$8 sps:$4 sm:$0xff]  }
 0x244   :  { %v1688_v53 = vpop.f32.mrb[163].mxu0  ;;  %v2139_v39 = vpop.f32.mrb[163].mxu1 }
 0x245   :  { %v11718_v53 = vld [vmem:[%s18890_s0 + $0xd4] sm:$0xff]  }
 0x246   :  { %2591 = vmatmul.mubr.bf16.gmra.mrb[12].mxu0 %v12014_v63  ;;  %3891 = vmatpush1.bf16.msra.mxu1 %v11718_v53  ;;  %v12016_v53 = vld [vmem:[%s18891_s1 + $0x80] ss:$8 sps:$4 sm:$0xff]  }
 0x247   :  { %3042 = vmatmul.mubr.bf16.gmra.mrb[12].mxu1 %v12014_v63  ;;  %10304 = vmatprep.mubr.msk.bf16.mxu0 %vm462_vm0, %v12015_v21 }
 0x248   :  { %10345 = vmatprep.mubr.msk.bf16.mxu1 %vm462_vm0, %v12015_v21  ;;  %3892 = vmatprep.subr.bf16.mxu1 %v19361_v47 }
 0x249   :  { %v13970_v5 = vpop.f32.mrb[164].mxu0  ;;  %v13974_v56 = vpop.f32.mrb[164].mxu1 }
 0x24a   :  { %19375 = vst [vmem:[#allocation39_spill] sm:$0xff] %v13970_v5  ;;  %19376 = vst [vmem:[#allocation5_spill] sm:$0xff] %v13974_v56  ;;  %v1693_v63 = vpop.f32.mrb[165].mxu0  ;;  %v2144_v58 = vpop.f32.mrb[165].mxu1  ;;  %v12032_v56 = vld [vmem:[%s18891_s1 + $0x100] ss:$8 sps:$4 sm:$0xff]   ;;  %v19403_v5 = vmax.f32 %v13737_v57, %v13871_v62 }
 0x24b   :  { %v13978_v15 = vpop.f32.mrb[166].mxu0  ;;  %v13983_v23 = vpop.f32.mrb[166].mxu1  ;;  %v12017_v58 = vld [vmem:[%s18891_s1 + $0x94] ss:$8 sps:$4 sm:$0xff]  }
 0x24c   :  { %19377 = vst [vmem:[#allocation22_spill] sm:$0xff] %v13978_v15  ;;  %19378 = vst [vmem:[#allocation40_spill] sm:$0xff] %v13983_v23  ;;  %v1696_v16 = vpop.f32.mrb[167].mxu0  ;;  %v2147_v3 = vpop.f32.mrb[167].mxu1 }
 0x24d   :  { %v11719_v16 = vld [vmem:[%s18890_s0 + $0xc0] sm:$0xff]  }
 0x24e   :  { %2599 = vmatmul.mubr.bf16.gmra.mrb[16].mxu0 %v12016_v53 }
 0x24f   :  { %3050 = vmatmul.mubr.bf16.gmra.mrb[16].mxu1 %v12016_v53  ;;  %10305 = vmatprep.mubr.msk.bf16.mxu0 %vm462_vm0, %v12017_v58 }
 0x250   :  { %10346 = vmatprep.mubr.msk.bf16.mxu1 %vm462_vm0, %v12017_v58  ;;  %3442 = vmatpush1.bf16.msra.mxu0 %v11719_v16  ;;  %v12018_v16 = vld [vmem:[%s18891_s1 + $0x90] ss:$8 sps:$4 sm:$0xff]  }
 0x251   :  { %v13998_v63 = vpop.f32.mrb[168].mxu0  ;;  %v14002_v39 = vpop.f32.mrb[168].mxu1  ;;  %3443 = vmatprep.subr.bf16.mxu0 %v19361_v47 }
 0x252   :  { %19379 = vst [vmem:[#allocation6_spill] sm:$0xff] %v13998_v63  ;;  %19380 = vst [vmem:[#allocation23_spill] sm:$0xff] %v14002_v39  ;;  %v1701_v53 = vpop.f32.mrb[169].mxu0  ;;  %v2152_v13 = vpop.f32.mrb[169].mxu1  ;;  %v12030_v39 = vld [vmem:[%s18891_s1 + $0xf0] ss:$8 sps:$4 sm:$0xff]  }
 0x253   :  { %v14006_v23 = vpop.f32.mrb[170].mxu0  ;;  %v14011_v11 = vpop.f32.mrb[170].mxu1  ;;  %v12019_v13 = vld [vmem:[%s18891_s1 + $0xa4] ss:$8 sps:$4 sm:$0xff]  }
 0x254   :  { %19381 = vst [vmem:[#allocation41_spill] sm:$0xff] %v14006_v23  ;;  %19382 = vst [vmem:[#allocation24_spill] sm:$0xff] %v14011_v11  ;;  %v1704_v15 = vpop.f32.mrb[171].mxu0  ;;  %v2155_v63 = vpop.f32.mrb[171].mxu1  ;;  %v12021_v11 = vld [vmem:[%s18891_s1 + $0xb4] ss:$8 sps:$4 sm:$0xff]  }
 0x256   :  { %2607 = vmatmul.mubr.bf16.gmra.mrb[20].mxu0 %v12018_v16 }
 0x257   :  { %3058 = vmatmul.mubr.bf16.gmra.mrb[20].mxu1 %v12018_v16  ;;  %10306 = vmatprep.mubr.msk.bf16.mxu0 %vm462_vm0, %v12019_v13 }
 0x258   :  { %10347 = vmatprep.mubr.msk.bf16.mxu1 %vm462_vm0, %v12019_v13 }
 0x259   :  { %v14023_v53 = vpop.f32.mrb[172].mxu0  ;;  %v14027_v63 = vpop.f32.mrb[172].mxu1 }
 0x25a   :  { %19383 = vst [vmem:[#allocation42_spill] sm:$0xff] %v14023_v53  ;;  %19384 = vst [vmem:[#allocation49_spill] sm:$0xff] %v14027_v63  ;;  %v1709_v3 = vpop.f32.mrb[173].mxu0  ;;  %v2160_v16 = vpop.f32.mrb[173].mxu1 }
 0x25b   :  { %v14031_v21 = vpop.f32.mrb[174].mxu0  ;;  %v14035_v32 = vpop.f32.mrb[174].mxu1  ;;  %v12020_v3 = vld [vmem:[%s18891_s1 + $0xa0] ss:$8 sps:$4 sm:$0xff]  }
 0x25c   :  { %19385 = vst [vmem:[#allocation50_spill] sm:$0xff] %v14031_v21  ;;  %19386 = vst [vmem:[#allocation25_spill] sm:$0xff] %v14035_v32  ;;  %v1712_v13 = vpop.f32.mrb[175].mxu0  ;;  %v2163_v12 = vpop.f32.mrb[175].mxu1  ;;  %v11720_v16 = vld [vmem:[%s18890_s0 + $0xdc] sm:$0xff]  }
 0x25d   :  { %3893 = vmatpush1.bf16.msra.mxu1 %v11720_v16  ;;  %v11721_v12 = vld [vmem:[%s18890_s0 + $0xc8] sm:$0xff]   ;;  %v11723_v16 = vld [vmem:[%s18890_s0 + $0xd0] sm:$0xff]  }
 0x25e   :  { %2615 = vmatmul.mubr.bf16.gmra.mrb[24].mxu0 %v12020_v3  ;;  %3894 = vmatprep.subr.bf16.mxu1 %v19361_v47 }
 0x25f   :  { %3066 = vmatmul.mubr.bf16.gmra.mrb[24].mxu1 %v12020_v3  ;;  %10307 = vmatprep.mubr.msk.bf16.mxu0 %vm462_vm0, %v12021_v11 }
 0x260   :  { %10348 = vmatprep.mubr.msk.bf16.mxu1 %vm462_vm0, %v12021_v11  ;;  %3444 = vmatpush1.bf16.msra.mxu0 %v11721_v12  ;;  %v11722_v11 = vld [vmem:[%s18890_s0 + $0xe4] sm:$0xff]  }
 0x261   :  { %v14053_v13 = vpop.f32.mrb[176].mxu0  ;;  %v14058_v23 = vpop.f32.mrb[176].mxu1  ;;  %3445 = vmatprep.subr.bf16.mxu0 %v19361_v47  ;;  %3895 = vmatpush1.bf16.msra.mxu1 %v11722_v11  ;;  %v12023_v11 = vld [vmem:[%s18891_s1 + $0xc4] ss:$8 sps:$4 sm:$0xff]  }
 0x262   :  { %19387 = vst [vmem:[#allocation43_spill] sm:$0xff] %v14053_v13  ;;  %19388 = vst [vmem:[#allocation7_spill] sm:$0xff] %v14058_v23  ;;  %v1717_v58 = vpop.f32.mrb[177].mxu0  ;;  %v2168_v15 = vpop.f32.mrb[177].mxu1  ;;  %3896 = vmatprep.subr.bf16.mxu1 %v19361_v47  ;;  %v11730_v23 = vld [vmem:[%s18890_s0 + $0x104] sm:$0xff]  }
 0x263   :  { %v14065_v32 = vpop.f32.mrb[178].mxu0  ;;  %v14070_v3 = vpop.f32.mrb[178].mxu1  ;;  %v12022_v15 = vld [vmem:[%s18891_s1 + $0xb0] ss:$8 sps:$4 sm:$0xff]  }
 0x264   :  { %19389 = vst [vmem:[#allocation26_spill] sm:$0xff] %v14065_v32  ;;  %19390 = vst [vmem:[#allocation44_spill] sm:$0xff] %v14070_v3  ;;  %v1720_v13 = vpop.f32.mrb[179].mxu0  ;;  %v2171_v12 = vpop.f32.mrb[179].mxu1  ;;  %3446 = vmatpush1.bf16.msra.mxu0 %v11723_v16  ;;  %v11726_v3 = vld [vmem:[%s18890_s0 + $0xf4] sm:$0xff]  }
 0x265   :  { %v11724_v13 = vld [vmem:[%s18890_s0 + $0xec] sm:$0xff]   ;;  %3447 = vmatprep.subr.bf16.mxu0 %v19361_v47 }
 0x266   :  { %2623 = vmatmul.mubr.bf16.gmra.mrb[28].mxu0 %v12022_v15  ;;  %3897 = vmatpush1.bf16.msra.mxu1 %v11724_v13 }
 0x267   :  { %3074 = vmatmul.mubr.bf16.gmra.mrb[28].mxu1 %v12022_v15  ;;  %10308 = vmatprep.mubr.msk.bf16.mxu0 %vm462_vm0, %v12023_v11  ;;  %v11725_v15 = vld [vmem:[%s18890_s0 + $0xd8] sm:$0xff]  }
 0x268   :  { %10349 = vmatprep.mubr.msk.bf16.mxu1 %vm462_vm0, %v12023_v11  ;;  %3898 = vmatprep.subr.bf16.mxu1 %v19361_v47 }
 0x269   :  { %v14089_v12 = vpop.f32.mrb[180].mxu0  ;;  %v14092_v58 = vpop.f32.mrb[180].mxu1  ;;  %3448 = vmatpush1.bf16.msra.mxu0 %v11725_v15 }
 0x26a   :  { %v1725_v40 = vpop.f32.mrb[181].mxu0  ;;  %v2176_v11 = vpop.f32.mrb[181].mxu1  ;;  %3899 = vmatpush1.bf16.msra.mxu1 %v11726_v3  ;;  %3449 = vmatprep.subr.bf16.mxu0 %v19361_v47 }
 0x26b   :  { %v14101_v16 = vpop.f32.mrb[182].mxu0  ;;  %v14103_v41 = vpop.f32.mrb[182].mxu1  ;;  %v12024_v40 = vld [vmem:[%s18891_s1 + $0xc0] ss:$8 sps:$4 sm:$0xff]   ;;  %3900 = vmatprep.subr.bf16.mxu1 %v19361_v47 }
 0x26c   :  { %v1728_v13 = vpop.f32.mrb[183].mxu0  ;;  %v2179_v32 = vpop.f32.mrb[183].mxu1  ;;  %v11727_v11 = vld [vmem:[%s18890_s0 + $0xe0] sm:$0xff]  }
 0x26d   :  { %v11728_v13 = vld [vmem:[%s18890_s0 + $0xfc] sm:$0xff]   ;;  %3450 = vmatpush1.bf16.msra.mxu0 %v11727_v11 }
 0x26e   :  { %2631 = vmatmul.mubr.bf16.gmra.mrb[32].mxu0 %v12024_v40  ;;  %v12025_v32 = vld [vmem:[%s18891_s1 + $0xd4] ss:$8 sps:$4 sm:$0xff]   ;;  %3901 = vmatpush1.bf16.msra.mxu1 %v11728_v13 }
 0x26f   :  { %3082 = vmatmul.mubr.bf16.gmra.mrb[32].mxu1 %v12024_v40  ;;  %10309 = vmatprep.mubr.msk.bf16.mxu0 %vm462_vm0, %v12025_v32  ;;  %v11729_v40 = vld [vmem:[%s18890_s0 + $0xe8] sm:$0xff]  }
 0x270   :  { %10350 = vmatprep.mubr.msk.bf16.mxu1 %vm462_vm0, %v12025_v32  ;;  %3451 = vmatprep.subr.bf16.mxu0 %v19361_v47 }
 0x271   :  { %v14121_v3 = vpop.f32.mrb[184].mxu0  ;;  %v14124_v15 = vpop.f32.mrb[184].mxu1  ;;  %3902 = vmatprep.subr.bf16.mxu1 %v19361_v47  ;;  %3452 = vmatpush1.bf16.msra.mxu0 %v11729_v40  ;;  %v11733_v40 = vld [vmem:[%s18890_s0 + $0xf8] ss:$0 sps:$4 sm:$0xff]  }
 0x272   :  { %v1733_v43 = vpop.f32.mrb[185].mxu0  ;;  %v2184_v32 = vpop.f32.mrb[185].mxu1  ;;  %3903 = vmatpush1.bf16.msra.mxu1 %v11730_v23  ;;  %3453 = vmatprep.subr.bf16.mxu0 %v19361_v47  ;;  %v12027_v23 = vld [vmem:[%s18891_s1 + $0xe4] ss:$8 sps:$4 sm:$0xff]  }
 0x273   :  { %v14133_v11 = vpop.f32.mrb[186].mxu0  ;;  %v14135_v28 = vpop.f32.mrb[186].mxu1  ;;  %v12026_v43 = vld [vmem:[%s18891_s1 + $0xd0] ss:$8 sps:$4 sm:$0xff]   ;;  %3904 = vmatprep.subr.bf16.mxu1 %v19361_v47 }
 0x274   :  { %v1736_v13 = vpop.f32.mrb[187].mxu0  ;;  %v2187_v17 = vpop.f32.mrb[187].mxu1  ;;  %v11731_v32 = vld [vmem:[%s18890_s0 + $0xf0] sm:$0xff]  }
 0x275   :  { %v11732_v13 = vld [vmem:[%s18890_s0 + $0x10c] sm:$0xff]   ;;  %3454 = vmatpush1.bf16.msra.mxu0 %v11731_v32 }
 0x276   :  { %2639 = vmatmul.mubr.bf16.gmra.mrb[36].mxu0 %v12026_v43  ;;  %3905 = vmatpush1.bf16.msra.mxu1 %v11732_v13  ;;  %v3433_v13 = vsel %vm553_vm1, %v11733_v40, 0  ;;  %v12029_v40 = vld [vmem:[%s18891_s1 + $0xf4] ss:$8 sps:$4 sm:$0xff]  }
 0x277   :  { %3090 = vmatmul.mubr.bf16.gmra.mrb[36].mxu1 %v12026_v43  ;;  %10310 = vmatprep.mubr.msk.bf16.mxu0 %vm462_vm0, %v12027_v23  ;;  %v11734_v43 = vld [vmem:[%s18890_s0 + $0x114] ss:$0 sps:$4 sm:$0xff]  }
 0x278   :  { %10351 = vmatprep.mubr.msk.bf16.mxu1 %vm462_vm0, %v12027_v23  ;;  %3455 = vmatprep.subr.bf16.mxu0 %v19361_v47  ;;  %v3884_v63 = vsel %vm553_vm1, %v11734_v43, 0 }
 0x279   :  { %v14153_v17 = vpop.f32.mrb[188].mxu0  ;;  %v14162_v21 = vpop.f32.mrb[188].mxu1  ;;  %3906 = vmatprep.subr.bf16.mxu1 %v19361_v47  ;;  %3456 = vmatpush1.bf16.msra.mxu0 %v3433_v13 }
 0x27a   :  { %v1741_v38 = vpop.f32.mrb[189].mxu0  ;;  %v2192_v23 = vpop.f32.mrb[189].mxu1  ;;  %3907 = vmatpush1.bf16.msra.mxu1 %v3884_v63  ;;  %4368 = vmatprep.subr.bf16.mxu0 %v19361_v47 }
 0x27b   :  { %v14165_v32 = vpop.f32.mrb[190].mxu0  ;;  %v14169_v4 = vpop.f32.mrb[190].mxu1  ;;  %v12028_v38 = vld [vmem:[%s18891_s1 + $0xe0] ss:$8 sps:$4 sm:$0xff]   ;;  %4819 = vmatprep.subr.bf16.mxu1 %v19361_v47 }
 0x27c   :  { %v1744_v53 = vpop.f32.mrb[191].mxu0  ;;  %v2195_v24 = vpop.f32.mrb[191].mxu1 }
 0x27e   :  { %2647 = vmatmul.mubr.bf16.gmra.mrb[40].mxu0 %v12028_v38 }
 0x27f   :  { %3098 = vmatmul.mubr.bf16.gmra.mrb[40].mxu1 %v12028_v38  ;;  %10311 = vmatprep.mubr.msk.bf16.mxu0 %vm462_vm0, %v12029_v40 }
 0x280   :  { %10352 = vmatprep.mubr.msk.bf16.mxu1 %vm462_vm0, %v12029_v40  ;;  %v12031_v40 = vld [vmem:[%s18891_s1 + $0x104] ss:$8 sps:$4 sm:$0xff]  }
 0x281   :  { %v14181_v24 = vpop.f32.mrb[192].mxu0  ;;  %v14183_v53 = vpop.f32.mrb[192].mxu1 }
 0x282   :  { %v1749_v63 = vpop.f32.mrb[193].mxu0  ;;  %v2200_v43 = vpop.f32.mrb[193].mxu1 }
 0x283   :  { %v14185_v23 = vpop.f32.mrb[194].mxu0  ;;  %v14187_v13 = vpop.f32.mrb[194].mxu1 }
 0x284   :  { %v1752_v47 = vpop.f32.mrb[195].mxu0  ;;  %v2203_v38 = vpop.f32.mrb[195].mxu1 }
 0x286   :  { %2655 = vmatmul.mubr.bf16.gmra.mrb[44].mxu0 %v12030_v39 }
 0x287   :  { %3106 = vmatmul.mubr.bf16.gmra.mrb[44].mxu1 %v12030_v39  ;;  %10312 = vmatprep.mubr.msk.bf16.mxu0 %vm462_vm0, %v12031_v40 }
 0x288   :  { %10353 = vmatprep.mubr.msk.bf16.mxu1 %vm462_vm0, %v12031_v40  ;;  %v12033_v40 = vld [vmem:[%s18891_s1 + $0x114] ss:$8 sps:$4 sm:$0xff]  }
 0x289   :  { %v14197_v63 = vpop.f32.mrb[196].mxu0  ;;  %v14199_v43 = vpop.f32.mrb[196].mxu1 }
 0x28a   :  { %19391 = vst [vmem:[#allocation8_spill] sm:$0xff] %v14197_v63  ;;  %19392 = vst [vmem:[#allocation27_spill] sm:$0xff] %v14199_v43  ;;  %v1757_v47 = vpop.f32.mrb[197].mxu0  ;;  %v2208_v38 = vpop.f32.mrb[197].mxu1 }
 0x28b   :  { %v14201_v50 = vpop.f32.mrb[198].mxu0  ;;  %v14203_v14 = vpop.f32.mrb[198].mxu1 }
 0x28c   :  { %19393 = vst [vmem:[#allocation45_spill] sm:$0xff] %v14201_v50  ;;  %19394 = vst [vmem:[#allocation28_spill] sm:$0xff] %v14203_v14  ;;  %v1760_v51 = vpop.f32.mrb[199].mxu0  ;;  %v2211_v39 = vpop.f32.mrb[199].mxu1 }
 0x28e   :  { %2663 = vmatmul.mubr.bf16.gmra.mrb[48].mxu0 %v12032_v56 }
 0x28f   :  { %3114 = vmatmul.mubr.bf16.gmra.mrb[48].mxu1 %v12032_v56  ;;  %10313 = vmatprep.mubr.msk.bf16.mxu0 %vm462_vm0, %v12033_v40 }
 0x290   :  { %10354 = vmatprep.mubr.msk.bf16.mxu1 %vm462_vm0, %v12033_v40  ;;  %v12035_v40 = vld [vmem:[%s18891_s1 + $0x124] ss:$8 sps:$4 sm:$0xff]  }
 0x291   :  { %v14213_v47 = vpop.f32.mrb[200].mxu0  ;;  %v14215_v38 = vpop.f32.mrb[200].mxu1 }
 0x292   :  { %19395 = vst [vmem:[#allocation46_spill] sm:$0xff] %v14213_v47  ;;  %19396 = vst [vmem:[#allocation51_spill] sm:$0xff] %v14215_v38  ;;  %v1765_v51 = vpop.f32.mrb[201].mxu0  ;;  %v2216_v39 = vpop.f32.mrb[201].mxu1  ;;  %v12036_v47 = vld [vmem:[%s18891_s1 + $0x120] ss:$8 sps:$4 sm:$0xff]  }
 0x293   :  { %v14217_v14 = vpop.f32.mrb[202].mxu0  ;;  %v14219_v50 = vpop.f32.mrb[202].mxu1 }
 0x294   :  { %19397 = vst [vmem:[#allocation52_spill] sm:$0xff] %v14217_v14  ;;  %19398 = vst [vmem:[#allocation53_spill] sm:$0xff] %v14219_v50  ;;  %v1768_v43 = vpop.f32.mrb[203].mxu0  ;;  %v2219_v56 = vpop.f32.mrb[203].mxu1 }
 0x296   :  { %2671 = vmatmul.mubr.bf16.gmra.mrb[52].mxu0 %v12034_v52 }
 0x297   :  { %3122 = vmatmul.mubr.bf16.gmra.mrb[52].mxu1 %v12034_v52  ;;  %10314 = vmatprep.mubr.msk.bf16.mxu0 %vm462_vm0, %v12035_v40 }
 0x298   :  { %10355 = vmatprep.mubr.msk.bf16.mxu1 %vm462_vm0, %v12035_v40  ;;  %v12037_v40 = vld [vmem:[%s18891_s1 + $0x134] ss:$8 sps:$4 sm:$0xff]  }
 0x299   :  { %v14229_v51 = vpop.f32.mrb[204].mxu0  ;;  %v14231_v39 = vpop.f32.mrb[204].mxu1 }
 0x29a   :  { %19399 = vst [vmem:[#allocation54_spill] sm:$0xff] %v14229_v51  ;;  %19400 = vst [vmem:[#allocation55_spill] sm:$0xff] %v14231_v39  ;;  %v1773_v43 = vpop.f32.mrb[205].mxu0  ;;  %v2224_v56 = vpop.f32.mrb[205].mxu1 }
 0x29b   :  { %v14233_v50 = vpop.f32.mrb[206].mxu0  ;;  %v14235_v14 = vpop.f32.mrb[206].mxu1 }
 0x29c   :  { %19401 = vst [vmem:[#allocation56_spill] sm:$0xff] %v14233_v50  ;;  %19402 = vst [vmem:[#allocation57_spill] sm:$0xff] %v14235_v14  ;;  %v1776_v38 = vpop.f32.mrb[207].mxu0  ;;  %v2227_v52 = vpop.f32.mrb[207].mxu1 }
 0x29e   :  { %2679 = vmatmul.mubr.bf16.gmra.mrb[56].mxu0 %v12036_v47 }
 0x29f   :  { %3130 = vmatmul.mubr.bf16.gmra.mrb[56].mxu1 %v12036_v47  ;;  %10315 = vmatprep.mubr.msk.bf16.mxu0 %vm462_vm0, %v12037_v40 }
 0x2a0   :  { %10356 = vmatprep.mubr.msk.bf16.mxu1 %vm462_vm0, %v12037_v40  ;;  %v12038_v40 = vld [vmem:[%s18891_s1 + $0x130] ss:$8 sps:$4 sm:$0xff]  }
 0x2a1   :  { %v14245_v43 = vpop.f32.mrb[208].mxu0  ;;  %v14247_v56 = vpop.f32.mrb[208].mxu1 }
 0x2a2   :  { %v1781_v38 = vpop.f32.mrb[209].mxu0  ;;  %v2232_v52 = vpop.f32.mrb[209].mxu1 }
 0x2a3   :  { %v1782_v14 = vpop.f32.mrb[210].mxu0  ;;  %v2233_v39 = vpop.f32.mrb[210].mxu1  ;;  %v19404_v38 = vmax.f32 %v13739_v54, %v13875_v44  ;;  %v19405_v44 = vmax.f32 %v13741_v45, %v13887_v31  ;;  %v12040_v31 = vld [vmem:[%s18891_s1 + $0x140] ss:$8 sps:$4 sm:$0xff]  }
 0x2a4   :  { %v1857_v50 = vmax.f32 %v14089_v12, %v1782_v14  ;;  %v1784_v51 = vpop.f32.mrb[211].mxu0  ;;  %v2308_v47 = vmax.f32 %v14092_v58, %v2233_v39  ;;  %v2235_v63 = vpop.f32.mrb[211].mxu1  ;;  %v12039_v14 = vld [vmem:[%s18891_s1 + $0x144] ss:$8 sps:$4 sm:$0xff]  }
 0x2a6   :  { %v1872_v27 = vmax.f32 %v19403_v5, %v1857_v50  ;;  %2687 = vmatmul.mubr.bf16.gmra.mrb[60].mxu0 %v12038_v40  ;;  %v2323_v52 = vmax.f32 %v19404_v38, %v2308_v47 }
 0x2a7   :  { %3138 = vmatmul.mubr.bf16.gmra.mrb[60].mxu1 %v12038_v40  ;;  %10316 = vmatprep.mubr.msk.bf16.mxu0 %vm462_vm0, %v12039_v14 }
 0x2a8   :  { %10357 = vmatprep.mubr.msk.bf16.mxu1 %vm462_vm0, %v12039_v14  ;;  %v1887_v54 = vadd.f32 %v1872_v27, %v13484_v60  ;;  %v2338_v38 = vadd.f32 %v2323_v52, %v13484_v60  ;;  %v19407_v27 = vmax.f32 %v13757_v20, %v13895_v26 }
 0x2a9   :  { %v1787_v57 = vpop.f32.mrb[212].mxu0  ;;  %v2238_v50 = vpop.f32.mrb[212].mxu1 }
 0x2aa   :  { %v1858_v5 = vmax.f32 %v14101_v16, %v1787_v57  ;;  %v1789_v62 = vpop.f32.mrb[213].mxu0  ;;  %v2309_v58 = vmax.f32 %v14103_v41, %v2238_v50  ;;  %v2240_v12 = vpop.f32.mrb[213].mxu1  ;;  %v19406_v16 = vmax.f32 %v13743_v59, %v13891_v7  ;;  %v19408_v59 = vmax.f32 %v13760_v42, %v13899_v10 }
 0x2ab   :  { %v1790_v63 = vpop.f32.mrb[214].mxu0  ;;  %v2241_v47 = vpop.f32.mrb[214].mxu1  ;;  %v1902_v20 = vmax.f32 %v1887_v54, 0.0  ;;  %v2353_v52 = vmax.f32 %v2338_v38, 0.0 }
 0x2ac   :  { %v1873_v51 = vmax.f32 %v19405_v44, %v1858_v5  ;;  %v1859_v39 = vmax.f32 %v14121_v3, %v1790_v63  ;;  %v1792_v40 = vpop.f32.mrb[215].mxu0  ;;  %v2324_v14 = vmax.f32 %v19406_v16, %v2309_v58  ;;  %v2310_v41 = vmax.f32 %v14124_v15, %v2241_v47  ;;  %v2243_v57 = vpop.f32.mrb[215].mxu1  ;;  %v12041_v15 = vld [vmem:[%s18891_s1 + $0x154] ss:$8 sps:$4 sm:$0xff]  }
 0x2ad   :  { %v19409_v47 = vmax.f32 %v13763_v30, %v13917_v9  ;;  %v19411_v30 = vmax.f32 %v13775_v48, %v13927_v46 }
 0x2ae   :  { %v1888_v50 = vadd.f32 %v1873_v51, %v13498_v36  ;;  %v1874_v45 = vmax.f32 %v19407_v27, %v1859_v39  ;;  %2695 = vmatmul.mubr.bf16.gmra.mrb[64].mxu0 %v12040_v31  ;;  %v2339_v3 = vadd.f32 %v2324_v14, %v13498_v36  ;;  %v2325_v7 = vmax.f32 %v19408_v59, %v2310_v41 }
 0x2af   :  { %3146 = vmatmul.mubr.bf16.gmra.mrb[64].mxu1 %v12040_v31  ;;  %10317 = vmatprep.mubr.msk.bf16.mxu0 %vm462_vm0, %v12041_v15 }
 0x2b0   :  { %v1903_v26 = vmax.f32 %v1888_v50, 0.0  ;;  %10358 = vmatprep.mubr.msk.bf16.mxu1 %vm462_vm0, %v12041_v15  ;;  %v2354_v5 = vmax.f32 %v2339_v3, 0.0  ;;  %v1889_v54 = vadd.f32 %v1874_v45, %v13511_v55  ;;  %v2340_v41 = vadd.f32 %v2325_v7, %v13511_v55 }
 0x2b1   :  { %v1795_v62 = vpop.f32.mrb[216].mxu0  ;;  %v2246_v63 = vpop.f32.mrb[216].mxu1 }
 0x2b2   :  { %v1917_v58 = vpack.c.bf16 %v1903_v26, %v1902_v20  ;;  %v1860_v12 = vmax.f32 %v14133_v11, %v1795_v62  ;;  %v1797_v42 = vpop.f32.mrb[217].mxu0  ;;  %v2368_v10 = vpack.c.bf16 %v2354_v5, %v2353_v52  ;;  %v2311_v44 = vmax.f32 %v14135_v28, %v2246_v63  ;;  %v2248_v51 = vpop.f32.mrb[217].mxu1 }
 0x2b3   :  { %v1798_v39 = vpop.f32.mrb[218].mxu0  ;;  %v2249_v16 = vpop.f32.mrb[218].mxu1  ;;  %v19410_v28 = vmax.f32 %v13765_v2, %v13921_v6  ;;  %v19412_v2 = vmax.f32 %v13777_v22, %v13931_v37  ;;  %v1904_v48 = vmax.f32 %v1889_v54, 0.0  ;;  %v2355_v3 = vmax.f32 %v2340_v41, 0.0 }
 0x2b4   :  { %1925 = vst.msk [vmem:[#allocation2 + $0x78] sm:$0xff] %vm988_vm2, %v1917_v58  ;;  %v1875_v40 = vmax.f32 %v19409_v47, %v1860_v12  ;;  %v1861_v38 = vmax.f32 %v14153_v17, %v1798_v39  ;;  %v1800_v14 = vpop.f32.mrb[219].mxu0  ;;  %v2384_v11 = vrot.slane %v2368_v10, 4  ;;  %v2312_v50 = vmax.f32 %v14162_v21, %v2249_v16  ;;  %v2251_v27 = vpop.f32.mrb[219].mxu1  ;;  %v12042_v17 = vld [vmem:[%s18891_s1 + $0x150] ss:$8 sps:$4 sm:$0xff]  }
 0x2b5   :  { %v2326_v57 = vmax.f32 %v19410_v28, %v2311_v44  ;;  %v12043_v21 = vld [vmem:[%s18891_s1 + $0x164] ss:$8 sps:$4 sm:$0xff]   ;;  %v19413_v12 = vmax.f32 %v13779_v61, %v13943_v8  ;;  %v19415_v61 = vmax.f32 %v13791_v18, %v13951_v49 }
 0x2b6   :  { %v1890_v45 = vadd.f32 %v1875_v40, %v13528_v0  ;;  %v1876_v9 = vmax.f32 %v19411_v30, %v1861_v38  ;;  %2703 = vmatmul.mubr.bf16.gmra.mrb[68].mxu0 %v12042_v17  ;;  %2407 = vst.msk [vmem:[#allocation2 + $0xb0] sm:$0xf0] %vm1473_vm3, %v2384_v11  ;;  %v2327_v6 = vmax.f32 %v19412_v2, %v2312_v50 }
 0x2b7   :  { %v2341_v31 = vadd.f32 %v2326_v57, %v13528_v0  ;;  %3154 = vmatmul.mubr.bf16.gmra.mrb[68].mxu1 %v12042_v17  ;;  %10318 = vmatprep.mubr.msk.bf16.mxu0 %vm462_vm0, %v12043_v21  ;;  %v19417_v17 = vld [vmem:[#allocation13_spill] sm:$0xff] }
 0x2b8   :  { %v1905_v46 = vmax.f32 %v1890_v45, 0.0  ;;  %10359 = vmatprep.mubr.msk.bf16.mxu1 %vm462_vm0, %v12043_v21  ;;  %v1891_v58 = vadd.f32 %v1876_v9, %v13556_v29  ;;  %v2342_v51 = vadd.f32 %v2327_v6, %v13556_v29  ;;  %v19420_v21 = vld [vmem:[#allocation8_spill] sm:$0xff] }
 0x2b9   :  { %v2356_v59 = vmax.f32 %v2341_v31, 0.0  ;;  %v1803_v7 = vpop.f32.mrb[220].mxu0  ;;  %v19418_v31 = vld [vmem:[#allocation39_spill] sm:$0xff] }
 0x2ba   :  { %v1918_v15 = vpack.c.bf16 %v1905_v46, %v1904_v48  ;;  %v1862_v20 = vmax.f32 %v14165_v32, %v1803_v7  ;;  %v2254_v26 = vpop.f32.mrb[220].mxu1  ;;  %v1805_v22 = vpop.f32.mrb[221].mxu0  ;;  %v1906_v18 = vmax.f32 %v1891_v58, 0.0  ;;  %v2357_v14 = vmax.f32 %v2342_v51, 0.0  ;;  %v19421_v7 = vld [vmem:[#allocation33_spill] sm:$0xff]  ;;  %v19427_v58 = vld [vmem:[#allocation22_spill] sm:$0xff] }
 0x2bb   :  { %v2369_v37 = vpack.c.bf16 %v2356_v59, %v2355_v3  ;;  %v2313_v52 = vmax.f32 %v14169_v4, %v2254_v26  ;;  %v2256_v5 = vpop.f32.mrb[221].mxu1  ;;  %v1806_v62 = vpop.f32.mrb[222].mxu0  ;;  %v19414_v4 = vmax.f32 %v13781_v25, %v13947_v1  ;;  %v19416_v25 = vmax.f32 %v13793_v19, %v13955_v33  ;;  %v19424_v26 = vld [vmem:[#allocation27_spill] sm:$0xff]  ;;  %v19429_v51 = vld [vmem:[#allocation34_spill] sm:$0xff] }
 0x2bc   :  { %1926 = vst.msk [vmem:[#allocation2 + $0x80] sm:$0xff] %vm988_vm2, %v1918_v15  ;;  %v1877_v63 = vmax.f32 %v19413_v12, %v1862_v20  ;;  %v1863_v42 = vmax.f32 %v14181_v24, %v1806_v62  ;;  %v2257_v10 = vpop.f32.mrb[222].mxu1  ;;  %v1808_v44 = vpop.f32.mrb[223].mxu0  ;;  %v12044_v24 = vld [vmem:[%s18891_s1 + $0x160] ss:$8 sps:$4 sm:$0xff]   ;;  %v19419_v2 = vmax.f32 %v19417_v17, %v19418_v31  ;;  %v19422_v15 = vld [vmem:[#allocation5_spill] sm:$0xff] }
 0x2bd   :  { %v2385_v32 = vrot.slane %v2369_v37, 4  ;;  %v2328_v39 = vmax.f32 %v19414_v4, %v2313_v52  ;;  %v2314_v54 = vmax.f32 %v14183_v53, %v2257_v10  ;;  %v2259_v47 = vpop.f32.mrb[223].mxu1  ;;  %v12045_v53 = vld [vmem:[%s18891_s1 + $0x174] ss:$8 sps:$4 sm:$0xff]   ;;  %v19426_v62 = vld [vmem:[#allocation14_spill] sm:$0xff] }
 0x2be   :  { %v1892_v40 = vadd.f32 %v1877_v63, %v13560_v35  ;;  %v1878_v8 = vmax.f32 %v19415_v61, %v1863_v42  ;;  %2711 = vmatmul.mubr.bf16.gmra.mrb[72].mxu0 %v12044_v24  ;;  %v19425_v52 = vld [vmem:[#allocation29_spill] sm:$0xff]  ;;  %v19428_v12 = vmax.f32 %v19426_v62, %v19427_v58  ;;  %v19430_v4 = vld [vmem:[#allocation40_spill] sm:$0xff]  ;;  %v12047_v47 = vld [vmem:[%s18891_s1 + $0x184] ss:$8 sps:$4 sm:$0xff]  }
 0x2bf   :  { %v2386_v38 = vsel %vm553_vm1, %v2384_v11, %v2385_v32  ;;  %v2343_v16 = vadd.f32 %v2328_v39, %v13560_v35  ;;  %v2329_v1 = vmax.f32 %v19416_v25, %v2314_v54  ;;  %3162 = vmatmul.mubr.bf16.gmra.mrb[72].mxu1 %v12044_v24  ;;  %10319 = vmatprep.mubr.msk.bf16.mxu0 %vm462_vm0, %v12045_v53  ;;  %v12046_v42 = vld [vmem:[%s18891_s1 + $0x170] ss:$8 sps:$4 sm:$0xff]  }
 0x2c0   :  { %2408 = vst.msk [vmem:[#allocation2 + $0xb8] sm:$0xff] %vm988_vm2, %v2386_v38  ;;  %v1907_v49 = vmax.f32 %v1892_v40, 0.0  ;;  %10360 = vmatprep.mubr.msk.bf16.mxu1 %vm462_vm0, %v12045_v53  ;;  %v1893_v9 = vadd.f32 %v1878_v8, %v13591_v34  ;;  %v19431_v39 = vmax.f32 %v19429_v51, %v19430_v4 }
 0x2c1   :  { %v2358_v11 = vmax.f32 %v2343_v16, 0.0  ;;  %v1811_v41 = vpop.f32.mrb[224].mxu0  ;;  %v2344_v59 = vadd.f32 %v2329_v1, %v13591_v34  ;;  %v19432_v16 = vld [vmem:[#allocation45_spill] sm:$0xff] }
 0x2c2   :  { %v1919_v28 = vpack.c.bf16 %v1907_v49, %v1906_v18  ;;  %v1864_v33 = vmax.f32 %v14185_v23, %v1811_v41  ;;  %v2262_v19 = vpop.f32.mrb[224].mxu1  ;;  %v1813_v57 = vpop.f32.mrb[225].mxu0  ;;  %v1908_v40 = vmax.f32 %v1893_v9, 0.0  ;;  %v19433_v49 = vld [vmem:[#allocation28_spill] sm:$0xff] }
 0x2c3   :  { %v2370_v50 = vpack.c.bf16 %v2358_v11, %v2357_v14  ;;  %v2315_v27 = vmax.f32 %v14187_v13, %v2262_v19  ;;  %v2264_v45 = vpop.f32.mrb[225].mxu1  ;;  %v1814_v30 = vpop.f32.mrb[226].mxu0  ;;  %v19423_v13 = vmax.f32 %v19421_v7, %v19422_v15  ;;  %v19435_v19 = vld [vmem:[#allocation17_spill] sm:$0xff]  ;;  %v19436_v57 = vld [vmem:[#allocation6_spill] sm:$0xff] }
 0x2c4   :  { %1927 = vst.msk [vmem:[#allocation2 + $0x88] sm:$0xff] %vm988_vm2, %v1919_v28  ;;  %v1879_v6 = vmax.f32 %v19419_v2, %v1864_v33  ;;  %v1865_v48 = vmax.f32 %v19420_v21, %v1814_v30  ;;  %v2265_v46 = vpop.f32.mrb[226].mxu1  ;;  %v1816_v3 = vpop.f32.mrb[227].mxu0  ;;  %v19434_v28 = vld [vmem:[#allocation10_spill] sm:$0xff]  ;;  %v19440_v21 = vld [vmem:[#allocation23_spill] sm:$0xff] }
 0x2c5   :  { %v2387_v23 = vrot.slane %v2370_v50, 4  ;;  %v2330_v20 = vmax.f32 %v19423_v13, %v2315_v27  ;;  %v2316_v22 = vmax.f32 %v19424_v26, %v2265_v46  ;;  %v2267_v37 = vpop.f32.mrb[227].mxu1  ;;  %v19437_v50 = vmax.f32 %v19435_v19, %v19436_v57  ;;  %v19438_v45 = vld [vmem:[#allocation46_spill] sm:$0xff]  ;;  %v19442_v3 = vld [vmem:[#allocation51_spill] sm:$0xff]  ;;  %v19445_v26 = vld [vmem:[#allocation41_spill] sm:$0xff] }
 0x2c6   :  { %v1894_v5 = vadd.f32 %v1879_v6, %v19425_v52  ;;  %v1880_v63 = vmax.f32 %v19428_v12, %v1865_v48  ;;  %2719 = vmatmul.mubr.bf16.gmra.mrb[76].mxu0 %v12046_v42  ;;  %v19439_v6 = vld [vmem:[#allocation35_spill] sm:$0xff]  ;;  %v19443_v15 = vld [vmem:[#allocation30_spill] sm:$0xff]  ;;  %v19447_v12 = vld [vmem:[#allocation36_spill] sm:$0xff] }
 0x2c7   :  { %v2388_v10 = vsel %vm553_vm1, %v2385_v32, %v2387_v23  ;;  %v2345_v44 = vadd.f32 %v2330_v20, %v19425_v52  ;;  %v2331_v54 = vmax.f32 %v19431_v39, %v2316_v22  ;;  %3170 = vmatmul.mubr.bf16.gmra.mrb[76].mxu1 %v12046_v42  ;;  %10320 = vmatprep.mubr.msk.bf16.mxu0 %vm462_vm0, %v12047_v47  ;;  %v2359_v32 = vmax.f32 %v2344_v59, 0.0  ;;  %v19444_v20 = vld [vmem:[#allocation18_spill] sm:$0xff] }
 0x2c8   :  { %2409 = vst.msk [vmem:[#allocation2 + $0xc0] sm:$0xff] %vm988_vm2, %v2388_v10  ;;  %v1909_v61 = vmax.f32 %v1894_v5, 0.0  ;;  %10361 = vmatprep.mubr.msk.bf16.mxu1 %vm462_vm0, %v12047_v47  ;;  %v1895_v33 = vadd.f32 %v1880_v63, %v19434_v28  ;;  %v19441_v48 = vmax.f32 %v19439_v6, %v19440_v21  ;;  %v19446_v22 = vmax.f32 %v19444_v20, %v19445_v26  ;;  %v12048_v5 = vld [vmem:[%s18891_s1 + $0x180] ss:$8 sps:$4 sm:$0xff]   ;;  %v19448_v63 = vld [vmem:[#allocation24_spill] sm:$0xff] }
 0x2c9   :  { %v2360_v8 = vmax.f32 %v2345_v44, 0.0  ;;  %v1819_v24 = vpop.f32.mrb[228].mxu0  ;;  %v2346_v2 = vadd.f32 %v2331_v54, %v19434_v28  ;;  %v19449_v42 = vmax.f32 %v19447_v12, %v19448_v63  ;;  %v12049_v44 = vld [vmem:[%s18891_s1 + $0x194] ss:$8 sps:$4 sm:$0xff]   ;;  %v19460_v6 = vld [vmem:[#allocation55_spill] sm:$0xff] }
 0x2ca   :  { %v1920_v38 = vpack.c.bf16 %v1909_v61, %v1908_v40  ;;  %v1866_v25 = vmax.f32 %v19432_v16, %v1819_v24  ;;  %v2270_v1 = vpop.f32.mrb[228].mxu1  ;;  %v1821_v53 = vpop.f32.mrb[229].mxu0  ;;  %v1910_v51 = vmax.f32 %v1895_v33, 0.0  ;;  %v19450_v40 = vld [vmem:[#allocation52_spill] sm:$0xff]  ;;  %v19456_v33 = vld [vmem:[#allocation54_spill] sm:$0xff] }
 0x2cb   :  { %v2371_v18 = vpack.c.bf16 %v2360_v8, %v2359_v32  ;;  %v2317_v14 = vmax.f32 %v19433_v49, %v2270_v1  ;;  %v2272_v11 = vpop.f32.mrb[229].mxu1  ;;  %v1822_v41 = vpop.f32.mrb[230].mxu0  ;;  %v19452_v53 = vld [vmem:[#allocation31_spill] sm:$0xff]  ;;  %v19453_v49 = vld [vmem:[#allocation4_spill] sm:$0xff] }
 0x2cc   :  { %1928 = vst.msk [vmem:[#allocation2 + $0x90] sm:$0xff] %vm988_vm2, %v1920_v38  ;;  %v1881_v27 = vmax.f32 %v19437_v50, %v1866_v25  ;;  %v1867_v30 = vmax.f32 %v19438_v45, %v1822_v41  ;;  %v2273_v9 = vpop.f32.mrb[230].mxu1  ;;  %v1824_v17 = vpop.f32.mrb[231].mxu0  ;;  %v19451_v38 = vld [vmem:[#allocation53_spill] sm:$0xff]  ;;  %v12051_v63 = vld [vmem:[%s18891_s1 + $0x1a4] ss:$8 sps:$4 sm:$0xff]  }
 0x2cd   :  { %v2389_v31 = vrot.slane %v2371_v18, 4  ;;  %v2332_v46 = vmax.f32 %v19441_v48, %v2317_v14  ;;  %v2318_v59 = vmax.f32 %v19442_v3, %v2273_v9  ;;  %v2275_v7 = vpop.f32.mrb[231].mxu1  ;;  %v19454_v14 = vld [vmem:[#allocation42_spill] sm:$0xff]  ;;  %v19458_v9 = vld [vmem:[#allocation49_spill] sm:$0xff] }
 0x2ce   :  { %v1896_v13 = vadd.f32 %v1881_v27, %v19443_v15  ;;  %v1882_v37 = vmax.f32 %v19446_v22, %v1867_v30  ;;  %2727 = vmatmul.mubr.bf16.gmra.mrb[80].mxu0 %v12048_v5  ;;  %v19455_v11 = vmax.f32 %v19453_v49, %v19454_v14  ;;  %v19457_v30 = vld [vmem:[#allocation19_spill] sm:$0xff]  ;;  %v19463_v7 = vld [vmem:[#allocation50_spill] sm:$0xff]  ;;  %v12050_v26 = vld [vmem:[%s18891_s1 + $0x190] ss:$8 sps:$4 sm:$0xff]  }
 0x2cf   :  { %v2390_v62 = vsel %vm553_vm1, %v2387_v23, %v2389_v31  ;;  %v2347_v58 = vadd.f32 %v2332_v46, %v19443_v15  ;;  %v2333_v10 = vmax.f32 %v19449_v42, %v2318_v59  ;;  %3178 = vmatmul.mubr.bf16.gmra.mrb[80].mxu1 %v12048_v5  ;;  %10321 = vmatprep.mubr.msk.bf16.mxu0 %vm462_vm0, %v12049_v44  ;;  %v2361_v23 = vmax.f32 %v2346_v2, 0.0  ;;  %v19461_v46 = vld [vmem:[#allocation11_spill] sm:$0xff]  ;;  %v19462_v59 = vld [vmem:[#allocation37_spill] sm:$0xff]  ;;  %v19465_v5 = vld [vmem:[#allocation20_spill] sm:$0xff] }
 0x2d0   :  { %2410 = vst.msk [vmem:[#allocation2 + $0xc8] sm:$0xff] %vm988_vm2, %v2390_v62  ;;  %v1911_v4 = vmax.f32 %v1896_v13, 0.0  ;;  %10362 = vmatprep.mubr.msk.bf16.mxu1 %vm462_vm0, %v12049_v44  ;;  %v1897_v18 = vadd.f32 %v1882_v37, %v19452_v53  ;;  %v19459_v17 = vmax.f32 %v19457_v30, %v19458_v9  ;;  %v19464_v13 = vmax.f32 %v19462_v59, %v19463_v7  ;;  %v19466_v62 = vld [vmem:[#allocation25_spill] sm:$0xff] }
 0x2d1   :  { %v2362_v39 = vmax.f32 %v2347_v58, 0.0  ;;  %v1827_v54 = vpop.f32.mrb[232].mxu0  ;;  %v2348_v45 = vadd.f32 %v2333_v10, %v19452_v53  ;;  %v19467_v58 = vmax.f32 %v19465_v5, %v19466_v62 }
 0x2d2   :  { %v1921_v47 = vpack.c.bf16 %v1911_v4, %v1910_v51  ;;  %v1868_v61 = vmax.f32 %v19450_v40, %v1827_v54  ;;  %v2278_v32 = vpop.f32.mrb[232].mxu1  ;;  %v1829_v8 = vpop.f32.mrb[233].mxu0  ;;  %v1912_v42 = vmax.f32 %v1897_v18, 0.0 }
 0x2d3   :  { %v2372_v24 = vpack.c.bf16 %v2362_v39, %v2361_v23  ;;  %v2319_v16 = vmax.f32 %v19451_v38, %v2278_v32  ;;  %v2280_v25 = vpop.f32.mrb[233].mxu1  ;;  %v1830_v1 = vpop.f32.mrb[234].mxu0  ;;  %v19468_v23 = vld [vmem:[#allocation56_spill] sm:$0xff] }
 0x2d4   :  { %1929 = vst.msk [vmem:[#allocation2 + $0x98] sm:$0xff] %vm988_vm2, %v1921_v47  ;;  %v1883_v41 = vmax.f32 %v19455_v11, %v1868_v61  ;;  %v1869_v19 = vmax.f32 %v19456_v33, %v1830_v1  ;;  %v2281_v57 = vpop.f32.mrb[234].mxu1  ;;  %v1832_v50 = vpop.f32.mrb[235].mxu0  ;;  %v19469_v61 = vld [vmem:[#allocation57_spill] sm:$0xff]  ;;  %v19470_v38 = vld [vmem:[#allocation16_spill] sm:$0xff]  ;;  %v19471_v25 = vld [vmem:[#allocation38_spill] sm:$0xff] }
 0x2d5   :  { %v2391_v27 = vrot.slane %v2372_v24, 4  ;;  %v2334_v2 = vmax.f32 %v19459_v17, %v2319_v16  ;;  %v2320_v21 = vmax.f32 %v19460_v6, %v2281_v57  ;;  %v2283_v48 = vpop.f32.mrb[235].mxu1  ;;  %v19472_v1 = vld [vmem:[#allocation43_spill] sm:$0xff] }
 0x2d6   :  { %v1898_v3 = vadd.f32 %v1883_v41, %v19461_v46  ;;  %v1884_v20 = vmax.f32 %v19464_v13, %v1869_v19  ;;  %2735 = vmatmul.mubr.bf16.gmra.mrb[84].mxu0 %v12050_v26  ;;  %v19473_v18 = vmax.f32 %v19471_v25, %v19472_v1  ;;  %v19474_v57 = vld [vmem:[#allocation47_spill] sm:$0xff]  ;;  %v19479_v48 = vld [vmem:[#allocation26_spill] sm:$0xff]  ;;  %v12054_v25 = vld [vmem:[%s18891_s1 + $0x1b0] ss:$8 sps:$4 sm:$0xff]  }
 0x2d7   :  { %v2392_v22 = vsel %vm553_vm1, %v2389_v31, %v2391_v27  ;;  %v2349_v37 = vadd.f32 %v2334_v2, %v19461_v46  ;;  %v2335_v12 = vmax.f32 %v19467_v58, %v2320_v21  ;;  %3186 = vmatmul.mubr.bf16.gmra.mrb[84].mxu1 %v12050_v26  ;;  %10322 = vmatprep.mubr.msk.bf16.mxu0 %vm462_vm0, %v12051_v63  ;;  %v2363_v31 = vmax.f32 %v2348_v45, 0.0  ;;  %v19475_v50 = vld [vmem:[#allocation7_spill] sm:$0xff]  ;;  %v19477_v2 = vld [vmem:[#allocation32_spill] sm:$0xff] }
 0x2d8   :  { %2411 = vst.msk [vmem:[#allocation2 + $0xd0] sm:$0xff] %vm988_vm2, %v2392_v22  ;;  %v1913_v10 = vmax.f32 %v1898_v3, 0.0  ;;  %10363 = vmatprep.mubr.msk.bf16.mxu1 %vm462_vm0, %v12051_v63  ;;  %v1899_v16 = vadd.f32 %v1884_v20, %v19470_v38  ;;  %v19476_v45 = vmax.f32 %v19474_v57, %v19475_v50  ;;  %v19478_v21 = vld [vmem:[#allocation48_spill] sm:$0xff]  ;;  %v19481_v20 = vld [vmem:[#allocation21_spill] sm:$0xff] }
 0x2d9   :  { %v2364_v44 = vmax.f32 %v2349_v37, 0.0  ;;  %v1835_v51 = vpop.f32.mrb[236].mxu0  ;;  %v2350_v19 = vadd.f32 %v2335_v12, %v19470_v38  ;;  %v19480_v3 = vmax.f32 %v19478_v21, %v19479_v48  ;;  %v19482_v26 = vld [vmem:[#allocation44_spill] sm:$0xff] }
 0x2da   :  { %v1922_v4 = vpack.c.bf16 %v1913_v10, %v1912_v42  ;;  %v1870_v39 = vmax.f32 %v19468_v23, %v1835_v51  ;;  %v2286_v54 = vpop.f32.mrb[236].mxu1  ;;  %v1837_v47 = vpop.f32.mrb[237].mxu0  ;;  %v19483_v22 = vmax.f32 %v19481_v20, %v19482_v26  ;;  %v12053_v37 = vld [vmem:[%s18891_s1 + $0x1b4] ss:$8 sps:$4 sm:$0xff]   ;;  %v1914_v5 = vmax.f32 %v1899_v16, 0.0 }
 0x2db   :  { %v2373_v40 = vpack.c.bf16 %v2364_v44, %v2363_v31  ;;  %v2321_v32 = vmax.f32 %v19469_v61, %v2286_v54  ;;  %v2288_v8 = vpop.f32.mrb[237].mxu1  ;;  %v1838_v24 = vpop.f32.mrb[238].mxu0  ;;  %v19484_v58 = vld [vmem:[#allocation12_spill] sm:$0xff]  ;;  %v12059_v26 = vld [vmem:[%s18891_s1 + $0x4] ss:$8 sps:$4 sm:$0xff]  }
 0x2dc   :  { %1930 = vst.msk [vmem:[#allocation2 + $0xa0] sm:$0xff] %vm988_vm2, %v1922_v4  ;;  %v1885_v49 = vmax.f32 %v19473_v18, %v1870_v39  ;;  %v1871_v14 = vmax.f32 %v14245_v43, %v1838_v24  ;;  %v2289_v11 = vpop.f32.mrb[238].mxu1  ;;  %v1840_v41 = vpop.f32.mrb[239].mxu0  ;;  %v12052_v43 = vld [vmem:[%s18891_s1 + $0x1a0] ss:$8 sps:$4 sm:$0xff]  }
 0x2dd   :  { %v2393_v33 = vrot.slane %v2373_v40, 4  ;;  %v2336_v30 = vmax.f32 %v19476_v45, %v2321_v32  ;;  %v2322_v9 = vmax.f32 %v14247_v56, %v2289_v11  ;;  %v2291_v17 = vpop.f32.mrb[239].mxu1  ;;  %v12058_v20 = vld [vmem:[%s18891_s1 + $0x1d0] ss:$8 sps:$4 sm:$0xff]  }
 0x2de   :  { %v1900_v6 = vadd.f32 %v1885_v49, %v19477_v2  ;;  %v1886_v59 = vmax.f32 %v19480_v3, %v1871_v14  ;;  %2743 = vmatmul.mubr.bf16.gmra.mrb[88].mxu0 %v12052_v43  ;;  %v12055_v49 = vld [vmem:[%s18891_s1 + $0x1c4] ss:$8 sps:$4 sm:$0xff]   ;;  %v12057_v17 = vld [vmem:[%s18891_s1 + $0x1d4] ss:$8 sps:$4 sm:$0xff]  }
 0x2df   :  { %v2394_v7 = vsel %vm553_vm1, %v2391_v27, %v2393_v33  ;;  %v2351_v13 = vadd.f32 %v2336_v30, %v19477_v2  ;;  %v2337_v56 = vmax.f32 %v19483_v22, %v2322_v9  ;;  %3194 = vmatmul.mubr.bf16.gmra.mrb[88].mxu1 %v12052_v43  ;;  %10323 = vmatprep.mubr.msk.bf16.mxu0 %vm462_vm0, %v12053_v37  ;;  %v2365_v27 = vmax.f32 %v2350_v19, 0.0  ;;  %v12056_v9 = vld [vmem:[%s18891_s1 + $0x1c0] ss:$8 sps:$4 sm:$0xff]  }
 0x2e0   :  { %2412 = vst.msk [vmem:[#allocation2 + $0xd8] sm:$0xff] %vm988_vm2, %v2394_v7  ;;  %v1915_v62 = vmax.f32 %v1900_v6, 0.0  ;;  %v1901_v12 = vadd.f32 %v1886_v59, %v19484_v58  ;;  %10364 = vmatprep.mubr.msk.bf16.mxu1 %vm462_vm0, %v12053_v37 }
 0x2e1   :  { %v2366_v63 = vmax.f32 %v2351_v13, 0.0  ;;  %v2352_v42 = vadd.f32 %v2337_v56, %v19484_v58  ;;  %v14480_v10 = vpop.f32.mrb[240].mxu0 }
 0x2e2   :  { %v1923_v31 = vpack.c.bf16 %v1915_v62, %v1914_v5  ;;  %v1916_v44 = vmax.f32 %v1901_v12, 0.0  ;;  %v14482_v51 = vpop.f32.mrb[240].mxu1  ;;  %v2538_v4 = vpop.f32.mrb[241].mxu0 }
 0x2e3   :  { %v2374_v23 = vpack.c.bf16 %v2366_v63, %v2365_v27  ;;  %v2367_v39 = vmax.f32 %v2352_v42, 0.0  ;;  %v2989_v54 = vpop.f32.mrb[241].mxu1  ;;  %v14484_v47 = vpop.f32.mrb[242].mxu0  ;;  %v11735_v63 = vld [vmem:[%s18890_s0 + $0xe0] sm:$0xff]  }
 0x2e4   :  { %1931 = vst.msk [vmem:[#allocation2 + $0xa8] sm:$0xff] %vm988_vm2, %v1923_v31  ;;  %v1924_v40 = vpack.c.bf16 %v1916_v44, %v1916_v44  ;;  %v14487_v61 = vpop.f32.mrb[242].mxu1  ;;  %v2541_v32 = vpop.f32.mrb[243].mxu0  ;;  %v12060_v31 = vld [vmem:[%s18891_s1] ss:$8 sps:$4 sm:$0xff]  }
 0x2e5   :  { %v2395_v8 = vrot.slane %v2374_v23, 4  ;;  %v2375_v24 = vpack.c.bf16 %v2367_v39, %v2367_v39  ;;  %v2992_v16 = vpop.f32.mrb[243].mxu1  ;;  %v12061_v44 = vld [vmem:[%s18891_s1 + $0x14] ss:$8 sps:$4 sm:$0xff]   ;;  %v19488_v23 = vmov 0  }
 0x2e6   :  { %1932 = vst.msk [vmem:[#allocation2 + $0xb0] sm:$0xf] %vm996_vm4, %v1924_v40  ;;  %2751 = vmatmul.mubr.bf16.gmra.mrb[92].mxu0 %v12054_v25  ;;  %v11736_v16 = vld [vmem:[%s18890_s0 + $0xfc] sm:$0xff]  }
 0x2e7   :  { %v2396_v1 = vsel %vm553_vm1, %v2393_v33, %v2395_v8  ;;  %v2397_v18 = vrot.slane %v2375_v24, 4  ;;  %3202 = vmatmul.mubr.bf16.gmra.mrb[92].mxu1 %v12054_v25  ;;  %10324 = vmatprep.mubr.msk.bf16.mxu0 %vm462_vm0, %v12055_v49 }
 0x2e8   :  { %2413 = vst.msk [vmem:[#allocation2 + $0xe0] sm:$0xff] %vm988_vm2, %v2396_v1  ;;  %10365 = vmatprep.mubr.msk.bf16.mxu1 %vm462_vm0, %v12055_v49  ;;  %v12062_v1 = vld [vmem:[%s18891_s1 + $0x10] ss:$8 sps:$4 sm:$0xff]   ;;  %v11737_v49 = vld [vmem:[%s18890_s0 + $0xe8] sm:$0xff]  }
 0x2e9   :  { %v2398_v14 = vsel %vm553_vm1, %v2395_v8, %v2397_v18  ;;  %v14501_v11 = vpop.f32.mrb[244].mxu0  ;;  %v12063_v18 = vld [vmem:[%s18891_s1 + $0x24] ss:$8 sps:$4 sm:$0xff]  }
 0x2ea   :  { %2414 = vst.msk [vmem:[#allocation2 + $0xe8] sm:$0xff] %vm988_vm2, %v2398_v14  ;;  %v14504_v41 = vpop.f32.mrb[244].mxu1  ;;  %v2546_v33 = vpop.f32.mrb[245].mxu0 }
 0x2eb   :  { %v2997_v19 = vpop.f32.mrb[245].mxu1  ;;  %v14506_v57 = vpop.f32.mrb[246].mxu0 }
 0x2ec   :  { %v14508_v50 = vpop.f32.mrb[246].mxu1  ;;  %v2549_v45 = vpop.f32.mrb[247].mxu0 }
 0x2ed   :  { %v3000_v30 = vpop.f32.mrb[247].mxu1 }
 0x2ee   :  { %2759 = vmatmul.mubr.bf16.gmra.mrb[96].mxu0 %v12056_v9 }
 0x2ef   :  { %3210 = vmatmul.mubr.bf16.gmra.mrb[96].mxu1 %v12056_v9  ;;  %10325 = vmatprep.mubr.msk.bf16.mxu0 %vm462_vm0, %v12057_v17 }
 0x2f0   :  { %10366 = vmatprep.mubr.msk.bf16.mxu1 %vm462_vm0, %v12057_v17 }
 0x2f1   :  { %v14518_v6 = vpop.f32.mrb[248].mxu0 }
 0x2f2   :  { %v14520_v21 = vpop.f32.mrb[248].mxu1  ;;  %v2554_v48 = vpop.f32.mrb[249].mxu0 }
 0x2f3   :  { %v3005_v3 = vpop.f32.mrb[249].mxu1  ;;  %v14522_v59 = vpop.f32.mrb[250].mxu0 }
 0x2f4   :  { %v14524_v43 = vpop.f32.mrb[250].mxu1  ;;  %v2557_v7 = vpop.f32.mrb[251].mxu0  ;;  %v12064_v3 = vld [vmem:[%s18891_s1 + $0x20] ss:$8 sps:$4 sm:$0xff]  }
 0x2f5   :  { %v3008_v13 = vpop.f32.mrb[251].mxu1  ;;  %v12065_v7 = vld [vmem:[%s18891_s1 + $0x34] ss:$8 sps:$4 sm:$0xff]  }
 0x2f6   :  { %2767 = vmatmul.mubr.bf16.gmra.mrb[100].mxu0 %v12058_v20 }
 0x2f7   :  { %3218 = vmatmul.mubr.bf16.gmra.mrb[100].mxu1 %v12058_v20  ;;  %10378 = vmatprep.mubr.msk.bf16.mxu0 %vm462_vm0, %v12059_v26 }
 0x2f8   :  { %10419 = vmatprep.mubr.msk.bf16.mxu1 %vm462_vm0, %v12059_v26 }
 0x2f9   :  { %v14534_v22 = vpop.f32.mrb[252].mxu0 }
 0x2fa   :  { %v14536_v56 = vpop.f32.mrb[252].mxu1  ;;  %v2562_v37 = vpop.f32.mrb[253].mxu0 }
 0x2fb   :  { %v3013_v5 = vpop.f32.mrb[253].mxu1  ;;  %v14538_v62 = vpop.f32.mrb[254].mxu0 }
 0x2fc   :  { %19485 = vst [vmem:[#allocation13_spill] sm:$0xff] %v14538_v62  ;;  %v14540_v12 = vpop.f32.mrb[254].mxu1  ;;  %v2565_v27 = vpop.f32.mrb[255].mxu0 }
 0x2fd   :  { %19486 = vst [vmem:[#allocation39_spill] sm:$0xff] %v14540_v12  ;;  %v3016_v42 = vpop.f32.mrb[255].mxu1  ;;  %v12094_v12 = vld [vmem:[%s18891_s1 + $0x110] ss:$8 sps:$4 sm:$0xff]  }
 0x2fe   :  { %3468 = vmatmul.mubr.bf16.vlgmr.msra.gmra.mrb[104].mxu0 %v12060_v31 }
 0x2ff   :  { %3919 = vmatmul.mubr.bf16.vlgmr.msra.gmra.mrb[104].mxu1 %v12060_v31  ;;  %10379 = vmatprep.mubr.msk.bf16.mxu0 %vm462_vm0, %v12061_v44  ;;  %v12066_v31 = vld [vmem:[%s18891_s1 + $0x30] ss:$8 sps:$4 sm:$0xff]  }
 0x300   :  { %10420 = vmatprep.mubr.msk.bf16.mxu1 %vm462_vm0, %v12061_v44  ;;  %4369 = vmatpush1.bf16.msra.mxu0 %v11735_v63  ;;  %v12067_v44 = vld [vmem:[%s18891_s1 + $0x44] ss:$8 sps:$4 sm:$0xff]  }
 0x301   :  { %v14553_v4 = vpop.f32.mrb[0].mxu0  ;;  %4370 = vmatprep.subr.bf16.mxu0 %v19488_v23  ;;  %4820 = vmatpush1.bf16.msra.mxu1 %v11736_v16 }
 0x302   :  { %19487 = vst [vmem:[#allocation8_spill] sm:$0xff] %v14553_v4  ;;  %v14556_v39 = vpop.f32.mrb[0].mxu1  ;;  %v2570_v54 = vpop.f32.mrb[1].mxu0  ;;  %4821 = vmatprep.subr.bf16.mxu1 %v19488_v23 }
 0x303   :  { %19489 = vst [vmem:[#allocation33_spill] sm:$0xff] %v14556_v39  ;;  %v3021_v40 = vpop.f32.mrb[1].mxu1  ;;  %v14558_v32 = vpop.f32.mrb[2].mxu0 }
 0x304   :  { %19490 = vst [vmem:[#allocation5_spill] sm:$0xff] %v14558_v32  ;;  %v14560_v8 = vpop.f32.mrb[2].mxu1  ;;  %v2573_v24 = vpop.f32.mrb[3].mxu0  ;;  %4371 = vmatpush1.bf16.msra.mxu0 %v11737_v49 }
 0x305   :  { %19491 = vst [vmem:[#allocation27_spill] sm:$0xff] %v14560_v8  ;;  %v3024_v25 = vpop.f32.mrb[3].mxu1  ;;  %4372 = vmatprep.subr.bf16.mxu0 %v19488_v23 }
 0x306   :  { %3476 = vmatmul.mubr.bf16.gmra.mrb[108].mxu0 %v12062_v1 }
 0x307   :  { %3927 = vmatmul.mubr.bf16.gmra.mrb[108].mxu1 %v12062_v1  ;;  %10380 = vmatprep.mubr.msk.bf16.mxu0 %vm462_vm0, %v12063_v18 }
 0x308   :  { %10421 = vmatprep.mubr.msk.bf16.mxu1 %vm462_vm0, %v12063_v18 }
 0x309   :  { %v14577_v14 = vpop.f32.mrb[4].mxu0 }
 0x30a   :  { %19492 = vst [vmem:[#allocation14_spill] sm:$0xff] %v14577_v14  ;;  %v14579_v33 = vpop.f32.mrb[4].mxu1  ;;  %v2578_v19 = vpop.f32.mrb[5].mxu0 }
 0x30b   :  { %19493 = vst [vmem:[#allocation22_spill] sm:$0xff] %v14579_v33  ;;  %v3029_v45 = vpop.f32.mrb[5].mxu1  ;;  %v14582_v30 = vpop.f32.mrb[6].mxu0  ;;  %v12072_v19 = vld [vmem:[%s18891_s1 + $0x60] ss:$8 sps:$4 sm:$0xff]  }
 0x30c   :  { %19494 = vst [vmem:[#allocation34_spill] sm:$0xff] %v14582_v30  ;;  %v14584_v9 = vpop.f32.mrb[6].mxu1  ;;  %v2581_v17 = vpop.f32.mrb[7].mxu0 }
 0x30d   :  { %19495 = vst [vmem:[#allocation40_spill] sm:$0xff] %v14584_v9  ;;  %v3032_v48 = vpop.f32.mrb[7].mxu1  ;;  %v12068_v17 = vld [vmem:[%s18891_s1 + $0x40] ss:$8 sps:$4 sm:$0xff]  }
 0x30e   :  { %3484 = vmatmul.mubr.bf16.gmra.mrb[112].mxu0 %v12064_v3  ;;  %v12069_v48 = vld [vmem:[%s18891_s1 + $0x54] ss:$8 sps:$4 sm:$0xff]  }
 0x30f   :  { %3935 = vmatmul.mubr.bf16.gmra.mrb[112].mxu1 %v12064_v3  ;;  %10381 = vmatprep.mubr.msk.bf16.mxu0 %vm462_vm0, %v12065_v7 }
 0x310   :  { %10422 = vmatprep.mubr.msk.bf16.mxu1 %vm462_vm0, %v12065_v7 }
 0x311   :  { %v14594_v13 = vpop.f32.mrb[8].mxu0 }
 0x312   :  { %19496 = vst [vmem:[#allocation45_spill] sm:$0xff] %v14594_v13  ;;  %v14596_v20 = vpop.f32.mrb[8].mxu1  ;;  %v2586_v26 = vpop.f32.mrb[9].mxu0 }
 0x313   :  { %19497 = vst [vmem:[#allocation28_spill] sm:$0xff] %v14596_v20  ;;  %v3037_v37 = vpop.f32.mrb[9].mxu1  ;;  %v14598_v5 = vpop.f32.mrb[10].mxu0 }
 0x314   :  { %19498 = vst [vmem:[#allocation17_spill] sm:$0xff] %v14598_v5  ;;  %v14600_v27 = vpop.f32.mrb[10].mxu1  ;;  %v2589_v63 = vpop.f32.mrb[11].mxu0 }
 0x315   :  { %19499 = vst [vmem:[#allocation6_spill] sm:$0xff] %v14600_v27  ;;  %v3040_v42 = vpop.f32.mrb[11].mxu1 }
 0x316   :  { %3492 = vmatmul.mubr.bf16.gmra.mrb[116].mxu0 %v12066_v31 }
 0x317   :  { %3943 = vmatmul.mubr.bf16.gmra.mrb[116].mxu1 %v12066_v31  ;;  %10382 = vmatprep.mubr.msk.bf16.mxu0 %vm462_vm0, %v12067_v44 }
 0x318   :  { %10423 = vmatprep.mubr.msk.bf16.mxu1 %vm462_vm0, %v12067_v44 }
 0x319   :  { %v14610_v54 = vpop.f32.mrb[12].mxu0 }
 0x31a   :  { %19500 = vst [vmem:[#allocation46_spill] sm:$0xff] %v14610_v54  ;;  %v14612_v40 = vpop.f32.mrb[12].mxu1  ;;  %v2594_v24 = vpop.f32.mrb[13].mxu0 }
 0x31b   :  { %19501 = vst [vmem:[#allocation35_spill] sm:$0xff] %v14612_v40  ;;  %v3045_v16 = vpop.f32.mrb[13].mxu1  ;;  %v14614_v25 = vpop.f32.mrb[14].mxu0 }
 0x31c   :  { %v14618_v18 = vpop.f32.mrb[14].mxu1  ;;  %v2597_v49 = vpop.f32.mrb[15].mxu0 }
 0x31d   :  { %v3048_v45 = vpop.f32.mrb[15].mxu1 }
 0x31e   :  { %3500 = vmatmul.mubr.bf16.gmra.mrb[120].mxu0 %v12068_v17 }
 0x31f   :  { %3951 = vmatmul.mubr.bf16.gmra.mrb[120].mxu1 %v12068_v17  ;;  %10383 = vmatprep.mubr.msk.bf16.mxu0 %vm462_vm0, %v12069_v48  ;;  %v12070_v17 = vld [vmem:[%s18891_s1 + $0x50] ss:$8 sps:$4 sm:$0xff]  }
 0x320   :  { %10424 = vmatprep.mubr.msk.bf16.mxu1 %vm462_vm0, %v12069_v48  ;;  %v12071_v48 = vld [vmem:[%s18891_s1 + $0x64] ss:$8 sps:$4 sm:$0xff]  }
 0x321   :  { %v14630_v3 = vpop.f32.mrb[16].mxu0 }
 0x322   :  { %v14634_v26 = vpop.f32.mrb[16].mxu1  ;;  %v2602_v37 = vpop.f32.mrb[17].mxu0 }
 0x323   :  { %v3053_v42 = vpop.f32.mrb[17].mxu1  ;;  %v14638_v31 = vpop.f32.mrb[18].mxu0  ;;  %v11738_v37 = vld [vmem:[%s18890_s0 + $0x104] sm:$0xff]  }
 0x324   :  { %v14642_v24 = vpop.f32.mrb[18].mxu1  ;;  %v2605_v16 = vpop.f32.mrb[19].mxu0  ;;  %v11739_v42 = vld [vmem:[%s18890_s0 + $0xf0] sm:$0xff]   ;;  %4822 = vmatpush1.bf16.msra.mxu1 %v11738_v37 }
 0x325   :  { %v3056_v45 = vpop.f32.mrb[19].mxu1  ;;  %4373 = vmatpush1.bf16.msra.mxu0 %v11739_v42  ;;  %4823 = vmatprep.subr.bf16.mxu1 %v19488_v23 }
 0x326   :  { %3508 = vmatmul.mubr.bf16.gmra.mrb[124].mxu0 %v12070_v17  ;;  %4374 = vmatprep.subr.bf16.mxu0 %v19488_v23 }
 0x327   :  { %3959 = vmatmul.mubr.bf16.gmra.mrb[124].mxu1 %v12070_v17  ;;  %10384 = vmatprep.mubr.msk.bf16.mxu0 %vm462_vm0, %v12071_v48 }
 0x328   :  { %10425 = vmatprep.mubr.msk.bf16.mxu1 %vm462_vm0, %v12071_v48 }
 0x329   :  { %v14660_v16 = vpop.f32.mrb[20].mxu0 }
 0x32a   :  { %v14664_v17 = vpop.f32.mrb[20].mxu1  ;;  %v2610_v49 = vpop.f32.mrb[21].mxu0 }
 0x32b   :  { %v3061_v63 = vpop.f32.mrb[21].mxu1  ;;  %v14670_v7 = vpop.f32.mrb[22].mxu0 }
 0x32c   :  { %v14674_v37 = vpop.f32.mrb[22].mxu1  ;;  %v2613_v42 = vpop.f32.mrb[23].mxu0  ;;  %v12073_v63 = vld [vmem:[%s18891_s1 + $0x74] ss:$8 sps:$4 sm:$0xff]  }
 0x32d   :  { %v3064_v49 = vpop.f32.mrb[23].mxu1 }
 0x32e   :  { %3516 = vmatmul.mubr.bf16.gmra.mrb[128].mxu0 %v12072_v19 }
 0x32f   :  { %3967 = vmatmul.mubr.bf16.gmra.mrb[128].mxu1 %v12072_v19  ;;  %10385 = vmatprep.mubr.msk.bf16.mxu0 %vm462_vm0, %v12073_v63 }
 0x330   :  { %10426 = vmatprep.mubr.msk.bf16.mxu1 %vm462_vm0, %v12073_v63 }
 0x331   :  { %v14686_v48 = vpop.f32.mrb[24].mxu0 }
 0x332   :  { %v14690_v49 = vpop.f32.mrb[24].mxu1  ;;  %v2618_v45 = vpop.f32.mrb[25].mxu0 }
 0x333   :  { %v3069_v19 = vpop.f32.mrb[25].mxu1  ;;  %v14694_v1 = vpop.f32.mrb[26].mxu0  ;;  %v12074_v45 = vld [vmem:[%s18891_s1 + $0x70] ss:$8 sps:$4 sm:$0xff]  }
 0x334   :  { %v14698_v2 = vpop.f32.mrb[26].mxu1  ;;  %v2621_v63 = vpop.f32.mrb[27].mxu0  ;;  %v12075_v19 = vld [vmem:[%s18891_s1 + $0x84] ss:$8 sps:$4 sm:$0xff]  }
 0x335   :  { %v3072_v46 = vpop.f32.mrb[27].mxu1  ;;  %v11740_v63 = vld [vmem:[%s18890_s0 + $0x10c] sm:$0xff]  }
 0x336   :  { %3524 = vmatmul.mubr.bf16.gmra.mrb[132].mxu0 %v12074_v45  ;;  %4824 = vmatpush1.bf16.msra.mxu1 %v11740_v63  ;;  %v12076_v63 = vld [vmem:[%s18891_s1 + $0x80] ss:$8 sps:$4 sm:$0xff]  }
 0x337   :  { %3975 = vmatmul.mubr.bf16.gmra.mrb[132].mxu1 %v12074_v45  ;;  %10386 = vmatprep.mubr.msk.bf16.mxu0 %vm462_vm0, %v12075_v19 }
 0x338   :  { %10427 = vmatprep.mubr.msk.bf16.mxu1 %vm462_vm0, %v12075_v19  ;;  %4825 = vmatprep.subr.bf16.mxu1 %v19488_v23 }
 0x339   :  { %v14713_v38 = vpop.f32.mrb[28].mxu0 }
 0x33a   :  { %19502 = vst [vmem:[#allocation23_spill] sm:$0xff] %v14713_v38  ;;  %v14717_v58 = vpop.f32.mrb[28].mxu1  ;;  %v2626_v45 = vpop.f32.mrb[29].mxu0  ;;  %v19530_v38 = vmax.f32 %v14480_v10, %v14614_v25 }
 0x33b   :  { %19503 = vst [vmem:[#allocation51_spill] sm:$0xff] %v14717_v58  ;;  %v3077_v42 = vpop.f32.mrb[29].mxu1  ;;  %v14721_v53 = vpop.f32.mrb[30].mxu0  ;;  %v12092_v58 = vld [vmem:[%s18891_s1 + $0x100] ss:$8 sps:$4 sm:$0xff]  }
 0x33c   :  { %19504 = vst [vmem:[#allocation18_spill] sm:$0xff] %v14721_v53  ;;  %v14726_v15 = vpop.f32.mrb[30].mxu1  ;;  %v2629_v28 = vpop.f32.mrb[31].mxu0  ;;  %v12077_v42 = vld [vmem:[%s18891_s1 + $0x94] ss:$8 sps:$4 sm:$0xff]  }
 0x33d   :  { %19505 = vst [vmem:[#allocation41_spill] sm:$0xff] %v14726_v15  ;;  %v3080_v52 = vpop.f32.mrb[31].mxu1  ;;  %v11741_v28 = vld [vmem:[%s18890_s0 + $0xf8] sm:$0xff]  }
 0x33e   :  { %3532 = vmatmul.mubr.bf16.gmra.mrb[136].mxu0 %v12076_v63 }
 0x33f   :  { %3983 = vmatmul.mubr.bf16.gmra.mrb[136].mxu1 %v12076_v63  ;;  %10387 = vmatprep.mubr.msk.bf16.mxu0 %vm462_vm0, %v12077_v42 }
 0x340   :  { %10428 = vmatprep.mubr.msk.bf16.mxu1 %vm462_vm0, %v12077_v42  ;;  %4375 = vmatpush1.bf16.msra.mxu0 %v11741_v28  ;;  %v12078_v28 = vld [vmem:[%s18891_s1 + $0x90] ss:$8 sps:$4 sm:$0xff]  }
 0x341   :  { %v14741_v45 = vpop.f32.mrb[32].mxu0  ;;  %4376 = vmatprep.subr.bf16.mxu0 %v19488_v23 }
 0x342   :  { %19506 = vst [vmem:[#allocation36_spill] sm:$0xff] %v14741_v45  ;;  %v14745_v46 = vpop.f32.mrb[32].mxu1  ;;  %v2634_v63 = vpop.f32.mrb[33].mxu0 }
 0x343   :  { %19507 = vst [vmem:[#allocation24_spill] sm:$0xff] %v14745_v46  ;;  %v3085_v44 = vpop.f32.mrb[33].mxu1  ;;  %v14749_v15 = vpop.f32.mrb[34].mxu0  ;;  %v12090_v46 = vld [vmem:[%s18891_s1 + $0xf0] ss:$8 sps:$4 sm:$0xff]  }
 0x344   :  { %19508 = vst [vmem:[#allocation52_spill] sm:$0xff] %v14749_v15  ;;  %v14754_v39 = vpop.f32.mrb[34].mxu1  ;;  %v2637_v53 = vpop.f32.mrb[35].mxu0  ;;  %v12079_v44 = vld [vmem:[%s18891_s1 + $0xa4] ss:$8 sps:$4 sm:$0xff]  }
 0x345   :  { %19509 = vst [vmem:[#allocation53_spill] sm:$0xff] %v14754_v39  ;;  %v3088_v45 = vpop.f32.mrb[35].mxu1  ;;  %v12081_v39 = vld [vmem:[%s18891_s1 + $0xb4] ss:$8 sps:$4 sm:$0xff]  }
 0x346   :  { %3540 = vmatmul.mubr.bf16.gmra.mrb[140].mxu0 %v12078_v28 }
 0x347   :  { %3991 = vmatmul.mubr.bf16.gmra.mrb[140].mxu1 %v12078_v28  ;;  %10388 = vmatprep.mubr.msk.bf16.mxu0 %vm462_vm0, %v12079_v44 }
 0x348   :  { %10429 = vmatprep.mubr.msk.bf16.mxu1 %vm462_vm0, %v12079_v44 }
 0x349   :  { %v14766_v63 = vpop.f32.mrb[36].mxu0 }
 0x34a   :  { %19510 = vst [vmem:[#allocation4_spill] sm:$0xff] %v14766_v63  ;;  %v14770_v45 = vpop.f32.mrb[36].mxu1  ;;  %v2642_v52 = vpop.f32.mrb[37].mxu0 }
 0x34b   :  { %19511 = vst [vmem:[#allocation42_spill] sm:$0xff] %v14770_v45  ;;  %v3093_v28 = vpop.f32.mrb[37].mxu1  ;;  %v14774_v19 = vpop.f32.mrb[38].mxu0  ;;  %v12080_v52 = vld [vmem:[%s18891_s1 + $0xa0] ss:$8 sps:$4 sm:$0xff]  }
 0x34c   :  { %19512 = vst [vmem:[#allocation54_spill] sm:$0xff] %v14774_v19  ;;  %v14778_v33 = vpop.f32.mrb[38].mxu1  ;;  %v2645_v44 = vpop.f32.mrb[39].mxu0  ;;  %v11742_v28 = vld [vmem:[%s18890_s0 + $0x114] sm:$0xff]  }
 0x34d   :  { %19513 = vst [vmem:[#allocation19_spill] sm:$0xff] %v14778_v33  ;;  %v3096_v14 = vpop.f32.mrb[39].mxu1  ;;  %4826 = vmatpush1.bf16.msra.mxu1 %v11742_v28  ;;  %v11745_v28 = vld [vmem:[%s18890_s0 + $0x108] sm:$0xff]  }
 0x34e   :  { %3548 = vmatmul.mubr.bf16.gmra.mrb[144].mxu0 %v12080_v52  ;;  %v11743_v14 = vld [vmem:[%s18890_s0 + $0x100] sm:$0xff]   ;;  %4827 = vmatprep.subr.bf16.mxu1 %v19488_v23 }
 0x34f   :  { %3999 = vmatmul.mubr.bf16.gmra.mrb[144].mxu1 %v12080_v52  ;;  %10389 = vmatprep.mubr.msk.bf16.mxu0 %vm462_vm0, %v12081_v39 }
 0x350   :  { %10430 = vmatprep.mubr.msk.bf16.mxu1 %vm462_vm0, %v12081_v39  ;;  %4377 = vmatpush1.bf16.msra.mxu0 %v11743_v14  ;;  %v11744_v39 = vld [vmem:[%s18890_s0 + $0x11c] sm:$0xff]  }
 0x351   :  { %v14796_v44 = vpop.f32.mrb[40].mxu0  ;;  %4378 = vmatprep.subr.bf16.mxu0 %v19488_v23  ;;  %4828 = vmatpush1.bf16.msra.mxu1 %v11744_v39  ;;  %v12083_v39 = vld [vmem:[%s18891_s1 + $0xc4] ss:$8 sps:$4 sm:$0xff]  }
 0x352   :  { %19514 = vst [vmem:[#allocation49_spill] sm:$0xff] %v14796_v44  ;;  %v14801_v15 = vpop.f32.mrb[40].mxu1  ;;  %v2650_v42 = vpop.f32.mrb[41].mxu0  ;;  %4829 = vmatprep.subr.bf16.mxu1 %v19488_v23 }
 0x353   :  { %19515 = vst [vmem:[#allocation55_spill] sm:$0xff] %v14801_v15  ;;  %v3101_v53 = vpop.f32.mrb[41].mxu1  ;;  %v14808_v33 = vpop.f32.mrb[42].mxu0  ;;  %v11752_v15 = vld [vmem:[%s18890_s0 + $0x13c] sm:$0xff]  }
 0x354   :  { %19516 = vst [vmem:[#allocation37_spill] sm:$0xff] %v14808_v33  ;;  %v14813_v52 = vpop.f32.mrb[42].mxu1  ;;  %v2653_v44 = vpop.f32.mrb[43].mxu0  ;;  %v12082_v53 = vld [vmem:[%s18891_s1 + $0xb0] ss:$8 sps:$4 sm:$0xff]   ;;  %4379 = vmatpush1.bf16.msra.mxu0 %v11745_v28 }
 0x355   :  { %19517 = vst [vmem:[#allocation50_spill] sm:$0xff] %v14813_v52  ;;  %v3104_v14 = vpop.f32.mrb[43].mxu1  ;;  %v11746_v44 = vld [vmem:[%s18890_s0 + $0x124] sm:$0xff]   ;;  %4380 = vmatprep.subr.bf16.mxu0 %v19488_v23  ;;  %v11748_v52 = vld [vmem:[%s18890_s0 + $0x12c] sm:$0xff]  }
 0x356   :  { %3556 = vmatmul.mubr.bf16.gmra.mrb[148].mxu0 %v12082_v53  ;;  %4830 = vmatpush1.bf16.msra.mxu1 %v11746_v44 }
 0x357   :  { %4007 = vmatmul.mubr.bf16.gmra.mrb[148].mxu1 %v12082_v53  ;;  %10390 = vmatprep.mubr.msk.bf16.mxu0 %vm462_vm0, %v12083_v39  ;;  %v11747_v53 = vld [vmem:[%s18890_s0 + $0x110] sm:$0xff]  }
 0x358   :  { %10431 = vmatprep.mubr.msk.bf16.mxu1 %vm462_vm0, %v12083_v39  ;;  %4831 = vmatprep.subr.bf16.mxu1 %v19488_v23 }
 0x359   :  { %v14832_v14 = vpop.f32.mrb[44].mxu0  ;;  %4381 = vmatpush1.bf16.msra.mxu0 %v11747_v53 }
 0x35a   :  { %v14835_v42 = vpop.f32.mrb[44].mxu1  ;;  %v2658_v20 = vpop.f32.mrb[45].mxu0  ;;  %4832 = vmatpush1.bf16.msra.mxu1 %v11748_v52  ;;  %4382 = vmatprep.subr.bf16.mxu0 %v19488_v23 }
 0x35b   :  { %v3109_v39 = vpop.f32.mrb[45].mxu1  ;;  %v14844_v28 = vpop.f32.mrb[46].mxu0  ;;  %v12084_v20 = vld [vmem:[%s18891_s1 + $0xc0] ss:$8 sps:$4 sm:$0xff]   ;;  %4833 = vmatprep.subr.bf16.mxu1 %v19488_v23 }
 0x35c   :  { %v14846_v40 = vpop.f32.mrb[46].mxu1  ;;  %v2661_v44 = vpop.f32.mrb[47].mxu0  ;;  %v11749_v39 = vld [vmem:[%s18890_s0 + $0x118] sm:$0xff]  }
 0x35d   :  { %v3112_v33 = vpop.f32.mrb[47].mxu1  ;;  %v11750_v44 = vld [vmem:[%s18890_s0 + $0x134] sm:$0xff]   ;;  %4383 = vmatpush1.bf16.msra.mxu0 %v11749_v39 }
 0x35e   :  { %3564 = vmatmul.mubr.bf16.gmra.mrb[152].mxu0 %v12084_v20  ;;  %v12085_v33 = vld [vmem:[%s18891_s1 + $0xd4] ss:$8 sps:$4 sm:$0xff]   ;;  %4834 = vmatpush1.bf16.msra.mxu1 %v11750_v44 }
 0x35f   :  { %4015 = vmatmul.mubr.bf16.gmra.mrb[152].mxu1 %v12084_v20  ;;  %10391 = vmatprep.mubr.msk.bf16.mxu0 %vm462_vm0, %v12085_v33  ;;  %v11751_v20 = vld [vmem:[%s18890_s0 + $0x120] sm:$0xff]  }
 0x360   :  { %10432 = vmatprep.mubr.msk.bf16.mxu1 %vm462_vm0, %v12085_v33  ;;  %4384 = vmatprep.subr.bf16.mxu0 %v19488_v23 }
 0x361   :  { %v14864_v52 = vpop.f32.mrb[48].mxu0  ;;  %4835 = vmatprep.subr.bf16.mxu1 %v19488_v23  ;;  %4385 = vmatpush1.bf16.msra.mxu0 %v11751_v20  ;;  %v11755_v20 = vld [vmem:[%s18890_s0 + $0x130] ss:$0 sps:$4 sm:$0xff]  }
 0x362   :  { %v14867_v53 = vpop.f32.mrb[48].mxu1  ;;  %v2666_v54 = vpop.f32.mrb[49].mxu0  ;;  %4836 = vmatpush1.bf16.msra.mxu1 %v11752_v15  ;;  %4386 = vmatprep.subr.bf16.mxu0 %v19488_v23  ;;  %v12087_v15 = vld [vmem:[%s18891_s1 + $0xe4] ss:$8 sps:$4 sm:$0xff]  }
 0x363   :  { %v3117_v33 = vpop.f32.mrb[49].mxu1  ;;  %v14876_v39 = vpop.f32.mrb[50].mxu0  ;;  %v12086_v54 = vld [vmem:[%s18891_s1 + $0xd0] ss:$8 sps:$4 sm:$0xff]   ;;  %4837 = vmatprep.subr.bf16.mxu1 %v19488_v23 }
 0x364   :  { %v14878_v27 = vpop.f32.mrb[50].mxu1  ;;  %v2669_v44 = vpop.f32.mrb[51].mxu0  ;;  %v11753_v33 = vld [vmem:[%s18890_s0 + $0x128] sm:$0xff]  }
 0x365   :  { %v3120_v5 = vpop.f32.mrb[51].mxu1  ;;  %v11754_v44 = vld [vmem:[%s18890_s0 + $0x144] sm:$0xff]   ;;  %4387 = vmatpush1.bf16.msra.mxu0 %v11753_v33 }
 0x366   :  { %3572 = vmatmul.mubr.bf16.gmra.mrb[156].mxu0 %v12086_v54  ;;  %4838 = vmatpush1.bf16.msra.mxu1 %v11754_v44  ;;  %v4366_v44 = vsel %vm553_vm1, %v11755_v20, 0  ;;  %v12089_v20 = vld [vmem:[%s18891_s1 + $0xf4] ss:$8 sps:$4 sm:$0xff]  }
 0x367   :  { %4023 = vmatmul.mubr.bf16.gmra.mrb[156].mxu1 %v12086_v54  ;;  %10392 = vmatprep.mubr.msk.bf16.mxu0 %vm462_vm0, %v12087_v15  ;;  %v11756_v54 = vld [vmem:[%s18890_s0 + $0x14c] ss:$0 sps:$4 sm:$0xff]  }
 0x368   :  { %10433 = vmatprep.mubr.msk.bf16.mxu1 %vm462_vm0, %v12087_v15  ;;  %4388 = vmatprep.subr.bf16.mxu0 %v19488_v23  ;;  %v4817_v45 = vsel %vm553_vm1, %v11756_v54, 0 }
 0x369   :  { %v14896_v5 = vpop.f32.mrb[52].mxu0  ;;  %4839 = vmatprep.subr.bf16.mxu1 %v19488_v23  ;;  %4389 = vmatpush1.bf16.msra.mxu0 %v4366_v44 }
 0x36a   :  { %v14905_v19 = vpop.f32.mrb[52].mxu1  ;;  %v2674_v13 = vpop.f32.mrb[53].mxu0  ;;  %4840 = vmatpush1.bf16.msra.mxu1 %v4817_v45  ;;  %5301 = vmatprep.subr.bf16.mxu0 %v19488_v23 }
 0x36b   :  { %v3125_v15 = vpop.f32.mrb[53].mxu1  ;;  %v14908_v33 = vpop.f32.mrb[54].mxu0  ;;  %v12088_v13 = vld [vmem:[%s18891_s1 + $0xe0] ss:$8 sps:$4 sm:$0xff]   ;;  %5752 = vmatprep.subr.bf16.mxu1 %v19488_v23 }
 0x36c   :  { %v14912_v9 = vpop.f32.mrb[54].mxu1  ;;  %v2677_v63 = vpop.f32.mrb[55].mxu0 }
 0x36d   :  { %v3128_v30 = vpop.f32.mrb[55].mxu1 }
 0x36e   :  { %3580 = vmatmul.mubr.bf16.gmra.mrb[160].mxu0 %v12088_v13 }
 0x36f   :  { %4031 = vmatmul.mubr.bf16.gmra.mrb[160].mxu1 %v12088_v13  ;;  %10393 = vmatprep.mubr.msk.bf16.mxu0 %vm462_vm0, %v12089_v20 }
 0x370   :  { %10434 = vmatprep.mubr.msk.bf16.mxu1 %vm462_vm0, %v12089_v20  ;;  %v12091_v20 = vld [vmem:[%s18891_s1 + $0x104] ss:$8 sps:$4 sm:$0xff]  }
 0x371   :  { %v14924_v30 = vpop.f32.mrb[56].mxu0 }
 0x372   :  { %v14926_v63 = vpop.f32.mrb[56].mxu1  ;;  %v2682_v45 = vpop.f32.mrb[57].mxu0 }
 0x373   :  { %v3133_v54 = vpop.f32.mrb[57].mxu1  ;;  %v14928_v15 = vpop.f32.mrb[58].mxu0 }
 0x374   :  { %v14930_v44 = vpop.f32.mrb[58].mxu1  ;;  %v2685_v23 = vpop.f32.mrb[59].mxu0 }
 0x375   :  { %v3136_v13 = vpop.f32.mrb[59].mxu1 }
 0x376   :  { %3588 = vmatmul.mubr.bf16.gmra.mrb[164].mxu0 %v12090_v46 }
 0x377   :  { %4039 = vmatmul.mubr.bf16.gmra.mrb[164].mxu1 %v12090_v46  ;;  %10394 = vmatprep.mubr.msk.bf16.mxu0 %vm462_vm0, %v12091_v20 }
 0x378   :  { %10435 = vmatprep.mubr.msk.bf16.mxu1 %vm462_vm0, %v12091_v20  ;;  %v12093_v20 = vld [vmem:[%s18891_s1 + $0x114] ss:$8 sps:$4 sm:$0xff]  }
 0x379   :  { %v14940_v45 = vpop.f32.mrb[60].mxu0 }
 0x37a   :  { %19518 = vst [vmem:[#allocation20_spill] sm:$0xff] %v14940_v45  ;;  %v14942_v54 = vpop.f32.mrb[60].mxu1  ;;  %v2690_v23 = vpop.f32.mrb[61].mxu0 }
 0x37b   :  { %19519 = vst [vmem:[#allocation25_spill] sm:$0xff] %v14942_v54  ;;  %v3141_v13 = vpop.f32.mrb[61].mxu1  ;;  %v14944_v8 = vpop.f32.mrb[62].mxu0 }
 0x37c   :  { %19520 = vst [vmem:[#allocation56_spill] sm:$0xff] %v14944_v8  ;;  %v14946_v32 = vpop.f32.mrb[62].mxu1  ;;  %v2693_v4 = vpop.f32.mrb[63].mxu0 }
 0x37d   :  { %19521 = vst [vmem:[#allocation57_spill] sm:$0xff] %v14946_v32  ;;  %v3144_v46 = vpop.f32.mrb[63].mxu1 }
 0x37e   :  { %3596 = vmatmul.mubr.bf16.gmra.mrb[168].mxu0 %v12092_v58 }
 0x37f   :  { %4047 = vmatmul.mubr.bf16.gmra.mrb[168].mxu1 %v12092_v58  ;;  %10395 = vmatprep.mubr.msk.bf16.mxu0 %vm462_vm0, %v12093_v20 }
 0x380   :  { %10436 = vmatprep.mubr.msk.bf16.mxu1 %vm462_vm0, %v12093_v20  ;;  %v12095_v20 = vld [vmem:[%s18891_s1 + $0x124] ss:$8 sps:$4 sm:$0xff]  }
 0x381   :  { %v14956_v23 = vpop.f32.mrb[64].mxu0 }
 0x382   :  { %19522 = vst [vmem:[#allocation38_spill] sm:$0xff] %v14956_v23  ;;  %v14958_v13 = vpop.f32.mrb[64].mxu1  ;;  %v2698_v4 = vpop.f32.mrb[65].mxu0  ;;  %v12096_v23 = vld [vmem:[%s18891_s1 + $0x120] ss:$8 sps:$4 sm:$0xff]  }
 0x383   :  { %19523 = vst [vmem:[#allocation43_spill] sm:$0xff] %v14958_v13  ;;  %v3149_v46 = vpop.f32.mrb[65].mxu1  ;;  %v14960_v32 = vpop.f32.mrb[66].mxu0 }
 0x384   :  { %19524 = vst [vmem:[#allocation47_spill] sm:$0xff] %v14960_v32  ;;  %v14962_v8 = vpop.f32.mrb[66].mxu1  ;;  %v2701_v54 = vpop.f32.mrb[67].mxu0 }
 0x385   :  { %19525 = vst [vmem:[#allocation7_spill] sm:$0xff] %v14962_v8  ;;  %v3152_v58 = vpop.f32.mrb[67].mxu1 }
 0x386   :  { %3604 = vmatmul.mubr.bf16.gmra.mrb[172].mxu0 %v12094_v12 }
 0x387   :  { %4055 = vmatmul.mubr.bf16.gmra.mrb[172].mxu1 %v12094_v12  ;;  %10396 = vmatprep.mubr.msk.bf16.mxu0 %vm462_vm0, %v12095_v20 }
 0x388   :  { %10437 = vmatprep.mubr.msk.bf16.mxu1 %vm462_vm0, %v12095_v20  ;;  %v12097_v20 = vld [vmem:[%s18891_s1 + $0x134] ss:$8 sps:$4 sm:$0xff]  }
 0x389   :  { %v14972_v4 = vpop.f32.mrb[68].mxu0 }
 0x38a   :  { %19526 = vst [vmem:[#allocation48_spill] sm:$0xff] %v14972_v4  ;;  %v14974_v46 = vpop.f32.mrb[68].mxu1  ;;  %v2706_v54 = vpop.f32.mrb[69].mxu0 }
 0x38b   :  { %19527 = vst [vmem:[#allocation26_spill] sm:$0xff] %v14974_v46  ;;  %v3157_v58 = vpop.f32.mrb[69].mxu1  ;;  %v14976_v8 = vpop.f32.mrb[70].mxu0 }
 0x38c   :  { %19528 = vst [vmem:[#allocation21_spill] sm:$0xff] %v14976_v8  ;;  %v14978_v32 = vpop.f32.mrb[70].mxu1  ;;  %v2709_v13 = vpop.f32.mrb[71].mxu0 }
 0x38d   :  { %19529 = vst [vmem:[#allocation44_spill] sm:$0xff] %v14978_v32  ;;  %v3160_v12 = vpop.f32.mrb[71].mxu1 }
 0x38e   :  { %3612 = vmatmul.mubr.bf16.gmra.mrb[176].mxu0 %v12096_v23 }
 0x38f   :  { %4063 = vmatmul.mubr.bf16.gmra.mrb[176].mxu1 %v12096_v23  ;;  %10397 = vmatprep.mubr.msk.bf16.mxu0 %vm462_vm0, %v12097_v20 }
 0x390   :  { %10438 = vmatprep.mubr.msk.bf16.mxu1 %vm462_vm0, %v12097_v20  ;;  %v12098_v20 = vld [vmem:[%s18891_s1 + $0x130] ss:$8 sps:$4 sm:$0xff]  }
 0x391   :  { %v14988_v54 = vpop.f32.mrb[72].mxu0 }
 0x392   :  { %v14990_v58 = vpop.f32.mrb[72].mxu1  ;;  %v2714_v13 = vpop.f32.mrb[73].mxu0 }
 0x393   :  { %v3165_v12 = vpop.f32.mrb[73].mxu1  ;;  %v2715_v32 = vpop.f32.mrb[74].mxu0  ;;  %v19531_v13 = vmax.f32 %v14482_v51, %v14618_v18  ;;  %v19532_v18 = vmax.f32 %v14484_v47, %v14630_v3  ;;  %v12100_v3 = vld [vmem:[%s18891_s1 + $0x140] ss:$8 sps:$4 sm:$0xff]  }
 0x394   :  { %v2790_v8 = vmax.f32 %v14832_v14, %v2715_v32  ;;  %v3166_v46 = vpop.f32.mrb[74].mxu1  ;;  %v2717_v4 = vpop.f32.mrb[75].mxu0  ;;  %v12099_v32 = vld [vmem:[%s18891_s1 + $0x144] ss:$8 sps:$4 sm:$0xff]  }
 0x395   :  { %v3241_v23 = vmax.f32 %v14835_v42, %v3166_v46  ;;  %v3168_v45 = vpop.f32.mrb[75].mxu1 }
 0x396   :  { %v2805_v62 = vmax.f32 %v19530_v38, %v2790_v8  ;;  %3620 = vmatmul.mubr.bf16.gmra.mrb[180].mxu0 %v12098_v20 }
 0x397   :  { %v3256_v12 = vmax.f32 %v19531_v13, %v3241_v23  ;;  %4071 = vmatmul.mubr.bf16.gmra.mrb[180].mxu1 %v12098_v20  ;;  %10398 = vmatprep.mubr.msk.bf16.mxu0 %vm462_vm0, %v12099_v32 }
 0x398   :  { %10439 = vmatprep.mubr.msk.bf16.mxu1 %vm462_vm0, %v12099_v32  ;;  %v2820_v51 = vadd.f32 %v2805_v62, %v13484_v60  ;;  %v19534_v62 = vmax.f32 %v14501_v11, %v14638_v31 }
 0x399   :  { %v2720_v10 = vpop.f32.mrb[76].mxu0  ;;  %v3271_v13 = vadd.f32 %v3256_v12, %v13484_v60 }
 0x39a   :  { %v2791_v38 = vmax.f32 %v14844_v28, %v2720_v10  ;;  %v3171_v8 = vpop.f32.mrb[76].mxu1  ;;  %v2722_v25 = vpop.f32.mrb[77].mxu0  ;;  %v19533_v28 = vmax.f32 %v14487_v61, %v14634_v26  ;;  %v19535_v61 = vmax.f32 %v14504_v41, %v14642_v24  ;;  %v2835_v11 = vmax.f32 %v2820_v51, 0.0 }
 0x39b   :  { %v3242_v42 = vmax.f32 %v14846_v40, %v3171_v8  ;;  %v3173_v14 = vpop.f32.mrb[77].mxu1  ;;  %v2723_v45 = vpop.f32.mrb[78].mxu0  ;;  %v3286_v12 = vmax.f32 %v3271_v13, 0.0 }
 0x39c   :  { %v2806_v4 = vmax.f32 %v19532_v18, %v2791_v38  ;;  %v2792_v46 = vmax.f32 %v14864_v52, %v2723_v45  ;;  %v3174_v23 = vpop.f32.mrb[78].mxu1  ;;  %v2725_v20 = vpop.f32.mrb[79].mxu0 }
 0x39d   :  { %v3257_v32 = vmax.f32 %v19533_v28, %v3242_v42  ;;  %v3243_v40 = vmax.f32 %v14867_v53, %v3174_v23  ;;  %v3176_v10 = vpop.f32.mrb[79].mxu1  ;;  %v12101_v53 = vld [vmem:[%s18891_s1 + $0x154] ss:$8 sps:$4 sm:$0xff]   ;;  %v19536_v23 = vmax.f32 %v14506_v57, %v14660_v16  ;;  %v19538_v57 = vmax.f32 %v14518_v6, %v14670_v7 }
 0x39e   :  { %v2821_v8 = vadd.f32 %v2806_v4, %v13498_v36  ;;  %v2807_v47 = vmax.f32 %v19534_v62, %v2792_v46  ;;  %3628 = vmatmul.mubr.bf16.gmra.mrb[184].mxu0 %v12100_v3 }
 0x39f   :  { %v3272_v52 = vadd.f32 %v3257_v32, %v13498_v36  ;;  %v3258_v26 = vmax.f32 %v19535_v61, %v3243_v40  ;;  %4079 = vmatmul.mubr.bf16.gmra.mrb[184].mxu1 %v12100_v3  ;;  %10399 = vmatprep.mubr.msk.bf16.mxu0 %vm462_vm0, %v12101_v53 }
 0x3a0   :  { %v2836_v31 = vmax.f32 %v2821_v8, 0.0  ;;  %10440 = vmatprep.mubr.msk.bf16.mxu1 %vm462_vm0, %v12101_v53  ;;  %v2822_v51 = vadd.f32 %v2807_v47, %v13511_v55 }
 0x3a1   :  { %v3287_v38 = vmax.f32 %v3272_v52, 0.0  ;;  %v2728_v25 = vpop.f32.mrb[80].mxu0  ;;  %v3273_v40 = vadd.f32 %v3258_v26, %v13511_v55 }
 0x3a2   :  { %v2850_v42 = vpack.c.bf16 %v2836_v31, %v2835_v11  ;;  %v2793_v14 = vmax.f32 %v14876_v39, %v2728_v25  ;;  %v3179_v45 = vpop.f32.mrb[80].mxu1  ;;  %v2730_v41 = vpop.f32.mrb[81].mxu0  ;;  %v2837_v6 = vmax.f32 %v2822_v51, 0.0 }
 0x3a3   :  { %v3301_v24 = vpack.c.bf16 %v3287_v38, %v3286_v12  ;;  %v3244_v18 = vmax.f32 %v14878_v27, %v3179_v45  ;;  %v3181_v4 = vpop.f32.mrb[81].mxu1  ;;  %v2731_v46 = vpop.f32.mrb[82].mxu0  ;;  %v19537_v27 = vmax.f32 %v14508_v50, %v14664_v17  ;;  %v19539_v50 = vmax.f32 %v14520_v21, %v14674_v37 }
 0x3a4   :  { %2858 = vst.msk [vmem:[#allocation2 + $0xf0] sm:$0xff] %vm988_vm2, %v2850_v42  ;;  %v2808_v20 = vmax.f32 %v19536_v23, %v2793_v14  ;;  %v2794_v13 = vmax.f32 %v14896_v5, %v2731_v46  ;;  %v3182_v28 = vpop.f32.mrb[82].mxu1  ;;  %v2733_v32 = vpop.f32.mrb[83].mxu0  ;;  %v12102_v5 = vld [vmem:[%s18891_s1 + $0x150] ss:$8 sps:$4 sm:$0xff]   ;;  %v3288_v52 = vmax.f32 %v3273_v40, 0.0  ;;  %v19540_v14 = vmax.f32 %v14522_v59, %v14686_v48 }
 0x3a5   :  { %v3317_v39 = vrot.slane %v3301_v24, 4  ;;  %v3259_v10 = vmax.f32 %v19537_v27, %v3244_v18  ;;  %v3245_v8 = vmax.f32 %v14905_v19, %v3182_v28  ;;  %v3184_v62 = vpop.f32.mrb[83].mxu1  ;;  %v12103_v19 = vld [vmem:[%s18891_s1 + $0x164] ss:$8 sps:$4 sm:$0xff]   ;;  %v19542_v59 = vmax.f32 %v14534_v22, %v14694_v1 }
 0x3a6   :  { %v2823_v47 = vadd.f32 %v2808_v20, %v13528_v0  ;;  %v2809_v16 = vmax.f32 %v19538_v57, %v2794_v13  ;;  %3636 = vmatmul.mubr.bf16.gmra.mrb[188].mxu0 %v12102_v5 }
 0x3a7   :  { %3340 = vst.msk [vmem:[#allocation2 + $0x128] sm:$0xf0] %vm1473_vm3, %v3317_v39  ;;  %v3274_v3 = vadd.f32 %v3259_v10, %v13528_v0  ;;  %v3260_v17 = vmax.f32 %v19539_v50, %v3245_v8  ;;  %4087 = vmatmul.mubr.bf16.gmra.mrb[188].mxu1 %v12102_v5  ;;  %10400 = vmatprep.mubr.msk.bf16.mxu0 %vm462_vm0, %v12103_v19  ;;  %v19544_v5 = vld [vmem:[#allocation13_spill] sm:$0xff] }
 0x3a8   :  { %v2838_v7 = vmax.f32 %v2823_v47, 0.0  ;;  %10441 = vmatprep.mubr.msk.bf16.mxu1 %vm462_vm0, %v12103_v19  ;;  %v2824_v42 = vadd.f32 %v2809_v16, %v13556_v29  ;;  %v19547_v19 = vld [vmem:[#allocation20_spill] sm:$0xff] }
 0x3a9   :  { %v3289_v61 = vmax.f32 %v3274_v3, 0.0  ;;  %v2736_v26 = vpop.f32.mrb[84].mxu0  ;;  %v3275_v4 = vadd.f32 %v3260_v17, %v13556_v29  ;;  %v19545_v3 = vld [vmem:[#allocation23_spill] sm:$0xff] }
 0x3aa   :  { %v2851_v53 = vpack.c.bf16 %v2838_v7, %v2837_v6  ;;  %v2795_v11 = vmax.f32 %v14908_v33, %v2736_v26  ;;  %v3187_v31 = vpop.f32.mrb[84].mxu1  ;;  %v2738_v21 = vpop.f32.mrb[85].mxu0  ;;  %v2839_v22 = vmax.f32 %v2824_v42, 0.0  ;;  %v19546_v50 = vmax.f32 %v19544_v5, %v19545_v3  ;;  %v19548_v26 = vld [vmem:[#allocation39_spill] sm:$0xff]  ;;  %v19554_v42 = vld [vmem:[#allocation18_spill] sm:$0xff] }
 0x3ab   :  { %v3302_v37 = vpack.c.bf16 %v3289_v61, %v3288_v52  ;;  %v3246_v12 = vmax.f32 %v14912_v9, %v3187_v31  ;;  %v3189_v38 = vpop.f32.mrb[85].mxu1  ;;  %v2739_v25 = vpop.f32.mrb[86].mxu0  ;;  %v19541_v9 = vmax.f32 %v14524_v43, %v14690_v49  ;;  %v19543_v43 = vmax.f32 %v14536_v56, %v14698_v2  ;;  %v19551_v31 = vld [vmem:[#allocation25_spill] sm:$0xff] }
 0x3ac   :  { %2859 = vst.msk [vmem:[#allocation2 + $0xf8] sm:$0xff] %vm988_vm2, %v2851_v53  ;;  %v2810_v45 = vmax.f32 %v19540_v14, %v2795_v11  ;;  %v2796_v41 = vmax.f32 %v14924_v30, %v2739_v25  ;;  %v3190_v24 = vpop.f32.mrb[86].mxu1  ;;  %v2741_v18 = vpop.f32.mrb[87].mxu0  ;;  %v12104_v30 = vld [vmem:[%s18891_s1 + $0x160] ss:$8 sps:$4 sm:$0xff]   ;;  %v3290_v32 = vmax.f32 %v3275_v4, 0.0 }
 0x3ad   :  { %v3318_v33 = vrot.slane %v3302_v37, 4  ;;  %v3261_v46 = vmax.f32 %v19541_v9, %v3246_v12  ;;  %v3247_v51 = vmax.f32 %v14926_v63, %v3190_v24  ;;  %v3192_v23 = vpop.f32.mrb[87].mxu1  ;;  %v12105_v63 = vld [vmem:[%s18891_s1 + $0x174] ss:$8 sps:$4 sm:$0xff]   ;;  %v19549_v53 = vld [vmem:[#allocation51_spill] sm:$0xff] }
 0x3ae   :  { %v2825_v20 = vadd.f32 %v2810_v45, %v13560_v35  ;;  %v2811_v48 = vmax.f32 %v19542_v59, %v2796_v41  ;;  %3644 = vmatmul.mubr.bf16.gmra.mrb[192].mxu0 %v12104_v30  ;;  %v19552_v12 = vld [vmem:[#allocation29_spill] sm:$0xff]  ;;  %v19553_v25 = vld [vmem:[#allocation8_spill] sm:$0xff]  ;;  %v12107_v23 = vld [vmem:[%s18891_s1 + $0x184] ss:$8 sps:$4 sm:$0xff]  }
 0x3af   :  { %v3319_v13 = vsel %vm553_vm1, %v3317_v39, %v3318_v33  ;;  %v3276_v28 = vadd.f32 %v3261_v46, %v13560_v35  ;;  %v3262_v49 = vmax.f32 %v19543_v43, %v3247_v51  ;;  %4095 = vmatmul.mubr.bf16.gmra.mrb[192].mxu1 %v12104_v30  ;;  %10401 = vmatprep.mubr.msk.bf16.mxu0 %vm462_vm0, %v12105_v63  ;;  %v12106_v41 = vld [vmem:[%s18891_s1 + $0x170] ss:$8 sps:$4 sm:$0xff]  }
 0x3b0   :  { %3341 = vst.msk [vmem:[#allocation2 + $0x130] sm:$0xff] %vm988_vm2, %v3319_v13  ;;  %v2840_v1 = vmax.f32 %v2825_v20, 0.0  ;;  %10442 = vmatprep.mubr.msk.bf16.mxu1 %vm462_vm0, %v12105_v63  ;;  %v2826_v16 = vadd.f32 %v2811_v48, %v13591_v34  ;;  %v19555_v14 = vmax.f32 %v19553_v25, %v19554_v42  ;;  %v19556_v4 = vld [vmem:[#allocation33_spill] sm:$0xff] }
 0x3b1   :  { %v3291_v39 = vmax.f32 %v3276_v28, 0.0  ;;  %v2744_v40 = vpop.f32.mrb[88].mxu0  ;;  %v3277_v61 = vadd.f32 %v3262_v49, %v13591_v34  ;;  %v19557_v9 = vld [vmem:[#allocation41_spill] sm:$0xff]  ;;  %v19559_v28 = vld [vmem:[#allocation56_spill] sm:$0xff] }
 0x3b2   :  { %v2852_v27 = vpack.c.bf16 %v2840_v1, %v2839_v22  ;;  %v2797_v2 = vmax.f32 %v14928_v15, %v2744_v40  ;;  %v3195_v56 = vpop.f32.mrb[88].mxu1  ;;  %v2746_v10 = vpop.f32.mrb[89].mxu0  ;;  %v19558_v46 = vmax.f32 %v19556_v4, %v19557_v9  ;;  %v2841_v20 = vmax.f32 %v2826_v16, 0.0  ;;  %v19560_v1 = vld [vmem:[#allocation57_spill] sm:$0xff] }
 0x3b3   :  { %v3303_v8 = vpack.c.bf16 %v3291_v39, %v3290_v32  ;;  %v3248_v62 = vmax.f32 %v14930_v44, %v3195_v56  ;;  %v3197_v47 = vpop.f32.mrb[89].mxu1  ;;  %v2747_v57 = vpop.f32.mrb[90].mxu0  ;;  %v19550_v44 = vmax.f32 %v19548_v26, %v19549_v53  ;;  %v19562_v56 = vld [vmem:[#allocation5_spill] sm:$0xff]  ;;  %v19563_v10 = vld [vmem:[#allocation36_spill] sm:$0xff]  ;;  %v19570_v53 = vld [vmem:[#allocation30_spill] sm:$0xff] }
 0x3b4   :  { %2860 = vst.msk [vmem:[#allocation2 + $0x100] sm:$0xff] %vm988_vm2, %v2852_v27  ;;  %v2812_v17 = vmax.f32 %v19546_v50, %v2797_v2  ;;  %v2798_v6 = vmax.f32 %v19547_v19, %v2747_v57  ;;  %v3198_v7 = vpop.f32.mrb[90].mxu1  ;;  %v2749_v52 = vpop.f32.mrb[91].mxu0  ;;  %v19561_v27 = vld [vmem:[#allocation10_spill] sm:$0xff]  ;;  %v19567_v19 = vld [vmem:[#allocation24_spill] sm:$0xff] }
 0x3b5   :  { %v3320_v15 = vrot.slane %v3303_v8, 4  ;;  %v3263_v11 = vmax.f32 %v19550_v44, %v3248_v62  ;;  %v3249_v21 = vmax.f32 %v19551_v31, %v3198_v7  ;;  %v3200_v37 = vpop.f32.mrb[91].mxu1  ;;  %v19564_v8 = vmax.f32 %v19562_v56, %v19563_v10  ;;  %v19565_v47 = vld [vmem:[#allocation38_spill] sm:$0xff]  ;;  %v19569_v52 = vld [vmem:[#allocation43_spill] sm:$0xff]  ;;  %v19572_v31 = vld [vmem:[#allocation52_spill] sm:$0xff] }
 0x3b6   :  { %v2827_v38 = vadd.f32 %v2812_v17, %v19552_v12  ;;  %v2813_v45 = vmax.f32 %v19555_v14, %v2798_v6  ;;  %3652 = vmatmul.mubr.bf16.gmra.mrb[196].mxu0 %v12106_v41  ;;  %v19566_v17 = vld [vmem:[#allocation27_spill] sm:$0xff]  ;;  %v19574_v14 = vld [vmem:[#allocation22_spill] sm:$0xff] }
 0x3b7   :  { %v3321_v24 = vsel %vm553_vm1, %v3318_v33, %v3320_v15  ;;  %v3278_v18 = vadd.f32 %v3263_v11, %v19552_v12  ;;  %v3264_v51 = vmax.f32 %v19558_v46, %v3249_v21  ;;  %4103 = vmatmul.mubr.bf16.gmra.mrb[196].mxu1 %v12106_v41  ;;  %10402 = vmatprep.mubr.msk.bf16.mxu0 %vm462_vm0, %v12107_v23  ;;  %v3292_v33 = vmax.f32 %v3277_v61, 0.0  ;;  %v19571_v11 = vld [vmem:[#allocation14_spill] sm:$0xff] }
 0x3b8   :  { %3342 = vst.msk [vmem:[#allocation2 + $0x138] sm:$0xff] %vm988_vm2, %v3321_v24  ;;  %v2842_v59 = vmax.f32 %v2827_v38, 0.0  ;;  %10443 = vmatprep.mubr.msk.bf16.mxu1 %vm462_vm0, %v12107_v23  ;;  %v2828_v2 = vadd.f32 %v2813_v45, %v19561_v27  ;;  %v19568_v6 = vmax.f32 %v19566_v17, %v19567_v19  ;;  %v19573_v21 = vmax.f32 %v19571_v11, %v19572_v31  ;;  %v12108_v38 = vld [vmem:[%s18891_s1 + $0x180] ss:$8 sps:$4 sm:$0xff]   ;;  %v19575_v45 = vld [vmem:[#allocation53_spill] sm:$0xff] }
 0x3b9   :  { %v3293_v48 = vmax.f32 %v3278_v18, 0.0  ;;  %v2752_v30 = vpop.f32.mrb[92].mxu0  ;;  %v3279_v50 = vadd.f32 %v3264_v51, %v19561_v27  ;;  %v19576_v41 = vmax.f32 %v19574_v14, %v19575_v45  ;;  %v12109_v18 = vld [vmem:[%s18891_s1 + $0x194] ss:$8 sps:$4 sm:$0xff]   ;;  %v19587_v17 = vld [vmem:[#allocation26_spill] sm:$0xff] }
 0x3ba   :  { %v2853_v13 = vpack.c.bf16 %v2842_v59, %v2841_v20  ;;  %v2799_v43 = vmax.f32 %v19559_v28, %v2752_v30  ;;  %v3203_v49 = vpop.f32.mrb[92].mxu1  ;;  %v2754_v63 = vpop.f32.mrb[93].mxu0  ;;  %v2843_v4 = vmax.f32 %v2828_v2, 0.0  ;;  %v19577_v20 = vld [vmem:[#allocation47_spill] sm:$0xff]  ;;  %v19583_v2 = vld [vmem:[#allocation48_spill] sm:$0xff] }
 0x3bb   :  { %v3304_v22 = vpack.c.bf16 %v3293_v48, %v3292_v33  ;;  %v3250_v32 = vmax.f32 %v19560_v1, %v3203_v49  ;;  %v3205_v39 = vpop.f32.mrb[93].mxu1  ;;  %v2755_v40 = vpop.f32.mrb[94].mxu0  ;;  %v19579_v63 = vld [vmem:[#allocation31_spill] sm:$0xff]  ;;  %v19580_v1 = vld [vmem:[#allocation34_spill] sm:$0xff]  ;;  %v12110_v31 = vld [vmem:[%s18891_s1 + $0x190] ss:$8 sps:$4 sm:$0xff]  }
 0x3bc   :  { %2861 = vst.msk [vmem:[#allocation2 + $0x108] sm:$0xff] %vm988_vm2, %v2853_v13  ;;  %v2814_v62 = vmax.f32 %v19564_v8, %v2799_v43  ;;  %v2800_v57 = vmax.f32 %v19565_v47, %v2755_v40  ;;  %v3206_v16 = vpop.f32.mrb[94].mxu1  ;;  %v2757_v5 = vpop.f32.mrb[95].mxu0  ;;  %v19578_v13 = vld [vmem:[#allocation7_spill] sm:$0xff] }
 0x3bd   :  { %v3322_v3 = vrot.slane %v3304_v22, 4  ;;  %v3265_v7 = vmax.f32 %v19568_v6, %v3250_v32  ;;  %v3251_v61 = vmax.f32 %v19569_v52, %v3206_v16  ;;  %v3208_v26 = vpop.f32.mrb[95].mxu1  ;;  %v19581_v32 = vld [vmem:[#allocation4_spill] sm:$0xff]  ;;  %v19585_v16 = vld [vmem:[#allocation42_spill] sm:$0xff] }
 0x3be   :  { %v2829_v44 = vadd.f32 %v2814_v62, %v19570_v53  ;;  %v2815_v37 = vmax.f32 %v19573_v21, %v2800_v57  ;;  %3660 = vmatmul.mubr.bf16.gmra.mrb[200].mxu0 %v12108_v38  ;;  %v19582_v39 = vmax.f32 %v19580_v1, %v19581_v32  ;;  %v19584_v57 = vld [vmem:[#allocation40_spill] sm:$0xff]  ;;  %v19590_v26 = vld [vmem:[#allocation54_spill] sm:$0xff] }
 0x3bf   :  { %v3323_v25 = vsel %vm553_vm1, %v3320_v15, %v3322_v3  ;;  %v3280_v42 = vadd.f32 %v3265_v7, %v19570_v53  ;;  %v3266_v24 = vmax.f32 %v19576_v41, %v3251_v61  ;;  %4111 = vmatmul.mubr.bf16.gmra.mrb[200].mxu1 %v12108_v38  ;;  %10403 = vmatprep.mubr.msk.bf16.mxu0 %vm462_vm0, %v12109_v18  ;;  %v3294_v15 = vmax.f32 %v3279_v50, 0.0  ;;  %v19588_v7 = vld [vmem:[#allocation11_spill] sm:$0xff]  ;;  %v19589_v61 = vld [vmem:[#allocation45_spill] sm:$0xff]  ;;  %v19592_v38 = vld [vmem:[#allocation28_spill] sm:$0xff] }
 0x3c0   :  { %3343 = vst.msk [vmem:[#allocation2 + $0x140] sm:$0xff] %vm988_vm2, %v3323_v25  ;;  %v2844_v9 = vmax.f32 %v2829_v44, 0.0  ;;  %10444 = vmatprep.mubr.msk.bf16.mxu1 %vm462_vm0, %v12109_v18  ;;  %v2830_v22 = vadd.f32 %v2815_v37, %v19579_v63  ;;  %v19586_v5 = vmax.f32 %v19584_v57, %v19585_v16  ;;  %v19591_v44 = vmax.f32 %v19589_v61, %v19590_v26  ;;  %v19593_v25 = vld [vmem:[#allocation19_spill] sm:$0xff] }
 0x3c1   :  { %v3295_v46 = vmax.f32 %v3280_v42, 0.0  ;;  %v2760_v51 = vpop.f32.mrb[96].mxu0  ;;  %v3281_v47 = vadd.f32 %v3266_v24, %v19579_v63  ;;  %v19594_v42 = vmax.f32 %v19592_v38, %v19593_v25  ;;  %v12111_v45 = vld [vmem:[%s18891_s1 + $0x1a4] ss:$8 sps:$4 sm:$0xff]  }
 0x3c2   :  { %v2854_v23 = vpack.c.bf16 %v2844_v9, %v2843_v4  ;;  %v2801_v59 = vmax.f32 %v19577_v20, %v2760_v51  ;;  %v3211_v33 = vpop.f32.mrb[96].mxu1  ;;  %v2762_v48 = vpop.f32.mrb[97].mxu0  ;;  %v2845_v41 = vmax.f32 %v2830_v22, 0.0 }
 0x3c3   :  { %v3305_v30 = vpack.c.bf16 %v3295_v46, %v3294_v15  ;;  %v3252_v28 = vmax.f32 %v19578_v13, %v3211_v33  ;;  %v3213_v43 = vpop.f32.mrb[97].mxu1  ;;  %v2763_v49 = vpop.f32.mrb[98].mxu0  ;;  %v19595_v15 = vld [vmem:[#allocation21_spill] sm:$0xff]  ;;  %v19597_v13 = vld [vmem:[#allocation16_spill] sm:$0xff] }
 0x3c4   :  { %2862 = vst.msk [vmem:[#allocation2 + $0x110] sm:$0xff] %vm988_vm2, %v2854_v23  ;;  %v2816_v40 = vmax.f32 %v19582_v39, %v2801_v59  ;;  %v2802_v56 = vmax.f32 %v19583_v2, %v2763_v49  ;;  %v3214_v10 = vpop.f32.mrb[98].mxu1  ;;  %v2765_v8 = vpop.f32.mrb[99].mxu0  ;;  %v19596_v59 = vld [vmem:[#allocation44_spill] sm:$0xff]  ;;  %v19598_v43 = vld [vmem:[#allocation17_spill] sm:$0xff] }
 0x3c5   :  { %v3324_v62 = vrot.slane %v3305_v30, 4  ;;  %v3267_v50 = vmax.f32 %v19586_v5, %v3252_v28  ;;  %v3253_v19 = vmax.f32 %v19587_v17, %v3214_v10  ;;  %v3216_v6 = vpop.f32.mrb[99].mxu1  ;;  %v19599_v49 = vld [vmem:[#allocation49_spill] sm:$0xff]  ;;  %v19601_v10 = vld [vmem:[#allocation6_spill] sm:$0xff]  ;;  %v19602_v8 = vld [vmem:[#allocation55_spill] sm:$0xff] }
 0x3c6   :  { %v2831_v52 = vadd.f32 %v2816_v40, %v19588_v7  ;;  %v2817_v11 = vmax.f32 %v19591_v44, %v2802_v56  ;;  %3668 = vmatmul.mubr.bf16.gmra.mrb[204].mxu0 %v12110_v31  ;;  %v19600_v22 = vmax.f32 %v19598_v43, %v19599_v49  ;;  %v19606_v6 = vld [vmem:[#allocation37_spill] sm:$0xff] }
 0x3c7   :  { %v3325_v21 = vsel %vm553_vm1, %v3322_v3, %v3324_v62  ;;  %v3282_v37 = vadd.f32 %v3267_v50, %v19588_v7  ;;  %v3268_v14 = vmax.f32 %v19594_v42, %v3253_v19  ;;  %4119 = vmatmul.mubr.bf16.gmra.mrb[204].mxu1 %v12110_v31  ;;  %10404 = vmatprep.mubr.msk.bf16.mxu0 %vm462_vm0, %v12111_v45  ;;  %v3296_v3 = vmax.f32 %v3281_v47, 0.0  ;;  %v19604_v50 = vld [vmem:[#allocation32_spill] sm:$0xff]  ;;  %v19605_v19 = vld [vmem:[#allocation46_spill] sm:$0xff] }
 0x3c8   :  { %3344 = vst.msk [vmem:[#allocation2 + $0x148] sm:$0xff] %vm988_vm2, %v3325_v21  ;;  %v2846_v24 = vmax.f32 %v2831_v52, 0.0  ;;  %10445 = vmatprep.mubr.msk.bf16.mxu1 %vm462_vm0, %v12111_v45  ;;  %v2832_v28 = vadd.f32 %v2817_v11, %v19597_v13  ;;  %v19603_v47 = vmax.f32 %v19601_v10, %v19602_v8  ;;  %v19607_v52 = vmax.f32 %v19605_v19, %v19606_v6  ;;  %v19608_v11 = vld [vmem:[#allocation35_spill] sm:$0xff]  ;;  %v19609_v31 = vld [vmem:[#allocation50_spill] sm:$0xff]  ;;  %v19611_v42 = vld [vmem:[#allocation12_spill] sm:$0xff] }
 0x3c9   :  { %v3297_v18 = vmax.f32 %v3282_v37, 0.0  ;;  %v2768_v4 = vpop.f32.mrb[100].mxu0  ;;  %v3283_v56 = vadd.f32 %v3268_v14, %v19597_v13  ;;  %v19610_v21 = vmax.f32 %v19608_v11, %v19609_v31  ;;  %v12113_v37 = vld [vmem:[%s18891_s1 + $0x1b4] ss:$8 sps:$4 sm:$0xff]   ;;  %v12114_v43 = vld [vmem:[%s18891_s1 + $0x1b0] ss:$8 sps:$4 sm:$0xff]  }
 0x3ca   :  { %v2855_v9 = vpack.c.bf16 %v2846_v24, %v2845_v41  ;;  %v2803_v46 = vmax.f32 %v19595_v15, %v2768_v4  ;;  %v3219_v51 = vpop.f32.mrb[100].mxu1  ;;  %v2770_v23 = vpop.f32.mrb[101].mxu0  ;;  %v2847_v38 = vmax.f32 %v2832_v28, 0.0  ;;  %v12118_v11 = vld [vmem:[%s18891_s1 + $0x1d0] ss:$8 sps:$4 sm:$0xff]  }
 0x3cb   :  { %v3306_v20 = vpack.c.bf16 %v3297_v18, %v3296_v3  ;;  %v3254_v33 = vmax.f32 %v19596_v59, %v3219_v51  ;;  %v3221_v48 = vpop.f32.mrb[101].mxu1  ;;  %v2771_v30 = vpop.f32.mrb[102].mxu0  ;;  %v12119_v31 = vld [vmem:[%s18891_s1 + $0x4] ss:$8 sps:$4 sm:$0xff]  }
 0x3cc   :  { %2863 = vst.msk [vmem:[#allocation2 + $0x118] sm:$0xff] %vm988_vm2, %v2855_v9  ;;  %v2818_v1 = vmax.f32 %v19600_v22, %v2803_v46  ;;  %v2804_v32 = vmax.f32 %v14988_v54, %v2771_v30  ;;  %v3222_v39 = vpop.f32.mrb[102].mxu1  ;;  %v2773_v40 = vpop.f32.mrb[103].mxu0  ;;  %v12112_v54 = vld [vmem:[%s18891_s1 + $0x1a0] ss:$8 sps:$4 sm:$0xff]  }
 0x3cd   :  { %v3326_v2 = vrot.slane %v3306_v20, 4  ;;  %v3269_v57 = vmax.f32 %v19603_v47, %v3254_v33  ;;  %v3255_v16 = vmax.f32 %v14990_v58, %v3222_v39  ;;  %v3224_v5 = vpop.f32.mrb[103].mxu1 }
 0x3ce   :  { %v2833_v17 = vadd.f32 %v2818_v1, %v19604_v50  ;;  %v2819_v61 = vmax.f32 %v19607_v52, %v2804_v32  ;;  %3676 = vmatmul.mubr.bf16.gmra.mrb[208].mxu0 %v12112_v54  ;;  %v12115_v1 = vld [vmem:[%s18891_s1 + $0x1c4] ss:$8 sps:$4 sm:$0xff]   ;;  %v12117_v5 = vld [vmem:[%s18891_s1 + $0x1d4] ss:$8 sps:$4 sm:$0xff]  }
 0x3cf   :  { %v3327_v26 = vsel %vm553_vm1, %v3324_v62, %v3326_v2  ;;  %v3284_v44 = vadd.f32 %v3269_v57, %v19604_v50  ;;  %v3270_v58 = vmax.f32 %v19610_v21, %v3255_v16  ;;  %4127 = vmatmul.mubr.bf16.gmra.mrb[208].mxu1 %v12112_v54  ;;  %10405 = vmatprep.mubr.msk.bf16.mxu0 %vm462_vm0, %v12113_v37  ;;  %v3298_v62 = vmax.f32 %v3283_v56, 0.0  ;;  %v12116_v16 = vld [vmem:[%s18891_s1 + $0x1c0] ss:$8 sps:$4 sm:$0xff]  }
 0x3d0   :  { %3345 = vst.msk [vmem:[#allocation2 + $0x150] sm:$0xff] %vm988_vm2, %v3327_v26  ;;  %v2848_v25 = vmax.f32 %v2833_v17, 0.0  ;;  %v2834_v14 = vadd.f32 %v2819_v61, %v19611_v42  ;;  %10446 = vmatprep.mubr.msk.bf16.mxu1 %vm462_vm0, %v12113_v37 }
 0x3d1   :  { %v3299_v45 = vmax.f32 %v3284_v44, 0.0  ;;  %v3285_v41 = vadd.f32 %v3270_v58, %v19611_v42  ;;  %v15223_v24 = vpop.f32.mrb[104].mxu0 }
 0x3d2   :  { %v2856_v3 = vpack.c.bf16 %v2848_v25, %v2847_v38  ;;  %v2849_v18 = vmax.f32 %v2834_v14, 0.0  ;;  %v15225_v4 = vpop.f32.mrb[104].mxu1  ;;  %v3471_v9 = vpop.f32.mrb[105].mxu0 }
 0x3d3   :  { %v3307_v15 = vpack.c.bf16 %v3299_v45, %v3298_v62  ;;  %v3300_v46 = vmax.f32 %v3285_v41, 0.0  ;;  %v3922_v51 = vpop.f32.mrb[105].mxu1  ;;  %v15227_v23 = vpop.f32.mrb[106].mxu0  ;;  %v11757_v45 = vld [vmem:[%s18890_s0 + $0x118] sm:$0xff]  }
 0x3d4   :  { %2864 = vst.msk [vmem:[#allocation2 + $0x120] sm:$0xff] %vm988_vm2, %v2856_v3  ;;  %v2857_v20 = vpack.c.bf16 %v2849_v18, %v2849_v18  ;;  %v15230_v59 = vpop.f32.mrb[106].mxu1  ;;  %v3474_v33 = vpop.f32.mrb[107].mxu0  ;;  %v12120_v3 = vld [vmem:[%s18891_s1] ss:$8 sps:$4 sm:$0xff]  }
 0x3d5   :  { %v3328_v48 = vrot.slane %v3307_v15, 4  ;;  %v3308_v30 = vpack.c.bf16 %v3300_v46, %v3300_v46  ;;  %v3925_v28 = vpop.f32.mrb[107].mxu1  ;;  %v12121_v18 = vld [vmem:[%s18891_s1 + $0x14] ss:$8 sps:$4 sm:$0xff]   ;;  %v19615_v15 = vmov 0  }
 0x3d6   :  { %2865 = vst.msk [vmem:[#allocation2 + $0x128] sm:$0xf] %vm996_vm4, %v2857_v20  ;;  %3684 = vmatmul.mubr.bf16.gmra.mrb[212].mxu0 %v12114_v43  ;;  %v11758_v28 = vld [vmem:[%s18890_s0 + $0x134] sm:$0xff]  }
 0x3d7   :  { %v3329_v49 = vsel %vm553_vm1, %v3326_v2, %v3328_v48  ;;  %v3330_v22 = vrot.slane %v3308_v30, 4  ;;  %4135 = vmatmul.mubr.bf16.gmra.mrb[212].mxu1 %v12114_v43  ;;  %10406 = vmatprep.mubr.msk.bf16.mxu0 %vm462_vm0, %v12115_v1 }
 0x3d8   :  { %3346 = vst.msk [vmem:[#allocation2 + $0x158] sm:$0xff] %vm988_vm2, %v3329_v49  ;;  %10447 = vmatprep.mubr.msk.bf16.mxu1 %vm462_vm0, %v12115_v1  ;;  %v12122_v49 = vld [vmem:[%s18891_s1 + $0x10] ss:$8 sps:$4 sm:$0xff]   ;;  %v11759_v1 = vld [vmem:[%s18890_s0 + $0x120] sm:$0xff]  }
 0x3d9   :  { %v3331_v32 = vsel %vm553_vm1, %v3328_v48, %v3330_v22  ;;  %v15244_v39 = vpop.f32.mrb[108].mxu0  ;;  %v12123_v22 = vld [vmem:[%s18891_s1 + $0x24] ss:$8 sps:$4 sm:$0xff]  }
 0x3da   :  { %3347 = vst.msk [vmem:[#allocation2 + $0x160] sm:$0xff] %vm988_vm2, %v3331_v32  ;;  %v15247_v40 = vpop.f32.mrb[108].mxu1  ;;  %v3479_v2 = vpop.f32.mrb[109].mxu0 }
 0x3db   :  { %v3930_v56 = vpop.f32.mrb[109].mxu1  ;;  %v15249_v10 = vpop.f32.mrb[110].mxu0 }
 0x3dc   :  { %v15251_v8 = vpop.f32.mrb[110].mxu1  ;;  %v3482_v47 = vpop.f32.mrb[111].mxu0 }
 0x3dd   :  { %v3933_v57 = vpop.f32.mrb[111].mxu1 }
 0x3de   :  { %3692 = vmatmul.mubr.bf16.gmra.mrb[216].mxu0 %v12116_v16 }
 0x3df   :  { %4143 = vmatmul.mubr.bf16.gmra.mrb[216].mxu1 %v12116_v16  ;;  %10407 = vmatprep.mubr.msk.bf16.mxu0 %vm462_vm0, %v12117_v5 }
 0x3e0   :  { %10448 = vmatprep.mubr.msk.bf16.mxu1 %vm462_vm0, %v12117_v5 }
 0x3e1   :  { %v15261_v17 = vpop.f32.mrb[112].mxu0 }
 0x3e2   :  { %v15263_v19 = vpop.f32.mrb[112].mxu1  ;;  %v3487_v6 = vpop.f32.mrb[113].mxu0 }
 0x3e3   :  { %v3938_v52 = vpop.f32.mrb[113].mxu1  ;;  %v15265_v61 = vpop.f32.mrb[114].mxu0 }
 0x3e4   :  { %v15267_v54 = vpop.f32.mrb[114].mxu1  ;;  %v3490_v26 = vpop.f32.mrb[115].mxu0  ;;  %v12124_v52 = vld [vmem:[%s18891_s1 + $0x20] ss:$8 sps:$4 sm:$0xff]  }
 0x3e5   :  { %v3941_v44 = vpop.f32.mrb[115].mxu1  ;;  %v12125_v26 = vld [vmem:[%s18891_s1 + $0x34] ss:$8 sps:$4 sm:$0xff]  }
 0x3e6   :  { %3700 = vmatmul.mubr.bf16.gmra.mrb[220].mxu0 %v12118_v11 }
 0x3e7   :  { %4151 = vmatmul.mubr.bf16.gmra.mrb[220].mxu1 %v12118_v11  ;;  %10460 = vmatprep.mubr.msk.bf16.mxu0 %vm462_vm0, %v12119_v31 }
 0x3e8   :  { %10501 = vmatprep.mubr.msk.bf16.mxu1 %vm462_vm0, %v12119_v31 }
 0x3e9   :  { %v15277_v21 = vpop.f32.mrb[116].mxu0 }
 0x3ea   :  { %v15279_v58 = vpop.f32.mrb[116].mxu1  ;;  %v3495_v37 = vpop.f32.mrb[117].mxu0 }
 0x3eb   :  { %v3946_v38 = vpop.f32.mrb[117].mxu1  ;;  %v15281_v25 = vpop.f32.mrb[118].mxu0 }
 0x3ec   :  { %19612 = vst [vmem:[#allocation13_spill] sm:$0xff] %v15281_v25  ;;  %v15283_v14 = vpop.f32.mrb[118].mxu1  ;;  %v3498_v62 = vpop.f32.mrb[119].mxu0 }
 0x3ed   :  { %19613 = vst [vmem:[#allocation23_spill] sm:$0xff] %v15283_v14  ;;  %v3949_v41 = vpop.f32.mrb[119].mxu1  ;;  %v12154_v14 = vld [vmem:[%s18891_s1 + $0x110] ss:$8 sps:$4 sm:$0xff]  }
 0x3ee   :  { %4401 = vmatmul.mubr.bf16.vlgmr.msra.gmra.mrb[224].mxu0 %v12120_v3 }
 0x3ef   :  { %4852 = vmatmul.mubr.bf16.vlgmr.msra.gmra.mrb[224].mxu1 %v12120_v3  ;;  %10461 = vmatprep.mubr.msk.bf16.mxu0 %vm462_vm0, %v12121_v18  ;;  %v12126_v3 = vld [vmem:[%s18891_s1 + $0x30] ss:$8 sps:$4 sm:$0xff]  }
 0x3f0   :  { %10502 = vmatprep.mubr.msk.bf16.mxu1 %vm462_vm0, %v12121_v18  ;;  %5302 = vmatpush1.bf16.msra.mxu0 %v11757_v45  ;;  %v12127_v18 = vld [vmem:[%s18891_s1 + $0x44] ss:$8 sps:$4 sm:$0xff]  }
 0x3f1   :  { %v15296_v9 = vpop.f32.mrb[120].mxu0  ;;  %5303 = vmatprep.subr.bf16.mxu0 %v19615_v15  ;;  %5753 = vmatpush1.bf16.msra.mxu1 %v11758_v28 }
 0x3f2   :  { %19614 = vst [vmem:[#allocation20_spill] sm:$0xff] %v15296_v9  ;;  %v15299_v46 = vpop.f32.mrb[120].mxu1  ;;  %v3503_v51 = vpop.f32.mrb[121].mxu0  ;;  %5754 = vmatprep.subr.bf16.mxu1 %v19615_v15 }
 0x3f3   :  { %19616 = vst [vmem:[#allocation39_spill] sm:$0xff] %v15299_v46  ;;  %v3954_v20 = vpop.f32.mrb[121].mxu1  ;;  %v15301_v33 = vpop.f32.mrb[122].mxu0 }
 0x3f4   :  { %19617 = vst [vmem:[#allocation51_spill] sm:$0xff] %v15301_v33  ;;  %v15303_v48 = vpop.f32.mrb[122].mxu1  ;;  %v3506_v30 = vpop.f32.mrb[123].mxu0  ;;  %5304 = vmatpush1.bf16.msra.mxu0 %v11759_v1 }
 0x3f5   :  { %19618 = vst [vmem:[#allocation25_spill] sm:$0xff] %v15303_v48  ;;  %v3957_v43 = vpop.f32.mrb[123].mxu1  ;;  %5305 = vmatprep.subr.bf16.mxu0 %v19615_v15 }
 0x3f6   :  { %4409 = vmatmul.mubr.bf16.gmra.mrb[228].mxu0 %v12122_v49 }
 0x3f7   :  { %4860 = vmatmul.mubr.bf16.gmra.mrb[228].mxu1 %v12122_v49  ;;  %10462 = vmatprep.mubr.msk.bf16.mxu0 %vm462_vm0, %v12123_v22 }
 0x3f8   :  { %10503 = vmatprep.mubr.msk.bf16.mxu1 %vm462_vm0, %v12123_v22 }
 0x3f9   :  { %v15320_v32 = vpop.f32.mrb[124].mxu0 }
 0x3fa   :  { %19619 = vst [vmem:[#allocation8_spill] sm:$0xff] %v15320_v32  ;;  %v15322_v2 = vpop.f32.mrb[124].mxu1  ;;  %v3511_v56 = vpop.f32.mrb[125].mxu0 }
 0x3fb   :  { %19620 = vst [vmem:[#allocation18_spill] sm:$0xff] %v15322_v2  ;;  %v3962_v47 = vpop.f32.mrb[125].mxu1  ;;  %v15325_v57 = vpop.f32.mrb[126].mxu0  ;;  %v12132_v56 = vld [vmem:[%s18891_s1 + $0x60] ss:$8 sps:$4 sm:$0xff]  }
 0x3fc   :  { %19621 = vst [vmem:[#allocation33_spill] sm:$0xff] %v15325_v57  ;;  %v15327_v16 = vpop.f32.mrb[126].mxu1  ;;  %v3514_v5 = vpop.f32.mrb[127].mxu0 }
 0x3fd   :  { %19622 = vst [vmem:[#allocation41_spill] sm:$0xff] %v15327_v16  ;;  %v3965_v6 = vpop.f32.mrb[127].mxu1  ;;  %v12128_v5 = vld [vmem:[%s18891_s1 + $0x40] ss:$8 sps:$4 sm:$0xff]  }
 0x3fe   :  { %4417 = vmatmul.mubr.bf16.gmra.mrb[232].mxu0 %v12124_v52  ;;  %v12129_v6 = vld [vmem:[%s18891_s1 + $0x54] ss:$8 sps:$4 sm:$0xff]  }
 0x3ff   :  { %4868 = vmatmul.mubr.bf16.gmra.mrb[232].mxu1 %v12124_v52  ;;  %10463 = vmatprep.mubr.msk.bf16.mxu0 %vm462_vm0, %v12125_v26 }
 0x400   :  { %10504 = vmatprep.mubr.msk.bf16.mxu1 %vm462_vm0, %v12125_v26 }
 0x401   :  { %v15337_v44 = vpop.f32.mrb[128].mxu0 }
 0x402   :  { %19623 = vst [vmem:[#allocation56_spill] sm:$0xff] %v15337_v44  ;;  %v15339_v11 = vpop.f32.mrb[128].mxu1  ;;  %v3519_v31 = vpop.f32.mrb[129].mxu0 }
 0x403   :  { %19624 = vst [vmem:[#allocation57_spill] sm:$0xff] %v15339_v11  ;;  %v3970_v37 = vpop.f32.mrb[129].mxu1  ;;  %v15341_v38 = vpop.f32.mrb[130].mxu0 }
 0x404   :  { %19625 = vst [vmem:[#allocation5_spill] sm:$0xff] %v15341_v38  ;;  %v15343_v62 = vpop.f32.mrb[130].mxu1  ;;  %v3522_v45 = vpop.f32.mrb[131].mxu0 }
 0x405   :  { %19626 = vst [vmem:[#allocation36_spill] sm:$0xff] %v15343_v62  ;;  %v3973_v41 = vpop.f32.mrb[131].mxu1 }
 0x406   :  { %4425 = vmatmul.mubr.bf16.gmra.mrb[236].mxu0 %v12126_v3 }
 0x407   :  { %4876 = vmatmul.mubr.bf16.gmra.mrb[236].mxu1 %v12126_v3  ;;  %10464 = vmatprep.mubr.msk.bf16.mxu0 %vm462_vm0, %v12127_v18 }
 0x408   :  { %10505 = vmatprep.mubr.msk.bf16.mxu1 %vm462_vm0, %v12127_v18 }
 0x409   :  { %v15353_v51 = vpop.f32.mrb[132].mxu0 }
 0x40a   :  { %19627 = vst [vmem:[#allocation38_spill] sm:$0xff] %v15353_v51  ;;  %v15355_v20 = vpop.f32.mrb[132].mxu1  ;;  %v3527_v30 = vpop.f32.mrb[133].mxu0 }
 0x40b   :  { %19628 = vst [vmem:[#allocation27_spill] sm:$0xff] %v15355_v20  ;;  %v3978_v28 = vpop.f32.mrb[133].mxu1  ;;  %v15357_v43 = vpop.f32.mrb[134].mxu0 }
 0x40c   :  { %v15361_v22 = vpop.f32.mrb[134].mxu1  ;;  %v3530_v1 = vpop.f32.mrb[135].mxu0 }
 0x40d   :  { %v3981_v47 = vpop.f32.mrb[135].mxu1 }
 0x40e   :  { %4433 = vmatmul.mubr.bf16.gmra.mrb[240].mxu0 %v12128_v5 }
 0x40f   :  { %4884 = vmatmul.mubr.bf16.gmra.mrb[240].mxu1 %v12128_v5  ;;  %10465 = vmatprep.mubr.msk.bf16.mxu0 %vm462_vm0, %v12129_v6  ;;  %v12130_v5 = vld [vmem:[%s18891_s1 + $0x50] ss:$8 sps:$4 sm:$0xff]  }
 0x410   :  { %10506 = vmatprep.mubr.msk.bf16.mxu1 %vm462_vm0, %v12129_v6  ;;  %v12131_v6 = vld [vmem:[%s18891_s1 + $0x64] ss:$8 sps:$4 sm:$0xff]  }
 0x411   :  { %v15373_v52 = vpop.f32.mrb[136].mxu0 }
 0x412   :  { %v15377_v31 = vpop.f32.mrb[136].mxu1  ;;  %v3535_v37 = vpop.f32.mrb[137].mxu0 }
 0x413   :  { %v3986_v41 = vpop.f32.mrb[137].mxu1  ;;  %v15381_v3 = vpop.f32.mrb[138].mxu0  ;;  %v11760_v37 = vld [vmem:[%s18890_s0 + $0x13c] sm:$0xff]  }
 0x414   :  { %v15385_v30 = vpop.f32.mrb[138].mxu1  ;;  %v3538_v28 = vpop.f32.mrb[139].mxu0  ;;  %v11761_v41 = vld [vmem:[%s18890_s0 + $0x128] sm:$0xff]   ;;  %5755 = vmatpush1.bf16.msra.mxu1 %v11760_v37 }
 0x415   :  { %v3989_v47 = vpop.f32.mrb[139].mxu1  ;;  %5306 = vmatpush1.bf16.msra.mxu0 %v11761_v41  ;;  %5756 = vmatprep.subr.bf16.mxu1 %v19615_v15 }
 0x416   :  { %4441 = vmatmul.mubr.bf16.gmra.mrb[244].mxu0 %v12130_v5  ;;  %5307 = vmatprep.subr.bf16.mxu0 %v19615_v15 }
 0x417   :  { %4892 = vmatmul.mubr.bf16.gmra.mrb[244].mxu1 %v12130_v5  ;;  %10466 = vmatprep.mubr.msk.bf16.mxu0 %vm462_vm0, %v12131_v6 }
 0x418   :  { %10507 = vmatprep.mubr.msk.bf16.mxu1 %vm462_vm0, %v12131_v6 }
 0x419   :  { %v15403_v28 = vpop.f32.mrb[140].mxu0 }
 0x41a   :  { %v15407_v5 = vpop.f32.mrb[140].mxu1  ;;  %v3543_v1 = vpop.f32.mrb[141].mxu0 }
 0x41b   :  { %v3994_v45 = vpop.f32.mrb[141].mxu1  ;;  %v15413_v26 = vpop.f32.mrb[142].mxu0 }
 0x41c   :  { %v15417_v37 = vpop.f32.mrb[142].mxu1  ;;  %v3546_v41 = vpop.f32.mrb[143].mxu0  ;;  %v12133_v45 = vld [vmem:[%s18891_s1 + $0x74] ss:$8 sps:$4 sm:$0xff]  }
 0x41d   :  { %v3997_v1 = vpop.f32.mrb[143].mxu1 }
 0x41e   :  { %4449 = vmatmul.mubr.bf16.gmra.mrb[248].mxu0 %v12132_v56 }
 0x41f   :  { %4900 = vmatmul.mubr.bf16.gmra.mrb[248].mxu1 %v12132_v56  ;;  %10467 = vmatprep.mubr.msk.bf16.mxu0 %vm462_vm0, %v12133_v45 }
 0x420   :  { %10508 = vmatprep.mubr.msk.bf16.mxu1 %vm462_vm0, %v12133_v45 }
 0x421   :  { %v15429_v6 = vpop.f32.mrb[144].mxu0 }
 0x422   :  { %v15433_v1 = vpop.f32.mrb[144].mxu1  ;;  %v3551_v47 = vpop.f32.mrb[145].mxu0 }
 0x423   :  { %v4002_v56 = vpop.f32.mrb[145].mxu1  ;;  %v15437_v49 = vpop.f32.mrb[146].mxu0  ;;  %v12134_v47 = vld [vmem:[%s18891_s1 + $0x70] ss:$8 sps:$4 sm:$0xff]  }
 0x424   :  { %v15441_v50 = vpop.f32.mrb[146].mxu1  ;;  %v3554_v45 = vpop.f32.mrb[147].mxu0  ;;  %v12135_v56 = vld [vmem:[%s18891_s1 + $0x84] ss:$8 sps:$4 sm:$0xff]  }
 0x425   :  { %v4005_v7 = vpop.f32.mrb[147].mxu1  ;;  %v11762_v45 = vld [vmem:[%s18890_s0 + $0x144] sm:$0xff]  }
 0x426   :  { %4457 = vmatmul.mubr.bf16.gmra.mrb[252].mxu0 %v12134_v47  ;;  %v6274_v7 = vld [vmem:[%s18893_s4 + $0x38] sm:$0xff]  ;;  %5757 = vmatpush1.bf16.msra.mxu1 %v11762_v45  ;;  %v12136_v45 = vld [vmem:[%s18891_s1 + $0x80] ss:$8 sps:$4 sm:$0xff]  }
 0x427   :  { %4908 = vmatmul.mubr.bf16.gmra.mrb[252].mxu1 %v12134_v47  ;;  %10468 = vmatprep.mubr.msk.bf16.mxu0 %vm462_vm0, %v12135_v56 }
 0x428   :  { %10509 = vmatprep.mubr.msk.bf16.mxu1 %vm462_vm0, %v12135_v56  ;;  %7609 = vperm.xlu0 %11555, %v6274_v7   ;;  %v11763_v7 = vld [vmem:[%s18890_s0 + $0x130] sm:$0xff]   ;;  %v6276_v56 = vld [vmem:[%s18893_s4 + $0x48] sm:$0xff] }
 0x429   :  { %v15456_v13 = vpop.f32.mrb[148].mxu0  ;;  %5758 = vmatprep.subr.bf16.mxu1 %v19615_v15  ;;  %5308 = vmatpush1.bf16.msra.mxu0 %v11763_v7 }
 0x42a   :  { %19629 = vst [vmem:[#allocation24_spill] sm:$0xff] %v15456_v13  ;;  %v15463_v42 = vpop.f32.mrb[148].mxu1  ;;  %v3559_v18 = vpop.f32.mrb[149].mxu0  ;;  %5309 = vmatprep.subr.bf16.mxu0 %v19615_v15  ;;  %v19657_v13 = vmax.f32 %v15223_v24, %v15357_v43 }
 0x42b   :  { %19630 = vst [vmem:[#allocation43_spill] sm:$0xff] %v15463_v42  ;;  %v4010_v41 = vpop.f32.mrb[149].mxu1  ;;  %v15467_v63 = vpop.f32.mrb[150].mxu0  ;;  %v12152_v42 = vld [vmem:[%s18891_s1 + $0x100] ss:$8 sps:$4 sm:$0xff]  }
 0x42c   :  { %19631 = vst [vmem:[#allocation14_spill] sm:$0xff] %v15467_v63  ;;  %v15472_v27 = vpop.f32.mrb[150].mxu1  ;;  %v3562_v12 = vpop.f32.mrb[151].mxu0  ;;  %v12137_v41 = vld [vmem:[%s18891_s1 + $0x94] ss:$8 sps:$4 sm:$0xff]  }
 0x42d   :  { %19632 = vst [vmem:[#allocation52_spill] sm:$0xff] %v15472_v27  ;;  %v4013_v18 = vpop.f32.mrb[151].mxu1  ;;  %v6268_v12 = vld [vmem:[%s18893_s4 + $0x8] sm:$0xff]  ;;  %v6275_v27 = vld [vmem:[%s18893_s4 + $0x40] sm:$0xff] }
 0x42e   :  { %4465 = vmatmul.mubr.bf16.gmra.mrb[0].mxu0 %v12136_v45  ;;  %7579 = vperm.xlu0 %11555, %v6268_v12  }
 0x42f   :  { %4916 = vmatmul.mubr.bf16.gmra.mrb[0].mxu1 %v12136_v45  ;;  %10469 = vmatprep.mubr.msk.bf16.mxu0 %vm462_vm0, %v12137_v41  ;;  %v6273_v45 = vld [vmem:[%s18893_s4 + $0x30] sm:$0xff] }
 0x430   :  { %10510 = vmatprep.mubr.msk.bf16.mxu1 %vm462_vm0, %v12137_v41  ;;  %7604 = vperm.xlu1 %11556, %v6273_v45   ;;  %v12138_v45 = vld [vmem:[%s18891_s1 + $0x90] ss:$8 sps:$4 sm:$0xff]  }
 0x431   :  { %v15490_v18 = vpop.f32.mrb[152].mxu0 }
 0x432   :  { %19633 = vst [vmem:[#allocation22_spill] sm:$0xff] %v15490_v18  ;;  %v15497_v53 = vpop.f32.mrb[152].mxu1  ;;  %v3567_v41 = vpop.f32.mrb[153].mxu0  ;;  %7619 = vperm.xlu0 %11555, %v6276_v56  }
 0x433   :  { %19634 = vst [vmem:[#allocation53_spill] sm:$0xff] %v15497_v53  ;;  %v4018_v12 = vpop.f32.mrb[153].mxu1  ;;  %v15504_v46 = vpop.f32.mrb[154].mxu0 }
 0x434   :  { %19635 = vst [vmem:[#allocation47_spill] sm:$0xff] %v15504_v46  ;;  %v15509_v18 = vpop.f32.mrb[154].mxu1  ;;  %v3570_v41 = vpop.f32.mrb[155].mxu0  ;;  %v12139_v12 = vld [vmem:[%s18891_s1 + $0xa4] ss:$8 sps:$4 sm:$0xff]  }
 0x435   :  { %19636 = vst [vmem:[#allocation7_spill] sm:$0xff] %v15509_v18  ;;  %v4021_v33 = vpop.f32.mrb[155].mxu1  ;;  %v6270_v41 = vld [vmem:[%s18893_s4 + $0x18] sm:$0xff]  ;;  %v11764_v46 = vld [vmem:[%s18890_s0 + $0x14c] sm:$0xff]   ;;  %v6271_v18 = vld [vmem:[%s18893_s4 + $0x20] sm:$0xff] }
 0x436   :  { %4473 = vmatmul.mubr.bf16.gmra.mrb[4].mxu0 %v12138_v45  ;;  %v6267_v33 = vld [vmem:[%s18893_s4] sm:$0xff]  ;;  %7589 = vperm.xlu0 %11555, %v6270_v41  }
 0x437   :  { %4924 = vmatmul.mubr.bf16.gmra.mrb[4].mxu1 %v12138_v45  ;;  %10470 = vmatprep.mubr.msk.bf16.mxu0 %vm462_vm0, %v12139_v12 }
 0x438   :  { %10511 = vmatprep.mubr.msk.bf16.mxu1 %vm462_vm0, %v12139_v12  ;;  %7574 = vperm.xlu1 %11556, %v6267_v33   ;;  %v6272_v12 = vld [vmem:[%s18893_s4 + $0x28] sm:$0xff] }
 0x439   :  { %v15527_v56 = vpop.f32.mrb[156].mxu0  ;;  %5759 = vmatpush1.bf16.msra.mxu1 %v11764_v46 }
 0x43a   :  { %19637 = vst [vmem:[#allocation34_spill] sm:$0xff] %v15527_v56  ;;  %v15531_v7 = vpop.f32.mrb[156].mxu1  ;;  %v3575_v47 = vpop.f32.mrb[157].mxu0  ;;  %7599 = vperm.xlu0 %11555, %v6272_v12   ;;  %5760 = vmatprep.subr.bf16.mxu1 %v19615_v15 }
 0x43b   :  { %19638 = vst [vmem:[#allocation4_spill] sm:$0xff] %v15531_v7  ;;  %v4026_v2 = vpop.f32.mrb[157].mxu1  ;;  %v15541_v41 = vpop.f32.mrb[158].mxu0 }
 0x43c   :  { %19639 = vst [vmem:[#allocation48_spill] sm:$0xff] %v15541_v41  ;;  %v15545_v45 = vpop.f32.mrb[158].mxu1  ;;  %v3578_v47 = vpop.f32.mrb[159].mxu0  ;;  %7614 = vperm.xlu1 %11556, %v6275_v27   ;;  %v12140_v2 = vld [vmem:[%s18891_s1 + $0xa0] ss:$8 sps:$4 sm:$0xff]   ;;  %v6269_v27 = vld [vmem:[%s18893_s4 + $0x10] sm:$0xff] }
 0x43d   :  { %19640 = vst [vmem:[#allocation40_spill] sm:$0xff] %v15545_v45  ;;  %v4029_v57 = vpop.f32.mrb[159].mxu1  ;;  %v12141_v47 = vld [vmem:[%s18891_s1 + $0xb4] ss:$8 sps:$4 sm:$0xff]  }
 0x43e   :  { %4481 = vmatmul.mubr.bf16.gmra.mrb[8].mxu0 %v12140_v2  ;;  %v11765_v57 = vld [vmem:[%s18890_s0 + $0x138] sm:$0xff]  }
 0x43f   :  { %4932 = vmatmul.mubr.bf16.gmra.mrb[8].mxu1 %v12140_v2  ;;  %10471 = vmatprep.mubr.msk.bf16.mxu0 %vm462_vm0, %v12141_v47  ;;  %v9739_v2 = vld [vmem:[%s18894_s6 + $0x8] sm:$0xff]  ;;  %v9741_v41 = vld [vmem:[%s18894_s6 + $0x18] sm:$0xff] }
 0x440   :  { %10512 = vmatprep.mubr.msk.bf16.mxu1 %vm462_vm0, %v12141_v47  ;;  %7584 = vperm.xlu1 %11556, %v6269_v27   ;;  %v11766_v47 = vld [vmem:[%s18890_s0 + $0x154] sm:$0xff]  }
 0x441   :  { %v15566_v12 = vpop.f32.mrb[160].mxu0  ;;  %9752 = vperm.xlu0 %11555, %v9739_v2   ;;  %5310 = vmatpush1.bf16.msra.mxu0 %v11765_v57 }
 0x442   :  { %19641 = vst [vmem:[#allocation42_spill] sm:$0xff] %v15566_v12  ;;  %v15577_v56 = vpop.f32.mrb[160].mxu1  ;;  %v3583_v33 = vpop.f32.mrb[161].mxu0  ;;  %5311 = vmatprep.subr.bf16.mxu0 %v19615_v15  ;;  %5761 = vmatpush1.bf16.msra.mxu1 %v11766_v47  ;;  %v9743_v47 = vld [vmem:[%s18894_s6 + $0x28] sm:$0xff] }
 0x443   :  { %19642 = vst [vmem:[#allocation26_spill] sm:$0xff] %v15577_v56  ;;  %v4034_v45 = vpop.f32.mrb[161].mxu1  ;;  %v15584_v11 = vpop.f32.mrb[162].mxu0  ;;  %5762 = vmatprep.subr.bf16.mxu1 %v19615_v15  ;;  %v11768_v56 = vld [vmem:[%s18890_s0 + $0x15c] sm:$0xff]  }
 0x444   :  { %19643 = vst [vmem:[#allocation45_spill] sm:$0xff] %v15584_v11  ;;  %v15592_v57 = vpop.f32.mrb[162].mxu1  ;;  %v3586_v2 = vpop.f32.mrb[163].mxu0  ;;  %7594 = vperm.xlu1 %11556, %v6271_v18   ;;  %v11767_v45 = vld [vmem:[%s18890_s0 + $0x140] sm:$0xff]  }
 0x445   :  { %19644 = vst [vmem:[#allocation54_spill] sm:$0xff] %v15592_v57  ;;  %v4037_v27 = vpop.f32.mrb[163].mxu1  ;;  %v12142_v2 = vld [vmem:[%s18891_s1 + $0xb0] ss:$8 sps:$4 sm:$0xff]   ;;  %9762 = vperm.xlu0 %11555, %v9741_v41   ;;  %v12143_v18 = vld [vmem:[%s18891_s1 + $0xc4] ss:$8 sps:$4 sm:$0xff]   ;;  %5312 = vmatpush1.bf16.msra.mxu0 %v11767_v45 }
 0x446   :  { %4489 = vmatmul.mubr.bf16.gmra.mrb[12].mxu0 %v12142_v2  ;;  %5763 = vmatpush1.bf16.msra.mxu1 %v11768_v56  ;;  %v11769_v41 = vld [vmem:[%s18890_s0 + $0x148] sm:$0xff]   ;;  %v9738_v45 = vld [vmem:[%s18894_s6] sm:$0xff] }
 0x447   :  { %4940 = vmatmul.mubr.bf16.gmra.mrb[12].mxu1 %v12142_v2  ;;  %10472 = vmatprep.mubr.msk.bf16.mxu0 %vm462_vm0, %v12143_v18  ;;  %v11770_v2 = vld [vmem:[%s18890_s0 + $0x164] sm:$0xff]  }
 0x448   :  { %10513 = vmatprep.mubr.msk.bf16.mxu1 %vm462_vm0, %v12143_v18  ;;  %5313 = vmatprep.subr.bf16.mxu0 %v19615_v15  ;;  %v9988_v57 = vld [vmem:[%s18895_s8] sm:$0xff] }
 0x449   :  { %v15614_v27 = vpop.f32.mrb[164].mxu0  ;;  %9772 = vperm.xlu0 %11555, %v9743_v47   ;;  %5764 = vmatprep.subr.bf16.mxu1 %v19615_v15  ;;  %v9740_v47 = vld [vmem:[%s18894_s6 + $0x10] sm:$0xff] }
 0x44a   :  { %v15623_v46 = vpop.f32.mrb[164].mxu1  ;;  %v3591_v18 = vpop.f32.mrb[165].mxu0  ;;  %9747 = vperm.xlu1 %11556, %v9738_v45   ;;  %5314 = vmatpush1.bf16.msra.mxu0 %v11769_v41  ;;  %v11771_v45 = vld [vmem:[%s18890_s0 + $0x150] sm:$0xff]  }
 0x44b   :  { %v4042_v56 = vpop.f32.mrb[165].mxu1  ;;  %v15629_v33 = vpop.f32.mrb[166].mxu0  ;;  %5765 = vmatpush1.bf16.msra.mxu1 %v11770_v2  ;;  %5315 = vmatprep.subr.bf16.mxu0 %v19615_v15  ;;  %v12145_v41 = vld [vmem:[%s18891_s1 + $0xd4] ss:$8 sps:$4 sm:$0xff]  }
 0x44c   :  { %v15634_v20 = vpop.f32.mrb[166].mxu1  ;;  %v3594_v11 = vpop.f32.mrb[167].mxu0  ;;  %v12144_v56 = vld [vmem:[%s18891_s1 + $0xc0] ss:$8 sps:$4 sm:$0xff]   ;;  %5766 = vmatprep.subr.bf16.mxu1 %v19615_v15 }
 0x44d   :  { %v4045_v18 = vpop.f32.mrb[167].mxu1  ;;  %9992 = vperm.xlu0 %11555, %v9988_v57   ;;  %v11772_v11 = vld [vmem:[%s18890_s0 + $0x16c] sm:$0xff]   ;;  %v9742_v57 = vld [vmem:[%s18894_s6 + $0x20] sm:$0xff] }
 0x44e   :  { %4497 = vmatmul.mubr.bf16.gmra.mrb[16].mxu0 %v12144_v56  ;;  %9757 = vperm.xlu1 %11556, %v9740_v47   ;;  %v11773_v18 = vld [vmem:[%s18890_s0 + $0x158] sm:$0xff]  }
 0x44f   :  { %4948 = vmatmul.mubr.bf16.gmra.mrb[16].mxu1 %v12144_v56  ;;  %10473 = vmatprep.mubr.msk.bf16.mxu0 %vm462_vm0, %v12145_v41  ;;  %v11774_v47 = vld [vmem:[%s18890_s0 + $0x174] sm:$0xff]  }
 0x450   :  { %10514 = vmatprep.mubr.msk.bf16.mxu1 %vm462_vm0, %v12145_v41  ;;  %5316 = vmatpush1.bf16.msra.mxu0 %v11771_v45 }
 0x451   :  { %v15654_v2 = vpop.f32.mrb[168].mxu0  ;;  %5767 = vmatpush1.bf16.msra.mxu1 %v11772_v11  ;;  %5317 = vmatprep.subr.bf16.mxu0 %v19615_v15  ;;  %v12146_v11 = vld [vmem:[%s18891_s1 + $0xd0] ss:$8 sps:$4 sm:$0xff]  }
 0x452   :  { %v15663_v56 = vpop.f32.mrb[168].mxu1  ;;  %v3599_v51 = vpop.f32.mrb[169].mxu0  ;;  %5768 = vmatprep.subr.bf16.mxu1 %v19615_v15  ;;  %9767 = vperm.xlu1 %11556, %v9742_v57   ;;  %v11778_v57 = vld [vmem:[%s18890_s0 + $0x184] ss:$0 sps:$4 sm:$0xff]  }
 0x453   :  { %v4050_v41 = vpop.f32.mrb[169].mxu1  ;;  %v15669_v62 = vpop.f32.mrb[170].mxu0  ;;  %v9744_v51 = vld [vmem:[%s18894_s6 + $0x30] sm:$0x3]  ;;  %v5750_v16 = vsel %vm553_vm1, %v11778_v57, 0 }
 0x454   :  { %v15672_v45 = vpop.f32.mrb[170].mxu1  ;;  %v3602_v12 = vpop.f32.mrb[171].mxu0  ;;  %5318 = vmatpush1.bf16.msra.mxu0 %v11773_v18  ;;  %v11775_v41 = vld [vmem:[%s18890_s0 + $0x160] sm:$0xff]  }
 0x455   :  { %v4053_v38 = vpop.f32.mrb[171].mxu1  ;;  %5769 = vmatpush1.bf16.msra.mxu1 %v11774_v47  ;;  %v11776_v12 = vld [vmem:[%s18890_s0 + $0x17c] sm:$0xff]   ;;  %v9989_v47 = vld [vmem:[%s18895_s8 + $0x8] sm:$0x3]  ;;  %5319 = vmatprep.subr.bf16.mxu0 %v19615_v15 }
 0x456   :  { %4505 = vmatmul.mubr.bf16.gmra.mrb[20].mxu0 %v12146_v11  ;;  %v12147_v38 = vld [vmem:[%s18891_s1 + $0xe4] ss:$8 sps:$4 sm:$0xff]   ;;  %9777 = vperm.xlu1 %11556, %v9744_v51  }
 0x457   :  { %4956 = vmatmul.mubr.bf16.gmra.mrb[20].mxu1 %v12146_v11  ;;  %10474 = vmatprep.mubr.msk.bf16.mxu0 %vm462_vm0, %v12147_v38  ;;  %v11777_v11 = vld [vmem:[%s18890_s0 + $0x168] ss:$0 sps:$4 sm:$0xff]  }
 0x458   :  { %10515 = vmatprep.mubr.msk.bf16.mxu1 %vm462_vm0, %v12147_v38  ;;  %5770 = vmatprep.subr.bf16.mxu1 %v19615_v15  ;;  %v5299_v63 = vsel %vm553_vm1, %v11777_v11, 0 }
 0x459   :  { %v15694_v18 = vpop.f32.mrb[172].mxu0  ;;  %5320 = vmatpush1.bf16.msra.mxu0 %v11775_v41  ;;  %5771 = vmatpush1.bf16.msra.mxu1 %v11776_v12  ;;  %v12148_v41 = vld [vmem:[%s18891_s1 + $0xe0] ss:$8 sps:$4 sm:$0xff]  }
 0x45a   :  { %v15704_v38 = vpop.f32.mrb[172].mxu1  ;;  %v3607_v51 = vpop.f32.mrb[173].mxu0  ;;  %5321 = vmatprep.subr.bf16.mxu0 %v19615_v15  ;;  %5772 = vmatprep.subr.bf16.mxu1 %v19615_v15 }
 0x45b   :  { %v4058_v44 = vpop.f32.mrb[173].mxu1  ;;  %v15706_v7 = vpop.f32.mrb[174].mxu0  ;;  %9997 = vperm.xlu1 %11556, %v9989_v47  }
 0x45c   :  { %v15711_v32 = vpop.f32.mrb[174].mxu1  ;;  %v3610_v53 = vpop.f32.mrb[175].mxu0  ;;  %v12149_v44 = vld [vmem:[%s18891_s1 + $0xf4] ss:$8 sps:$4 sm:$0xff]  }
 0x45d   :  { %v4061_v48 = vpop.f32.mrb[175].mxu1  ;;  %5773 = vmatpush1.bf16.msra.mxu1 %v5750_v16  ;;  %5322 = vmatpush1.bf16.msra.mxu0 %v5299_v63  ;;  %v12150_v63 = vld [vmem:[%s18891_s1 + $0xf0] ss:$8 sps:$4 sm:$0xff]  }
 0x45e   :  { %4513 = vmatmul.mubr.bf16.gmra.mrb[24].mxu0 %v12148_v41  ;;  %6963 = vmatprep.subr.bf16.mxu0 %v19615_v15 }
 0x45f   :  { %4964 = vmatmul.mubr.bf16.gmra.mrb[24].mxu1 %v12148_v41  ;;  %10475 = vmatprep.mubr.msk.bf16.mxu0 %vm462_vm0, %v12149_v44  ;;  %v12151_v41 = vld [vmem:[%s18891_s1 + $0x104] ss:$8 sps:$4 sm:$0xff]  }
 0x460   :  { %10516 = vmatprep.mubr.msk.bf16.mxu1 %vm462_vm0, %v12149_v44  ;;  %7697 = vmatprep.subr.bf16.mxu1 %v19615_v15 }
 0x461   :  { %v15722_v53 = vpop.f32.mrb[176].mxu0 }
 0x462   :  { %v15726_v48 = vpop.f32.mrb[176].mxu1  ;;  %v3615_v12 = vpop.f32.mrb[177].mxu0 }
 0x463   :  { %v4066_v16 = vpop.f32.mrb[177].mxu1  ;;  %v15728_v57 = vpop.f32.mrb[178].mxu0 }
 0x464   :  { %v15730_v47 = vpop.f32.mrb[178].mxu1  ;;  %v3618_v11 = vpop.f32.mrb[179].mxu0 }
 0x465   :  { %v4069_v51 = vpop.f32.mrb[179].mxu1 }
 0x466   :  { %4521 = vmatmul.mubr.bf16.gmra.mrb[28].mxu0 %v12150_v63 }
 0x467   :  { %4972 = vmatmul.mubr.bf16.gmra.mrb[28].mxu1 %v12150_v63  ;;  %10476 = vmatprep.mubr.msk.bf16.mxu0 %vm462_vm0, %v12151_v41 }
 0x468   :  { %10517 = vmatprep.mubr.msk.bf16.mxu1 %vm462_vm0, %v12151_v41  ;;  %v12153_v41 = vld [vmem:[%s18891_s1 + $0x114] ss:$8 sps:$4 sm:$0xff]  }
 0x469   :  { %v15740_v44 = vpop.f32.mrb[180].mxu0 }
 0x46a   :  { %19645 = vst [vmem:[#allocation28_spill] sm:$0xff] %v15740_v44  ;;  %v15742_v12 = vpop.f32.mrb[180].mxu1  ;;  %v3623_v16 = vpop.f32.mrb[181].mxu0 }
 0x46b   :  { %19646 = vst [vmem:[#allocation19_spill] sm:$0xff] %v15742_v12  ;;  %v4074_v11 = vpop.f32.mrb[181].mxu1  ;;  %v15744_v51 = vpop.f32.mrb[182].mxu0 }
 0x46c   :  { %19647 = vst [vmem:[#allocation21_spill] sm:$0xff] %v15744_v51  ;;  %v15746_v15 = vpop.f32.mrb[182].mxu1  ;;  %v3626_v9 = vpop.f32.mrb[183].mxu0 }
 0x46d   :  { %19648 = vst [vmem:[#allocation44_spill] sm:$0xff] %v15746_v15  ;;  %v4077_v63 = vpop.f32.mrb[183].mxu1 }
 0x46e   :  { %4529 = vmatmul.mubr.bf16.gmra.mrb[32].mxu0 %v12152_v42 }
 0x46f   :  { %4980 = vmatmul.mubr.bf16.gmra.mrb[32].mxu1 %v12152_v42  ;;  %10477 = vmatprep.mubr.msk.bf16.mxu0 %vm462_vm0, %v12153_v41 }
 0x470   :  { %10518 = vmatprep.mubr.msk.bf16.mxu1 %vm462_vm0, %v12153_v41  ;;  %v12155_v41 = vld [vmem:[%s18891_s1 + $0x124] ss:$8 sps:$4 sm:$0xff]  }
 0x471   :  { %v15756_v16 = vpop.f32.mrb[184].mxu0 }
 0x472   :  { %19649 = vst [vmem:[#allocation17_spill] sm:$0xff] %v15756_v16  ;;  %v15758_v11 = vpop.f32.mrb[184].mxu1  ;;  %v3631_v9 = vpop.f32.mrb[185].mxu0  ;;  %v12156_v16 = vld [vmem:[%s18891_s1 + $0x120] ss:$8 sps:$4 sm:$0xff]  }
 0x473   :  { %19650 = vst [vmem:[#allocation49_spill] sm:$0xff] %v15758_v11  ;;  %v4082_v63 = vpop.f32.mrb[185].mxu1  ;;  %v15760_v15 = vpop.f32.mrb[186].mxu0 }
 0x474   :  { %19651 = vst [vmem:[#allocation6_spill] sm:$0xff] %v15760_v15  ;;  %v15762_v51 = vpop.f32.mrb[186].mxu1  ;;  %v3634_v12 = vpop.f32.mrb[187].mxu0 }
 0x475   :  { %19652 = vst [vmem:[#allocation55_spill] sm:$0xff] %v15762_v51  ;;  %v4085_v42 = vpop.f32.mrb[187].mxu1 }
 0x476   :  { %4537 = vmatmul.mubr.bf16.gmra.mrb[36].mxu0 %v12154_v14 }
 0x477   :  { %4988 = vmatmul.mubr.bf16.gmra.mrb[36].mxu1 %v12154_v14  ;;  %10478 = vmatprep.mubr.msk.bf16.mxu0 %vm462_vm0, %v12155_v41 }
 0x478   :  { %10519 = vmatprep.mubr.msk.bf16.mxu1 %vm462_vm0, %v12155_v41  ;;  %v12157_v41 = vld [vmem:[%s18891_s1 + $0x134] ss:$8 sps:$4 sm:$0xff]  }
 0x479   :  { %v15772_v9 = vpop.f32.mrb[188].mxu0 }
 0x47a   :  { %19653 = vst [vmem:[#allocation46_spill] sm:$0xff] %v15772_v9  ;;  %v15774_v63 = vpop.f32.mrb[188].mxu1  ;;  %v3639_v12 = vpop.f32.mrb[189].mxu0 }
 0x47b   :  { %19654 = vst [vmem:[#allocation37_spill] sm:$0xff] %v15774_v63  ;;  %v4090_v42 = vpop.f32.mrb[189].mxu1  ;;  %v15776_v51 = vpop.f32.mrb[190].mxu0 }
 0x47c   :  { %19655 = vst [vmem:[#allocation35_spill] sm:$0xff] %v15776_v51  ;;  %v15778_v15 = vpop.f32.mrb[190].mxu1  ;;  %v3642_v11 = vpop.f32.mrb[191].mxu0 }
 0x47d   :  { %19656 = vst [vmem:[#allocation50_spill] sm:$0xff] %v15778_v15  ;;  %v4093_v14 = vpop.f32.mrb[191].mxu1 }
 0x47e   :  { %4545 = vmatmul.mubr.bf16.gmra.mrb[40].mxu0 %v12156_v16 }
 0x47f   :  { %4996 = vmatmul.mubr.bf16.gmra.mrb[40].mxu1 %v12156_v16  ;;  %10479 = vmatprep.mubr.msk.bf16.mxu0 %vm462_vm0, %v12157_v41 }
 0x480   :  { %10520 = vmatprep.mubr.msk.bf16.mxu1 %vm462_vm0, %v12157_v41  ;;  %v12158_v41 = vld [vmem:[%s18891_s1 + $0x130] ss:$8 sps:$4 sm:$0xff]  }
 0x481   :  { %v15788_v12 = vpop.f32.mrb[192].mxu0 }
 0x482   :  { %v15790_v42 = vpop.f32.mrb[192].mxu1  ;;  %v3647_v11 = vpop.f32.mrb[193].mxu0 }
 0x483   :  { %v4098_v14 = vpop.f32.mrb[193].mxu1  ;;  %v3648_v15 = vpop.f32.mrb[194].mxu0  ;;  %v19658_v11 = vmax.f32 %v15225_v4, %v15361_v22  ;;  %v19659_v22 = vmax.f32 %v15227_v23, %v15373_v52  ;;  %v12160_v52 = vld [vmem:[%s18891_s1 + $0x140] ss:$8 sps:$4 sm:$0xff]  }
 0x484   :  { %v3723_v51 = vmax.f32 %v15614_v27, %v3648_v15  ;;  %v4099_v63 = vpop.f32.mrb[194].mxu1  ;;  %v3650_v9 = vpop.f32.mrb[195].mxu0  ;;  %v12159_v15 = vld [vmem:[%s18891_s1 + $0x144] ss:$8 sps:$4 sm:$0xff]  }
 0x485   :  { %v4174_v16 = vmax.f32 %v15623_v46, %v4099_v63  ;;  %v4101_v44 = vpop.f32.mrb[195].mxu1 }
 0x486   :  { %v3738_v25 = vmax.f32 %v19657_v13, %v3723_v51  ;;  %4553 = vmatmul.mubr.bf16.gmra.mrb[44].mxu0 %v12158_v41 }
 0x487   :  { %v4189_v14 = vmax.f32 %v19658_v11, %v4174_v16  ;;  %5004 = vmatmul.mubr.bf16.gmra.mrb[44].mxu1 %v12158_v41  ;;  %10480 = vmatprep.mubr.msk.bf16.mxu0 %vm462_vm0, %v12159_v15 }
 0x488   :  { %10521 = vmatprep.mubr.msk.bf16.mxu1 %vm462_vm0, %v12159_v15  ;;  %v3753_v4 = vadd.f32 %v3738_v25, %v13484_v60  ;;  %v19661_v25 = vmax.f32 %v15244_v39, %v15381_v3 }
 0x489   :  { %v3653_v24 = vpop.f32.mrb[196].mxu0  ;;  %v4204_v11 = vadd.f32 %v4189_v14, %v13484_v60 }
 0x48a   :  { %v3724_v13 = vmax.f32 %v15629_v33, %v3653_v24  ;;  %v4104_v43 = vpop.f32.mrb[196].mxu1  ;;  %v3655_v46 = vpop.f32.mrb[197].mxu0  ;;  %v19660_v33 = vmax.f32 %v15230_v59, %v15377_v31  ;;  %v19662_v59 = vmax.f32 %v15247_v40, %v15385_v30  ;;  %v3768_v39 = vmax.f32 %v3753_v4, 0.0 }
 0x48b   :  { %v4175_v27 = vmax.f32 %v15634_v20, %v4104_v43  ;;  %v4106_v44 = vpop.f32.mrb[197].mxu1  ;;  %v3656_v51 = vpop.f32.mrb[198].mxu0  ;;  %v4219_v14 = vmax.f32 %v4204_v11, 0.0 }
 0x48c   :  { %v3739_v9 = vmax.f32 %v19659_v22, %v3724_v13  ;;  %v3725_v63 = vmax.f32 %v15654_v2, %v3656_v51  ;;  %v4107_v16 = vpop.f32.mrb[198].mxu1  ;;  %v3658_v41 = vpop.f32.mrb[199].mxu0 }
 0x48d   :  { %v4190_v15 = vmax.f32 %v19660_v33, %v4175_v27  ;;  %v4176_v20 = vmax.f32 %v15663_v56, %v4107_v16  ;;  %v4109_v24 = vpop.f32.mrb[199].mxu1  ;;  %v12161_v56 = vld [vmem:[%s18891_s1 + $0x154] ss:$8 sps:$4 sm:$0xff]   ;;  %v19663_v16 = vmax.f32 %v15249_v10, %v15403_v28  ;;  %v19665_v10 = vmax.f32 %v15261_v17, %v15413_v26 }
 0x48e   :  { %v3754_v43 = vadd.f32 %v3739_v9, %v13498_v36  ;;  %v3740_v23 = vmax.f32 %v19661_v25, %v3725_v63  ;;  %4561 = vmatmul.mubr.bf16.gmra.mrb[48].mxu0 %v12160_v52 }
 0x48f   :  { %v4205_v2 = vadd.f32 %v4190_v15, %v13498_v36  ;;  %v4191_v31 = vmax.f32 %v19662_v59, %v4176_v20  ;;  %5012 = vmatmul.mubr.bf16.gmra.mrb[48].mxu1 %v12160_v52  ;;  %10481 = vmatprep.mubr.msk.bf16.mxu0 %vm462_vm0, %v12161_v56 }
 0x490   :  { %v3769_v3 = vmax.f32 %v3754_v43, 0.0  ;;  %10522 = vmatprep.mubr.msk.bf16.mxu1 %vm462_vm0, %v12161_v56  ;;  %v3755_v4 = vadd.f32 %v3740_v23, %v13511_v55 }
 0x491   :  { %v4220_v13 = vmax.f32 %v4205_v2, 0.0  ;;  %v3661_v46 = vpop.f32.mrb[200].mxu0  ;;  %v4206_v20 = vadd.f32 %v4191_v31, %v13511_v55 }
 0x492   :  { %v3783_v27 = vpack.c.bf16 %v3769_v3, %v3768_v39  ;;  %v3726_v44 = vmax.f32 %v15669_v62, %v3661_v46  ;;  %v4112_v51 = vpop.f32.mrb[200].mxu1  ;;  %v3663_v40 = vpop.f32.mrb[201].mxu0  ;;  %v3770_v17 = vmax.f32 %v3755_v4, 0.0 }
 0x493   :  { %v4234_v30 = vpack.c.bf16 %v4220_v13, %v4219_v14  ;;  %v4177_v22 = vmax.f32 %v15672_v45, %v4112_v51  ;;  %v4114_v9 = vpop.f32.mrb[201].mxu1  ;;  %v3664_v63 = vpop.f32.mrb[202].mxu0  ;;  %v19664_v45 = vmax.f32 %v15251_v8, %v15407_v5  ;;  %v19666_v8 = vmax.f32 %v15263_v19, %v15417_v37 }
 0x494   :  { %3791 = vst.msk [vmem:[#allocation2 + $0x168] sm:$0xff] %vm988_vm2, %v3783_v27  ;;  %v3741_v41 = vmax.f32 %v19663_v16, %v3726_v44  ;;  %v3727_v11 = vmax.f32 %v15694_v18, %v3664_v63  ;;  %v4115_v33 = vpop.f32.mrb[202].mxu1  ;;  %v3666_v15 = vpop.f32.mrb[203].mxu0  ;;  %v12162_v18 = vld [vmem:[%s18891_s1 + $0x150] ss:$8 sps:$4 sm:$0xff]   ;;  %v4221_v2 = vmax.f32 %v4206_v20, 0.0  ;;  %v19667_v44 = vmax.f32 %v15265_v61, %v15429_v6 }
 0x495   :  { %v4250_v62 = vrot.slane %v4234_v30, 4  ;;  %v4192_v24 = vmax.f32 %v19664_v45, %v4177_v22  ;;  %v4178_v43 = vmax.f32 %v15704_v38, %v4115_v33  ;;  %v4117_v25 = vpop.f32.mrb[203].mxu1  ;;  %v12163_v38 = vld [vmem:[%s18891_s1 + $0x164] ss:$8 sps:$4 sm:$0xff]   ;;  %v19669_v61 = vmax.f32 %v15277_v21, %v15437_v49 }
 0x496   :  { %v3756_v23 = vadd.f32 %v3741_v41, %v13528_v0  ;;  %v3742_v28 = vmax.f32 %v19665_v10, %v3727_v11  ;;  %4569 = vmatmul.mubr.bf16.gmra.mrb[52].mxu0 %v12162_v18 }
 0x497   :  { %4273 = vst.msk [vmem:[#allocation2 + $0x1a0] sm:$0xf0] %vm1473_vm3, %v4250_v62  ;;  %v4207_v52 = vadd.f32 %v4192_v24, %v13528_v0  ;;  %v4193_v5 = vmax.f32 %v19666_v8, %v4178_v43  ;;  %5020 = vmatmul.mubr.bf16.gmra.mrb[52].mxu1 %v12162_v18  ;;  %10482 = vmatprep.mubr.msk.bf16.mxu0 %vm462_vm0, %v12163_v38  ;;  %v19671_v18 = vld [vmem:[#allocation13_spill] sm:$0xff] }
 0x498   :  { %v3771_v26 = vmax.f32 %v3756_v23, 0.0  ;;  %10523 = vmatprep.mubr.msk.bf16.mxu1 %vm462_vm0, %v12163_v38  ;;  %v3757_v27 = vadd.f32 %v3742_v28, %v13556_v29  ;;  %v19674_v38 = vld [vmem:[#allocation28_spill] sm:$0xff] }
 0x499   :  { %v4222_v59 = vmax.f32 %v4207_v52, 0.0  ;;  %v3669_v31 = vpop.f32.mrb[204].mxu0  ;;  %v4208_v9 = vadd.f32 %v4193_v5, %v13556_v29  ;;  %v19672_v52 = vld [vmem:[#allocation24_spill] sm:$0xff] }
 0x49a   :  { %v3784_v56 = vpack.c.bf16 %v3771_v26, %v3770_v17  ;;  %v3728_v39 = vmax.f32 %v15706_v7, %v3669_v31  ;;  %v4120_v3 = vpop.f32.mrb[204].mxu1  ;;  %v3671_v19 = vpop.f32.mrb[205].mxu0  ;;  %v3772_v21 = vmax.f32 %v3757_v27, 0.0  ;;  %v19673_v8 = vmax.f32 %v19671_v18, %v19672_v52  ;;  %v19675_v31 = vld [vmem:[#allocation23_spill] sm:$0xff]  ;;  %v19681_v27 = vld [vmem:[#allocation14_spill] sm:$0xff] }
 0x49b   :  { %v4235_v37 = vpack.c.bf16 %v4222_v59, %v4221_v2  ;;  %v4179_v14 = vmax.f32 %v15711_v32, %v4120_v3  ;;  %v4122_v13 = vpop.f32.mrb[205].mxu1  ;;  %v3672_v46 = vpop.f32.mrb[206].mxu0  ;;  %v19668_v32 = vmax.f32 %v15267_v54, %v15433_v1  ;;  %v19670_v54 = vmax.f32 %v15279_v58, %v15441_v50  ;;  %v19678_v3 = vld [vmem:[#allocation19_spill] sm:$0xff] }
 0x49c   :  { %3792 = vst.msk [vmem:[#allocation2 + $0x170] sm:$0xff] %vm988_vm2, %v3784_v56  ;;  %v3743_v51 = vmax.f32 %v19667_v44, %v3728_v39  ;;  %v3729_v40 = vmax.f32 %v15722_v53, %v3672_v46  ;;  %v4123_v30 = vpop.f32.mrb[206].mxu1  ;;  %v3674_v22 = vpop.f32.mrb[207].mxu0  ;;  %v12164_v53 = vld [vmem:[%s18891_s1 + $0x160] ss:$8 sps:$4 sm:$0xff]   ;;  %v4223_v15 = vmax.f32 %v4208_v9, 0.0 }
 0x49d   :  { %v4251_v7 = vrot.slane %v4235_v37, 4  ;;  %v4194_v63 = vmax.f32 %v19668_v32, %v4179_v14  ;;  %v4180_v4 = vmax.f32 %v15726_v48, %v4123_v30  ;;  %v4125_v16 = vpop.f32.mrb[207].mxu1  ;;  %v12165_v48 = vld [vmem:[%s18891_s1 + $0x174] ss:$8 sps:$4 sm:$0xff]   ;;  %v19676_v56 = vld [vmem:[#allocation43_spill] sm:$0xff] }
 0x49e   :  { %v3758_v41 = vadd.f32 %v3743_v51, %v13560_v35  ;;  %v3744_v6 = vmax.f32 %v19669_v61, %v3729_v40  ;;  %4577 = vmatmul.mubr.bf16.gmra.mrb[56].mxu0 %v12164_v53  ;;  %v19679_v14 = vld [vmem:[#allocation29_spill] sm:$0xff]  ;;  %v19680_v46 = vld [vmem:[#allocation20_spill] sm:$0xff]  ;;  %v19683_v9 = vld [vmem:[#allocation39_spill] sm:$0xff] }
 0x49f   :  { %v4252_v11 = vsel %vm553_vm1, %v4250_v62, %v4251_v7  ;;  %v4209_v33 = vadd.f32 %v4194_v63, %v13560_v35  ;;  %v4195_v1 = vmax.f32 %v19670_v54, %v4180_v4  ;;  %5028 = vmatmul.mubr.bf16.gmra.mrb[56].mxu1 %v12164_v53  ;;  %10483 = vmatprep.mubr.msk.bf16.mxu0 %vm462_vm0, %v12165_v48  ;;  %v12166_v40 = vld [vmem:[%s18891_s1 + $0x170] ss:$8 sps:$4 sm:$0xff]   ;;  %v12167_v16 = vld [vmem:[%s18891_s1 + $0x184] ss:$8 sps:$4 sm:$0xff]  }
 0x4a0   :  { %4274 = vst.msk [vmem:[#allocation2 + $0x1a8] sm:$0xff] %vm988_vm2, %v4252_v11  ;;  %v3773_v49 = vmax.f32 %v3758_v41, 0.0  ;;  %10524 = vmatprep.mubr.msk.bf16.mxu1 %vm462_vm0, %v12165_v48  ;;  %v3759_v28 = vadd.f32 %v3744_v6, %v13591_v34  ;;  %v19682_v44 = vmax.f32 %v19680_v46, %v19681_v27  ;;  %v19684_v32 = vld [vmem:[#allocation52_spill] sm:$0xff] }
 0x4a1   :  { %v4224_v62 = vmax.f32 %v4209_v33, 0.0  ;;  %v3677_v20 = vpop.f32.mrb[208].mxu0  ;;  %v4210_v59 = vadd.f32 %v4195_v1, %v13591_v34  ;;  %v19685_v63 = vmax.f32 %v19683_v9, %v19684_v32  ;;  %v19686_v33 = vld [vmem:[#allocation21_spill] sm:$0xff] }
 0x4a2   :  { %v3785_v45 = vpack.c.bf16 %v3773_v49, %v3772_v21  ;;  %v3730_v50 = vmax.f32 %v15728_v57, %v3677_v20  ;;  %v4128_v58 = vpop.f32.mrb[208].mxu1  ;;  %v3679_v24 = vpop.f32.mrb[209].mxu0  ;;  %v3774_v41 = vmax.f32 %v3759_v28, 0.0  ;;  %v19687_v49 = vld [vmem:[#allocation44_spill] sm:$0xff] }
 0x4a3   :  { %v4236_v43 = vpack.c.bf16 %v4224_v62, %v4223_v15  ;;  %v4181_v25 = vmax.f32 %v15730_v47, %v4128_v58  ;;  %v4130_v23 = vpop.f32.mrb[209].mxu1  ;;  %v3680_v10 = vpop.f32.mrb[210].mxu0  ;;  %v19677_v47 = vmax.f32 %v19675_v31, %v19676_v56  ;;  %v19689_v58 = vld [vmem:[#allocation51_spill] sm:$0xff]  ;;  %v19690_v24 = vld [vmem:[#allocation22_spill] sm:$0xff] }
 0x4a4   :  { %3793 = vst.msk [vmem:[#allocation2 + $0x178] sm:$0xff] %vm988_vm2, %v3785_v45  ;;  %v3745_v5 = vmax.f32 %v19673_v8, %v3730_v50  ;;  %v3731_v17 = vmax.f32 %v19674_v38, %v3680_v10  ;;  %v4131_v26 = vpop.f32.mrb[210].mxu1  ;;  %v3682_v2 = vpop.f32.mrb[211].mxu0  ;;  %v19688_v45 = vld [vmem:[#allocation10_spill] sm:$0xff]  ;;  %v19692_v23 = vld [vmem:[#allocation17_spill] sm:$0xff] }
 0x4a5   :  { %v4253_v57 = vrot.slane %v4236_v43, 4  ;;  %v4196_v39 = vmax.f32 %v19677_v47, %v4181_v25  ;;  %v4182_v19 = vmax.f32 %v19678_v3, %v4131_v26  ;;  %v4133_v37 = vpop.f32.mrb[211].mxu1  ;;  %v19691_v43 = vmax.f32 %v19689_v58, %v19690_v24  ;;  %v19694_v38 = vld [vmem:[#allocation53_spill] sm:$0xff]  ;;  %v19697_v56 = vld [vmem:[#allocation30_spill] sm:$0xff]  ;;  %v19699_v3 = vld [vmem:[#allocation47_spill] sm:$0xff] }
 0x4a6   :  { %v3760_v13 = vadd.f32 %v3745_v5, %v19679_v14  ;;  %v3746_v51 = vmax.f32 %v19682_v44, %v3731_v17  ;;  %4585 = vmatmul.mubr.bf16.gmra.mrb[60].mxu0 %v12166_v40  ;;  %v19693_v5 = vld [vmem:[#allocation25_spill] sm:$0xff]  ;;  %v19701_v44 = vld [vmem:[#allocation18_spill] sm:$0xff] }
 0x4a7   :  { %v4254_v30 = vsel %vm553_vm1, %v4251_v7, %v4253_v57  ;;  %v4211_v22 = vadd.f32 %v4196_v39, %v19679_v14  ;;  %v4197_v4 = vmax.f32 %v19685_v63, %v4182_v19  ;;  %5036 = vmatmul.mubr.bf16.gmra.mrb[60].mxu1 %v12166_v40  ;;  %10484 = vmatprep.mubr.msk.bf16.mxu0 %vm462_vm0, %v12167_v16  ;;  %v4225_v7 = vmax.f32 %v4210_v59, 0.0  ;;  %v19696_v2 = vld [vmem:[#allocation49_spill] sm:$0xff]  ;;  %v19698_v39 = vld [vmem:[#allocation8_spill] sm:$0xff] }
 0x4a8   :  { %4275 = vst.msk [vmem:[#allocation2 + $0x1b0] sm:$0xff] %vm988_vm2, %v4254_v30  ;;  %v3775_v61 = vmax.f32 %v3760_v13, 0.0  ;;  %10525 = vmatprep.mubr.msk.bf16.mxu1 %vm462_vm0, %v12167_v16  ;;  %v3761_v50 = vadd.f32 %v3746_v51, %v19688_v45  ;;  %v19695_v17 = vmax.f32 %v19693_v5, %v19694_v38  ;;  %v19700_v19 = vmax.f32 %v19698_v39, %v19699_v3  ;;  %v12168_v13 = vld [vmem:[%s18891_s1 + $0x180] ss:$8 sps:$4 sm:$0xff]   ;;  %v19714_v5 = vld [vmem:[#allocation37_spill] sm:$0xff] }
 0x4a9   :  { %v4226_v6 = vmax.f32 %v4211_v22, 0.0  ;;  %v3685_v53 = vpop.f32.mrb[212].mxu0  ;;  %v4212_v8 = vadd.f32 %v4197_v4, %v19688_v45  ;;  %v19702_v51 = vld [vmem:[#allocation7_spill] sm:$0xff]  ;;  %v12169_v22 = vld [vmem:[%s18891_s1 + $0x194] ss:$8 sps:$4 sm:$0xff]  }
 0x4aa   :  { %v3786_v11 = vpack.c.bf16 %v3775_v61, %v3774_v41  ;;  %v3732_v54 = vmax.f32 %v19686_v33, %v3685_v53  ;;  %v4136_v1 = vpop.f32.mrb[212].mxu1  ;;  %v3687_v48 = vpop.f32.mrb[213].mxu0  ;;  %v19703_v40 = vmax.f32 %v19701_v44, %v19702_v51  ;;  %v3776_v9 = vmax.f32 %v3761_v50, 0.0  ;;  %v19704_v41 = vld [vmem:[#allocation6_spill] sm:$0xff]  ;;  %v12170_v3 = vld [vmem:[%s18891_s1 + $0x190] ss:$8 sps:$4 sm:$0xff]  }
 0x4ab   :  { %v4237_v21 = vpack.c.bf16 %v4226_v6, %v4225_v7  ;;  %v4183_v15 = vmax.f32 %v19687_v49, %v4136_v1  ;;  %v4138_v62 = vpop.f32.mrb[213].mxu1  ;;  %v3688_v20 = vpop.f32.mrb[214].mxu0  ;;  %v19706_v48 = vld [vmem:[#allocation31_spill] sm:$0xff]  ;;  %v19707_v49 = vld [vmem:[#allocation33_spill] sm:$0xff]  ;;  %v19710_v50 = vld [vmem:[#allocation46_spill] sm:$0xff] }
 0x4ac   :  { %3794 = vst.msk [vmem:[#allocation2 + $0x180] sm:$0xff] %vm988_vm2, %v3786_v11  ;;  %v3747_v25 = vmax.f32 %v19691_v43, %v3732_v54  ;;  %v3733_v10 = vmax.f32 %v19692_v23, %v3688_v20  ;;  %v4139_v28 = vpop.f32.mrb[214].mxu1  ;;  %v3690_v18 = vpop.f32.mrb[215].mxu0  ;;  %v19705_v11 = vld [vmem:[#allocation55_spill] sm:$0xff] }
 0x4ad   :  { %v4255_v52 = vrot.slane %v4237_v21, 4  ;;  %v4198_v26 = vmax.f32 %v19695_v17, %v4183_v15  ;;  %v4184_v59 = vmax.f32 %v19696_v2, %v4139_v28  ;;  %v4141_v31 = vpop.f32.mrb[215].mxu1  ;;  %v19708_v15 = vld [vmem:[#allocation34_spill] sm:$0xff]  ;;  %v19712_v28 = vld [vmem:[#allocation4_spill] sm:$0xff] }
 0x4ae   :  { %v3762_v47 = vadd.f32 %v3747_v25, %v19697_v56  ;;  %v3748_v37 = vmax.f32 %v19700_v19, %v3733_v10  ;;  %4593 = vmatmul.mubr.bf16.gmra.mrb[64].mxu0 %v12168_v13  ;;  %v19709_v62 = vmax.f32 %v19707_v49, %v19708_v15  ;;  %v19711_v10 = vld [vmem:[#allocation41_spill] sm:$0xff]  ;;  %v19717_v31 = vld [vmem:[#allocation48_spill] sm:$0xff]  ;;  %v12171_v51 = vld [vmem:[%s18891_s1 + $0x1a4] ss:$8 sps:$4 sm:$0xff]  }
 0x4af   :  { %v4256_v46 = vsel %vm553_vm1, %v4253_v57, %v4255_v52  ;;  %v4213_v27 = vadd.f32 %v4198_v26, %v19697_v56  ;;  %v4199_v30 = vmax.f32 %v19703_v40, %v4184_v59  ;;  %5044 = vmatmul.mubr.bf16.gmra.mrb[64].mxu1 %v12168_v13  ;;  %10485 = vmatprep.mubr.msk.bf16.mxu0 %vm462_vm0, %v12169_v22  ;;  %v4227_v57 = vmax.f32 %v4212_v8, 0.0  ;;  %v19715_v26 = vld [vmem:[#allocation11_spill] sm:$0xff]  ;;  %v19716_v59 = vld [vmem:[#allocation56_spill] sm:$0xff]  ;;  %v19719_v13 = vld [vmem:[#allocation57_spill] sm:$0xff] }
 0x4b0   :  { %4276 = vst.msk [vmem:[#allocation2 + $0x1b8] sm:$0xff] %vm988_vm2, %v4256_v46  ;;  %v3777_v32 = vmax.f32 %v3762_v47, 0.0  ;;  %10526 = vmatprep.mubr.msk.bf16.mxu1 %vm462_vm0, %v12169_v22  ;;  %v3763_v21 = vadd.f32 %v3748_v37, %v19706_v48  ;;  %v19713_v18 = vmax.f32 %v19711_v10, %v19712_v28  ;;  %v19718_v47 = vmax.f32 %v19716_v59, %v19717_v31  ;;  %v19720_v46 = vld [vmem:[#allocation40_spill] sm:$0xff] }
 0x4b1   :  { %v4228_v63 = vmax.f32 %v4213_v27, 0.0  ;;  %v3693_v4 = vpop.f32.mrb[216].mxu0  ;;  %v4214_v23 = vadd.f32 %v4199_v30, %v19706_v48  ;;  %v19721_v27 = vmax.f32 %v19719_v13, %v19720_v46 }
 0x4b2   :  { %v3787_v16 = vpack.c.bf16 %v3777_v32, %v3776_v9  ;;  %v3734_v61 = vmax.f32 %v19704_v41, %v3693_v4  ;;  %v4144_v7 = vpop.f32.mrb[216].mxu1  ;;  %v3695_v6 = vpop.f32.mrb[217].mxu0  ;;  %v3778_v40 = vmax.f32 %v3763_v21, 0.0 }
 0x4b3   :  { %v4238_v53 = vpack.c.bf16 %v4228_v63, %v4227_v57  ;;  %v4185_v33 = vmax.f32 %v19705_v11, %v4144_v7  ;;  %v4146_v54 = vpop.f32.mrb[217].mxu1  ;;  %v3696_v1 = vpop.f32.mrb[218].mxu0  ;;  %v19722_v57 = vld [vmem:[#allocation35_spill] sm:$0xff]  ;;  %v19724_v11 = vld [vmem:[#allocation16_spill] sm:$0xff] }
 0x4b4   :  { %3795 = vst.msk [vmem:[#allocation2 + $0x188] sm:$0xff] %vm988_vm2, %v3787_v16  ;;  %v3749_v20 = vmax.f32 %v19709_v62, %v3734_v61  ;;  %v3735_v58 = vmax.f32 %v19710_v50, %v3696_v1  ;;  %v4147_v24 = vpop.f32.mrb[218].mxu1  ;;  %v3698_v43 = vpop.f32.mrb[219].mxu0  ;;  %v19723_v61 = vld [vmem:[#allocation50_spill] sm:$0xff]  ;;  %v19725_v54 = vld [vmem:[#allocation5_spill] sm:$0xff] }
 0x4b5   :  { %v4257_v25 = vrot.slane %v4238_v53, 4  ;;  %v4200_v8 = vmax.f32 %v19713_v18, %v4185_v33  ;;  %v4186_v38 = vmax.f32 %v19714_v5, %v4147_v24  ;;  %v4149_v17 = vpop.f32.mrb[219].mxu1  ;;  %v19726_v1 = vld [vmem:[#allocation42_spill] sm:$0xff]  ;;  %v19728_v24 = vld [vmem:[#allocation36_spill] sm:$0xff] }
 0x4b6   :  { %v3764_v2 = vadd.f32 %v3749_v20, %v19715_v26  ;;  %v3750_v39 = vmax.f32 %v19718_v47, %v3735_v58  ;;  %4601 = vmatmul.mubr.bf16.gmra.mrb[68].mxu0 %v12170_v3  ;;  %v19727_v21 = vmax.f32 %v19725_v54, %v19726_v1  ;;  %v19729_v43 = vld [vmem:[#allocation26_spill] sm:$0xff]  ;;  %v19733_v17 = vld [vmem:[#allocation45_spill] sm:$0xff] }
 0x4b7   :  { %v4258_v19 = vsel %vm553_vm1, %v4255_v52, %v4257_v25  ;;  %v4215_v37 = vadd.f32 %v4200_v8, %v19715_v26  ;;  %v4201_v44 = vmax.f32 %v19721_v27, %v4186_v38  ;;  %5052 = vmatmul.mubr.bf16.gmra.mrb[68].mxu1 %v12170_v3  ;;  %10486 = vmatprep.mubr.msk.bf16.mxu0 %vm462_vm0, %v12171_v51  ;;  %v4229_v52 = vmax.f32 %v4214_v23, 0.0  ;;  %v19731_v8 = vld [vmem:[#allocation32_spill] sm:$0xff]  ;;  %v19732_v38 = vld [vmem:[#allocation38_spill] sm:$0xff] }
 0x4b8   :  { %4277 = vst.msk [vmem:[#allocation2 + $0x1c0] sm:$0xff] %vm988_vm2, %v4258_v19  ;;  %v3779_v30 = vmax.f32 %v3764_v2, 0.0  ;;  %10527 = vmatprep.mubr.msk.bf16.mxu1 %vm462_vm0, %v12171_v51  ;;  %v3765_v33 = vadd.f32 %v3750_v39, %v19724_v11  ;;  %v19730_v23 = vmax.f32 %v19728_v24, %v19729_v43  ;;  %v19734_v2 = vmax.f32 %v19732_v38, %v19733_v17  ;;  %v19735_v39 = vld [vmem:[#allocation27_spill] sm:$0xff]  ;;  %v19736_v3 = vld [vmem:[#allocation54_spill] sm:$0xff]  ;;  %v19738_v27 = vld [vmem:[#allocation12_spill] sm:$0xff] }
 0x4b9   :  { %v4230_v22 = vmax.f32 %v4215_v37, 0.0  ;;  %v3701_v9 = vpop.f32.mrb[220].mxu0  ;;  %v4216_v58 = vadd.f32 %v4201_v44, %v19724_v11  ;;  %v19737_v19 = vmax.f32 %v19735_v39, %v19736_v3  ;;  %v12173_v37 = vld [vmem:[%s18891_s1 + $0x1b4] ss:$8 sps:$4 sm:$0xff]   ;;  %v12174_v54 = vld [vmem:[%s18891_s1 + $0x1b0] ss:$8 sps:$4 sm:$0xff]  }
 0x4ba   :  { %v3788_v32 = vpack.c.bf16 %v3779_v30, %v3778_v40  ;;  %v3736_v63 = vmax.f32 %v19722_v57, %v3701_v9  ;;  %v4152_v4 = vpop.f32.mrb[220].mxu1  ;;  %v3703_v16 = vpop.f32.mrb[221].mxu0  ;;  %v3780_v13 = vmax.f32 %v3765_v33, 0.0  ;;  %v12178_v39 = vld [vmem:[%s18891_s1 + $0x1d0] ss:$8 sps:$4 sm:$0xff]  }
 0x4bb   :  { %v4239_v41 = vpack.c.bf16 %v4230_v22, %v4229_v52  ;;  %v4187_v7 = vmax.f32 %v19723_v61, %v4152_v4  ;;  %v4154_v6 = vpop.f32.mrb[221].mxu1  ;;  %v3704_v53 = vpop.f32.mrb[222].mxu0  ;;  %v12179_v3 = vld [vmem:[%s18891_s1 + $0x4] ss:$8 sps:$4 sm:$0xff]  }
 0x4bc   :  { %3796 = vst.msk [vmem:[#allocation2 + $0x190] sm:$0xff] %vm988_vm2, %v3788_v32  ;;  %v3751_v49 = vmax.f32 %v19727_v21, %v3736_v63  ;;  %v3737_v15 = vmax.f32 %v15788_v12, %v3704_v53  ;;  %v4155_v62 = vpop.f32.mrb[222].mxu1  ;;  %v3706_v20 = vpop.f32.mrb[223].mxu0  ;;  %v12172_v12 = vld [vmem:[%s18891_s1 + $0x1a0] ss:$8 sps:$4 sm:$0xff]  }
 0x4bd   :  { %v4259_v50 = vrot.slane %v4239_v41, 4  ;;  %v4202_v10 = vmax.f32 %v19730_v23, %v4187_v7  ;;  %v4188_v28 = vmax.f32 %v15790_v42, %v4155_v62  ;;  %v4157_v18 = vpop.f32.mrb[223].mxu1 }
 0x4be   :  { %v3766_v5 = vadd.f32 %v3751_v49, %v19731_v8  ;;  %v3752_v59 = vmax.f32 %v19734_v2, %v3737_v15  ;;  %4609 = vmatmul.mubr.bf16.gmra.mrb[72].mxu0 %v12172_v12  ;;  %v12175_v49 = vld [vmem:[%s18891_s1 + $0x1c4] ss:$8 sps:$4 sm:$0xff]   ;;  %v12177_v18 = vld [vmem:[%s18891_s1 + $0x1d4] ss:$8 sps:$4 sm:$0xff]  }
 0x4bf   :  { %v4260_v31 = vsel %vm553_vm1, %v4257_v25, %v4259_v50  ;;  %v4217_v47 = vadd.f32 %v4202_v10, %v19731_v8  ;;  %v4203_v42 = vmax.f32 %v19737_v19, %v4188_v28  ;;  %5060 = vmatmul.mubr.bf16.gmra.mrb[72].mxu1 %v12172_v12  ;;  %10487 = vmatprep.mubr.msk.bf16.mxu0 %vm462_vm0, %v12173_v37  ;;  %v4231_v25 = vmax.f32 %v4216_v58, 0.0  ;;  %v12176_v28 = vld [vmem:[%s18891_s1 + $0x1c0] ss:$8 sps:$4 sm:$0xff]  }
 0x4c0   :  { %4278 = vst.msk [vmem:[#allocation2 + $0x1c8] sm:$0xff] %vm988_vm2, %v4260_v31  ;;  %v3781_v46 = vmax.f32 %v3766_v5, 0.0  ;;  %v3767_v44 = vadd.f32 %v3752_v59, %v19738_v27  ;;  %10528 = vmatprep.mubr.msk.bf16.mxu1 %vm462_vm0, %v12173_v37  ;;  %v7665_v8 = vld [vmem:[#allocation2 + $0xe0] sm:$0xff] }
 0x4c1   :  { %v4232_v51 = vmax.f32 %v4217_v47, 0.0  ;;  %v4218_v40 = vadd.f32 %v4203_v42, %v19738_v27  ;;  %v16023_v30 = vpop.f32.mrb[224].mxu0 }
 0x4c2   :  { %v3789_v52 = vpack.c.bf16 %v3781_v46, %v3780_v13  ;;  %v3782_v22 = vmax.f32 %v3767_v44, 0.0  ;;  %v16025_v9 = vpop.f32.mrb[224].mxu1  ;;  %v4404_v32 = vpop.f32.mrb[225].mxu0 }
 0x4c3   :  { %v4240_v57 = vpack.c.bf16 %v4232_v51, %v4231_v25  ;;  %v4233_v63 = vmax.f32 %v4218_v40, 0.0  ;;  %v4855_v4 = vpop.f32.mrb[225].mxu1  ;;  %v16027_v16 = vpop.f32.mrb[226].mxu0  ;;  %v12180_v40 = vld [vmem:[%s18891_s1] ss:$8 sps:$4 sm:$0xff]   ;;  %v19741_v32 = vmov 0  }
 0x4c4   :  { %3797 = vst.msk [vmem:[#allocation2 + $0x198] sm:$0xff] %vm988_vm2, %v3789_v52  ;;  %v3790_v41 = vpack.c.bf16 %v3782_v22, %v3782_v22  ;;  %v16030_v61 = vpop.f32.mrb[226].mxu1  ;;  %v4407_v7 = vpop.f32.mrb[227].mxu0  ;;  %v6277_v52 = vld [vmem:[#allocation2] sm:$0xff]  ;;  %v16088_v22 = vld [vmem:[#allocation2 + $0x78] sm:$0xff] }
 0x4c5   :  { %v4261_v6 = vrot.slane %v4240_v57, 4  ;;  %v4241_v53 = vpack.c.bf16 %v4233_v63, %v4233_v63  ;;  %v4858_v33 = vpop.f32.mrb[227].mxu1  ;;  %v12181_v57 = vld [vmem:[%s18891_s1 + $0x14] ss:$8 sps:$4 sm:$0xff]  }
 0x4c6   :  { %3798 = vst.msk [vmem:[#allocation2 + $0x1a0] sm:$0xf] %vm996_vm4, %v3790_v41  ;;  %4617 = vmatmul.mubr.bf16.gmra.mrb[76].mxu0 %v12174_v54  ;;  %v6278_v41 = vld [vmem:[#allocation2 + $0x8] sm:$0xff] }
 0x4c7   :  { %v4262_v1 = vsel %vm553_vm1, %v4259_v50, %v4261_v6  ;;  %v4263_v21 = vrot.slane %v4241_v53, 4  ;;  %5068 = vmatmul.mubr.bf16.gmra.mrb[76].mxu1 %v12174_v54  ;;  %10488 = vmatprep.mubr.msk.bf16.mxu0 %vm462_vm0, %v12175_v49  ;;  %v7653_v53 = vld [vmem:[#allocation2 + $0x80] sm:$0xff] }
 0x4c8   :  { %4279 = vst.msk [vmem:[#allocation2 + $0x1d0] sm:$0xff] %vm988_vm2, %v4262_v1  ;;  %10529 = vmatprep.mubr.msk.bf16.mxu1 %vm462_vm0, %v12175_v49  ;;  %v12182_v49 = vld [vmem:[%s18891_s1 + $0x10] ss:$8 sps:$4 sm:$0xff]  }
 0x4c9   :  { %v4264_v15 = vsel %vm553_vm1, %v4261_v6, %v4263_v21  ;;  %v16044_v62 = vpop.f32.mrb[228].mxu0 }
 0x4ca   :  { %4280 = vst.msk [vmem:[#allocation2 + $0x1d8] sm:$0xff] %vm988_vm2, %v4264_v15  ;;  %v16047_v20 = vpop.f32.mrb[228].mxu1  ;;  %v4412_v50 = vpop.f32.mrb[229].mxu0  ;;  %v6279_v15 = vld [vmem:[#allocation2 + $0x10] sm:$0xff] }
 0x4cb   :  { %v4863_v58 = vpop.f32.mrb[229].mxu1  ;;  %v16049_v24 = vpop.f32.mrb[230].mxu0  ;;  %v7654_v50 = vld [vmem:[#allocation2 + $0x88] sm:$0xff] }
 0x4cc   :  { %v16051_v43 = vpop.f32.mrb[230].mxu1  ;;  %v4415_v23 = vpop.f32.mrb[231].mxu0  ;;  %v12183_v58 = vld [vmem:[%s18891_s1 + $0x24] ss:$8 sps:$4 sm:$0xff]  }
 0x4cd   :  { %v4866_v10 = vpop.f32.mrb[231].mxu1 }
 0x4ce   :  { %4625 = vmatmul.mubr.bf16.gmra.mrb[80].mxu0 %v12176_v28 }
 0x4cf   :  { %5076 = vmatmul.mubr.bf16.gmra.mrb[80].mxu1 %v12176_v28  ;;  %10489 = vmatprep.mubr.msk.bf16.mxu0 %vm462_vm0, %v12177_v18  ;;  %v6280_v28 = vld [vmem:[#allocation2 + $0x18] sm:$0xff] }
 0x4d0   :  { %10530 = vmatprep.mubr.msk.bf16.mxu1 %vm462_vm0, %v12177_v18 }
 0x4d1   :  { %v16061_v5 = vpop.f32.mrb[232].mxu0 }
 0x4d2   :  { %v16063_v38 = vpop.f32.mrb[232].mxu1  ;;  %v4420_v17 = vpop.f32.mrb[233].mxu0 }
 0x4d3   :  { %v4871_v2 = vpop.f32.mrb[233].mxu1  ;;  %v16065_v59 = vpop.f32.mrb[234].mxu0 }
 0x4d4   :  { %v16067_v12 = vpop.f32.mrb[234].mxu1  ;;  %v4423_v31 = vpop.f32.mrb[235].mxu0  ;;  %v7655_v2 = vld [vmem:[#allocation2 + $0x90] sm:$0xff] }
 0x4d5   :  { %v4874_v47 = vpop.f32.mrb[235].mxu1 }
 0x4d6   :  { %4633 = vmatmul.mubr.bf16.gmra.mrb[84].mxu0 %v12178_v39 }
 0x4d7   :  { %5084 = vmatmul.mubr.bf16.gmra.mrb[84].mxu1 %v12178_v39  ;;  %10542 = vmatprep.mubr.msk.bf16.mxu0 %vm462_vm0, %v12179_v3 }
 0x4d8   :  { %10583 = vmatprep.mubr.msk.bf16.mxu1 %vm462_vm0, %v12179_v3 }
 0x4d9   :  { %v16077_v19 = vpop.f32.mrb[236].mxu0 }
 0x4da   :  { %v16079_v42 = vpop.f32.mrb[236].mxu1  ;;  %v4428_v37 = vpop.f32.mrb[237].mxu0 }
 0x4db   :  { %v4879_v13 = vpop.f32.mrb[237].mxu1  ;;  %v16081_v46 = vpop.f32.mrb[238].mxu0  ;;  %v12184_v37 = vld [vmem:[%s18891_s1 + $0x20] ss:$8 sps:$4 sm:$0xff]  }
 0x4dc   :  { %19739 = vst [vmem:[#allocation13_spill] sm:$0xff] %v16081_v46  ;;  %v16083_v44 = vpop.f32.mrb[238].mxu1  ;;  %v4431_v25 = vpop.f32.mrb[239].mxu0  ;;  %v6281_v13 = vld [vmem:[#allocation2 + $0x20] sm:$0xff] }
 0x4dd   :  { %19740 = vst [vmem:[#allocation24_spill] sm:$0xff] %v16083_v44  ;;  %v4882_v51 = vpop.f32.mrb[239].mxu1  ;;  %v7656_v25 = vld [vmem:[#allocation2 + $0x98] sm:$0xff] }
 0x4de   :  { %5334 = vmatmul.mubr.bf16.vlgmr.msra.gmra.mrb[88].mxu0 %v12180_v40  ;;  %v12214_v44 = vld [vmem:[%s18891_s1 + $0x110] ss:$8 sps:$4 sm:$0xff]  }
 0x4df   :  { %5785 = vmatmul.mubr.bf16.vlgmr.msra.gmra.mrb[88].mxu1 %v12180_v40  ;;  %6964 = vmatpush1.bf16.msra.mxu0 %v6277_v52  ;;  %v12185_v40 = vld [vmem:[%s18891_s1 + $0x34] ss:$8 sps:$4 sm:$0xff]  }
 0x4e0   :  { %7698 = vmatpush1.bf16.msra.mxu1 %v16088_v22  ;;  %6965 = vmatprep.subr.bf16.mxu0 %v19741_v32 }
 0x4e1   :  { %7699 = vmatprep.subr.bf16.mxu1 %v19741_v32  ;;  %10543 = vmatprep.mubr.msk.bf16.mxu0 %vm462_vm0, %v12181_v57  ;;  %v16097_v63 = vpop.f32.mrb[240].mxu0 }
 0x4e2   :  { %19742 = vst [vmem:[#allocation28_spill] sm:$0xff] %v16097_v63  ;;  %v16099_v4 = vpop.f32.mrb[240].mxu1  ;;  %10584 = vmatprep.mubr.msk.bf16.mxu1 %vm462_vm0, %v12181_v57  ;;  %v4436_v7 = vpop.f32.mrb[241].mxu0  ;;  %v6282_v57 = vld [vmem:[#allocation2 + $0x28] sm:$0xff] }
 0x4e3   :  { %19743 = vst [vmem:[#allocation23_spill] sm:$0xff] %v16099_v4  ;;  %v4887_v6 = vpop.f32.mrb[241].mxu1  ;;  %6966 = vmatpush1.bf16.msra.mxu0 %v6278_v41  ;;  %v16102_v33 = vpop.f32.mrb[242].mxu0 }
 0x4e4   :  { %19744 = vst [vmem:[#allocation43_spill] sm:$0xff] %v16102_v33  ;;  %7700 = vmatpush1.bf16.msra.mxu1 %v7653_v53  ;;  %v16104_v54 = vpop.f32.mrb[242].mxu1  ;;  %6967 = vmatprep.subr.bf16.mxu0 %v19741_v32  ;;  %v4439_v1 = vpop.f32.mrb[243].mxu0  ;;  %v7657_v6 = vld [vmem:[#allocation2 + $0xa0] sm:$0xff] }
 0x4e5   :  { %19745 = vst [vmem:[#allocation19_spill] sm:$0xff] %v16104_v54  ;;  %v4890_v21 = vpop.f32.mrb[243].mxu1  ;;  %7701 = vmatprep.subr.bf16.mxu1 %v19741_v32  ;;  %v12210_v54 = vld [vmem:[%s18891_s1 + $0xf0] ss:$8 sps:$4 sm:$0xff]  }
 0x4e6   :  { %5342 = vmatmul.mubr.bf16.gmra.mrb[92].mxu0 %v12182_v49 }
 0x4e7   :  { %5793 = vmatmul.mubr.bf16.gmra.mrb[92].mxu1 %v12182_v49  ;;  %6968 = vmatpush1.bf16.msra.mxu0 %v6279_v15  ;;  %v12186_v15 = vld [vmem:[%s18891_s1 + $0x30] ss:$8 sps:$4 sm:$0xff]  }
 0x4e8   :  { %7702 = vmatpush1.bf16.msra.mxu1 %v7654_v50  ;;  %6969 = vmatprep.subr.bf16.mxu0 %v19741_v32  ;;  %v6283_v50 = vld [vmem:[#allocation2 + $0x30] sm:$0xff] }
 0x4e9   :  { %7703 = vmatprep.subr.bf16.mxu1 %v19741_v32  ;;  %10544 = vmatprep.mubr.msk.bf16.mxu0 %vm462_vm0, %v12183_v58  ;;  %v16117_v23 = vpop.f32.mrb[244].mxu0 }
 0x4ea   :  { %19746 = vst [vmem:[#allocation20_spill] sm:$0xff] %v16117_v23  ;;  %v16119_v10 = vpop.f32.mrb[244].mxu1  ;;  %10585 = vmatprep.mubr.msk.bf16.mxu1 %vm462_vm0, %v12183_v58  ;;  %v4444_v18 = vpop.f32.mrb[245].mxu0  ;;  %v7658_v58 = vld [vmem:[#allocation2 + $0xa8] sm:$0xff] }
 0x4eb   :  { %19747 = vst [vmem:[#allocation14_spill] sm:$0xff] %v16119_v10  ;;  %v4895_v17 = vpop.f32.mrb[245].mxu1  ;;  %6970 = vmatpush1.bf16.msra.mxu0 %v6280_v28  ;;  %v16122_v31 = vpop.f32.mrb[246].mxu0  ;;  %v12187_v18 = vld [vmem:[%s18891_s1 + $0x44] ss:$8 sps:$4 sm:$0xff]  }
 0x4ec   :  { %19748 = vst [vmem:[#allocation39_spill] sm:$0xff] %v16122_v31  ;;  %7704 = vmatpush1.bf16.msra.mxu1 %v7655_v2  ;;  %v16124_v47 = vpop.f32.mrb[246].mxu1  ;;  %6971 = vmatprep.subr.bf16.mxu0 %v19741_v32  ;;  %v4447_v39 = vpop.f32.mrb[247].mxu0 }
 0x4ed   :  { %19749 = vst [vmem:[#allocation52_spill] sm:$0xff] %v16124_v47  ;;  %v4898_v3 = vpop.f32.mrb[247].mxu1  ;;  %7705 = vmatprep.subr.bf16.mxu1 %v19741_v32  ;;  %v6284_v39 = vld [vmem:[#allocation2 + $0x38] sm:$0xff]  ;;  %v12208_v47 = vld [vmem:[%s18891_s1 + $0xe0] ss:$8 sps:$4 sm:$0xff]  }
 0x4ee   :  { %5350 = vmatmul.mubr.bf16.gmra.mrb[96].mxu0 %v12184_v37 }
 0x4ef   :  { %5801 = vmatmul.mubr.bf16.gmra.mrb[96].mxu1 %v12184_v37  ;;  %6972 = vmatpush1.bf16.msra.mxu0 %v6281_v13  ;;  %v7659_v37 = vld [vmem:[#allocation2 + $0xb0] sm:$0xff] }
 0x4f0   :  { %7706 = vmatpush1.bf16.msra.mxu1 %v7656_v25  ;;  %6973 = vmatprep.subr.bf16.mxu0 %v19741_v32 }
 0x4f1   :  { %7707 = vmatprep.subr.bf16.mxu1 %v19741_v32  ;;  %v16133_v51 = vpop.f32.mrb[248].mxu0  ;;  %10545 = vmatprep.mubr.msk.bf16.mxu0 %vm462_vm0, %v12185_v40 }
 0x4f2   :  { %19750 = vst [vmem:[#allocation21_spill] sm:$0xff] %v16133_v51  ;;  %v16139_v52 = vpop.f32.mrb[248].mxu1  ;;  %10586 = vmatprep.mubr.msk.bf16.mxu1 %vm462_vm0, %v12185_v40  ;;  %v4452_v41 = vpop.f32.mrb[249].mxu0 }
 0x4f3   :  { %19751 = vst [vmem:[#allocation44_spill] sm:$0xff] %v16139_v52  ;;  %v4903_v7 = vpop.f32.mrb[249].mxu1  ;;  %6974 = vmatpush1.bf16.msra.mxu0 %v6282_v57  ;;  %v16142_v53 = vpop.f32.mrb[250].mxu0 }
 0x4f4   :  { %19752 = vst [vmem:[#allocation51_spill] sm:$0xff] %v16142_v53  ;;  %7708 = vmatpush1.bf16.msra.mxu1 %v7657_v6  ;;  %v16144_v1 = vpop.f32.mrb[250].mxu1  ;;  %6975 = vmatprep.subr.bf16.mxu0 %v19741_v32  ;;  %v4455_v21 = vpop.f32.mrb[251].mxu0  ;;  %v12188_v6 = vld [vmem:[%s18891_s1 + $0x40] ss:$8 sps:$4 sm:$0xff]  }
 0x4f5   :  { %19753 = vst [vmem:[#allocation22_spill] sm:$0xff] %v16144_v1  ;;  %v4906_v49 = vpop.f32.mrb[251].mxu1  ;;  %7709 = vmatprep.subr.bf16.mxu1 %v19741_v32  ;;  %v6285_v21 = vld [vmem:[#allocation2 + $0x40] sm:$0xff]  ;;  %v12206_v1 = vld [vmem:[%s18891_s1 + $0xd0] ss:$8 sps:$4 sm:$0xff]  }
 0x4f6   :  { %5358 = vmatmul.mubr.bf16.gmra.mrb[100].mxu0 %v12186_v15  ;;  %v7660_v49 = vld [vmem:[#allocation2 + $0xb8] sm:$0xff] }
 0x4f7   :  { %5809 = vmatmul.mubr.bf16.gmra.mrb[100].mxu1 %v12186_v15  ;;  %6976 = vmatpush1.bf16.msra.mxu0 %v6283_v50  ;;  %v12189_v50 = vld [vmem:[%s18891_s1 + $0x54] ss:$8 sps:$4 sm:$0xff]  }
 0x4f8   :  { %7710 = vmatpush1.bf16.msra.mxu1 %v7658_v58  ;;  %6977 = vmatprep.subr.bf16.mxu0 %v19741_v32  ;;  %v7663_v58 = vld [vmem:[#allocation2 + $0xd0] sm:$0xff] }
 0x4f9   :  { %v16152_v28 = vpop.f32.mrb[252].mxu0  ;;  %7711 = vmatprep.subr.bf16.mxu1 %v19741_v32  ;;  %10546 = vmatprep.mubr.msk.bf16.mxu0 %vm462_vm0, %v12187_v18 }
 0x4fa   :  { %19754 = vst [vmem:[#allocation17_spill] sm:$0xff] %v16152_v28  ;;  %v16159_v17 = vpop.f32.mrb[252].mxu1  ;;  %v4460_v2 = vpop.f32.mrb[253].mxu0  ;;  %10587 = vmatprep.mubr.msk.bf16.mxu1 %vm462_vm0, %v12187_v18 }
 0x4fb   :  { %19755 = vst [vmem:[#allocation25_spill] sm:$0xff] %v16159_v17  ;;  %v4911_v3 = vpop.f32.mrb[253].mxu1  ;;  %6978 = vmatpush1.bf16.msra.mxu0 %v6284_v39  ;;  %v16162_v13 = vpop.f32.mrb[254].mxu0  ;;  %v6286_v39 = vld [vmem:[#allocation2 + $0x48] sm:$0xff] }
 0x4fc   :  { %7712 = vmatpush1.bf16.msra.mxu1 %v7659_v37  ;;  %v16166_v40 = vpop.f32.mrb[254].mxu1  ;;  %6979 = vmatprep.subr.bf16.mxu0 %v19741_v32  ;;  %v4463_v57 = vpop.f32.mrb[255].mxu0  ;;  %v12204_v17 = vld [vmem:[%s18891_s1 + $0xc0] ss:$8 sps:$4 sm:$0xff]  }
 0x4fd   :  { %v4914_v7 = vpop.f32.mrb[255].mxu1  ;;  %7713 = vmatprep.subr.bf16.mxu1 %v19741_v32  ;;  %v7661_v57 = vld [vmem:[#allocation2 + $0xc0] sm:$0xff] }
 0x4fe   :  { %5366 = vmatmul.mubr.bf16.gmra.mrb[104].mxu0 %v12188_v6 }
 0x4ff   :  { %5817 = vmatmul.mubr.bf16.gmra.mrb[104].mxu1 %v12188_v6  ;;  %6980 = vmatpush1.bf16.msra.mxu0 %v6285_v21 }
 0x500   :  { %7714 = vmatpush1.bf16.msra.mxu1 %v7660_v49  ;;  %6981 = vmatprep.subr.bf16.mxu0 %v19741_v32 }
 0x501   :  { %v16176_v15 = vpop.f32.mrb[0].mxu0  ;;  %7715 = vmatprep.subr.bf16.mxu1 %v19741_v32  ;;  %10547 = vmatprep.mubr.msk.bf16.mxu0 %vm462_vm0, %v12189_v50 }
 0x502   :  { %v16185_v18 = vpop.f32.mrb[0].mxu1  ;;  %v4468_v2 = vpop.f32.mrb[1].mxu0  ;;  %10588 = vmatprep.mubr.msk.bf16.mxu1 %vm462_vm0, %v12189_v50 }
 0x503   :  { %v4919_v37 = vpop.f32.mrb[1].mxu1  ;;  %6982 = vmatpush1.bf16.msra.mxu0 %v6286_v39  ;;  %v16190_v7 = vpop.f32.mrb[2].mxu0  ;;  %v12190_v39 = vld [vmem:[%s18891_s1 + $0x50] ss:$8 sps:$4 sm:$0xff]  }
 0x504   :  { %7716 = vmatpush1.bf16.msra.mxu1 %v7661_v57  ;;  %v16194_v21 = vpop.f32.mrb[2].mxu1  ;;  %6983 = vmatprep.subr.bf16.mxu0 %v19741_v32  ;;  %v4471_v49 = vpop.f32.mrb[3].mxu0  ;;  %v6287_v37 = vld [vmem:[#allocation2 + $0x50] sm:$0xff]  ;;  %v7662_v57 = vld [vmem:[#allocation2 + $0xc8] sm:$0xff] }
 0x505   :  { %v4922_v2 = vpop.f32.mrb[3].mxu1  ;;  %7717 = vmatprep.subr.bf16.mxu1 %v19741_v32  ;;  %v12191_v49 = vld [vmem:[%s18891_s1 + $0x64] ss:$8 sps:$4 sm:$0xff]  }
 0x506   :  { %5374 = vmatmul.mubr.bf16.gmra.mrb[108].mxu0 %v12190_v39 }
 0x507   :  { %5825 = vmatmul.mubr.bf16.gmra.mrb[108].mxu1 %v12190_v39  ;;  %6984 = vmatpush1.bf16.msra.mxu0 %v6287_v37  ;;  %v6288_v37 = vld [vmem:[#allocation2 + $0x58] sm:$0xff] }
 0x508   :  { %7718 = vmatpush1.bf16.msra.mxu1 %v7662_v57  ;;  %6985 = vmatprep.subr.bf16.mxu0 %v19741_v32 }
 0x509   :  { %v16204_v6 = vpop.f32.mrb[4].mxu0  ;;  %7719 = vmatprep.subr.bf16.mxu1 %v19741_v32  ;;  %10548 = vmatprep.mubr.msk.bf16.mxu0 %vm462_vm0, %v12191_v49 }
 0x50a   :  { %v16213_v50 = vpop.f32.mrb[4].mxu1  ;;  %v4476_v39 = vpop.f32.mrb[5].mxu0  ;;  %10589 = vmatprep.mubr.msk.bf16.mxu1 %vm462_vm0, %v12191_v49 }
 0x50b   :  { %v4927_v3 = vpop.f32.mrb[5].mxu1  ;;  %6986 = vmatpush1.bf16.msra.mxu0 %v6288_v37  ;;  %v16218_v41 = vpop.f32.mrb[6].mxu0  ;;  %v7664_v37 = vld [vmem:[#allocation2 + $0xd8] sm:$0xff] }
 0x50c   :  { %7720 = vmatpush1.bf16.msra.mxu1 %v7663_v58  ;;  %v16222_v27 = vpop.f32.mrb[6].mxu1  ;;  %6987 = vmatprep.subr.bf16.mxu0 %v19741_v32  ;;  %v4479_v39 = vpop.f32.mrb[7].mxu0  ;;  %v12192_v3 = vld [vmem:[%s18891_s1 + $0x60] ss:$8 sps:$4 sm:$0xff]  }
 0x50d   :  { %v4930_v2 = vpop.f32.mrb[7].mxu1  ;;  %7721 = vmatprep.subr.bf16.mxu1 %v19741_v32  ;;  %v6289_v58 = vld [vmem:[#allocation2 + $0x60] sm:$0xff] }
 0x50e   :  { %5382 = vmatmul.mubr.bf16.gmra.mrb[112].mxu0 %v12192_v3  ;;  %v12193_v2 = vld [vmem:[%s18891_s1 + $0x74] ss:$8 sps:$4 sm:$0xff]  }
 0x50f   :  { %5833 = vmatmul.mubr.bf16.gmra.mrb[112].mxu1 %v12192_v3  ;;  %6988 = vmatpush1.bf16.msra.mxu0 %v6289_v58  ;;  %v6290_v58 = vld [vmem:[#allocation2 + $0x68] sm:$0xff] }
 0x510   :  { %7722 = vmatpush1.bf16.msra.mxu1 %v7664_v37  ;;  %6989 = vmatprep.subr.bf16.mxu0 %v19741_v32  ;;  %v7667_v37 = vld [vmem:[#allocation2 + $0xf0] sm:$0xff] }
 0x511   :  { %v16232_v25 = vpop.f32.mrb[8].mxu0  ;;  %7723 = vmatprep.subr.bf16.mxu1 %v19741_v32  ;;  %10549 = vmatprep.mubr.msk.bf16.mxu0 %vm462_vm0, %v12193_v2 }
 0x512   :  { %v16241_v49 = vpop.f32.mrb[8].mxu1  ;;  %v4484_v3 = vpop.f32.mrb[9].mxu0  ;;  %10590 = vmatprep.mubr.msk.bf16.mxu1 %vm462_vm0, %v12193_v2 }
 0x513   :  { %v4935_v57 = vpop.f32.mrb[9].mxu1  ;;  %6990 = vmatpush1.bf16.msra.mxu0 %v6290_v58  ;;  %v16246_v11 = vpop.f32.mrb[10].mxu0  ;;  %v7666_v58 = vld [vmem:[#allocation2 + $0xe8] sm:$0xff] }
 0x514   :  { %7724 = vmatpush1.bf16.msra.mxu1 %v7665_v8  ;;  %v16250_v48 = vpop.f32.mrb[10].mxu1  ;;  %6991 = vmatprep.subr.bf16.mxu0 %v19741_v32  ;;  %v4487_v3 = vpop.f32.mrb[11].mxu0  ;;  %v12194_v57 = vld [vmem:[%s18891_s1 + $0x70] ss:$8 sps:$4 sm:$0xff]  }
 0x515   :  { %v4938_v39 = vpop.f32.mrb[11].mxu1  ;;  %7725 = vmatprep.subr.bf16.mxu1 %v19741_v32  ;;  %v6291_v8 = vld [vmem:[#allocation2 + $0x70] sm:$0xff] }
 0x516   :  { %5390 = vmatmul.mubr.bf16.gmra.mrb[116].mxu0 %v12194_v57  ;;  %v12195_v39 = vld [vmem:[%s18891_s1 + $0x84] ss:$8 sps:$4 sm:$0xff]  }
 0x517   :  { %5841 = vmatmul.mubr.bf16.gmra.mrb[116].mxu1 %v12194_v57  ;;  %6992 = vmatpush1.bf16.msra.mxu0 %v6291_v8 }
 0x518   :  { %7726 = vmatpush1.bf16.msra.mxu1 %v7666_v58  ;;  %6993 = vmatprep.subr.bf16.mxu0 %v19741_v32 }
 0x519   :  { %v16260_v26 = vpop.f32.mrb[12].mxu0  ;;  %7727 = vmatprep.subr.bf16.mxu1 %v19741_v32  ;;  %10550 = vmatprep.mubr.msk.bf16.mxu0 %vm462_vm0, %v12195_v39 }
 0x51a   :  { %19756 = vst [vmem:[#allocation53_spill] sm:$0xff] %v16260_v26  ;;  %v16269_v2 = vpop.f32.mrb[12].mxu1  ;;  %v4492_v57 = vpop.f32.mrb[13].mxu0  ;;  %10591 = vmatprep.mubr.msk.bf16.mxu1 %vm462_vm0, %v12195_v39  ;;  %v19784_v26 = vmax.f32 %v16023_v30, %v16162_v13 }
 0x51b   :  { %19757 = vst [vmem:[#allocation49_spill] sm:$0xff] %v16269_v2  ;;  %v4943_v58 = vpop.f32.mrb[13].mxu1  ;;  %6994 = vmatpush1.bf16.msra.mxu0 %v16088_v22  ;;  %v16275_v56 = vpop.f32.mrb[14].mxu0  ;;  %v12196_v22 = vld [vmem:[%s18891_s1 + $0x80] ss:$8 sps:$4 sm:$0xff]  }
 0x51c   :  { %19758 = vst [vmem:[#allocation8_spill] sm:$0xff] %v16275_v56  ;;  %7728 = vmatpush1.bf16.msra.mxu1 %v7667_v37  ;;  %v16279_v14 = vpop.f32.mrb[14].mxu1  ;;  %v4495_v3 = vpop.f32.mrb[15].mxu0  ;;  %7156 = vmatprep.subr.bf16.mxu0 %v19741_v32  ;;  %v12197_v37 = vld [vmem:[%s18891_s1 + $0x94] ss:$8 sps:$4 sm:$0xff]  }
 0x51d   :  { %19759 = vst [vmem:[#allocation47_spill] sm:$0xff] %v16279_v14  ;;  %v4946_v57 = vpop.f32.mrb[15].mxu1  ;;  %7890 = vmatprep.subr.bf16.mxu1 %v19741_v32  ;;  %v12212_v2 = vld [vmem:[%s18891_s1 + $0x100] ss:$8 sps:$4 sm:$0xff]  }
 0x51e   :  { %5398 = vmatmul.mubr.bf16.gmra.mrb[120].mxu0 %v12196_v22 }
 0x51f   :  { %5849 = vmatmul.mubr.bf16.gmra.mrb[120].mxu1 %v12196_v22  ;;  %10551 = vmatprep.mubr.msk.bf16.mxu0 %vm462_vm0, %v12197_v37 }
 0x520   :  { %10592 = vmatprep.mubr.msk.bf16.mxu1 %vm462_vm0, %v12197_v37 }
 0x521   :  { %v16293_v3 = vpop.f32.mrb[16].mxu0 }
 0x522   :  { %19760 = vst [vmem:[#allocation18_spill] sm:$0xff] %v16293_v3  ;;  %v16297_v57 = vpop.f32.mrb[16].mxu1  ;;  %v4500_v39 = vpop.f32.mrb[17].mxu0 }
 0x523   :  { %19761 = vst [vmem:[#allocation7_spill] sm:$0xff] %v16297_v57  ;;  %v4951_v22 = vpop.f32.mrb[17].mxu1  ;;  %v16301_v8 = vpop.f32.mrb[18].mxu0  ;;  %v12198_v39 = vld [vmem:[%s18891_s1 + $0x90] ss:$8 sps:$4 sm:$0xff]  }
 0x524   :  { %19762 = vst [vmem:[#allocation6_spill] sm:$0xff] %v16301_v8  ;;  %v16305_v14 = vpop.f32.mrb[18].mxu1  ;;  %v4503_v37 = vpop.f32.mrb[19].mxu0  ;;  %v12199_v22 = vld [vmem:[%s18891_s1 + $0xa4] ss:$8 sps:$4 sm:$0xff]  }
 0x525   :  { %19763 = vst [vmem:[#allocation55_spill] sm:$0xff] %v16305_v14  ;;  %v4954_v56 = vpop.f32.mrb[19].mxu1 }
 0x526   :  { %5406 = vmatmul.mubr.bf16.gmra.mrb[124].mxu0 %v12198_v39 }
 0x527   :  { %5857 = vmatmul.mubr.bf16.gmra.mrb[124].mxu1 %v12198_v39  ;;  %10552 = vmatprep.mubr.msk.bf16.mxu0 %vm462_vm0, %v12199_v22 }
 0x528   :  { %10593 = vmatprep.mubr.msk.bf16.mxu1 %vm462_vm0, %v12199_v22 }
 0x529   :  { %v16317_v32 = vpop.f32.mrb[20].mxu0 }
 0x52a   :  { %19764 = vst [vmem:[#allocation33_spill] sm:$0xff] %v16317_v32  ;;  %v16321_v56 = vpop.f32.mrb[20].mxu1  ;;  %v4508_v4 = vpop.f32.mrb[21].mxu0 }
 0x52b   :  { %19765 = vst [vmem:[#allocation34_spill] sm:$0xff] %v16321_v56  ;;  %v4959_v39 = vpop.f32.mrb[21].mxu1  ;;  %v16325_v58 = vpop.f32.mrb[22].mxu0  ;;  %v12200_v4 = vld [vmem:[%s18891_s1 + $0xa0] ss:$8 sps:$4 sm:$0xff]  }
 0x52c   :  { %19766 = vst [vmem:[#allocation46_spill] sm:$0xff] %v16325_v58  ;;  %v16329_v10 = vpop.f32.mrb[22].mxu1  ;;  %v4511_v22 = vpop.f32.mrb[23].mxu0  ;;  %v12201_v39 = vld [vmem:[%s18891_s1 + $0xb4] ss:$8 sps:$4 sm:$0xff]  }
 0x52d   :  { %19767 = vst [vmem:[#allocation41_spill] sm:$0xff] %v16329_v10  ;;  %v4962_v23 = vpop.f32.mrb[23].mxu1 }
 0x52e   :  { %5414 = vmatmul.mubr.bf16.gmra.mrb[128].mxu0 %v12200_v4 }
 0x52f   :  { %5865 = vmatmul.mubr.bf16.gmra.mrb[128].mxu1 %v12200_v4  ;;  %10553 = vmatprep.mubr.msk.bf16.mxu0 %vm462_vm0, %v12201_v39 }
 0x530   :  { %10594 = vmatprep.mubr.msk.bf16.mxu1 %vm462_vm0, %v12201_v39 }
 0x531   :  { %v16341_v14 = vpop.f32.mrb[24].mxu0 }
 0x532   :  { %19768 = vst [vmem:[#allocation4_spill] sm:$0xff] %v16341_v14  ;;  %v16345_v23 = vpop.f32.mrb[24].mxu1  ;;  %v4516_v8 = vpop.f32.mrb[25].mxu0 }
 0x533   :  { %19769 = vst [vmem:[#allocation37_spill] sm:$0xff] %v16345_v23  ;;  %v4967_v4 = vpop.f32.mrb[25].mxu1  ;;  %v16349_v37 = vpop.f32.mrb[26].mxu0  ;;  %v12202_v8 = vld [vmem:[%s18891_s1 + $0xb0] ss:$8 sps:$4 sm:$0xff]  }
 0x534   :  { %19770 = vst [vmem:[#allocation56_spill] sm:$0xff] %v16349_v37  ;;  %v16353_v52 = vpop.f32.mrb[26].mxu1  ;;  %v4519_v39 = vpop.f32.mrb[27].mxu0  ;;  %v12203_v4 = vld [vmem:[%s18891_s1 + $0xc4] ss:$8 sps:$4 sm:$0xff]  }
 0x535   :  { %19771 = vst [vmem:[#allocation48_spill] sm:$0xff] %v16353_v52  ;;  %v4970_v51 = vpop.f32.mrb[27].mxu1 }
 0x536   :  { %5422 = vmatmul.mubr.bf16.gmra.mrb[132].mxu0 %v12202_v8 }
 0x537   :  { %5873 = vmatmul.mubr.bf16.gmra.mrb[132].mxu1 %v12202_v8  ;;  %10554 = vmatprep.mubr.msk.bf16.mxu0 %vm462_vm0, %v12203_v4 }
 0x538   :  { %10595 = vmatprep.mubr.msk.bf16.mxu1 %vm462_vm0, %v12203_v4  ;;  %v12205_v4 = vld [vmem:[%s18891_s1 + $0xd4] ss:$8 sps:$4 sm:$0xff]  }
 0x539   :  { %v16365_v10 = vpop.f32.mrb[28].mxu0 }
 0x53a   :  { %v16367_v39 = vpop.f32.mrb[28].mxu1  ;;  %v4524_v58 = vpop.f32.mrb[29].mxu0 }
 0x53b   :  { %v4975_v51 = vpop.f32.mrb[29].mxu1  ;;  %v16369_v45 = vpop.f32.mrb[30].mxu0 }
 0x53c   :  { %v16371_v22 = vpop.f32.mrb[30].mxu1  ;;  %v4527_v52 = vpop.f32.mrb[31].mxu0 }
 0x53d   :  { %v4978_v8 = vpop.f32.mrb[31].mxu1 }
 0x53e   :  { %5430 = vmatmul.mubr.bf16.gmra.mrb[136].mxu0 %v12204_v17 }
 0x53f   :  { %5881 = vmatmul.mubr.bf16.gmra.mrb[136].mxu1 %v12204_v17  ;;  %10555 = vmatprep.mubr.msk.bf16.mxu0 %vm462_vm0, %v12205_v4 }
 0x540   :  { %10596 = vmatprep.mubr.msk.bf16.mxu1 %vm462_vm0, %v12205_v4  ;;  %v12207_v4 = vld [vmem:[%s18891_s1 + $0xe4] ss:$8 sps:$4 sm:$0xff]  }
 0x541   :  { %v16381_v58 = vpop.f32.mrb[32].mxu0 }
 0x542   :  { %v16383_v51 = vpop.f32.mrb[32].mxu1  ;;  %v4532_v52 = vpop.f32.mrb[33].mxu0 }
 0x543   :  { %v4983_v8 = vpop.f32.mrb[33].mxu1  ;;  %v16385_v37 = vpop.f32.mrb[34].mxu0 }
 0x544   :  { %v16387_v28 = vpop.f32.mrb[34].mxu1  ;;  %v4535_v23 = vpop.f32.mrb[35].mxu0 }
 0x545   :  { %v4986_v17 = vpop.f32.mrb[35].mxu1 }
 0x546   :  { %5438 = vmatmul.mubr.bf16.gmra.mrb[140].mxu0 %v12206_v1 }
 0x547   :  { %5889 = vmatmul.mubr.bf16.gmra.mrb[140].mxu1 %v12206_v1  ;;  %10556 = vmatprep.mubr.msk.bf16.mxu0 %vm462_vm0, %v12207_v4 }
 0x548   :  { %10597 = vmatprep.mubr.msk.bf16.mxu1 %vm462_vm0, %v12207_v4  ;;  %v12209_v4 = vld [vmem:[%s18891_s1 + $0xf4] ss:$8 sps:$4 sm:$0xff]  }
 0x549   :  { %v16397_v52 = vpop.f32.mrb[36].mxu0 }
 0x54a   :  { %v16399_v8 = vpop.f32.mrb[36].mxu1  ;;  %v4540_v23 = vpop.f32.mrb[37].mxu0 }
 0x54b   :  { %v4991_v17 = vpop.f32.mrb[37].mxu1  ;;  %v16401_v14 = vpop.f32.mrb[38].mxu0 }
 0x54c   :  { %v16403_v53 = vpop.f32.mrb[38].mxu1  ;;  %v4543_v56 = vpop.f32.mrb[39].mxu0 }
 0x54d   :  { %v4994_v1 = vpop.f32.mrb[39].mxu1 }
 0x54e   :  { %5446 = vmatmul.mubr.bf16.gmra.mrb[144].mxu0 %v12208_v47 }
 0x54f   :  { %5897 = vmatmul.mubr.bf16.gmra.mrb[144].mxu1 %v12208_v47  ;;  %10557 = vmatprep.mubr.msk.bf16.mxu0 %vm462_vm0, %v12209_v4 }
 0x550   :  { %10598 = vmatprep.mubr.msk.bf16.mxu1 %vm462_vm0, %v12209_v4  ;;  %v12211_v4 = vld [vmem:[%s18891_s1 + $0x104] ss:$8 sps:$4 sm:$0xff]  }
 0x551   :  { %v16413_v23 = vpop.f32.mrb[40].mxu0 }
 0x552   :  { %v16415_v17 = vpop.f32.mrb[40].mxu1  ;;  %v4548_v56 = vpop.f32.mrb[41].mxu0 }
 0x553   :  { %v4999_v1 = vpop.f32.mrb[41].mxu1  ;;  %v16417_v32 = vpop.f32.mrb[42].mxu0 }
 0x554   :  { %v16419_v31 = vpop.f32.mrb[42].mxu1  ;;  %v4551_v57 = vpop.f32.mrb[43].mxu0 }
 0x555   :  { %v5002_v47 = vpop.f32.mrb[43].mxu1 }
 0x556   :  { %5454 = vmatmul.mubr.bf16.gmra.mrb[148].mxu0 %v12210_v54 }
 0x557   :  { %5905 = vmatmul.mubr.bf16.gmra.mrb[148].mxu1 %v12210_v54  ;;  %10558 = vmatprep.mubr.msk.bf16.mxu0 %vm462_vm0, %v12211_v4 }
 0x558   :  { %10599 = vmatprep.mubr.msk.bf16.mxu1 %vm462_vm0, %v12211_v4  ;;  %v12213_v4 = vld [vmem:[%s18891_s1 + $0x114] ss:$8 sps:$4 sm:$0xff]  }
 0x559   :  { %v16429_v56 = vpop.f32.mrb[44].mxu0 }
 0x55a   :  { %19772 = vst [vmem:[#allocation57_spill] sm:$0xff] %v16429_v56  ;;  %v16431_v1 = vpop.f32.mrb[44].mxu1  ;;  %v4556_v57 = vpop.f32.mrb[45].mxu0 }
 0x55b   :  { %19773 = vst [vmem:[#allocation40_spill] sm:$0xff] %v16431_v1  ;;  %v5007_v47 = vpop.f32.mrb[45].mxu1  ;;  %v16433_v3 = vpop.f32.mrb[46].mxu0 }
 0x55c   :  { %19774 = vst [vmem:[#allocation35_spill] sm:$0xff] %v16433_v3  ;;  %v16435_v33 = vpop.f32.mrb[46].mxu1  ;;  %v4559_v63 = vpop.f32.mrb[47].mxu0 }
 0x55d   :  { %19775 = vst [vmem:[#allocation50_spill] sm:$0xff] %v16435_v33  ;;  %v5010_v54 = vpop.f32.mrb[47].mxu1 }
 0x55e   :  { %5462 = vmatmul.mubr.bf16.gmra.mrb[152].mxu0 %v12212_v2 }
 0x55f   :  { %5913 = vmatmul.mubr.bf16.gmra.mrb[152].mxu1 %v12212_v2  ;;  %10559 = vmatprep.mubr.msk.bf16.mxu0 %vm462_vm0, %v12213_v4 }
 0x560   :  { %10600 = vmatprep.mubr.msk.bf16.mxu1 %vm462_vm0, %v12213_v4  ;;  %v12215_v4 = vld [vmem:[%s18891_s1 + $0x124] ss:$8 sps:$4 sm:$0xff]  }
 0x561   :  { %v16445_v57 = vpop.f32.mrb[48].mxu0 }
 0x562   :  { %19776 = vst [vmem:[#allocation5_spill] sm:$0xff] %v16445_v57  ;;  %v16447_v47 = vpop.f32.mrb[48].mxu1  ;;  %v4564_v63 = vpop.f32.mrb[49].mxu0  ;;  %v12216_v57 = vld [vmem:[%s18891_s1 + $0x120] ss:$8 sps:$4 sm:$0xff]  }
 0x563   :  { %19777 = vst [vmem:[#allocation42_spill] sm:$0xff] %v16447_v47  ;;  %v5015_v54 = vpop.f32.mrb[49].mxu1  ;;  %v16449_v33 = vpop.f32.mrb[50].mxu0 }
 0x564   :  { %19778 = vst [vmem:[#allocation36_spill] sm:$0xff] %v16449_v33  ;;  %v16451_v3 = vpop.f32.mrb[50].mxu1  ;;  %v4567_v1 = vpop.f32.mrb[51].mxu0 }
 0x565   :  { %19779 = vst [vmem:[#allocation26_spill] sm:$0xff] %v16451_v3  ;;  %v5018_v2 = vpop.f32.mrb[51].mxu1 }
 0x566   :  { %5470 = vmatmul.mubr.bf16.gmra.mrb[156].mxu0 %v12214_v44 }
 0x567   :  { %5921 = vmatmul.mubr.bf16.gmra.mrb[156].mxu1 %v12214_v44  ;;  %10560 = vmatprep.mubr.msk.bf16.mxu0 %vm462_vm0, %v12215_v4 }
 0x568   :  { %10601 = vmatprep.mubr.msk.bf16.mxu1 %vm462_vm0, %v12215_v4  ;;  %v12217_v4 = vld [vmem:[%s18891_s1 + $0x134] ss:$8 sps:$4 sm:$0xff]  }
 0x569   :  { %v16461_v63 = vpop.f32.mrb[52].mxu0 }
 0x56a   :  { %19780 = vst [vmem:[#allocation38_spill] sm:$0xff] %v16461_v63  ;;  %v16463_v54 = vpop.f32.mrb[52].mxu1  ;;  %v4572_v1 = vpop.f32.mrb[53].mxu0 }
 0x56b   :  { %19781 = vst [vmem:[#allocation45_spill] sm:$0xff] %v16463_v54  ;;  %v5023_v2 = vpop.f32.mrb[53].mxu1  ;;  %v16465_v3 = vpop.f32.mrb[54].mxu0 }
 0x56c   :  { %19782 = vst [vmem:[#allocation27_spill] sm:$0xff] %v16465_v3  ;;  %v16467_v33 = vpop.f32.mrb[54].mxu1  ;;  %v4575_v47 = vpop.f32.mrb[55].mxu0 }
 0x56d   :  { %19783 = vst [vmem:[#allocation54_spill] sm:$0xff] %v16467_v33  ;;  %v5026_v44 = vpop.f32.mrb[55].mxu1 }
 0x56e   :  { %5478 = vmatmul.mubr.bf16.gmra.mrb[160].mxu0 %v12216_v57 }
 0x56f   :  { %5929 = vmatmul.mubr.bf16.gmra.mrb[160].mxu1 %v12216_v57  ;;  %10561 = vmatprep.mubr.msk.bf16.mxu0 %vm462_vm0, %v12217_v4 }
 0x570   :  { %10602 = vmatprep.mubr.msk.bf16.mxu1 %vm462_vm0, %v12217_v4  ;;  %v12218_v4 = vld [vmem:[%s18891_s1 + $0x130] ss:$8 sps:$4 sm:$0xff]  }
 0x571   :  { %v16477_v1 = vpop.f32.mrb[56].mxu0 }
 0x572   :  { %v16479_v2 = vpop.f32.mrb[56].mxu1  ;;  %v4580_v47 = vpop.f32.mrb[57].mxu0 }
 0x573   :  { %v5031_v44 = vpop.f32.mrb[57].mxu1  ;;  %v4581_v33 = vpop.f32.mrb[58].mxu0  ;;  %v19785_v47 = vmax.f32 %v16025_v9, %v16166_v40  ;;  %v19786_v40 = vmax.f32 %v16027_v16, %v16176_v15  ;;  %v12220_v15 = vld [vmem:[%s18891_s1 + $0x140] ss:$8 sps:$4 sm:$0xff]  }
 0x574   :  { %v4656_v3 = vmax.f32 %v16365_v10, %v4581_v33  ;;  %v5032_v54 = vpop.f32.mrb[58].mxu1  ;;  %v4583_v63 = vpop.f32.mrb[59].mxu0  ;;  %v12219_v33 = vld [vmem:[%s18891_s1 + $0x144] ss:$8 sps:$4 sm:$0xff]  }
 0x575   :  { %v5107_v57 = vmax.f32 %v16367_v39, %v5032_v54  ;;  %v5034_v56 = vpop.f32.mrb[59].mxu1 }
 0x576   :  { %v4671_v46 = vmax.f32 %v19784_v26, %v4656_v3  ;;  %5486 = vmatmul.mubr.bf16.gmra.mrb[164].mxu0 %v12218_v4 }
 0x577   :  { %v5122_v44 = vmax.f32 %v19785_v47, %v5107_v57  ;;  %5937 = vmatmul.mubr.bf16.gmra.mrb[164].mxu1 %v12218_v4  ;;  %10562 = vmatprep.mubr.msk.bf16.mxu0 %vm462_vm0, %v12219_v33 }
 0x578   :  { %10603 = vmatprep.mubr.msk.bf16.mxu1 %vm462_vm0, %v12219_v33  ;;  %v4686_v9 = vadd.f32 %v4671_v46, %v13484_v60  ;;  %v19788_v46 = vmax.f32 %v16044_v62, %v16190_v7 }
 0x579   :  { %v4586_v30 = vpop.f32.mrb[60].mxu0  ;;  %v5137_v47 = vadd.f32 %v5122_v44, %v13484_v60 }
 0x57a   :  { %v4657_v26 = vmax.f32 %v16369_v45, %v4586_v30  ;;  %v5037_v10 = vpop.f32.mrb[60].mxu1  ;;  %v4588_v13 = vpop.f32.mrb[61].mxu0  ;;  %v19787_v45 = vmax.f32 %v16030_v61, %v16185_v18  ;;  %v19789_v61 = vmax.f32 %v16047_v20, %v16194_v21  ;;  %v4701_v62 = vmax.f32 %v4686_v9, 0.0 }
 0x57b   :  { %v5108_v3 = vmax.f32 %v16371_v22, %v5037_v10  ;;  %v5039_v39 = vpop.f32.mrb[61].mxu1  ;;  %v4589_v56 = vpop.f32.mrb[62].mxu0  ;;  %v5152_v44 = vmax.f32 %v5137_v47, 0.0 }
 0x57c   :  { %v4672_v63 = vmax.f32 %v19786_v40, %v4657_v26  ;;  %v4658_v54 = vmax.f32 %v16381_v58, %v4589_v56  ;;  %v5040_v57 = vpop.f32.mrb[62].mxu1  ;;  %v4591_v4 = vpop.f32.mrb[63].mxu0 }
 0x57d   :  { %v5123_v33 = vmax.f32 %v19787_v45, %v5108_v3  ;;  %v5109_v22 = vmax.f32 %v16383_v51, %v5040_v57  ;;  %v5042_v30 = vpop.f32.mrb[63].mxu1  ;;  %v12221_v51 = vld [vmem:[%s18891_s1 + $0x154] ss:$8 sps:$4 sm:$0xff]   ;;  %v19790_v57 = vmax.f32 %v16049_v24, %v16204_v6  ;;  %v19792_v24 = vmax.f32 %v16061_v5, %v16218_v41 }
 0x57e   :  { %v4687_v10 = vadd.f32 %v4672_v63, %v13498_v36  ;;  %v4673_v16 = vmax.f32 %v19788_v46, %v4658_v54  ;;  %5494 = vmatmul.mubr.bf16.gmra.mrb[168].mxu0 %v12220_v15 }
 0x57f   :  { %v5138_v58 = vadd.f32 %v5123_v33, %v13498_v36  ;;  %v5124_v18 = vmax.f32 %v19789_v61, %v5109_v22  ;;  %5945 = vmatmul.mubr.bf16.gmra.mrb[168].mxu1 %v12220_v15  ;;  %10563 = vmatprep.mubr.msk.bf16.mxu0 %vm462_vm0, %v12221_v51 }
 0x580   :  { %v4702_v7 = vmax.f32 %v4687_v10, 0.0  ;;  %10604 = vmatprep.mubr.msk.bf16.mxu1 %vm462_vm0, %v12221_v51  ;;  %v4688_v9 = vadd.f32 %v4673_v16, %v13511_v55 }
 0x581   :  { %v5153_v26 = vmax.f32 %v5138_v58, 0.0  ;;  %v4594_v13 = vpop.f32.mrb[64].mxu0  ;;  %v5139_v22 = vadd.f32 %v5124_v18, %v13511_v55 }
 0x582   :  { %v4716_v3 = vpack.c.bf16 %v4702_v7, %v4701_v62  ;;  %v4659_v39 = vmax.f32 %v16385_v37, %v4594_v13  ;;  %v5045_v56 = vpop.f32.mrb[64].mxu1  ;;  %v4596_v20 = vpop.f32.mrb[65].mxu0  ;;  %v4703_v5 = vmax.f32 %v4688_v9, 0.0 }
 0x583   :  { %v5167_v21 = vpack.c.bf16 %v5153_v26, %v5152_v44  ;;  %v5110_v40 = vmax.f32 %v16387_v28, %v5045_v56  ;;  %v5047_v63 = vpop.f32.mrb[65].mxu1  ;;  %v4597_v54 = vpop.f32.mrb[66].mxu0  ;;  %v19791_v28 = vmax.f32 %v16051_v43, %v16213_v50  ;;  %v19793_v43 = vmax.f32 %v16063_v38, %v16222_v27 }
 0x584   :  { %4724 = vst.msk [vmem:[#allocation2 + $0x1e0] sm:$0xff] %vm988_vm2, %v4716_v3  ;;  %v4674_v4 = vmax.f32 %v19790_v57, %v4659_v39  ;;  %v4660_v47 = vmax.f32 %v16397_v52, %v4597_v54  ;;  %v5048_v45 = vpop.f32.mrb[66].mxu1  ;;  %v4599_v33 = vpop.f32.mrb[67].mxu0  ;;  %v12222_v52 = vld [vmem:[%s18891_s1 + $0x150] ss:$8 sps:$4 sm:$0xff]   ;;  %v5154_v58 = vmax.f32 %v5139_v22, 0.0  ;;  %v19794_v39 = vmax.f32 %v16065_v59, %v16232_v25 }
 0x585   :  { %v5183_v37 = vrot.slane %v5167_v21, 4  ;;  %v5125_v30 = vmax.f32 %v19791_v28, %v5110_v40  ;;  %v5111_v10 = vmax.f32 %v16399_v8, %v5048_v45  ;;  %v5050_v46 = vpop.f32.mrb[67].mxu1  ;;  %v12223_v8 = vld [vmem:[%s18891_s1 + $0x164] ss:$8 sps:$4 sm:$0xff]   ;;  %v19796_v59 = vmax.f32 %v16077_v19, %v16246_v11 }
 0x586   :  { %v4689_v16 = vadd.f32 %v4674_v4, %v13528_v0  ;;  %v4675_v6 = vmax.f32 %v19792_v24, %v4660_v47  ;;  %5502 = vmatmul.mubr.bf16.gmra.mrb[172].mxu0 %v12222_v52 }
 0x587   :  { %5206 = vst.msk [vmem:[#allocation2 + $0x218] sm:$0xf0] %vm1473_vm3, %v5183_v37  ;;  %v5140_v15 = vadd.f32 %v5125_v30, %v13528_v0  ;;  %v5126_v50 = vmax.f32 %v19793_v43, %v5111_v10  ;;  %5953 = vmatmul.mubr.bf16.gmra.mrb[172].mxu1 %v12222_v52  ;;  %10564 = vmatprep.mubr.msk.bf16.mxu0 %vm462_vm0, %v12223_v8  ;;  %v19798_v52 = vld [vmem:[#allocation13_spill] sm:$0xff] }
 0x588   :  { %v4704_v41 = vmax.f32 %v4689_v16, 0.0  ;;  %10605 = vmatprep.mubr.msk.bf16.mxu1 %vm462_vm0, %v12223_v8  ;;  %v4690_v3 = vadd.f32 %v4675_v6, %v13556_v29  ;;  %v19801_v8 = vld [vmem:[#allocation57_spill] sm:$0xff] }
 0x589   :  { %v5155_v61 = vmax.f32 %v5140_v15, 0.0  ;;  %v4602_v18 = vpop.f32.mrb[68].mxu0  ;;  %v5141_v63 = vadd.f32 %v5126_v50, %v13556_v29  ;;  %v19799_v15 = vld [vmem:[#allocation53_spill] sm:$0xff] }
 0x58a   :  { %v4717_v51 = vpack.c.bf16 %v4704_v41, %v4703_v5  ;;  %v4661_v62 = vmax.f32 %v16401_v14, %v4602_v18  ;;  %v5053_v7 = vpop.f32.mrb[68].mxu1  ;;  %v4604_v27 = vpop.f32.mrb[69].mxu0  ;;  %v4705_v11 = vmax.f32 %v4690_v3, 0.0  ;;  %v19800_v43 = vmax.f32 %v19798_v52, %v19799_v15  ;;  %v19802_v18 = vld [vmem:[#allocation24_spill] sm:$0xff] }
 0x58b   :  { %v5168_v38 = vpack.c.bf16 %v5155_v61, %v5154_v58  ;;  %v5112_v44 = vmax.f32 %v16403_v53, %v5053_v7  ;;  %v5055_v26 = vpop.f32.mrb[69].mxu1  ;;  %v4605_v13 = vpop.f32.mrb[70].mxu0  ;;  %v19795_v53 = vmax.f32 %v16067_v12, %v16241_v49  ;;  %v19797_v12 = vmax.f32 %v16079_v42, %v16250_v48  ;;  %v19805_v7 = vld [vmem:[#allocation40_spill] sm:$0xff] }
 0x58c   :  { %4725 = vst.msk [vmem:[#allocation2 + $0x1e8] sm:$0xff] %vm988_vm2, %v4717_v51  ;;  %v4676_v56 = vmax.f32 %v19794_v39, %v4661_v62  ;;  %v4662_v20 = vmax.f32 %v16413_v23, %v4605_v13  ;;  %v5056_v21 = vpop.f32.mrb[70].mxu1  ;;  %v4607_v40 = vpop.f32.mrb[71].mxu0  ;;  %v12224_v23 = vld [vmem:[%s18891_s1 + $0x160] ss:$8 sps:$4 sm:$0xff]   ;;  %v5156_v33 = vmax.f32 %v5141_v63, 0.0 }
 0x58d   :  { %v5184_v14 = vrot.slane %v5168_v38, 4  ;;  %v5127_v54 = vmax.f32 %v19795_v53, %v5112_v44  ;;  %v5113_v9 = vmax.f32 %v16415_v17, %v5056_v21  ;;  %v5058_v57 = vpop.f32.mrb[71].mxu1  ;;  %v12225_v17 = vld [vmem:[%s18891_s1 + $0x174] ss:$8 sps:$4 sm:$0xff]   ;;  %v19810_v63 = vld [vmem:[#allocation23_spill] sm:$0xff] }
 0x58e   :  { %v4691_v4 = vadd.f32 %v4676_v56, %v13560_v35  ;;  %v4677_v25 = vmax.f32 %v19796_v59, %v4662_v20  ;;  %5510 = vmatmul.mubr.bf16.gmra.mrb[176].mxu0 %v12224_v23  ;;  %v19803_v51 = vld [vmem:[#allocation49_spill] sm:$0xff]  ;;  %v19807_v13 = vld [vmem:[#allocation28_spill] sm:$0xff]  ;;  %v19811_v53 = vld [vmem:[#allocation47_spill] sm:$0xff] }
 0x58f   :  { %v5185_v47 = vsel %vm553_vm1, %v5183_v37, %v5184_v14  ;;  %v5142_v45 = vadd.f32 %v5127_v54, %v13560_v35  ;;  %v5128_v49 = vmax.f32 %v19797_v12, %v5113_v9  ;;  %5961 = vmatmul.mubr.bf16.gmra.mrb[176].mxu1 %v12224_v23  ;;  %10565 = vmatprep.mubr.msk.bf16.mxu0 %vm462_vm0, %v12225_v17  ;;  %v19806_v44 = vld [vmem:[#allocation29_spill] sm:$0xff]  ;;  %v19808_v3 = vld [vmem:[#allocation8_spill] sm:$0xff]  ;;  %v12227_v57 = vld [vmem:[%s18891_s1 + $0x184] ss:$8 sps:$4 sm:$0xff]  }
 0x590   :  { %5207 = vst.msk [vmem:[#allocation2 + $0x220] sm:$0xff] %vm988_vm2, %v5185_v47  ;;  %v4706_v19 = vmax.f32 %v4691_v4, 0.0  ;;  %10606 = vmatprep.mubr.msk.bf16.mxu1 %vm462_vm0, %v12225_v17  ;;  %v4692_v6 = vadd.f32 %v4677_v25, %v13591_v34  ;;  %v19809_v39 = vmax.f32 %v19807_v13, %v19808_v3  ;;  %v12226_v20 = vld [vmem:[%s18891_s1 + $0x170] ss:$8 sps:$4 sm:$0xff]   ;;  %v19812_v54 = vmax.f32 %v19810_v63, %v19811_v53 }
 0x591   :  { %v5157_v37 = vmax.f32 %v5142_v45, 0.0  ;;  %v4610_v22 = vpop.f32.mrb[72].mxu0  ;;  %v5143_v61 = vadd.f32 %v5128_v49, %v13591_v34  ;;  %v19813_v45 = vld [vmem:[#allocation35_spill] sm:$0xff] }
 0x592   :  { %v4718_v28 = vpack.c.bf16 %v4706_v19, %v4705_v11  ;;  %v4663_v48 = vmax.f32 %v16417_v32, %v4610_v22  ;;  %v5061_v42 = vpop.f32.mrb[72].mxu1  ;;  %v4612_v30 = vpop.f32.mrb[73].mxu0  ;;  %v4707_v4 = vmax.f32 %v4692_v6, 0.0  ;;  %v19814_v19 = vld [vmem:[#allocation50_spill] sm:$0xff] }
 0x593   :  { %v5169_v10 = vpack.c.bf16 %v5157_v37, %v5156_v33  ;;  %v5114_v46 = vmax.f32 %v16419_v31, %v5061_v42  ;;  %v5063_v16 = vpop.f32.mrb[73].mxu1  ;;  %v4613_v24 = vpop.f32.mrb[74].mxu0  ;;  %v19804_v31 = vmax.f32 %v19802_v18, %v19803_v51  ;;  %v19816_v42 = vld [vmem:[#allocation43_spill] sm:$0xff]  ;;  %v19817_v30 = vld [vmem:[#allocation18_spill] sm:$0xff] }
 0x594   :  { %4726 = vst.msk [vmem:[#allocation2 + $0x1f0] sm:$0xff] %vm988_vm2, %v4718_v28  ;;  %v4678_v50 = vmax.f32 %v19800_v43, %v4663_v48  ;;  %v4664_v5 = vmax.f32 %v19801_v8, %v4613_v24  ;;  %v5064_v41 = vpop.f32.mrb[74].mxu1  ;;  %v4615_v58 = vpop.f32.mrb[75].mxu0  ;;  %v19815_v28 = vld [vmem:[#allocation10_spill] sm:$0xff]  ;;  %v19819_v16 = vld [vmem:[#allocation5_spill] sm:$0xff]  ;;  %v19821_v8 = vld [vmem:[#allocation7_spill] sm:$0xff] }
 0x595   :  { %v5186_v32 = vrot.slane %v5169_v10, 4  ;;  %v5129_v62 = vmax.f32 %v19804_v31, %v5114_v46  ;;  %v5115_v27 = vmax.f32 %v19805_v7, %v5064_v41  ;;  %v5066_v38 = vpop.f32.mrb[75].mxu1  ;;  %v19818_v10 = vmax.f32 %v19816_v42, %v19817_v30  ;;  %v19823_v58 = vld [vmem:[#allocation42_spill] sm:$0xff] }
 0x596   :  { %v4693_v26 = vadd.f32 %v4678_v50, %v19806_v44  ;;  %v4679_v56 = vmax.f32 %v19809_v39, %v4664_v5  ;;  %5518 = vmatmul.mubr.bf16.gmra.mrb[180].mxu0 %v12226_v20  ;;  %v19820_v50 = vld [vmem:[#allocation19_spill] sm:$0xff]  ;;  %v19824_v51 = vld [vmem:[#allocation30_spill] sm:$0xff] }
 0x597   :  { %v5187_v21 = vsel %vm553_vm1, %v5184_v14, %v5186_v32  ;;  %v5144_v40 = vadd.f32 %v5129_v62, %v19806_v44  ;;  %v5130_v9 = vmax.f32 %v19812_v54, %v5115_v27  ;;  %5969 = vmatmul.mubr.bf16.gmra.mrb[180].mxu1 %v12226_v20  ;;  %10566 = vmatprep.mubr.msk.bf16.mxu0 %vm462_vm0, %v12227_v57  ;;  %v5158_v14 = vmax.f32 %v5143_v61, 0.0  ;;  %v19825_v62 = vld [vmem:[#allocation20_spill] sm:$0xff]  ;;  %v19826_v7 = vld [vmem:[#allocation6_spill] sm:$0xff] }
 0x598   :  { %5208 = vst.msk [vmem:[#allocation2 + $0x228] sm:$0xff] %vm988_vm2, %v5187_v21  ;;  %v4708_v59 = vmax.f32 %v4693_v26, 0.0  ;;  %10607 = vmatprep.mubr.msk.bf16.mxu1 %vm462_vm0, %v12227_v57  ;;  %v4694_v48 = vadd.f32 %v4679_v56, %v19815_v28  ;;  %v19822_v5 = vmax.f32 %v19820_v50, %v19821_v8  ;;  %v19827_v27 = vmax.f32 %v19825_v62, %v19826_v7  ;;  %v12228_v26 = vld [vmem:[%s18891_s1 + $0x180] ss:$8 sps:$4 sm:$0xff]   ;;  %v19841_v50 = vld [vmem:[#allocation45_spill] sm:$0xff] }
 0x599   :  { %v5159_v25 = vmax.f32 %v5144_v40, 0.0  ;;  %v4618_v23 = vpop.f32.mrb[76].mxu0  ;;  %v5145_v43 = vadd.f32 %v5130_v9, %v19815_v28  ;;  %v19828_v39 = vld [vmem:[#allocation14_spill] sm:$0xff]  ;;  %v19829_v56 = vld [vmem:[#allocation55_spill] sm:$0xff]  ;;  %v12229_v40 = vld [vmem:[%s18891_s1 + $0x194] ss:$8 sps:$4 sm:$0xff]  }
 0x59a   :  { %v4719_v47 = vpack.c.bf16 %v4708_v59, %v4707_v4  ;;  %v4665_v12 = vmax.f32 %v19813_v45, %v4618_v23  ;;  %v5069_v49 = vpop.f32.mrb[76].mxu1  ;;  %v4620_v17 = vpop.f32.mrb[77].mxu0  ;;  %v19830_v20 = vmax.f32 %v19828_v39, %v19829_v56  ;;  %v4709_v63 = vmax.f32 %v4694_v48, 0.0  ;;  %v19831_v4 = vld [vmem:[#allocation36_spill] sm:$0xff]  ;;  %v19837_v48 = vld [vmem:[#allocation38_spill] sm:$0xff] }
 0x59b   :  { %v5170_v11 = vpack.c.bf16 %v5159_v25, %v5158_v14  ;;  %v5116_v33 = vmax.f32 %v19814_v19, %v5069_v49  ;;  %v5071_v37 = vpop.f32.mrb[77].mxu1  ;;  %v4621_v22 = vpop.f32.mrb[78].mxu0  ;;  %v19833_v17 = vld [vmem:[#allocation31_spill] sm:$0xff]  ;;  %v12230_v7 = vld [vmem:[%s18891_s1 + $0x190] ss:$8 sps:$4 sm:$0xff]   ;;  %v7681_v44 = vld [vmem:[#allocation2 + $0x160] sm:$0xff] }
 0x59c   :  { %4727 = vst.msk [vmem:[#allocation2 + $0x1f8] sm:$0xff] %vm988_vm2, %v4719_v47  ;;  %v4680_v46 = vmax.f32 %v19818_v10, %v4665_v12  ;;  %v4666_v24 = vmax.f32 %v19819_v16, %v4621_v22  ;;  %v5072_v6 = vpop.f32.mrb[78].mxu1  ;;  %v4623_v52 = vpop.f32.mrb[79].mxu0  ;;  %v19832_v47 = vld [vmem:[#allocation26_spill] sm:$0xff]  ;;  %v19834_v19 = vld [vmem:[#allocation39_spill] sm:$0xff] }
 0x59d   :  { %v5188_v15 = vrot.slane %v5170_v11, 4  ;;  %v5131_v41 = vmax.f32 %v19822_v5, %v5116_v33  ;;  %v5117_v61 = vmax.f32 %v19823_v58, %v5072_v6  ;;  %v5074_v18 = vpop.f32.mrb[79].mxu1  ;;  %v19835_v33 = vld [vmem:[#allocation33_spill] sm:$0xff]  ;;  %v19839_v6 = vld [vmem:[#allocation34_spill] sm:$0xff] }
 0x59e   :  { %v4695_v31 = vadd.f32 %v4680_v46, %v19824_v51  ;;  %v4681_v38 = vmax.f32 %v19827_v27, %v4666_v24  ;;  %5526 = vmatmul.mubr.bf16.gmra.mrb[184].mxu0 %v12228_v26  ;;  %v19836_v37 = vmax.f32 %v19834_v19, %v19835_v33  ;;  %v19838_v24 = vld [vmem:[#allocation52_spill] sm:$0xff]  ;;  %v19844_v18 = vld [vmem:[#allocation46_spill] sm:$0xff] }
 0x59f   :  { %v5189_v13 = vsel %vm553_vm1, %v5186_v32, %v5188_v15  ;;  %v5146_v3 = vadd.f32 %v5131_v41, %v19824_v51  ;;  %v5132_v21 = vmax.f32 %v19830_v20, %v5117_v61  ;;  %5977 = vmatmul.mubr.bf16.gmra.mrb[184].mxu1 %v12228_v26  ;;  %10567 = vmatprep.mubr.msk.bf16.mxu0 %vm462_vm0, %v12229_v40  ;;  %v5160_v32 = vmax.f32 %v5145_v43, 0.0  ;;  %v19842_v41 = vld [vmem:[#allocation11_spill] sm:$0xff]  ;;  %v19843_v61 = vld [vmem:[#allocation21_spill] sm:$0xff]  ;;  %v19846_v26 = vld [vmem:[#allocation44_spill] sm:$0xff] }
 0x5a0   :  { %5209 = vst.msk [vmem:[#allocation2 + $0x230] sm:$0xff] %vm988_vm2, %v5189_v13  ;;  %v4710_v53 = vmax.f32 %v4695_v31, 0.0  ;;  %10608 = vmatprep.mubr.msk.bf16.mxu1 %vm462_vm0, %v12229_v40  ;;  %v4696_v11 = vadd.f32 %v4681_v38, %v19833_v17  ;;  %v19840_v52 = vmax.f32 %v19838_v24, %v19839_v6  ;;  %v19845_v31 = vmax.f32 %v19843_v61, %v19844_v18  ;;  %v19847_v13 = vld [vmem:[#allocation41_spill] sm:$0xff]  ;;  %v12231_v56 = vld [vmem:[%s18891_s1 + $0x1a4] ss:$8 sps:$4 sm:$0xff]  }
 0x5a1   :  { %v5161_v54 = vmax.f32 %v5146_v3, 0.0  ;;  %v4626_v9 = vpop.f32.mrb[80].mxu0  ;;  %v5147_v16 = vadd.f32 %v5132_v21, %v19833_v17  ;;  %v19848_v3 = vmax.f32 %v19846_v26, %v19847_v13 }
 0x5a2   :  { %v4720_v57 = vpack.c.bf16 %v4710_v53, %v4709_v63  ;;  %v4667_v59 = vmax.f32 %v19831_v4, %v4626_v9  ;;  %v5077_v14 = vpop.f32.mrb[80].mxu1  ;;  %v4628_v25 = vpop.f32.mrb[81].mxu0  ;;  %v4711_v20 = vmax.f32 %v4696_v11, 0.0 }
 0x5a3   :  { %v5171_v23 = vpack.c.bf16 %v5161_v54, %v5160_v32  ;;  %v5118_v45 = vmax.f32 %v19832_v47, %v5077_v14  ;;  %v5079_v12 = vpop.f32.mrb[81].mxu1  ;;  %v4629_v49 = vpop.f32.mrb[82].mxu0  ;;  %v19849_v32 = vld [vmem:[#allocation27_spill] sm:$0xff]  ;;  %v19851_v47 = vld [vmem:[#allocation16_spill] sm:$0xff] }
 0x5a4   :  { %4728 = vst.msk [vmem:[#allocation2 + $0x200] sm:$0xff] %vm988_vm2, %v4720_v57  ;;  %v4682_v22 = vmax.f32 %v19836_v37, %v4667_v59  ;;  %v4668_v42 = vmax.f32 %v19837_v48, %v4629_v49  ;;  %v5080_v30 = vpop.f32.mrb[82].mxu1  ;;  %v4631_v10 = vpop.f32.mrb[83].mxu0  ;;  %v19850_v59 = vld [vmem:[#allocation54_spill] sm:$0xff]  ;;  %v19852_v12 = vld [vmem:[#allocation51_spill] sm:$0xff]  ;;  %v19853_v49 = vld [vmem:[#allocation4_spill] sm:$0xff] }
 0x5a5   :  { %v5190_v46 = vrot.slane %v5171_v23, 4  ;;  %v5133_v43 = vmax.f32 %v19840_v52, %v5118_v45  ;;  %v5119_v8 = vmax.f32 %v19841_v50, %v5080_v30  ;;  %v5082_v5 = vpop.f32.mrb[83].mxu1  ;;  %v19854_v11 = vmax.f32 %v19852_v12, %v19853_v49  ;;  %v19855_v30 = vld [vmem:[#allocation22_spill] sm:$0xff]  ;;  %v19856_v10 = vld [vmem:[#allocation37_spill] sm:$0xff] }
 0x5a6   :  { %v4697_v58 = vadd.f32 %v4682_v22, %v19842_v41  ;;  %v4683_v62 = vmax.f32 %v19845_v31, %v4668_v42  ;;  %5534 = vmatmul.mubr.bf16.gmra.mrb[188].mxu0 %v12230_v7  ;;  %v19860_v5 = vld [vmem:[#allocation56_spill] sm:$0xff] }
 0x5a7   :  { %v5191_v27 = vsel %vm553_vm1, %v5188_v15, %v5190_v46  ;;  %v5148_v38 = vadd.f32 %v5133_v43, %v19842_v41  ;;  %v5134_v39 = vmax.f32 %v19848_v3, %v5119_v8  ;;  %5985 = vmatmul.mubr.bf16.gmra.mrb[188].mxu1 %v12230_v7  ;;  %10568 = vmatprep.mubr.msk.bf16.mxu0 %vm462_vm0, %v12231_v56  ;;  %v5162_v15 = vmax.f32 %v5147_v16, 0.0  ;;  %v19858_v43 = vld [vmem:[#allocation32_spill] sm:$0xff]  ;;  %v19859_v8 = vld [vmem:[#allocation17_spill] sm:$0xff] }
 0x5a8   :  { %5210 = vst.msk [vmem:[#allocation2 + $0x238] sm:$0xff] %vm988_vm2, %v5191_v27  ;;  %v4712_v21 = vmax.f32 %v4697_v58, 0.0  ;;  %10609 = vmatprep.mubr.msk.bf16.mxu1 %vm462_vm0, %v12231_v56  ;;  %v4698_v45 = vadd.f32 %v4683_v62, %v19851_v47  ;;  %v19857_v16 = vmax.f32 %v19855_v30, %v19856_v10  ;;  %v19861_v58 = vmax.f32 %v19859_v8, %v19860_v5  ;;  %v19862_v62 = vld [vmem:[#allocation25_spill] sm:$0xff]  ;;  %v19863_v7 = vld [vmem:[#allocation48_spill] sm:$0xff] }
 0x5a9   :  { %v5163_v40 = vmax.f32 %v5148_v38, 0.0  ;;  %v4634_v63 = vpop.f32.mrb[84].mxu0  ;;  %v5149_v42 = vadd.f32 %v5134_v39, %v19851_v47  ;;  %v19864_v27 = vmax.f32 %v19862_v62, %v19863_v7  ;;  %v12233_v38 = vld [vmem:[%s18891_s1 + $0x1b4] ss:$8 sps:$4 sm:$0xff]   ;;  %v12234_v12 = vld [vmem:[%s18891_s1 + $0x1b0] ss:$8 sps:$4 sm:$0xff]  }
 0x5aa   :  { %v4721_v53 = vpack.c.bf16 %v4712_v21, %v4711_v20  ;;  %v4669_v54 = vmax.f32 %v19849_v32, %v4634_v63  ;;  %v5085_v9 = vpop.f32.mrb[84].mxu1  ;;  %v4636_v57 = vpop.f32.mrb[85].mxu0  ;;  %v4713_v26 = vmax.f32 %v4698_v45, 0.0  ;;  %v19865_v3 = vld [vmem:[#allocation12_spill] sm:$0xff] }
 0x5ab   :  { %v5172_v4 = vpack.c.bf16 %v5163_v40, %v5162_v15  ;;  %v5120_v14 = vmax.f32 %v19850_v59, %v5085_v9  ;;  %v5087_v25 = vpop.f32.mrb[85].mxu1  ;;  %v4637_v23 = vpop.f32.mrb[86].mxu0  ;;  %v12238_v7 = vld [vmem:[%s18891_s1 + $0x1d0] ss:$8 sps:$4 sm:$0xff]  }
 0x5ac   :  { %4729 = vst.msk [vmem:[#allocation2 + $0x208] sm:$0xff] %vm988_vm2, %v4721_v53  ;;  %v4684_v19 = vmax.f32 %v19854_v11, %v4669_v54  ;;  %v4670_v33 = vmax.f32 %v16477_v1, %v4637_v23  ;;  %v5088_v37 = vpop.f32.mrb[86].mxu1  ;;  %v4639_v22 = vpop.f32.mrb[87].mxu0  ;;  %v12232_v1 = vld [vmem:[%s18891_s1 + $0x1a0] ss:$8 sps:$4 sm:$0xff]   ;;  %v7679_v41 = vld [vmem:[#allocation2 + $0x150] sm:$0xff] }
 0x5ad   :  { %v5192_v48 = vrot.slane %v5172_v4, 4  ;;  %v5135_v24 = vmax.f32 %v19857_v16, %v5120_v14  ;;  %v5121_v6 = vmax.f32 %v16479_v2, %v5088_v37  ;;  %v5090_v52 = vpop.f32.mrb[87].mxu1 }
 0x5ae   :  { %v4699_v50 = vadd.f32 %v4684_v19, %v19858_v43  ;;  %v4685_v61 = vmax.f32 %v19861_v58, %v4670_v33  ;;  %5542 = vmatmul.mubr.bf16.gmra.mrb[192].mxu0 %v12232_v1  ;;  %v12235_v19 = vld [vmem:[%s18891_s1 + $0x1c4] ss:$8 sps:$4 sm:$0xff]   ;;  %v12237_v52 = vld [vmem:[%s18891_s1 + $0x1d4] ss:$8 sps:$4 sm:$0xff]  }
 0x5af   :  { %v5193_v18 = vsel %vm553_vm1, %v5190_v46, %v5192_v48  ;;  %v5150_v31 = vadd.f32 %v5135_v24, %v19858_v43  ;;  %v5136_v2 = vmax.f32 %v19864_v27, %v5121_v6  ;;  %5993 = vmatmul.mubr.bf16.gmra.mrb[192].mxu1 %v12232_v1  ;;  %10569 = vmatprep.mubr.msk.bf16.mxu0 %vm462_vm0, %v12233_v38  ;;  %v5164_v46 = vmax.f32 %v5149_v42, 0.0  ;;  %v12236_v6 = vld [vmem:[%s18891_s1 + $0x1c0] ss:$8 sps:$4 sm:$0xff]  }
 0x5b0   :  { %5211 = vst.msk [vmem:[#allocation2 + $0x240] sm:$0xff] %vm988_vm2, %v5193_v18  ;;  %v4714_v13 = vmax.f32 %v4699_v50, 0.0  ;;  %v4700_v39 = vadd.f32 %v4685_v61, %v19865_v3  ;;  %10610 = vmatprep.mubr.msk.bf16.mxu1 %vm462_vm0, %v12233_v38  ;;  %v11781_v61 = vld [vmem:[%s18896_s3 + $0x4] ss:$24 sps:$4 sm:$0xff]   ;;  %v11779_v38 = vld [vmem:[%s18896_s3] ss:$24 sps:$4 sm:$0xff]  }
 0x5b1   :  { %v5165_v56 = vmax.f32 %v5150_v31, 0.0  ;;  %v5151_v20 = vadd.f32 %v5136_v2, %v19865_v3  ;;  %v16712_v21 = vpop.f32.mrb[88].mxu0 }
 0x5b2   :  { %v4722_v15 = vpack.c.bf16 %v4714_v13, %v4713_v26  ;;  %v4715_v40 = vmax.f32 %v4700_v39, 0.0  ;;  %v16714_v63 = vpop.f32.mrb[88].mxu1  ;;  %v5337_v53 = vpop.f32.mrb[89].mxu0 }
 0x5b3   :  { %v5173_v32 = vpack.c.bf16 %v5165_v56, %v5164_v46  ;;  %v5166_v54 = vmax.f32 %v5151_v20, 0.0  ;;  %v5788_v9 = vpop.f32.mrb[89].mxu1  ;;  %v16716_v57 = vpop.f32.mrb[90].mxu0  ;;  %v16778_v53 = vld [vmem:[#allocation2 + $0xf8] sm:$0xff] }
 0x5b4   :  { %4730 = vst.msk [vmem:[#allocation2 + $0x210] sm:$0xff] %vm988_vm2, %v4722_v15  ;;  %v4723_v4 = vpack.c.bf16 %v4715_v40, %v4715_v40  ;;  %v16719_v59 = vpop.f32.mrb[90].mxu1  ;;  %v5340_v14 = vpop.f32.mrb[91].mxu0  ;;  %v11784_v15 = vld [vmem:[%s18896_s3 + $0x34] ss:$24 sps:$4 sm:$0xff]   ;;  %v6293_v40 = vld [vmem:[#allocation2 + $0x80] sm:$0xff] }
 0x5b5   :  { %v5194_v25 = vrot.slane %v5173_v32, 4  ;;  %v5174_v23 = vpack.c.bf16 %v5166_v54, %v5166_v54  ;;  %v5791_v45 = vpop.f32.mrb[91].mxu1  ;;  %v19868_v32 = vmov 0   ;;  %v11782_v14 = vld [vmem:[%s18896_s3 + $0x30] ss:$24 sps:$4 sm:$0xff]  }
 0x5b6   :  { %4731 = vst.msk [vmem:[#allocation2 + $0x218] sm:$0xf] %vm996_vm4, %v4723_v4  ;;  %5550 = vmatmul.mubr.bf16.gmra.mrb[196].mxu0 %v12234_v12  ;;  %v6294_v4 = vld [vmem:[#allocation2 + $0x88] sm:$0xff]  ;;  %v16790_v45 = vld [vmem:[#allocation2 + $0x100] sm:$0xff] }
 0x5b7   :  { %v5195_v49 = vsel %vm553_vm1, %v5192_v48, %v5194_v25  ;;  %v5196_v11 = vrot.slane %v5174_v23, 4  ;;  %6001 = vmatmul.mubr.bf16.gmra.mrb[196].mxu1 %v12234_v12  ;;  %10570 = vmatprep.mubr.msk.bf16.mxu0 %vm462_vm0, %v12235_v19 }
 0x5b8   :  { %5212 = vst.msk [vmem:[#allocation2 + $0x248] sm:$0xff] %vm988_vm2, %v5195_v49  ;;  %10611 = vmatprep.mubr.msk.bf16.mxu1 %vm462_vm0, %v12235_v19 }
 0x5b9   :  { %v5197_v33 = vsel %vm553_vm1, %v5194_v25, %v5196_v11  ;;  %v16733_v37 = vpop.f32.mrb[92].mxu0 }
 0x5ba   :  { %5213 = vst.msk [vmem:[#allocation2 + $0x250] sm:$0xff] %vm988_vm2, %v5197_v33  ;;  %v16736_v22 = vpop.f32.mrb[92].mxu1  ;;  %v5345_v48 = vpop.f32.mrb[93].mxu0  ;;  %v11787_v33 = vld [vmem:[%s18896_s3 + $0x64] ss:$24 sps:$4 sm:$0xff]  }
 0x5bb   :  { %v5796_v42 = vpop.f32.mrb[93].mxu1  ;;  %v16738_v30 = vpop.f32.mrb[94].mxu0  ;;  %v6295_v48 = vld [vmem:[#allocation2 + $0x90] sm:$0xff] }
 0x5bc   :  { %v16740_v10 = vpop.f32.mrb[94].mxu1  ;;  %v5348_v16 = vpop.f32.mrb[95].mxu0  ;;  %v16802_v42 = vld [vmem:[#allocation2 + $0x108] sm:$0xff] }
 0x5bd   :  { %v5799_v24 = vpop.f32.mrb[95].mxu1 }
 0x5be   :  { %5558 = vmatmul.mubr.bf16.gmra.mrb[200].mxu0 %v12236_v6 }
 0x5bf   :  { %6009 = vmatmul.mubr.bf16.gmra.mrb[200].mxu1 %v12236_v6  ;;  %10571 = vmatprep.mubr.msk.bf16.mxu0 %vm462_vm0, %v12237_v52  ;;  %v6296_v6 = vld [vmem:[#allocation2 + $0x98] sm:$0xff] }
 0x5c0   :  { %10612 = vmatprep.mubr.msk.bf16.mxu1 %vm462_vm0, %v12237_v52  ;;  %v11785_v52 = vld [vmem:[%s18896_s3 + $0x60] ss:$24 sps:$4 sm:$0xff]  }
 0x5c1   :  { %v16750_v50 = vpop.f32.mrb[96].mxu0 }
 0x5c2   :  { %v16752_v8 = vpop.f32.mrb[96].mxu1  ;;  %v5353_v5 = vpop.f32.mrb[97].mxu0 }
 0x5c3   :  { %v5804_v58 = vpop.f32.mrb[97].mxu1  ;;  %v16757_v1 = vpop.f32.mrb[98].mxu0 }
 0x5c4   :  { %v16759_v18 = vpop.f32.mrb[98].mxu1  ;;  %v5356_v31 = vpop.f32.mrb[99].mxu0 }
 0x5c5   :  { %v5807_v62 = vpop.f32.mrb[99].mxu1 }
 0x5c6   :  { %5566 = vmatmul.mubr.bf16.gmra.mrb[204].mxu0 %v12238_v7 }
 0x5c7   :  { %6017 = vmatmul.mubr.bf16.gmra.mrb[204].mxu1 %v12238_v7  ;;  %6995 = vmatprep.mubr.bf16.mxu0 %v11781_v61 }
 0x5c8   :  { %7729 = vmatprep.mubr.bf16.mxu1 %v11781_v61  ;;  %v16814_v61 = vld [vmem:[#allocation2 + $0x110] sm:$0xff] }
 0x5c9   :  { %v16764_v27 = vpop.f32.mrb[100].mxu0 }
 0x5ca   :  { %v16766_v2 = vpop.f32.mrb[100].mxu1  ;;  %v5361_v26 = vpop.f32.mrb[101].mxu0 }
 0x5cb   :  { %v5812_v13 = vpop.f32.mrb[101].mxu1  ;;  %v16771_v39 = vpop.f32.mrb[102].mxu0  ;;  %v11790_v26 = vld [vmem:[%s18896_s3 + $0x94] ss:$24 sps:$4 sm:$0xff]  }
 0x5cc   :  { %19866 = vst [vmem:[#allocation13_spill] sm:$0xff] %v16771_v39  ;;  %v16773_v46 = vpop.f32.mrb[102].mxu1  ;;  %v5364_v56 = vpop.f32.mrb[103].mxu0  ;;  %v6297_v13 = vld [vmem:[#allocation2 + $0xa0] sm:$0xff] }
 0x5cd   :  { %19867 = vst [vmem:[#allocation53_spill] sm:$0xff] %v16773_v46  ;;  %v5815_v20 = vpop.f32.mrb[103].mxu1  ;;  %v16826_v56 = vld [vmem:[#allocation2 + $0x118] sm:$0xff]  ;;  %v11832_v46 = vld [vmem:[%s18896_s3 + $0x334] ss:$24 sps:$4 sm:$0xff]  }
 0x5ce   :  { %6996 = vmatmul.mubr.bf16.vlgmr.msra.gmra.mrb[208].mxu0 %v11779_v38 }
 0x5cf   :  { %7157 = vmatpush1.bf16.msra.mxu0 %v6293_v40  ;;  %7730 = vmatmul.mubr.bf16.vlgmr.msra.gmra.mrb[208].mxu1 %v11779_v38  ;;  %v6298_v40 = vld [vmem:[#allocation2 + $0xa8] sm:$0xff] }
 0x5d0   :  { %7891 = vmatpush1.bf16.msra.mxu1 %v16778_v53  ;;  %7158 = vmatprep.subr.bf16.mxu0 %v19868_v32 }
 0x5d1   :  { %7892 = vmatprep.subr.bf16.mxu1 %v19868_v32  ;;  %7003 = vmatprep.mubr.bf16.mxu0 %v11784_v15  ;;  %v16783_v54 = vpop.f32.mrb[104].mxu0 }
 0x5d2   :  { %19869 = vst [vmem:[#allocation57_spill] sm:$0xff] %v16783_v54  ;;  %v16785_v9 = vpop.f32.mrb[104].mxu1  ;;  %7737 = vmatprep.mubr.bf16.mxu1 %v11784_v15  ;;  %v5369_v25 = vpop.f32.mrb[105].mxu0 }
 0x5d3   :  { %19870 = vst [vmem:[#allocation24_spill] sm:$0xff] %v16785_v9  ;;  %v5820_v23 = vpop.f32.mrb[105].mxu1  ;;  %7159 = vmatpush1.bf16.msra.mxu0 %v6294_v4  ;;  %v16792_v12 = vpop.f32.mrb[106].mxu0  ;;  %v11788_v4 = vld [vmem:[%s18896_s3 + $0x90] ss:$24 sps:$4 sm:$0xff]  }
 0x5d4   :  { %19871 = vst [vmem:[#allocation49_spill] sm:$0xff] %v16792_v12  ;;  %7893 = vmatpush1.bf16.msra.mxu1 %v16790_v45  ;;  %v16795_v49 = vpop.f32.mrb[106].mxu1  ;;  %7160 = vmatprep.subr.bf16.mxu0 %v19868_v32  ;;  %v5372_v11 = vpop.f32.mrb[107].mxu0  ;;  %v16838_v23 = vld [vmem:[#allocation2 + $0x120] sm:$0xff] }
 0x5d5   :  { %19872 = vst [vmem:[#allocation40_spill] sm:$0xff] %v16795_v49  ;;  %v5823_v19 = vpop.f32.mrb[107].mxu1  ;;  %7894 = vmatprep.subr.bf16.mxu1 %v19868_v32  ;;  %19879 = vst [vmem:[#allocation43_spill] sm:$0xff] %v16838_v23 }
 0x5d6   :  { %7004 = vmatmul.mubr.bf16.gmra.mrb[212].mxu0 %v11782_v14 }
 0x5d7   :  { %7161 = vmatpush1.bf16.msra.mxu0 %v6295_v48  ;;  %7738 = vmatmul.mubr.bf16.gmra.mrb[212].mxu1 %v11782_v14 }
 0x5d8   :  { %7895 = vmatpush1.bf16.msra.mxu1 %v16802_v42  ;;  %7162 = vmatprep.subr.bf16.mxu0 %v19868_v32 }
 0x5d9   :  { %7896 = vmatprep.subr.bf16.mxu1 %v19868_v32  ;;  %7011 = vmatprep.mubr.bf16.mxu0 %v11787_v33  ;;  %v16807_v16 = vpop.f32.mrb[108].mxu0 }
 0x5da   :  { %19873 = vst [vmem:[#allocation28_spill] sm:$0xff] %v16807_v16  ;;  %v16809_v24 = vpop.f32.mrb[108].mxu1  ;;  %7745 = vmatprep.mubr.bf16.mxu1 %v11787_v33  ;;  %v5377_v5 = vpop.f32.mrb[109].mxu0  ;;  %v11829_v16 = vld [vmem:[%s18896_s3 + $0x304] ss:$24 sps:$4 sm:$0xff]  }
 0x5db   :  { %19874 = vst [vmem:[#allocation8_spill] sm:$0xff] %v16809_v24  ;;  %v5828_v58 = vpop.f32.mrb[109].mxu1  ;;  %7163 = vmatpush1.bf16.msra.mxu0 %v6296_v6  ;;  %v16816_v31 = vpop.f32.mrb[110].mxu0  ;;  %v11793_v6 = vld [vmem:[%s18896_s3 + $0xc4] ss:$24 sps:$4 sm:$0xff]   ;;  %v7674_v5 = vld [vmem:[#allocation2 + $0x128] sm:$0xff] }
 0x5dc   :  { %19875 = vst [vmem:[#allocation23_spill] sm:$0xff] %v16816_v31  ;;  %7897 = vmatpush1.bf16.msra.mxu1 %v16814_v61  ;;  %v16819_v62 = vpop.f32.mrb[110].mxu1  ;;  %7164 = vmatprep.subr.bf16.mxu0 %v19868_v32  ;;  %v5380_v7 = vpop.f32.mrb[111].mxu0 }
 0x5dd   :  { %19876 = vst [vmem:[#allocation47_spill] sm:$0xff] %v16819_v62  ;;  %v5831_v38 = vpop.f32.mrb[111].mxu1  ;;  %7898 = vmatprep.subr.bf16.mxu1 %v19868_v32 }
 0x5de   :  { %7012 = vmatmul.mubr.bf16.gmra.mrb[216].mxu0 %v11785_v52 }
 0x5df   :  { %7165 = vmatpush1.bf16.msra.mxu0 %v6297_v13  ;;  %7746 = vmatmul.mubr.bf16.gmra.mrb[216].mxu1 %v11785_v52  ;;  %v6299_v52 = vld [vmem:[#allocation2 + $0xb0] sm:$0xff]  ;;  %v11791_v13 = vld [vmem:[%s18896_s3 + $0xc0] ss:$24 sps:$4 sm:$0xff]  }
 0x5e0   :  { %7899 = vmatpush1.bf16.msra.mxu1 %v16826_v56  ;;  %7166 = vmatprep.subr.bf16.mxu0 %v19868_v32 }
 0x5e1   :  { %7900 = vmatprep.subr.bf16.mxu1 %v19868_v32  ;;  %v16831_v20 = vpop.f32.mrb[112].mxu0  ;;  %7019 = vmatprep.mubr.bf16.mxu0 %v11790_v26 }
 0x5e2   :  { %19877 = vst [vmem:[#allocation35_spill] sm:$0xff] %v16831_v20  ;;  %v16833_v15 = vpop.f32.mrb[112].mxu1  ;;  %7753 = vmatprep.mubr.bf16.mxu1 %v11790_v26  ;;  %v5385_v14 = vpop.f32.mrb[113].mxu0  ;;  %v6300_v26 = vld [vmem:[#allocation2 + $0xb8] sm:$0xff]  ;;  %v11826_v20 = vld [vmem:[%s18896_s3 + $0x2d4] ss:$24 sps:$4 sm:$0xff]  }
 0x5e3   :  { %19878 = vst [vmem:[#allocation50_spill] sm:$0xff] %v16833_v15  ;;  %v5836_v25 = vpop.f32.mrb[113].mxu1  ;;  %7167 = vmatpush1.bf16.msra.mxu0 %v6298_v40  ;;  %v16840_v11 = vpop.f32.mrb[114].mxu0 }
 0x5e4   :  { %19880 = vst [vmem:[#allocation18_spill] sm:$0xff] %v16840_v11  ;;  %7901 = vmatpush1.bf16.msra.mxu1 %v16838_v23  ;;  %v16843_v19 = vpop.f32.mrb[114].mxu1  ;;  %7168 = vmatprep.subr.bf16.mxu0 %v19868_v32  ;;  %v5388_v33 = vpop.f32.mrb[115].mxu0  ;;  %v7677_v25 = vld [vmem:[#allocation2 + $0x140] sm:$0xff] }
 0x5e5   :  { %19881 = vst [vmem:[#allocation5_spill] sm:$0xff] %v16843_v19  ;;  %v5839_v48 = vpop.f32.mrb[115].mxu1  ;;  %7902 = vmatprep.subr.bf16.mxu1 %v19868_v32  ;;  %v11823_v19 = vld [vmem:[%s18896_s3 + $0x2a4] ss:$24 sps:$4 sm:$0xff]  }
 0x5e6   :  { %7020 = vmatmul.mubr.bf16.gmra.mrb[220].mxu0 %v11788_v4 }
 0x5e7   :  { %7169 = vmatpush1.bf16.msra.mxu0 %v6299_v52  ;;  %7754 = vmatmul.mubr.bf16.gmra.mrb[220].mxu1 %v11788_v4  ;;  %v7675_v4 = vld [vmem:[#allocation2 + $0x130] sm:$0xff]  ;;  %v6302_v52 = vld [vmem:[#allocation2 + $0xc8] sm:$0xff] }
 0x5e8   :  { %7903 = vmatpush1.bf16.msra.mxu1 %v7674_v5  ;;  %7170 = vmatprep.subr.bf16.mxu0 %v19868_v32 }
 0x5e9   :  { %v16851_v58 = vpop.f32.mrb[116].mxu0  ;;  %7904 = vmatprep.subr.bf16.mxu1 %v19868_v32  ;;  %7027 = vmatprep.mubr.bf16.mxu0 %v11793_v6 }
 0x5ea   :  { %19882 = vst [vmem:[#allocation19_spill] sm:$0xff] %v16851_v58  ;;  %v16854_v7 = vpop.f32.mrb[116].mxu1  ;;  %v5393_v38 = vpop.f32.mrb[117].mxu0  ;;  %7761 = vmatprep.mubr.bf16.mxu1 %v11793_v6  ;;  %v11796_v6 = vld [vmem:[%s18896_s3 + $0xf4] ss:$24 sps:$4 sm:$0xff]  }
 0x5eb   :  { %19883 = vst [vmem:[#allocation7_spill] sm:$0xff] %v16854_v7  ;;  %v5844_v40 = vpop.f32.mrb[117].mxu1  ;;  %7171 = vmatpush1.bf16.msra.mxu0 %v6300_v26  ;;  %v16859_v14 = vpop.f32.mrb[118].mxu0  ;;  %v6301_v38 = vld [vmem:[#allocation2 + $0xc0] sm:$0xff]  ;;  %v7676_v26 = vld [vmem:[#allocation2 + $0x138] sm:$0xff] }
 0x5ec   :  { %7905 = vmatpush1.bf16.msra.mxu1 %v7675_v4  ;;  %v16863_v33 = vpop.f32.mrb[118].mxu1  ;;  %7172 = vmatprep.subr.bf16.mxu0 %v19868_v32  ;;  %v5396_v48 = vpop.f32.mrb[119].mxu0 }
 0x5ed   :  { %v5847_v5 = vpop.f32.mrb[119].mxu1  ;;  %7906 = vmatprep.subr.bf16.mxu1 %v19868_v32 }
 0x5ee   :  { %7028 = vmatmul.mubr.bf16.gmra.mrb[224].mxu0 %v11791_v13 }
 0x5ef   :  { %7173 = vmatpush1.bf16.msra.mxu0 %v6301_v38  ;;  %7762 = vmatmul.mubr.bf16.gmra.mrb[224].mxu1 %v11791_v13  ;;  %v11794_v13 = vld [vmem:[%s18896_s3 + $0xf0] ss:$24 sps:$4 sm:$0xff]   ;;  %v6304_v38 = vld [vmem:[#allocation2 + $0xd8] sm:$0xff] }
 0x5f0   :  { %7907 = vmatpush1.bf16.msra.mxu1 %v7676_v26  ;;  %7174 = vmatprep.subr.bf16.mxu0 %v19868_v32 }
 0x5f1   :  { %v16873_v40 = vpop.f32.mrb[120].mxu0  ;;  %7908 = vmatprep.subr.bf16.mxu1 %v19868_v32  ;;  %7035 = vmatprep.mubr.bf16.mxu0 %v11796_v6 }
 0x5f2   :  { %v16878_v48 = vpop.f32.mrb[120].mxu1  ;;  %v5401_v5 = vpop.f32.mrb[121].mxu0  ;;  %7769 = vmatprep.mubr.bf16.mxu1 %v11796_v6 }
 0x5f3   :  { %v5852_v26 = vpop.f32.mrb[121].mxu1  ;;  %7175 = vmatpush1.bf16.msra.mxu0 %v6302_v52  ;;  %v16885_v3 = vpop.f32.mrb[122].mxu0  ;;  %v11799_v52 = vld [vmem:[%s18896_s3 + $0x124] ss:$24 sps:$4 sm:$0xff]  }
 0x5f4   :  { %7909 = vmatpush1.bf16.msra.mxu1 %v7677_v25  ;;  %v16889_v43 = vpop.f32.mrb[122].mxu1  ;;  %7176 = vmatprep.subr.bf16.mxu0 %v19868_v32  ;;  %v5404_v5 = vpop.f32.mrb[123].mxu0  ;;  %v6303_v25 = vld [vmem:[#allocation2 + $0xd0] sm:$0xff]  ;;  %v7678_v26 = vld [vmem:[#allocation2 + $0x148] sm:$0xff] }
 0x5f5   :  { %v5855_v47 = vpop.f32.mrb[123].mxu1  ;;  %7910 = vmatprep.subr.bf16.mxu1 %v19868_v32 }
 0x5f6   :  { %7036 = vmatmul.mubr.bf16.gmra.mrb[228].mxu0 %v11794_v13 }
 0x5f7   :  { %7177 = vmatpush1.bf16.msra.mxu0 %v6303_v25  ;;  %7770 = vmatmul.mubr.bf16.gmra.mrb[228].mxu1 %v11794_v13  ;;  %v11797_v13 = vld [vmem:[%s18896_s3 + $0x120] ss:$24 sps:$4 sm:$0xff]   ;;  %v6306_v25 = vld [vmem:[#allocation2 + $0xe8] sm:$0xff] }
 0x5f8   :  { %7911 = vmatpush1.bf16.msra.mxu1 %v7678_v26  ;;  %7178 = vmatprep.subr.bf16.mxu0 %v19868_v32 }
 0x5f9   :  { %v16899_v4 = vpop.f32.mrb[124].mxu0  ;;  %7912 = vmatprep.subr.bf16.mxu1 %v19868_v32  ;;  %7043 = vmatprep.mubr.bf16.mxu0 %v11799_v52 }
 0x5fa   :  { %v16904_v5 = vpop.f32.mrb[124].mxu1  ;;  %v5409_v6 = vpop.f32.mrb[125].mxu0  ;;  %7777 = vmatprep.mubr.bf16.mxu1 %v11799_v52 }
 0x5fb   :  { %v5860_v26 = vpop.f32.mrb[125].mxu1  ;;  %7179 = vmatpush1.bf16.msra.mxu0 %v6304_v38  ;;  %v16911_v17 = vpop.f32.mrb[126].mxu0  ;;  %v11802_v38 = vld [vmem:[%s18896_s3 + $0x154] ss:$24 sps:$4 sm:$0xff]  }
 0x5fc   :  { %7913 = vmatpush1.bf16.msra.mxu1 %v7679_v41  ;;  %v16915_v51 = vpop.f32.mrb[126].mxu1  ;;  %7180 = vmatprep.subr.bf16.mxu0 %v19868_v32  ;;  %v5412_v6 = vpop.f32.mrb[127].mxu0  ;;  %v6305_v41 = vld [vmem:[#allocation2 + $0xe0] sm:$0xff]  ;;  %v7680_v26 = vld [vmem:[#allocation2 + $0x158] sm:$0xff] }
 0x5fd   :  { %v5863_v28 = vpop.f32.mrb[127].mxu1  ;;  %7914 = vmatprep.subr.bf16.mxu1 %v19868_v32 }
 0x5fe   :  { %7044 = vmatmul.mubr.bf16.gmra.mrb[232].mxu0 %v11797_v13 }
 0x5ff   :  { %7181 = vmatpush1.bf16.msra.mxu0 %v6305_v41  ;;  %7778 = vmatmul.mubr.bf16.gmra.mrb[232].mxu1 %v11797_v13  ;;  %v11800_v13 = vld [vmem:[%s18896_s3 + $0x150] ss:$24 sps:$4 sm:$0xff]  }
 0x600   :  { %7915 = vmatpush1.bf16.msra.mxu1 %v7680_v26  ;;  %7182 = vmatprep.subr.bf16.mxu0 %v19868_v32  ;;  %v7683_v41 = vld [vmem:[#allocation2 + $0x170] sm:$0xff] }
 0x601   :  { %v16925_v47 = vpop.f32.mrb[128].mxu0  ;;  %7916 = vmatprep.subr.bf16.mxu1 %v19868_v32  ;;  %7051 = vmatprep.mubr.bf16.mxu0 %v11802_v38 }
 0x602   :  { %v16930_v6 = vpop.f32.mrb[128].mxu1  ;;  %v5417_v52 = vpop.f32.mrb[129].mxu0  ;;  %7785 = vmatprep.mubr.bf16.mxu1 %v11802_v38 }
 0x603   :  { %v5868_v26 = vpop.f32.mrb[129].mxu1  ;;  %7183 = vmatpush1.bf16.msra.mxu0 %v6306_v25  ;;  %v16937_v34 = vpop.f32.mrb[130].mxu0  ;;  %v11805_v25 = vld [vmem:[%s18896_s3 + $0x184] ss:$24 sps:$4 sm:$0xff]  }
 0x604   :  { %7917 = vmatpush1.bf16.msra.mxu1 %v7681_v44  ;;  %v16941_v23 = vpop.f32.mrb[130].mxu1  ;;  %7184 = vmatprep.subr.bf16.mxu0 %v19868_v32  ;;  %v5420_v52 = vpop.f32.mrb[131].mxu0  ;;  %v6307_v44 = vld [vmem:[#allocation2 + $0xf0] sm:$0xff]  ;;  %v7682_v26 = vld [vmem:[#allocation2 + $0x168] sm:$0xff] }
 0x605   :  { %19884 = vst [vmem:[#allocation42_spill] sm:$0xff] %v16941_v23  ;;  %v5871_v35 = vpop.f32.mrb[131].mxu1  ;;  %7918 = vmatprep.subr.bf16.mxu1 %v19868_v32 }
 0x606   :  { %7052 = vmatmul.mubr.bf16.gmra.mrb[236].mxu0 %v11800_v13  ;;  %v11808_v35 = vld [vmem:[%s18896_s3 + $0x1b4] ss:$24 sps:$4 sm:$0xff]  }
 0x607   :  { %7185 = vmatpush1.bf16.msra.mxu0 %v6307_v44  ;;  %7786 = vmatmul.mubr.bf16.gmra.mrb[236].mxu1 %v11800_v13  ;;  %v11803_v44 = vld [vmem:[%s18896_s3 + $0x180] ss:$24 sps:$4 sm:$0xff]  }
 0x608   :  { %7919 = vmatpush1.bf16.msra.mxu1 %v7682_v26  ;;  %7186 = vmatprep.subr.bf16.mxu0 %v19868_v32 }
 0x609   :  { %v16951_v28 = vpop.f32.mrb[132].mxu0  ;;  %7920 = vmatprep.subr.bf16.mxu1 %v19868_v32  ;;  %7059 = vmatprep.mubr.bf16.mxu0 %v11805_v25 }
 0x60a   :  { %19885 = vst [vmem:[#allocation20_spill] sm:$0xff] %v16951_v28  ;;  %v16956_v52 = vpop.f32.mrb[132].mxu1  ;;  %v5425_v38 = vpop.f32.mrb[133].mxu0  ;;  %7793 = vmatprep.mubr.bf16.mxu1 %v11805_v25 }
 0x60b   :  { %19886 = vst [vmem:[#allocation6_spill] sm:$0xff] %v16956_v52  ;;  %v5876_v26 = vpop.f32.mrb[133].mxu1  ;;  %7187 = vmatpush1.bf16.msra.mxu0 %v16778_v53  ;;  %v16964_v23 = vpop.f32.mrb[134].mxu0 }
 0x60c   :  { %19887 = vst [vmem:[#allocation14_spill] sm:$0xff] %v16964_v23  ;;  %7921 = vmatpush1.bf16.msra.mxu1 %v7683_v41  ;;  %v16971_v28 = vpop.f32.mrb[134].mxu1  ;;  %v5428_v25 = vpop.f32.mrb[135].mxu0  ;;  %7349 = vmatprep.subr.bf16.mxu0 %v19868_v32  ;;  %v11806_v23 = vld [vmem:[%s18896_s3 + $0x1b0] ss:$24 sps:$4 sm:$0xff]  }
 0x60d   :  { %19888 = vst [vmem:[#allocation55_spill] sm:$0xff] %v16971_v28  ;;  %v5879_v53 = vpop.f32.mrb[135].mxu1  ;;  %8083 = vmatprep.subr.bf16.mxu1 %v19868_v32 }
 0x60e   :  { %7060 = vmatmul.mubr.bf16.gmra.mrb[240].mxu0 %v11803_v44 }
 0x60f   :  { %7794 = vmatmul.mubr.bf16.gmra.mrb[240].mxu1 %v11803_v44  ;;  %7067 = vmatprep.mubr.bf16.mxu0 %v11808_v35 }
 0x610   :  { %7801 = vmatprep.mubr.bf16.mxu1 %v11808_v35  ;;  %v11811_v35 = vld [vmem:[%s18896_s3 + $0x1e4] ss:$24 sps:$4 sm:$0xff]  }
 0x611   :  { %v16977_v13 = vpop.f32.mrb[136].mxu0 }
 0x612   :  { %19889 = vst [vmem:[#allocation36_spill] sm:$0xff] %v16977_v13  ;;  %v16981_v38 = vpop.f32.mrb[136].mxu1  ;;  %v5433_v25 = vpop.f32.mrb[137].mxu0 }
 0x613   :  { %19890 = vst [vmem:[#allocation26_spill] sm:$0xff] %v16981_v38  ;;  %v5884_v26 = vpop.f32.mrb[137].mxu1  ;;  %v16988_v28 = vpop.f32.mrb[138].mxu0 }
 0x614   :  { %19891 = vst [vmem:[#allocation39_spill] sm:$0xff] %v16988_v28  ;;  %v16995_v41 = vpop.f32.mrb[138].mxu1  ;;  %v5436_v25 = vpop.f32.mrb[139].mxu0 }
 0x615   :  { %19892 = vst [vmem:[#allocation33_spill] sm:$0xff] %v16995_v41  ;;  %v5887_v12 = vpop.f32.mrb[139].mxu1  ;;  %v11809_v25 = vld [vmem:[%s18896_s3 + $0x1e0] ss:$24 sps:$4 sm:$0xff]  }
 0x616   :  { %7068 = vmatmul.mubr.bf16.gmra.mrb[244].mxu0 %v11806_v23 }
 0x617   :  { %7802 = vmatmul.mubr.bf16.gmra.mrb[244].mxu1 %v11806_v23  ;;  %7075 = vmatprep.mubr.bf16.mxu0 %v11811_v35  ;;  %v11814_v23 = vld [vmem:[%s18896_s3 + $0x214] ss:$24 sps:$4 sm:$0xff]  }
 0x618   :  { %7809 = vmatprep.mubr.bf16.mxu1 %v11811_v35 }
 0x619   :  { %v16999_v26 = vpop.f32.mrb[140].mxu0 }
 0x61a   :  { %19893 = vst [vmem:[#allocation38_spill] sm:$0xff] %v16999_v26  ;;  %v17003_v38 = vpop.f32.mrb[140].mxu1  ;;  %v5441_v49 = vpop.f32.mrb[141].mxu0 }
 0x61b   :  { %19894 = vst [vmem:[#allocation52_spill] sm:$0xff] %v17003_v38  ;;  %v5892_v12 = vpop.f32.mrb[141].mxu1  ;;  %v17010_v44 = vpop.f32.mrb[142].mxu0 }
 0x61c   :  { %19895 = vst [vmem:[#allocation34_spill] sm:$0xff] %v17010_v44  ;;  %v17017_v53 = vpop.f32.mrb[142].mxu1  ;;  %v5444_v49 = vpop.f32.mrb[143].mxu0 }
 0x61d   :  { %19896 = vst [vmem:[#allocation45_spill] sm:$0xff] %v17017_v53  ;;  %v5895_v31 = vpop.f32.mrb[143].mxu1  ;;  %v11812_v49 = vld [vmem:[%s18896_s3 + $0x210] ss:$24 sps:$4 sm:$0xff]  }
 0x61e   :  { %7076 = vmatmul.mubr.bf16.gmra.mrb[248].mxu0 %v11809_v25 }
 0x61f   :  { %7810 = vmatmul.mubr.bf16.gmra.mrb[248].mxu1 %v11809_v25  ;;  %7083 = vmatprep.mubr.bf16.mxu0 %v11814_v23  ;;  %v11817_v25 = vld [vmem:[%s18896_s3 + $0x244] ss:$24 sps:$4 sm:$0xff]  }
 0x620   :  { %7817 = vmatprep.mubr.bf16.mxu1 %v11814_v23 }
 0x621   :  { %v17021_v12 = vpop.f32.mrb[144].mxu0 }
 0x622   :  { %19897 = vst [vmem:[#allocation21_spill] sm:$0xff] %v17021_v12  ;;  %v17025_v38 = vpop.f32.mrb[144].mxu1  ;;  %v5449_v62 = vpop.f32.mrb[145].mxu0 }
 0x623   :  { %19898 = vst [vmem:[#allocation46_spill] sm:$0xff] %v17025_v38  ;;  %v5900_v31 = vpop.f32.mrb[145].mxu1  ;;  %v17032_v35 = vpop.f32.mrb[146].mxu0  ;;  %v11815_v38 = vld [vmem:[%s18896_s3 + $0x240] ss:$24 sps:$4 sm:$0xff]  }
 0x624   :  { %19899 = vst [vmem:[#allocation44_spill] sm:$0xff] %v17032_v35  ;;  %v17039_v13 = vpop.f32.mrb[146].mxu1  ;;  %v5452_v62 = vpop.f32.mrb[147].mxu0 }
 0x625   :  { %19900 = vst [vmem:[#allocation41_spill] sm:$0xff] %v17039_v13  ;;  %v5903_v11 = vpop.f32.mrb[147].mxu1  ;;  %v11820_v62 = vld [vmem:[%s18896_s3 + $0x274] ss:$24 sps:$4 sm:$0xff]  }
 0x626   :  { %7084 = vmatmul.mubr.bf16.gmra.mrb[252].mxu0 %v11812_v49 }
 0x627   :  { %7818 = vmatmul.mubr.bf16.gmra.mrb[252].mxu1 %v11812_v49  ;;  %7091 = vmatprep.mubr.bf16.mxu0 %v11817_v25 }
 0x628   :  { %7825 = vmatprep.mubr.bf16.mxu1 %v11817_v25 }
 0x629   :  { %v17043_v31 = vpop.f32.mrb[148].mxu0 }
 0x62a   :  { %v17045_v26 = vpop.f32.mrb[148].mxu1  ;;  %v5457_v23 = vpop.f32.mrb[149].mxu0 }
 0x62b   :  { %v5908_v35 = vpop.f32.mrb[149].mxu1  ;;  %v17053_v12 = vpop.f32.mrb[150].mxu0 }
 0x62c   :  { %v17055_v11 = vpop.f32.mrb[150].mxu1  ;;  %v5460_v49 = vpop.f32.mrb[151].mxu0  ;;  %v11818_v35 = vld [vmem:[%s18896_s3 + $0x270] ss:$24 sps:$4 sm:$0xff]  }
 0x62d   :  { %v5911_v25 = vpop.f32.mrb[151].mxu1 }
 0x62e   :  { %7092 = vmatmul.mubr.bf16.gmra.mrb[0].mxu0 %v11815_v38 }
 0x62f   :  { %7826 = vmatmul.mubr.bf16.gmra.mrb[0].mxu1 %v11815_v38  ;;  %7099 = vmatprep.mubr.bf16.mxu0 %v11820_v62 }
 0x630   :  { %7833 = vmatprep.mubr.bf16.mxu1 %v11820_v62 }
 0x631   :  { %v17057_v13 = vpop.f32.mrb[152].mxu0 }
 0x632   :  { %v17059_v7 = vpop.f32.mrb[152].mxu1  ;;  %v5465_v23 = vpop.f32.mrb[153].mxu0 }
 0x633   :  { %v5916_v58 = vpop.f32.mrb[153].mxu1  ;;  %v17067_v49 = vpop.f32.mrb[154].mxu0 }
 0x634   :  { %v17069_v25 = vpop.f32.mrb[154].mxu1  ;;  %v5468_v38 = vpop.f32.mrb[155].mxu0  ;;  %v11821_v58 = vld [vmem:[%s18896_s3 + $0x2a0] ss:$24 sps:$4 sm:$0xff]  }
 0x635   :  { %v5919_v62 = vpop.f32.mrb[155].mxu1 }
 0x636   :  { %7100 = vmatmul.mubr.bf16.gmra.mrb[4].mxu0 %v11818_v35 }
 0x637   :  { %7834 = vmatmul.mubr.bf16.gmra.mrb[4].mxu1 %v11818_v35  ;;  %7107 = vmatprep.mubr.bf16.mxu0 %v11823_v19 }
 0x638   :  { %7841 = vmatprep.mubr.bf16.mxu1 %v11823_v19 }
 0x639   :  { %v17071_v53 = vpop.f32.mrb[156].mxu0 }
 0x63a   :  { %v17073_v15 = vpop.f32.mrb[156].mxu1  ;;  %v5473_v23 = vpop.f32.mrb[157].mxu0 }
 0x63b   :  { %v5924_v44 = vpop.f32.mrb[157].mxu1  ;;  %v17081_v38 = vpop.f32.mrb[158].mxu0 }
 0x63c   :  { %v17083_v62 = vpop.f32.mrb[158].mxu1  ;;  %v5476_v35 = vpop.f32.mrb[159].mxu0  ;;  %v11824_v44 = vld [vmem:[%s18896_s3 + $0x2d0] ss:$24 sps:$4 sm:$0xff]  }
 0x63d   :  { %v5927_v19 = vpop.f32.mrb[159].mxu1 }
 0x63e   :  { %7108 = vmatmul.mubr.bf16.gmra.mrb[8].mxu0 %v11821_v58 }
 0x63f   :  { %7842 = vmatmul.mubr.bf16.gmra.mrb[8].mxu1 %v11821_v58  ;;  %7115 = vmatprep.mubr.bf16.mxu0 %v11826_v20 }
 0x640   :  { %7849 = vmatprep.mubr.bf16.mxu1 %v11826_v20 }
 0x641   :  { %v17085_v41 = vpop.f32.mrb[160].mxu0 }
 0x642   :  { %v17087_v24 = vpop.f32.mrb[160].mxu1  ;;  %v5481_v23 = vpop.f32.mrb[161].mxu0 }
 0x643   :  { %v5932_v28 = vpop.f32.mrb[161].mxu1  ;;  %v17095_v35 = vpop.f32.mrb[162].mxu0 }
 0x644   :  { %19901 = vst [vmem:[#allocation27_spill] sm:$0xff] %v17095_v35  ;;  %v17097_v19 = vpop.f32.mrb[162].mxu1  ;;  %v5484_v58 = vpop.f32.mrb[163].mxu0  ;;  %v11827_v28 = vld [vmem:[%s18896_s3 + $0x300] ss:$24 sps:$4 sm:$0xff]  }
 0x645   :  { %19902 = vst [vmem:[#allocation54_spill] sm:$0xff] %v17097_v19  ;;  %v5935_v20 = vpop.f32.mrb[163].mxu1 }
 0x646   :  { %7116 = vmatmul.mubr.bf16.gmra.mrb[12].mxu0 %v11824_v44 }
 0x647   :  { %7850 = vmatmul.mubr.bf16.gmra.mrb[12].mxu1 %v11824_v44  ;;  %7123 = vmatprep.mubr.bf16.mxu0 %v11829_v16 }
 0x648   :  { %7857 = vmatprep.mubr.bf16.mxu1 %v11829_v16 }
 0x649   :  { %v17099_v9 = vpop.f32.mrb[164].mxu0 }
 0x64a   :  { %19903 = vst [vmem:[#allocation51_spill] sm:$0xff] %v17099_v9  ;;  %v17101_v54 = vpop.f32.mrb[164].mxu1  ;;  %v5489_v23 = vpop.f32.mrb[165].mxu0 }
 0x64b   :  { %19904 = vst [vmem:[#allocation4_spill] sm:$0xff] %v17101_v54  ;;  %v5940_v52 = vpop.f32.mrb[165].mxu1  ;;  %v17109_v58 = vpop.f32.mrb[166].mxu0 }
 0x64c   :  { %19905 = vst [vmem:[#allocation22_spill] sm:$0xff] %v17109_v58  ;;  %v17111_v20 = vpop.f32.mrb[166].mxu1  ;;  %v5492_v44 = vpop.f32.mrb[167].mxu0  ;;  %v11830_v52 = vld [vmem:[%s18896_s3 + $0x330] ss:$24 sps:$4 sm:$0xff]  }
 0x64d   :  { %19906 = vst [vmem:[#allocation37_spill] sm:$0xff] %v17111_v20  ;;  %v5943_v16 = vpop.f32.mrb[167].mxu1  ;;  %v11835_v44 = vld [vmem:[%s18896_s3 + $0x364] ss:$24 sps:$4 sm:$0xff]  }
 0x64e   :  { %7124 = vmatmul.mubr.bf16.gmra.mrb[16].mxu0 %v11827_v28 }
 0x64f   :  { %7858 = vmatmul.mubr.bf16.gmra.mrb[16].mxu1 %v11827_v28  ;;  %7131 = vmatprep.mubr.bf16.mxu0 %v11832_v46 }
 0x650   :  { %7865 = vmatprep.mubr.bf16.mxu1 %v11832_v46 }
 0x651   :  { %v17113_v54 = vpop.f32.mrb[168].mxu0 }
 0x652   :  { %19907 = vst [vmem:[#allocation17_spill] sm:$0xff] %v17113_v54  ;;  %v17115_v9 = vpop.f32.mrb[168].mxu1  ;;  %v5497_v23 = vpop.f32.mrb[169].mxu0 }
 0x653   :  { %19908 = vst [vmem:[#allocation56_spill] sm:$0xff] %v17115_v9  ;;  %v5948_v39 = vpop.f32.mrb[169].mxu1  ;;  %v17120_v19 = vpop.f32.mrb[170].mxu0 }
 0x654   :  { %19909 = vst [vmem:[#allocation25_spill] sm:$0xff] %v17120_v19  ;;  %v17125_v16 = vpop.f32.mrb[170].mxu1  ;;  %v5500_v28 = vpop.f32.mrb[171].mxu0  ;;  %v11833_v39 = vld [vmem:[%s18896_s3 + $0x360] ss:$24 sps:$4 sm:$0xff]  }
 0x655   :  { %19910 = vst [vmem:[#allocation48_spill] sm:$0xff] %v17125_v16  ;;  %v5951_v46 = vpop.f32.mrb[171].mxu1  ;;  %v11838_v28 = vld [vmem:[%s18896_s3 + $0x394] ss:$24 sps:$4 sm:$0xff]  }
 0x656   :  { %7132 = vmatmul.mubr.bf16.gmra.mrb[20].mxu0 %v11830_v52 }
 0x657   :  { %7866 = vmatmul.mubr.bf16.gmra.mrb[20].mxu1 %v11830_v52  ;;  %7139 = vmatprep.mubr.bf16.mxu0 %v11835_v44 }
 0x658   :  { %7873 = vmatprep.mubr.bf16.mxu1 %v11835_v44 }
 0x659   :  { %v17127_v9 = vpop.f32.mrb[172].mxu0 }
 0x65a   :  { %19911 = vst [vmem:[#allocation58_spill] sm:$0xff] %v17127_v9  ;;  %v17129_v54 = vpop.f32.mrb[172].mxu1  ;;  %v5505_v23 = vpop.f32.mrb[173].mxu0 }
 0x65b   :  { %19912 = vst [vmem:[#allocation59_spill] sm:$0xff] %v17129_v54  ;;  %v5956_v19 = vpop.f32.mrb[173].mxu1  ;;  %v17134_v20 = vpop.f32.mrb[174].mxu0 }
 0x65c   :  { %19913 = vst [vmem:[#allocation60_spill] sm:$0xff] %v17134_v20  ;;  %v17139_v46 = vpop.f32.mrb[174].mxu1  ;;  %v5508_v52 = vpop.f32.mrb[175].mxu0  ;;  %v11836_v19 = vld [vmem:[%s18896_s3 + $0x390] ss:$24 sps:$4 sm:$0xff]  }
 0x65d   :  { %19914 = vst [vmem:[#allocation61_spill] sm:$0xff] %v17139_v46  ;;  %v5959_v44 = vpop.f32.mrb[175].mxu1  ;;  %v11841_v52 = vld [vmem:[%s18896_s3 + $0xc] ss:$24 sps:$4 sm:$0xff]  }
 0x65e   :  { %7140 = vmatmul.mubr.bf16.gmra.mrb[24].mxu0 %v11833_v39 }
 0x65f   :  { %7874 = vmatmul.mubr.bf16.gmra.mrb[24].mxu1 %v11833_v39  ;;  %7147 = vmatprep.mubr.bf16.mxu0 %v11838_v28 }
 0x660   :  { %7881 = vmatprep.mubr.bf16.mxu1 %v11838_v28 }
 0x661   :  { %v17141_v54 = vpop.f32.mrb[176].mxu0 }
 0x662   :  { %19915 = vst [vmem:[#allocation62_spill] sm:$0xff] %v17141_v54  ;;  %v17143_v9 = vpop.f32.mrb[176].mxu1  ;;  %v5513_v23 = vpop.f32.mrb[177].mxu0 }
 0x663   :  { %19916 = vst [vmem:[#allocation63_spill] sm:$0xff] %v17143_v9  ;;  %v5964_v20 = vpop.f32.mrb[177].mxu1  ;;  %v5514_v16 = vpop.f32.mrb[178].mxu0  ;;  %v19917_v23 = vmax.f32 %v16712_v21, %v16859_v14 }
 0x664   :  { %v5589_v44 = vmax.f32 %v17043_v31, %v5514_v16  ;;  %v5965_v39 = vpop.f32.mrb[178].mxu1  ;;  %v5516_v46 = vpop.f32.mrb[179].mxu0  ;;  %v19918_v20 = vmax.f32 %v16714_v63, %v16863_v33  ;;  %v19919_v63 = vmax.f32 %v16716_v57, %v16873_v40  ;;  %v19921_v40 = vmax.f32 %v16733_v37, %v16885_v3 }
 0x665   :  { %v6040_v28 = vmax.f32 %v17045_v26, %v5965_v39  ;;  %v5967_v54 = vpop.f32.mrb[179].mxu1  ;;  %v19920_v39 = vmax.f32 %v16719_v59, %v16878_v48  ;;  %v19922_v59 = vmax.f32 %v16736_v22, %v16889_v43 }
 0x666   :  { %v5604_v9 = vmax.f32 %v19917_v23, %v5589_v44  ;;  %7148 = vmatmul.mubr.bf16.gmra.mrb[28].mxu0 %v11836_v19  ;;  %v11839_v54 = vld [vmem:[%s18896_s3 + $0x8] ss:$24 sps:$4 sm:$0xff]  }
 0x667   :  { %v6055_v58 = vmax.f32 %v19918_v20, %v6040_v28  ;;  %7882 = vmatmul.mubr.bf16.gmra.mrb[28].mxu1 %v11836_v19  ;;  %7188 = vmatprep.mubr.bf16.mxu0 %v11841_v52 }
 0x668   :  { %7922 = vmatprep.mubr.bf16.mxu1 %v11841_v52  ;;  %v5619_v44 = vadd.f32 %v5604_v9, %v13484_v60  ;;  %v11844_v9 = vld [vmem:[%s18896_s3 + $0x3c] ss:$24 sps:$4 sm:$0xff]  }
 0x669   :  { %v5519_v35 = vpop.f32.mrb[180].mxu0 }
 0x66a   :  { %v5590_v31 = vmax.f32 %v17053_v12, %v5519_v35  ;;  %v5970_v16 = vpop.f32.mrb[180].mxu1  ;;  %v5521_v46 = vpop.f32.mrb[181].mxu0  ;;  %v6070_v35 = vadd.f32 %v6055_v58, %v13484_v60  ;;  %v5634_v58 = vmax.f32 %v5619_v44, 0.0  ;;  %v19923_v44 = vmax.f32 %v16738_v30, %v16899_v4  ;;  %v11847_v4 = vld [vmem:[%s18896_s3 + $0x6c] ss:$24 sps:$4 sm:$0xff]  }
 0x66b   :  { %v6041_v21 = vmax.f32 %v17055_v11, %v5970_v16  ;;  %v5972_v14 = vpop.f32.mrb[181].mxu1  ;;  %v5522_v26 = vpop.f32.mrb[182].mxu0  ;;  %v11842_v16 = vld [vmem:[%s18896_s3 + $0x38] ss:$24 sps:$4 sm:$0xff]  }
 0x66c   :  { %v5605_v33 = vmax.f32 %v19919_v63, %v5590_v31  ;;  %v5591_v19 = vmax.f32 %v17057_v13, %v5522_v26  ;;  %v5973_v52 = vpop.f32.mrb[182].mxu1  ;;  %v5524_v12 = vpop.f32.mrb[183].mxu0  ;;  %v6085_v3 = vmax.f32 %v6070_v35, 0.0  ;;  %v17199_v14 = vld [vmem:[#allocation2 + $0x180] sm:$0xff] }
 0x66d   :  { %v6056_v28 = vmax.f32 %v19920_v39, %v6041_v21  ;;  %v6042_v11 = vmax.f32 %v17059_v7, %v5973_v52  ;;  %v5975_v23 = vpop.f32.mrb[183].mxu1  ;;  %v17186_v7 = vld [vmem:[#allocation2 + $0x178] sm:$0xff]  ;;  %v19924_v12 = vmax.f32 %v16740_v10, %v16904_v5  ;;  %v19926_v10 = vmax.f32 %v16752_v8, %v16915_v51  ;;  %v17229_v5 = vld [vmem:[#allocation2 + $0x188] sm:$0xff] }
 0x66e   :  { %v5620_v57 = vadd.f32 %v5605_v33, %v13498_v36  ;;  %v5606_v13 = vmax.f32 %v19921_v40, %v5591_v19  ;;  %7189 = vmatmul.mubr.bf16.vlgmr.msra.gmra.mrb[208].mxu0 %v11839_v54  ;;  %v11845_v40 = vld [vmem:[%s18896_s3 + $0x68] ss:$24 sps:$4 sm:$0xff]  }
 0x66f   :  { %v6071_v60 = vadd.f32 %v6056_v28, %v13498_v36  ;;  %v6057_v48 = vmax.f32 %v19922_v59, %v6042_v11  ;;  %7350 = vmatpush1.bf16.msra.mxu0 %v16790_v45  ;;  %7923 = vmatmul.mubr.bf16.vlgmr.msra.gmra.mrb[208].mxu1 %v11839_v54  ;;  %v19925_v28 = vmax.f32 %v16750_v50, %v16911_v17 }
 0x670   :  { %v5635_v20 = vmax.f32 %v5620_v57, 0.0  ;;  %8084 = vmatpush1.bf16.msra.mxu1 %v17186_v7  ;;  %7351 = vmatprep.subr.bf16.mxu0 %v19868_v32 }
 0x671   :  { %v6086_v37 = vmax.f32 %v6071_v60, 0.0  ;;  %v5527_v31 = vpop.f32.mrb[184].mxu0  ;;  %8085 = vmatprep.subr.bf16.mxu1 %v19868_v32  ;;  %7196 = vmatprep.mubr.bf16.mxu0 %v11844_v9  ;;  %v6072_v52 = vadd.f32 %v6057_v48, %v13511_v55  ;;  %v17242_v48 = vld [vmem:[#allocation2 + $0x190] sm:$0xff] }
 0x672   :  { %v5649_v36 = vpack.c.bf16 %v5635_v20, %v5634_v58  ;;  %v5592_v43 = vmax.f32 %v17067_v49, %v5527_v31  ;;  %v5978_v22 = vpop.f32.mrb[184].mxu1  ;;  %v5529_v45 = vpop.f32.mrb[185].mxu0  ;;  %7930 = vmatprep.mubr.bf16.mxu1 %v11844_v9  ;;  %v5621_v49 = vadd.f32 %v5606_v13, %v13511_v55  ;;  %v19927_v20 = vmax.f32 %v16757_v1, %v16925_v47  ;;  %v11850_v47 = vld [vmem:[%s18896_s3 + $0x9c] ss:$24 sps:$4 sm:$0xff]  }
 0x673   :  { %v17195_v46 = vpack.c.bf16 %v6086_v37, %v6085_v3  ;;  %v6043_v54 = vmax.f32 %v17069_v25, %v5978_v22  ;;  %v5980_v21 = vpop.f32.mrb[185].mxu1  ;;  %7352 = vmatpush1.bf16.msra.mxu0 %v16802_v42  ;;  %v5530_v26 = vpop.f32.mrb[186].mxu0  ;;  %v6087_v17 = vmax.f32 %v6072_v52, 0.0 }
 0x674   :  { %5657 = vst.msk [vmem:[#allocation2 + $0x258] sm:$0xff] %vm988_vm2, %v5649_v36  ;;  %v5607_v63 = vmax.f32 %v19923_v44, %v5592_v43  ;;  %8086 = vmatpush1.bf16.msra.mxu1 %v17199_v14  ;;  %v5593_v33 = vmax.f32 %v17071_v53, %v5530_v26  ;;  %v5981_v19 = vpop.f32.mrb[186].mxu1  ;;  %7353 = vmatprep.subr.bf16.mxu0 %v19868_v32  ;;  %v5532_v25 = vpop.f32.mrb[187].mxu0  ;;  %v5636_v23 = vmax.f32 %v5621_v49, 0.0  ;;  %v19933_v26 = vld [vmem:[#allocation43_spill] sm:$0xff]  ;;  %v17272_v49 = vld [vmem:[#allocation2 + $0x198] sm:$0xff] }
 0x675   :  { %v6116_v42 = vrot.slane %v17195_v46, 4  ;;  %v6058_v35 = vmax.f32 %v19924_v12, %v6043_v54  ;;  %v6044_v39 = vmax.f32 %v17073_v15, %v5981_v19  ;;  %v5983_v30 = vpop.f32.mrb[187].mxu1  ;;  %8087 = vmatprep.subr.bf16.mxu1 %v19868_v32  ;;  %v19928_v43 = vmax.f32 %v16759_v18, %v16930_v6  ;;  %v19934_v19 = vld [vmem:[#allocation27_spill] sm:$0xff] }
 0x676   :  { %v5622_v53 = vadd.f32 %v5607_v63, %v13528_v0  ;;  %v5608_v11 = vmax.f32 %v19925_v28, %v5593_v33  ;;  %7197 = vmatmul.mubr.bf16.gmra.mrb[212].mxu0 %v11842_v16  ;;  %v19930_v46 = vmax.f32 %v16764_v27, %v16937_v34  ;;  %v17279_v12 = vld [vmem:[#allocation2 + $0x128] sm:$0xff]  ;;  %v19935_v30 = vld [vmem:[#allocation54_spill] sm:$0xff] }
 0x677   :  { %6139 = vst.msk [vmem:[#allocation2 + $0x290] sm:$0xf0] %vm1473_vm3, %v6116_v42  ;;  %v6073_v55 = vadd.f32 %v6058_v35, %v13528_v0  ;;  %v6059_v15 = vmax.f32 %v19926_v10, %v6044_v39  ;;  %7354 = vmatpush1.bf16.msra.mxu0 %v16814_v61  ;;  %7931 = vmatmul.mubr.bf16.gmra.mrb[212].mxu1 %v11842_v16  ;;  %v11848_v35 = vld [vmem:[%s18896_s3 + $0x98] ss:$24 sps:$4 sm:$0xff]   ;;  %v17288_v28 = vld [vmem:[#allocation2 + $0x1a0] sm:$0xff] }
 0x678   :  { %v5637_v9 = vmax.f32 %v5622_v53, 0.0  ;;  %8088 = vmatpush1.bf16.msra.mxu1 %v17229_v5  ;;  %7355 = vmatprep.subr.bf16.mxu0 %v19868_v32 }
 0x679   :  { %v6088_v50 = vmax.f32 %v6073_v55, 0.0  ;;  %v5535_v57 = vpop.f32.mrb[188].mxu0  ;;  %8089 = vmatprep.subr.bf16.mxu1 %v19868_v32  ;;  %7204 = vmatprep.mubr.bf16.mxu0 %v11847_v4  ;;  %v6074_v36 = vadd.f32 %v6059_v15, %v13556_v29  ;;  %v19936_v55 = vld [vmem:[#allocation15_spill] sm:$0xff]  ;;  %v19937_v15 = vld [vmem:[#allocation13_spill] sm:$0xff] }
 0x67a   :  { %v5650_v0 = vpack.c.bf16 %v5637_v9, %v5636_v23  ;;  %v5594_v51 = vmax.f32 %v17081_v38, %v5535_v57  ;;  %v5986_v8 = vpop.f32.mrb[188].mxu1  ;;  %v5537_v61 = vpop.f32.mrb[189].mxu0  ;;  %7938 = vmatprep.mubr.bf16.mxu1 %v11847_v4  ;;  %v5623_v38 = vadd.f32 %v5608_v11, %v13556_v29  ;;  %v19938_v23 = vld [vmem:[#allocation20_spill] sm:$0xff] }
 0x67b   :  { %v17238_v13 = vpack.c.bf16 %v6088_v50, %v6087_v17  ;;  %v6045_v60 = vmax.f32 %v17083_v62, %v5986_v8  ;;  %v5988_v59 = vpop.f32.mrb[189].mxu1  ;;  %7356 = vmatpush1.bf16.msra.mxu0 %v16826_v56  ;;  %v5538_v58 = vpop.f32.mrb[190].mxu0  ;;  %v6089_v34 = vmax.f32 %v6074_v36, 0.0  ;;  %v19939_v9 = vmax.f32 %v19937_v15, %v19938_v23  ;;  %v19940_v50 = vld [vmem:[#allocation51_spill] sm:$0xff]  ;;  %v19947_v36 = vld [vmem:[#allocation14_spill] sm:$0xff]  ;;  %v19958_v15 = vld [vmem:[#allocation17_spill] sm:$0xff] }
 0x67c   :  { %5658 = vst.msk [vmem:[#allocation2 + $0x260] sm:$0xff] %vm988_vm2, %v5650_v0  ;;  %v5609_v3 = vmax.f32 %v19927_v20, %v5594_v51  ;;  %8090 = vmatpush1.bf16.msra.mxu1 %v17242_v48  ;;  %v5595_v37 = vmax.f32 %v17085_v41, %v5538_v58  ;;  %v5989_v31 = vpop.f32.mrb[190].mxu1  ;;  %7357 = vmatprep.subr.bf16.mxu0 %v19868_v32  ;;  %v5540_v62 = vpop.f32.mrb[191].mxu0  ;;  %v19929_v41 = vld [vmem:[#allocation9_spill] sm:$0xff]  ;;  %v5638_v44 = vmax.f32 %v5623_v38, 0.0  ;;  %v19944_v58 = vld [vmem:[#allocation4_spill] sm:$0xff] }
 0x67d   :  { %v6117_v56 = vrot.slane %v17238_v13, 4  ;;  %v6060_v22 = vmax.f32 %v19928_v43, %v6045_v60  ;;  %v6046_v45 = vmax.f32 %v17087_v24, %v5989_v31  ;;  %v5991_v1 = vpop.f32.mrb[191].mxu1  ;;  %8091 = vmatprep.subr.bf16.mxu1 %v19868_v32  ;;  %v19931_v24 = vld [vmem:[#allocation42_spill] sm:$0xff]  ;;  %v19946_v62 = vld [vmem:[#allocation57_spill] sm:$0xff] }
 0x67e   :  { %v5624_v16 = vadd.f32 %v5609_v3, %v19929_v41  ;;  %v5610_v54 = vmax.f32 %v19930_v46, %v5595_v37  ;;  %7205 = vmatmul.mubr.bf16.gmra.mrb[216].mxu0 %v11845_v40  ;;  %v19932_v6 = vmax.f32 %v16766_v2, %v19931_v24  ;;  %v19942_v13 = vld [vmem:[#allocation6_spill] sm:$0xff]  ;;  %v19945_v37 = vld [vmem:[#allocation29_spill] sm:$0xff]  ;;  %v19948_v43 = vmax.f32 %v19946_v62, %v19947_v36 }
 0x67f   :  { %v6118_v29 = vsel %vm553_vm1, %v6116_v42, %v6117_v56  ;;  %v6075_v18 = vadd.f32 %v6060_v22, %v19929_v41  ;;  %7358 = vmatpush1.bf16.msra.mxu0 %v19933_v26  ;;  %7939 = vmatmul.mubr.bf16.gmra.mrb[216].mxu1 %v11845_v40  ;;  %v19941_v40 = vld [vmem:[#allocation53_spill] sm:$0xff]  ;;  %v11853_v3 = vld [vmem:[%s18896_s3 + $0xcc] ss:$24 sps:$4 sm:$0xff]   ;;  %v19949_v41 = vld [vmem:[#allocation24_spill] sm:$0xff] }
 0x680   :  { %v6061_v21 = vmax.f32 %v19932_v6, %v6046_v45  ;;  %6140 = vst.msk [vmem:[#allocation2 + $0x298] sm:$0xff] %vm988_vm2, %v6118_v29  ;;  %v5639_v63 = vmax.f32 %v5624_v16, 0.0  ;;  %8092 = vmatpush1.bf16.msra.mxu1 %v17272_v49  ;;  %7359 = vmatprep.subr.bf16.mxu0 %v19868_v32  ;;  %v5625_v10 = vadd.f32 %v5610_v54, %v19936_v55  ;;  %v17312_v45 = vld [vmem:[#allocation2 + $0x130] sm:$0xff]  ;;  %v19950_v16 = vld [vmem:[#allocation55_spill] sm:$0xff]  ;;  %v17360_v36 = vld [vmem:[#allocation2 + $0x140] sm:$0xff] }
 0x681   :  { %v6090_v27 = vmax.f32 %v6075_v18, 0.0  ;;  %v5543_v33 = vpop.f32.mrb[192].mxu0  ;;  %8093 = vmatprep.subr.bf16.mxu1 %v19868_v32  ;;  %7212 = vmatprep.mubr.bf16.mxu0 %v11850_v47  ;;  %v19943_v60 = vmax.f32 %v19941_v40, %v19942_v13  ;;  %v19951_v46 = vmax.f32 %v19949_v41, %v19950_v16  ;;  %v17320_v29 = vld [vmem:[#allocation2 + $0x1a8] sm:$0xff]  ;;  %v19962_v13 = vld [vmem:[#allocation56_spill] sm:$0xff] }
 0x682   :  { %v5651_v2 = vpack.c.bf16 %v5639_v63, %v5638_v44  ;;  %v5596_v25 = vmax.f32 %v19934_v19, %v5543_v33  ;;  %v5994_v42 = vpop.f32.mrb[192].mxu1  ;;  %v5545_v52 = vpop.f32.mrb[193].mxu0  ;;  %7946 = vmatprep.mubr.bf16.mxu1 %v11850_v47  ;;  %v6076_v61 = vadd.f32 %v6061_v21, %v19936_v55  ;;  %v5640_v18 = vmax.f32 %v5625_v10, 0.0  ;;  %v19952_v44 = vld [vmem:[#allocation22_spill] sm:$0xff]  ;;  %v17327_v33 = vld [vmem:[#allocation2 + $0x138] sm:$0xff] }
 0x683   :  { %v17284_v39 = vpack.c.bf16 %v6090_v27, %v6089_v34  ;;  %v6047_v4 = vmax.f32 %v19935_v30, %v5994_v42  ;;  %v5996_v53 = vpop.f32.mrb[193].mxu1  ;;  %7360 = vmatpush1.bf16.msra.mxu0 %v17279_v12  ;;  %v5546_v11 = vpop.f32.mrb[194].mxu0  ;;  %v19954_v30 = vld [vmem:[#allocation10_spill] sm:$0xff] }
 0x684   :  { %5659 = vst.msk [vmem:[#allocation2 + $0x268] sm:$0xff] %vm988_vm2, %v5651_v2  ;;  %v5611_v17 = vmax.f32 %v19939_v9, %v5596_v25  ;;  %8094 = vmatpush1.bf16.msra.mxu1 %v17288_v28  ;;  %v5597_v57 = vmax.f32 %v19940_v50, %v5546_v11  ;;  %v5997_v0 = vpop.f32.mrb[194].mxu1  ;;  %7361 = vmatprep.subr.bf16.mxu0 %v19868_v32  ;;  %v5548_v51 = vpop.f32.mrb[195].mxu0  ;;  %v11851_v2 = vld [vmem:[%s18896_s3 + $0xc8] ss:$24 sps:$4 sm:$0xff]   ;;  %v19953_v25 = vld [vmem:[#allocation37_spill] sm:$0xff] }
 0x685   :  { %v6119_v8 = vrot.slane %v17284_v39, 4  ;;  %v6062_v59 = vmax.f32 %v19943_v60, %v6047_v4  ;;  %v6048_v38 = vmax.f32 %v19944_v58, %v5997_v0  ;;  %v5999_v20 = vpop.f32.mrb[195].mxu1  ;;  %8095 = vmatprep.subr.bf16.mxu1 %v19868_v32  ;;  %v19955_v53 = vld [vmem:[#allocation49_spill] sm:$0xff]  ;;  %v19956_v11 = vld [vmem:[#allocation36_spill] sm:$0xff]  ;;  %v19960_v51 = vld [vmem:[#allocation26_spill] sm:$0xff] }
 0x686   :  { %v5626_v31 = vadd.f32 %v5611_v17, %v19945_v37  ;;  %v5612_v22 = vmax.f32 %v19948_v43, %v5597_v57  ;;  %7213 = vmatmul.mubr.bf16.gmra.mrb[220].mxu0 %v11848_v35  ;;  %v19957_v55 = vmax.f32 %v19955_v53, %v19956_v11  ;;  %v19959_v0 = vld [vmem:[#allocation40_spill] sm:$0xff]  ;;  %v19973_v53 = vld [vmem:[#allocation23_spill] sm:$0xff]  ;;  %v19974_v11 = vld [vmem:[#allocation38_spill] sm:$0xff] }
 0x687   :  { %v6120_v1 = vsel %vm553_vm1, %v6117_v56, %v6119_v8  ;;  %v6077_v47 = vadd.f32 %v6062_v59, %v19945_v37  ;;  %v6063_v54 = vmax.f32 %v19951_v46, %v6048_v38  ;;  %7362 = vmatpush1.bf16.msra.mxu0 %v17312_v45  ;;  %7947 = vmatmul.mubr.bf16.gmra.mrb[220].mxu1 %v11848_v35  ;;  %v6091_v56 = vmax.f32 %v6076_v61, 0.0  ;;  %v17336_v35 = vld [vmem:[#allocation2 + $0x1b0] sm:$0xff]  ;;  %v19963_v38 = vld [vmem:[#allocation30_spill] sm:$0xff]  ;;  %v19965_v37 = vld [vmem:[#allocation39_spill] sm:$0xff] }
 0x688   :  { %6141 = vst.msk [vmem:[#allocation2 + $0x2a0] sm:$0xff] %vm988_vm2, %v6120_v1  ;;  %v5641_v24 = vmax.f32 %v5626_v31, 0.0  ;;  %8096 = vmatpush1.bf16.msra.mxu1 %v17320_v29  ;;  %7363 = vmatprep.subr.bf16.mxu0 %v19868_v32  ;;  %v5627_v4 = vadd.f32 %v5612_v22, %v19954_v30  ;;  %v19961_v61 = vmax.f32 %v19959_v0, %v19960_v51  ;;  %v11856_v58 = vld [vmem:[%s18896_s3 + $0xfc] ss:$24 sps:$4 sm:$0xff]   ;;  %v19977_v51 = vld [vmem:[#allocation47_spill] sm:$0xff] }
 0x689   :  { %v6092_v6 = vmax.f32 %v6077_v47, 0.0  ;;  %v5551_v21 = vpop.f32.mrb[196].mxu0  ;;  %8097 = vmatprep.subr.bf16.mxu1 %v19868_v32  ;;  %7220 = vmatprep.mubr.bf16.mxu0 %v11853_v3  ;;  %v6078_v57 = vadd.f32 %v6063_v54, %v19954_v30  ;;  %v19967_v1 = vld [vmem:[#allocation8_spill] sm:$0xff]  ;;  %v19968_v47 = vld [vmem:[#allocation33_spill] sm:$0xff]  ;;  %v19972_v30 = vld [vmem:[#allocation31_spill] sm:$0xff] }
 0x68a   :  { %v5652_v26 = vpack.c.bf16 %v5641_v24, %v5640_v18  ;;  %v5598_v63 = vmax.f32 %v19952_v44, %v5551_v21  ;;  %v6002_v34 = vpop.f32.mrb[196].mxu1  ;;  %v5553_v27 = vpop.f32.mrb[197].mxu0  ;;  %7954 = vmatprep.mubr.bf16.mxu1 %v11853_v3  ;;  %v19964_v3 = vld [vmem:[#allocation28_spill] sm:$0xff]  ;;  %v19969_v41 = vmax.f32 %v19967_v1, %v19968_v47  ;;  %v17368_v46 = vld [vmem:[#allocation2 + $0x1b8] sm:$0xff]  ;;  %v5642_v54 = vmax.f32 %v5627_v4, 0.0 }
 0x68b   :  { %v17332_v19 = vpack.c.bf16 %v6092_v6, %v6091_v56  ;;  %v6049_v42 = vmax.f32 %v19953_v25, %v6002_v34  ;;  %v6004_v52 = vpop.f32.mrb[197].mxu1  ;;  %7364 = vmatpush1.bf16.msra.mxu0 %v17327_v33  ;;  %v5554_v39 = vpop.f32.mrb[198].mxu0  ;;  %v19966_v31 = vmax.f32 %v19964_v3, %v19965_v37  ;;  %v19970_v21 = vld [vmem:[#allocation25_spill] sm:$0xff]  ;;  %v17375_v34 = vld [vmem:[#allocation2 + $0x148] sm:$0xff] }
 0x68c   :  { %5660 = vst.msk [vmem:[#allocation2 + $0x270] sm:$0xff] %vm988_vm2, %v5652_v26  ;;  %v5613_v10 = vmax.f32 %v19957_v55, %v5598_v63  ;;  %8098 = vmatpush1.bf16.msra.mxu1 %v17336_v35  ;;  %v5599_v23 = vmax.f32 %v19958_v15, %v5554_v39  ;;  %v6005_v9 = vpop.f32.mrb[198].mxu1  ;;  %7365 = vmatprep.subr.bf16.mxu0 %v19868_v32  ;;  %v5556_v17 = vpop.f32.mrb[199].mxu0  ;;  %v11854_v27 = vld [vmem:[%s18896_s3 + $0xf8] ss:$24 sps:$4 sm:$0xff]   ;;  %v17384_v52 = vld [vmem:[#allocation2 + $0x1c0] sm:$0xff] }
 0x68d   :  { %v6121_v50 = vrot.slane %v17332_v19, 4  ;;  %v6064_v40 = vmax.f32 %v19961_v61, %v6049_v42  ;;  %v6050_v60 = vmax.f32 %v19962_v13, %v6005_v9  ;;  %v6007_v59 = vpop.f32.mrb[199].mxu1  ;;  %8099 = vmatprep.subr.bf16.mxu1 %v19868_v32  ;;  %v19971_v19 = vld [vmem:[#allocation48_spill] sm:$0xff]  ;;  %v19975_v55 = vmax.f32 %v19973_v53, %v19974_v11  ;;  %v19976_v15 = vld [vmem:[#allocation58_spill] sm:$0xff]  ;;  %v19982_v37 = vld [vmem:[#allocation35_spill] sm:$0xff] }
 0x68e   :  { %v5628_v20 = vadd.f32 %v5613_v10, %v19963_v38  ;;  %v5614_v62 = vmax.f32 %v19966_v31, %v5599_v23  ;;  %7221 = vmatmul.mubr.bf16.gmra.mrb[224].mxu0 %v11851_v2  ;;  %v19978_v61 = vld [vmem:[#allocation52_spill] sm:$0xff]  ;;  %v19983_v31 = vld [vmem:[#allocation34_spill] sm:$0xff] }
 0x68f   :  { %v6122_v43 = vsel %vm553_vm1, %v6119_v8, %v6121_v50  ;;  %v6079_v22 = vadd.f32 %v6064_v40, %v19963_v38  ;;  %v6065_v16 = vmax.f32 %v19969_v41, %v6050_v60  ;;  %7366 = vmatpush1.bf16.msra.mxu0 %v17360_v36  ;;  %7955 = vmatmul.mubr.bf16.gmra.mrb[224].mxu1 %v11851_v2  ;;  %v6093_v8 = vmax.f32 %v6078_v57, 0.0  ;;  %v19980_v60 = vld [vmem:[#allocation59_spill] sm:$0xff]  ;;  %v19985_v41 = vld [vmem:[#allocation50_spill] sm:$0xff]  ;;  %v17430_v53 = vld [vmem:[#allocation2 + $0x1d0] sm:$0xff] }
 0x690   :  { %6142 = vst.msk [vmem:[#allocation2 + $0x2a8] sm:$0xff] %vm988_vm2, %v6122_v43  ;;  %v5643_v18 = vmax.f32 %v5628_v20, 0.0  ;;  %8100 = vmatpush1.bf16.msra.mxu1 %v17368_v46  ;;  %7367 = vmatprep.subr.bf16.mxu0 %v19868_v32  ;;  %v5629_v4 = vadd.f32 %v5614_v62, %v19972_v30  ;;  %v19979_v40 = vmax.f32 %v19977_v51, %v19978_v61  ;;  %v11859_v38 = vld [vmem:[%s18896_s3 + $0x12c] ss:$24 sps:$4 sm:$0xff]  }
 0x691   :  { %v6094_v24 = vmax.f32 %v6079_v22, 0.0  ;;  %v5559_v56 = vpop.f32.mrb[200].mxu0  ;;  %8101 = vmatprep.subr.bf16.mxu1 %v19868_v32  ;;  %7228 = vmatprep.mubr.bf16.mxu0 %v11856_v58  ;;  %v6080_v0 = vadd.f32 %v6065_v16, %v19972_v30  ;;  %v19981_v20 = vld [vmem:[#allocation11_spill] sm:$0xff]  ;;  %v19984_v62 = vmax.f32 %v19982_v37, %v19983_v31  ;;  %v17408_v22 = vld [vmem:[#allocation2 + $0x150] sm:$0xff]  ;;  %v19986_v16 = vld [vmem:[#allocation45_spill] sm:$0xff] }
 0x692   :  { %v5653_v6 = vpack.c.bf16 %v5643_v18, %v5642_v54  ;;  %v5600_v26 = vmax.f32 %v19970_v21, %v5559_v56  ;;  %v6010_v44 = vpop.f32.mrb[200].mxu1  ;;  %v5561_v63 = vpop.f32.mrb[201].mxu0  ;;  %7962 = vmatprep.mubr.bf16.mxu1 %v11856_v58  ;;  %v19987_v54 = vmax.f32 %v19985_v41, %v19986_v16  ;;  %v19998_v37 = vld [vmem:[#allocation63_spill] sm:$0xff]  ;;  %v20001_v41 = vld [vmem:[#allocation44_spill] sm:$0xff] }
 0x693   :  { %v17380_v2 = vpack.c.bf16 %v6094_v24, %v6093_v8  ;;  %v6051_v25 = vmax.f32 %v19971_v19, %v6010_v44  ;;  %v6012_v42 = vpop.f32.mrb[201].mxu1  ;;  %7368 = vmatpush1.bf16.msra.mxu0 %v17375_v34  ;;  %v5562_v39 = vpop.f32.mrb[202].mxu0  ;;  %v17416_v8 = vld [vmem:[#allocation2 + $0x1c8] sm:$0xff]  ;;  %v5644_v24 = vmax.f32 %v5629_v4, 0.0  ;;  %v19988_v44 = vld [vmem:[#allocation60_spill] sm:$0xff]  ;;  %v17423_v19 = vld [vmem:[#allocation2 + $0x158] sm:$0xff] }
 0x694   :  { %5661 = vst.msk [vmem:[#allocation2 + $0x278] sm:$0xff] %vm988_vm2, %v5653_v6  ;;  %v5615_v10 = vmax.f32 %v19975_v55, %v5600_v26  ;;  %8102 = vmatpush1.bf16.msra.mxu1 %v17384_v52  ;;  %v5601_v23 = vmax.f32 %v19976_v15, %v5562_v39  ;;  %v6013_v9 = vpop.f32.mrb[202].mxu1  ;;  %7369 = vmatprep.subr.bf16.mxu0 %v19868_v32  ;;  %v5564_v17 = vpop.f32.mrb[203].mxu0  ;;  %v19989_v39 = vld [vmem:[#allocation61_spill] sm:$0xff]  ;;  %v19990_v55 = vld [vmem:[#allocation16_spill] sm:$0xff]  ;;  %v19991_v15 = vld [vmem:[#allocation18_spill] sm:$0xff] }
 0x695   :  { %v6123_v57 = vrot.slane %v17380_v2, 4  ;;  %v6066_v13 = vmax.f32 %v19979_v40, %v6051_v25  ;;  %v6052_v59 = vmax.f32 %v19980_v60, %v6013_v9  ;;  %v6015_v58 = vpop.f32.mrb[203].mxu1  ;;  %8103 = vmatprep.subr.bf16.mxu1 %v19868_v32  ;;  %v11857_v25 = vld [vmem:[%s18896_s3 + $0x128] ss:$24 sps:$4 sm:$0xff]   ;;  %v11862_v40 = vld [vmem:[%s18896_s3 + $0x15c] ss:$24 sps:$4 sm:$0xff]  }
 0x696   :  { %v5630_v3 = vadd.f32 %v5615_v10, %v19981_v20  ;;  %v5616_v43 = vmax.f32 %v19984_v62, %v5601_v23  ;;  %7229 = vmatmul.mubr.bf16.gmra.mrb[228].mxu0 %v11854_v27  ;;  %v19992_v23 = vld [vmem:[#allocation21_spill] sm:$0xff] }
 0x697   :  { %v6124_v1 = vsel %vm553_vm1, %v6121_v50, %v6123_v57  ;;  %v6081_v47 = vadd.f32 %v6066_v13, %v19981_v20  ;;  %v6067_v18 = vmax.f32 %v19987_v54, %v6052_v59  ;;  %7370 = vmatpush1.bf16.msra.mxu0 %v17408_v22  ;;  %7963 = vmatmul.mubr.bf16.gmra.mrb[228].mxu1 %v11854_v27  ;;  %v6095_v50 = vmax.f32 %v6080_v0, 0.0  ;;  %v19994_v0 = vld [vmem:[#allocation62_spill] sm:$0xff]  ;;  %v19995_v58 = vld [vmem:[#allocation5_spill] sm:$0xff] }
 0x698   :  { %6143 = vst.msk [vmem:[#allocation2 + $0x2b0] sm:$0xff] %vm988_vm2, %v6124_v1  ;;  %v5645_v56 = vmax.f32 %v5630_v3, 0.0  ;;  %8104 = vmatpush1.bf16.msra.mxu1 %v17416_v8  ;;  %7371 = vmatprep.subr.bf16.mxu0 %v19868_v32  ;;  %v5631_v10 = vadd.f32 %v5616_v43, %v19990_v55  ;;  %v19993_v9 = vmax.f32 %v19991_v15, %v19992_v23  ;;  %v19999_v43 = vld [vmem:[#allocation32_spill] sm:$0xff]  ;;  %v11865_v15 = vld [vmem:[%s18896_s3 + $0x18c] ss:$24 sps:$4 sm:$0xff]  }
 0x699   :  { %v6096_v6 = vmax.f32 %v6081_v47, 0.0  ;;  %v5567_v21 = vpop.f32.mrb[204].mxu0  ;;  %8105 = vmatprep.subr.bf16.mxu1 %v19868_v32  ;;  %7236 = vmatprep.mubr.bf16.mxu0 %v11859_v38  ;;  %v6082_v59 = vadd.f32 %v6067_v18, %v19990_v55  ;;  %v20000_v47 = vld [vmem:[#allocation19_spill] sm:$0xff] }
 0x69a   :  { %v5654_v26 = vpack.c.bf16 %v5645_v56, %v5644_v24  ;;  %v5602_v63 = vmax.f32 %v19988_v44, %v5567_v21  ;;  %v6018_v27 = vpop.f32.mrb[204].mxu1  ;;  %v5569_v2 = vpop.f32.mrb[205].mxu0  ;;  %7970 = vmatprep.mubr.bf16.mxu1 %v11859_v38  ;;  %v19996_v38 = vld [vmem:[#allocation46_spill] sm:$0xff]  ;;  %v20002_v16 = vmax.f32 %v20000_v47, %v20001_v41  ;;  %v17461_v44 = vld [vmem:[#allocation2 + $0x1d8] sm:$0xff] }
 0x69b   :  { %v6105_v42 = vpack.c.bf16 %v6096_v6, %v6095_v50  ;;  %v6053_v30 = vmax.f32 %v19989_v39, %v6018_v27  ;;  %v6020_v4 = vpop.f32.mrb[205].mxu1  ;;  %7372 = vmatpush1.bf16.msra.mxu0 %v17423_v19  ;;  %v5570_v11 = vpop.f32.mrb[206].mxu0  ;;  %v19997_v20 = vmax.f32 %v19995_v58, %v19996_v38  ;;  %v17453_v24 = vld [vmem:[#allocation2 + $0x160] sm:$0xff]  ;;  %v20003_v50 = vld [vmem:[#allocation7_spill] sm:$0xff]  ;;  %v20004_v6 = vld [vmem:[#allocation41_spill] sm:$0xff] }
 0x69c   :  { %5662 = vst.msk [vmem:[#allocation2 + $0x280] sm:$0xff] %vm988_vm2, %v5654_v26  ;;  %v5617_v17 = vmax.f32 %v19993_v9, %v5602_v63  ;;  %8106 = vmatpush1.bf16.msra.mxu1 %v17430_v53  ;;  %v5603_v51 = vmax.f32 %v19994_v0, %v5570_v11  ;;  %v6021_v61 = vpop.f32.mrb[206].mxu1  ;;  %7373 = vmatprep.subr.bf16.mxu0 %v19868_v32  ;;  %v5572_v13 = vpop.f32.mrb[207].mxu0  ;;  %v5646_v63 = vmax.f32 %v5631_v10, 0.0  ;;  %v20006_v2 = vld [vmem:[#allocation12_spill] sm:$0xff] }
 0x69d   :  { %v6125_v60 = vrot.slane %v6105_v42, 4  ;;  %v6068_v3 = vmax.f32 %v19997_v20, %v6053_v30  ;;  %v6054_v31 = vmax.f32 %v19998_v37, %v6021_v61  ;;  %v6023_v62 = vpop.f32.mrb[207].mxu1  ;;  %8107 = vmatprep.subr.bf16.mxu1 %v19868_v32  ;;  %v20005_v21 = vmax.f32 %v20003_v50, %v20004_v6  ;;  %v11860_v11 = vld [vmem:[%s18896_s3 + $0x158] ss:$24 sps:$4 sm:$0xff]   ;;  %v11868_v13 = vld [vmem:[%s18896_s3 + $0x1bc] ss:$24 sps:$4 sm:$0xff]  }
 0x69e   :  { %v5632_v1 = vadd.f32 %v5617_v17, %v19999_v43  ;;  %v5618_v54 = vmax.f32 %v20002_v16, %v5603_v51  ;;  %7237 = vmatmul.mubr.bf16.gmra.mrb[232].mxu0 %v11857_v25  ;;  %v11869_v58 = vld [vmem:[%s18896_s3 + $0x1e8] ss:$24 sps:$4 sm:$0xff]   ;;  %v11874_v38 = vld [vmem:[%s18896_s3 + $0x21c] ss:$24 sps:$4 sm:$0xff]   ;;  %v11872_v20 = vld [vmem:[%s18896_s3 + $0x218] ss:$24 sps:$4 sm:$0xff]  }
 0x69f   :  { %v6126_v18 = vsel %vm553_vm1, %v6123_v57, %v6125_v60  ;;  %v6083_v56 = vadd.f32 %v6068_v3, %v19999_v43  ;;  %v6069_v26 = vmax.f32 %v20005_v21, %v6054_v31  ;;  %7374 = vmatpush1.bf16.msra.mxu0 %v17453_v24  ;;  %7971 = vmatmul.mubr.bf16.gmra.mrb[232].mxu1 %v11857_v25  ;;  %v6097_v57 = vmax.f32 %v6082_v59, 0.0  ;;  %v11871_v59 = vld [vmem:[%s18896_s3 + $0x1ec] ss:$24 sps:$4 sm:$0xff]   ;;  %v11875_v37 = vld [vmem:[%s18896_s3 + $0x248] ss:$24 sps:$4 sm:$0xff]  }
 0x6a0   :  { %6144 = vst.msk [vmem:[#allocation2 + $0x2b8] sm:$0xff] %vm988_vm2, %v6126_v18  ;;  %v5647_v27 = vmax.f32 %v5632_v1, 0.0  ;;  %v5633_v42 = vadd.f32 %v5618_v54, %v20006_v2  ;;  %8108 = vmatpush1.bf16.msra.mxu1 %v17461_v44  ;;  %7244 = vmatprep.mubr.bf16.mxu0 %v11862_v40  ;;  %v11877_v3 = vld [vmem:[%s18896_s3 + $0x24c] ss:$24 sps:$4 sm:$0xff]   ;;  %v11880_v31 = vld [vmem:[%s18896_s3 + $0x27c] ss:$24 sps:$4 sm:$0xff]  }
 0x6a1   :  { %v6098_v39 = vmax.f32 %v6083_v56, 0.0  ;;  %v6084_v30 = vadd.f32 %v6069_v26, %v20006_v2  ;;  %7978 = vmatprep.mubr.bf16.mxu1 %v11862_v40  ;;  %8381 = vmatprep.subr.bf16.mxu0 %v19868_v32  ;;  %v11863_v40 = vld [vmem:[%s18896_s3 + $0x188] ss:$24 sps:$4 sm:$0xff]   ;;  %v11878_v62 = vld [vmem:[%s18896_s3 + $0x278] ss:$24 sps:$4 sm:$0xff]  }
 0x6a2   :  { %v5655_v4 = vpack.c.bf16 %v5647_v27, %v5646_v63  ;;  %v5648_v25 = vmax.f32 %v5633_v42, 0.0  ;;  %9065 = vmatprep.subr.bf16.mxu1 %v19868_v32  ;;  %v11883_v43 = vld [vmem:[%s18896_s3 + $0x2ac] ss:$24 sps:$4 sm:$0xff]   ;;  %v11881_v1 = vld [vmem:[%s18896_s3 + $0x2a8] ss:$24 sps:$4 sm:$0xff]   ;;  %v8336_v42 = vld [vmem:[#allocation2 + $0xf0] sm:$0xff] }
 0x6a3   :  { %v6106_v55 = vpack.c.bf16 %v6098_v39, %v6097_v57  ;;  %v6099_v10 = vmax.f32 %v6084_v30, 0.0  ;;  %v11886_v47 = vld [vmem:[%s18896_s3 + $0x2dc] ss:$24 sps:$4 sm:$0xff]   ;;  %v11884_v41 = vld [vmem:[%s18896_s3 + $0x2d8] ss:$24 sps:$4 sm:$0xff]   ;;  %v17561_v57 = vld [vmem:[#allocation2 + $0x168] sm:$0xff] }
 0x6a4   :  { %5663 = vst.msk [vmem:[#allocation2 + $0x288] sm:$0xff] %vm988_vm2, %v5655_v4  ;;  %v5656_v23 = vpack.c.bf16 %v5648_v25, %v5648_v25  ;;  %v11889_v16 = vld [vmem:[%s18896_s3 + $0x30c] ss:$24 sps:$4 sm:$0xff]   ;;  %v11887_v54 = vld [vmem:[%s18896_s3 + $0x308] ss:$24 sps:$4 sm:$0xff]   ;;  %v8337_v39 = vld [vmem:[#allocation2 + $0xf8] sm:$0xff] }
 0x6a5   :  { %v6127_v9 = vrot.slane %v6106_v55, 4  ;;  %v6107_v17 = vpack.c.bf16 %v6099_v10, %v6099_v10  ;;  %v11892_v18 = vld [vmem:[%s18896_s3 + $0x33c] ss:$24 sps:$4 sm:$0xff]   ;;  %v11890_v56 = vld [vmem:[%s18896_s3 + $0x338] ss:$24 sps:$4 sm:$0xff]   ;;  %v8339_v55 = vld [vmem:[#allocation2 + $0x108] sm:$0xff] }
 0x6a6   :  { %5664 = vst.msk [vmem:[#allocation2 + $0x290] sm:$0xf] %vm996_vm4, %v5656_v23  ;;  %7245 = vmatmul.mubr.bf16.gmra.mrb[236].mxu0 %v11860_v11  ;;  %v11895_v50 = vld [vmem:[%s18896_s3 + $0x36c] ss:$24 sps:$4 sm:$0xff]   ;;  %v11893_v6 = vld [vmem:[%s18896_s3 + $0x368] ss:$24 sps:$4 sm:$0xff]  }
 0x6a7   :  { %v6128_v0 = vsel %vm553_vm1, %v6125_v60, %v6127_v9  ;;  %v6129_v51 = vrot.slane %v6107_v17, 4  ;;  %7979 = vmatmul.mubr.bf16.gmra.mrb[236].mxu1 %v11860_v11  ;;  %7252 = vmatprep.mubr.bf16.mxu0 %v11865_v15  ;;  %v11866_v60 = vld [vmem:[%s18896_s3 + $0x1b8] ss:$24 sps:$4 sm:$0xff]   ;;  %v11898_v21 = vld [vmem:[%s18896_s3 + $0x39c] ss:$24 sps:$4 sm:$0xff]   ;;  %v8338_v11 = vld [vmem:[#allocation2 + $0x100] sm:$0xff] }
 0x6a8   :  { %6145 = vst.msk [vmem:[#allocation2 + $0x2c0] sm:$0xff] %vm988_vm2, %v6128_v0  ;;  %7986 = vmatprep.mubr.bf16.mxu1 %v11865_v15  ;;  %v11896_v26 = vld [vmem:[%s18896_s3 + $0x398] ss:$24 sps:$4 sm:$0xff]   ;;  %v11901_v63 = vld [vmem:[%s18896_s3 + $0x14] ss:$24 sps:$4 sm:$0xff]  }
 0x6a9   :  { %v6130_v61 = vsel %vm553_vm1, %v6127_v9, %v6129_v51  ;;  %v11899_v27 = vld [vmem:[%s18896_s3 + $0x10] ss:$24 sps:$4 sm:$0xff]   ;;  %v11904_v2 = vld [vmem:[%s18896_s3 + $0x44] ss:$24 sps:$4 sm:$0xff]   ;;  %v11902_v30 = vld [vmem:[%s18896_s3 + $0x40] ss:$24 sps:$4 sm:$0xff]  }
 0x6aa   :  { %6146 = vst.msk [vmem:[#allocation2 + $0x2c8] sm:$0xff] %vm988_vm2, %v6130_v61  ;;  %v17571_v4 = vld [vmem:[#allocation2 + $0x170] sm:$0xff]  ;;  %v11908_v23 = vld [vmem:[%s18896_s3 + $0xa0] ss:$24 sps:$4 sm:$0xff]   ;;  %v11940_v61 = vld [vmem:[%s18896_s3 + $0x284] ss:$24 sps:$4 sm:$0xff]  }
 0x6ab   :  { %v11907_v25 = vld [vmem:[%s18896_s3 + $0x74] ss:$24 sps:$4 sm:$0xff]   ;;  %v11905_v10 = vld [vmem:[%s18896_s3 + $0x70] ss:$24 sps:$4 sm:$0xff]   ;;  %v8342_v9 = vld [vmem:[#allocation2 + $0x120] sm:$0xff] }
 0x6ac   :  { %v8340_v15 = vld [vmem:[#allocation2 + $0x110] sm:$0xff]  ;;  %v11932_v17 = vld [vmem:[%s18896_s3 + $0x220] ss:$24 sps:$4 sm:$0xff]  }
 0x6ad   :  { %v11937_v0 = vld [vmem:[%s18896_s3 + $0x254] ss:$24 sps:$4 sm:$0xff]   ;;  %v11935_v51 = vld [vmem:[%s18896_s3 + $0x250] ss:$24 sps:$4 sm:$0xff]  }
 0x6ae   :  { %7253 = vmatmul.mubr.bf16.gmra.mrb[240].mxu0 %v11863_v40 }
 0x6af   :  { %7987 = vmatmul.mubr.bf16.gmra.mrb[240].mxu1 %v11863_v40  ;;  %7260 = vmatprep.mubr.bf16.mxu0 %v11868_v13  ;;  %v11938_v40 = vld [vmem:[%s18896_s3 + $0x280] ss:$24 sps:$4 sm:$0xff]  }
 0x6b0   :  { %7994 = vmatprep.mubr.bf16.mxu1 %v11868_v13  ;;  %v11943_v13 = vld [vmem:[%s18896_s3 + $0x2b4] ss:$24 sps:$4 sm:$0xff]  }
 0x6b6   :  { %7261 = vmatmul.mubr.bf16.gmra.mrb[244].mxu0 %v11866_v60 }
 0x6b7   :  { %7995 = vmatmul.mubr.bf16.gmra.mrb[244].mxu1 %v11866_v60  ;;  %7268 = vmatprep.mubr.bf16.mxu0 %v11871_v59  ;;  %v11941_v60 = vld [vmem:[%s18896_s3 + $0x2b0] ss:$24 sps:$4 sm:$0xff]  }
 0x6b8   :  { %8002 = vmatprep.mubr.bf16.mxu1 %v11871_v59  ;;  %v11946_v59 = vld [vmem:[%s18896_s3 + $0x2e4] ss:$24 sps:$4 sm:$0xff]  }
 0x6be   :  { %7269 = vmatmul.mubr.bf16.gmra.mrb[248].mxu0 %v11869_v58 }
 0x6bf   :  { %8003 = vmatmul.mubr.bf16.gmra.mrb[248].mxu1 %v11869_v58  ;;  %7276 = vmatprep.mubr.bf16.mxu0 %v11874_v38  ;;  %v11944_v58 = vld [vmem:[%s18896_s3 + $0x2e0] ss:$24 sps:$4 sm:$0xff]  }
 0x6c0   :  { %8010 = vmatprep.mubr.bf16.mxu1 %v11874_v38  ;;  %v11949_v38 = vld [vmem:[%s18896_s3 + $0x314] ss:$24 sps:$4 sm:$0xff]  }
 0x6c6   :  { %7277 = vmatmul.mubr.bf16.gmra.mrb[252].mxu0 %v11872_v20 }
 0x6c7   :  { %8011 = vmatmul.mubr.bf16.gmra.mrb[252].mxu1 %v11872_v20  ;;  %7284 = vmatprep.mubr.bf16.mxu0 %v11877_v3  ;;  %v11947_v20 = vld [vmem:[%s18896_s3 + $0x310] ss:$24 sps:$4 sm:$0xff]  }
 0x6c8   :  { %8018 = vmatprep.mubr.bf16.mxu1 %v11877_v3  ;;  %v11952_v3 = vld [vmem:[%s18896_s3 + $0x344] ss:$24 sps:$4 sm:$0xff]  }
 0x6ce   :  { %7285 = vmatmul.mubr.bf16.gmra.mrb[0].mxu0 %v11875_v37 }
 0x6cf   :  { %8019 = vmatmul.mubr.bf16.gmra.mrb[0].mxu1 %v11875_v37  ;;  %7292 = vmatprep.mubr.bf16.mxu0 %v11880_v31  ;;  %v11950_v37 = vld [vmem:[%s18896_s3 + $0x340] ss:$24 sps:$4 sm:$0xff]  }
 0x6d0   :  { %8026 = vmatprep.mubr.bf16.mxu1 %v11880_v31  ;;  %v11955_v31 = vld [vmem:[%s18896_s3 + $0x374] ss:$24 sps:$4 sm:$0xff]  }
 0x6d6   :  { %7293 = vmatmul.mubr.bf16.gmra.mrb[4].mxu0 %v11878_v62 }
 0x6d7   :  { %8027 = vmatmul.mubr.bf16.gmra.mrb[4].mxu1 %v11878_v62  ;;  %7300 = vmatprep.mubr.bf16.mxu0 %v11883_v43  ;;  %v11953_v62 = vld [vmem:[%s18896_s3 + $0x370] ss:$24 sps:$4 sm:$0xff]  }
 0x6d8   :  { %8034 = vmatprep.mubr.bf16.mxu1 %v11883_v43  ;;  %v11958_v43 = vld [vmem:[%s18896_s3 + $0x3a4] ss:$24 sps:$4 sm:$0xff]  }
 0x6de   :  { %7301 = vmatmul.mubr.bf16.gmra.mrb[8].mxu0 %v11881_v1 }
 0x6df   :  { %8035 = vmatmul.mubr.bf16.gmra.mrb[8].mxu1 %v11881_v1  ;;  %7308 = vmatprep.mubr.bf16.mxu0 %v11886_v47  ;;  %v11956_v1 = vld [vmem:[%s18896_s3 + $0x3a0] ss:$24 sps:$4 sm:$0xff]  }
 0x6e0   :  { %8042 = vmatprep.mubr.bf16.mxu1 %v11886_v47  ;;  %v12239_v47 = vld [vmem:[%s18896_s3 + $0x4] ss:$24 sps:$4 sm:$0xff]  }
 0x6e6   :  { %7309 = vmatmul.mubr.bf16.gmra.mrb[12].mxu0 %v11884_v41 }
 0x6e7   :  { %8043 = vmatmul.mubr.bf16.gmra.mrb[12].mxu1 %v11884_v41  ;;  %7316 = vmatprep.mubr.bf16.mxu0 %v11889_v16  ;;  %v12240_v41 = vld [vmem:[%s18896_s3] ss:$24 sps:$4 sm:$0xff]  }
 0x6e8   :  { %8050 = vmatprep.mubr.bf16.mxu1 %v11889_v16  ;;  %v17780_v16 = vld [vmem:[#allocation2 + $0x1e8] sm:$0xff] }
 0x6ee   :  { %7317 = vmatmul.mubr.bf16.gmra.mrb[16].mxu0 %v11887_v54 }
 0x6ef   :  { %8051 = vmatmul.mubr.bf16.gmra.mrb[16].mxu1 %v11887_v54  ;;  %7324 = vmatprep.mubr.bf16.mxu0 %v11892_v18  ;;  %v12241_v54 = vld [vmem:[%s18896_s3 + $0x34] ss:$24 sps:$4 sm:$0xff]  }
 0x6f0   :  { %8058 = vmatprep.mubr.bf16.mxu1 %v11892_v18  ;;  %v8353_v18 = vld [vmem:[#allocation2 + $0x178] sm:$0xff] }
 0x6f6   :  { %7325 = vmatmul.mubr.bf16.gmra.mrb[20].mxu0 %v11890_v56 }
 0x6f7   :  { %8059 = vmatmul.mubr.bf16.gmra.mrb[20].mxu1 %v11890_v56  ;;  %7332 = vmatprep.mubr.bf16.mxu0 %v11895_v50  ;;  %v17788_v56 = vld [vmem:[#allocation2 + $0x1f0] sm:$0xff] }
 0x6f8   :  { %8066 = vmatprep.mubr.bf16.mxu1 %v11895_v50  ;;  %v12242_v50 = vld [vmem:[%s18896_s3 + $0x30] ss:$24 sps:$4 sm:$0xff]  }
 0x6fe   :  { %7333 = vmatmul.mubr.bf16.gmra.mrb[24].mxu0 %v11893_v6 }
 0x6ff   :  { %8067 = vmatmul.mubr.bf16.gmra.mrb[24].mxu1 %v11893_v6  ;;  %7340 = vmatprep.mubr.bf16.mxu0 %v11898_v21  ;;  %v8354_v6 = vld [vmem:[#allocation2 + $0x180] sm:$0xff] }
 0x700   :  { %8074 = vmatprep.mubr.bf16.mxu1 %v11898_v21  ;;  %v17796_v21 = vld [vmem:[#allocation2 + $0x1f8] sm:$0xff] }
 0x706   :  { %7341 = vmatmul.mubr.bf16.gmra.mrb[28].mxu0 %v11896_v26 }
 0x707   :  { %8075 = vmatmul.mubr.bf16.gmra.mrb[28].mxu1 %v11896_v26  ;;  %10733 = vmatprep.mubr.msk.bf16.mxu0 %vm6902_vm5, %v11901_v63  ;;  %v12243_v26 = vld [vmem:[%s18896_s3 + $0x64] ss:$24 sps:$4 sm:$0xff]  }
 0x708   :  { %10753 = vmatprep.mubr.msk.bf16.mxu1 %vm6902_vm5, %v11901_v63  ;;  %v8355_v63 = vld [vmem:[#allocation2 + $0x188] sm:$0xff] }
 0x70e   :  { %7382 = vmatmul.mubr.bf16.vlgmr.msra.gmra.mrb[208].mxu0 %v11899_v27 }
 0x70f   :  { %8116 = vmatmul.mubr.bf16.vlgmr.msra.gmra.mrb[208].mxu1 %v11899_v27  ;;  %8382 = vmatpush1.bf16.msra.mxu0 %v8336_v42  ;;  %v17804_v27 = vld [vmem:[#allocation2 + $0x200] sm:$0xff]  ;;  %v8356_v42 = vld [vmem:[#allocation2 + $0x190] sm:$0xff] }
 0x710   :  { %9066 = vmatpush1.bf16.msra.mxu1 %v17561_v57  ;;  %8383 = vmatprep.subr.bf16.mxu0 %v19868_v32 }
 0x711   :  { %9067 = vmatprep.subr.bf16.mxu1 %v19868_v32  ;;  %10734 = vmatprep.mubr.msk.bf16.mxu0 %vm6902_vm5, %v11904_v2 }
 0x712   :  { %10754 = vmatprep.mubr.msk.bf16.mxu1 %vm6902_vm5, %v11904_v2  ;;  %v12244_v2 = vld [vmem:[%s18896_s3 + $0x60] ss:$24 sps:$4 sm:$0xff]  }
 0x713   :  { %8384 = vmatpush1.bf16.msra.mxu0 %v8337_v39  ;;  %v12245_v39 = vld [vmem:[%s18896_s3 + $0x94] ss:$24 sps:$4 sm:$0xff]  }
 0x714   :  { %9068 = vmatpush1.bf16.msra.mxu1 %v17571_v4  ;;  %8385 = vmatprep.subr.bf16.mxu0 %v19868_v32 }
 0x715   :  { %9069 = vmatprep.subr.bf16.mxu1 %v19868_v32 }
 0x716   :  { %7390 = vmatmul.mubr.bf16.gmra.mrb[212].mxu0 %v11902_v30 }
 0x717   :  { %8124 = vmatmul.mubr.bf16.gmra.mrb[212].mxu1 %v11902_v30  ;;  %8386 = vmatpush1.bf16.msra.mxu0 %v8338_v11  ;;  %v8357_v30 = vld [vmem:[#allocation2 + $0x198] sm:$0xff]  ;;  %v8358_v11 = vld [vmem:[#allocation2 + $0x1a0] sm:$0xff] }
 0x718   :  { %9070 = vmatpush1.bf16.msra.mxu1 %v17186_v7  ;;  %8387 = vmatprep.subr.bf16.mxu0 %v19868_v32  ;;  %v11910_v7 = vld [vmem:[%s18896_s3 + $0xa4] ss:$24 sps:$4 sm:$0xff]  }
 0x719   :  { %9071 = vmatprep.subr.bf16.mxu1 %v19868_v32  ;;  %10735 = vmatprep.mubr.msk.bf16.mxu0 %vm6902_vm5, %v11907_v25 }
 0x71a   :  { %10755 = vmatprep.mubr.msk.bf16.mxu1 %vm6902_vm5, %v11907_v25  ;;  %v12246_v25 = vld [vmem:[%s18896_s3 + $0x90] ss:$24 sps:$4 sm:$0xff]  }
 0x71b   :  { %8388 = vmatpush1.bf16.msra.mxu0 %v8339_v55  ;;  %v17828_v55 = vld [vmem:[#allocation2 + $0x218] sm:$0xff] }
 0x71c   :  { %9072 = vmatpush1.bf16.msra.mxu1 %v17199_v14  ;;  %8389 = vmatprep.subr.bf16.mxu0 %v19868_v32  ;;  %v8341_v14 = vld [vmem:[#allocation2 + $0x118] sm:$0xff] }
 0x71d   :  { %9073 = vmatprep.subr.bf16.mxu1 %v19868_v32 }
 0x71e   :  { %7398 = vmatmul.mubr.bf16.gmra.mrb[216].mxu0 %v11905_v10 }
 0x71f   :  { %8132 = vmatmul.mubr.bf16.gmra.mrb[216].mxu1 %v11905_v10  ;;  %8390 = vmatpush1.bf16.msra.mxu0 %v8340_v15  ;;  %v12247_v10 = vld [vmem:[%s18896_s3 + $0xc4] ss:$24 sps:$4 sm:$0xff]  }
 0x720   :  { %9074 = vmatpush1.bf16.msra.mxu1 %v17229_v5  ;;  %8391 = vmatprep.subr.bf16.mxu0 %v19868_v32  ;;  %v11913_v5 = vld [vmem:[%s18896_s3 + $0xd4] ss:$24 sps:$4 sm:$0xff]   ;;  %v17836_v15 = vld [vmem:[#allocation2 + $0x220] sm:$0xff] }
 0x721   :  { %9075 = vmatprep.subr.bf16.mxu1 %v19868_v32  ;;  %10736 = vmatprep.mubr.msk.bf16.mxu0 %vm6902_vm5, %v11910_v7 }
 0x722   :  { %10756 = vmatprep.mubr.msk.bf16.mxu1 %vm6902_vm5, %v11910_v7  ;;  %v8359_v7 = vld [vmem:[#allocation2 + $0x1a8] sm:$0xff] }
 0x723   :  { %8392 = vmatpush1.bf16.msra.mxu0 %v8341_v14  ;;  %v12248_v14 = vld [vmem:[%s18896_s3 + $0xc0] ss:$24 sps:$4 sm:$0xff]  }
 0x724   :  { %9076 = vmatpush1.bf16.msra.mxu1 %v17242_v48  ;;  %8393 = vmatprep.subr.bf16.mxu0 %v19868_v32  ;;  %v11911_v48 = vld [vmem:[%s18896_s3 + $0xd0] ss:$24 sps:$4 sm:$0xff]  }
 0x725   :  { %9077 = vmatprep.subr.bf16.mxu1 %v19868_v32 }
 0x726   :  { %7406 = vmatmul.mubr.bf16.gmra.mrb[220].mxu0 %v11908_v23 }
 0x727   :  { %8140 = vmatmul.mubr.bf16.gmra.mrb[220].mxu1 %v11908_v23  ;;  %8394 = vmatpush1.bf16.msra.mxu0 %v8342_v9  ;;  %v8360_v23 = vld [vmem:[#allocation2 + $0x1b0] sm:$0xff] }
 0x728   :  { %9078 = vmatpush1.bf16.msra.mxu1 %v17272_v49  ;;  %8395 = vmatprep.subr.bf16.mxu0 %v19868_v32  ;;  %v11916_v49 = vld [vmem:[%s18896_s3 + $0x104] ss:$24 sps:$4 sm:$0xff]   ;;  %v12249_v9 = vld [vmem:[%s18896_s3 + $0xf4] ss:$24 sps:$4 sm:$0xff]  }
 0x729   :  { %9079 = vmatprep.subr.bf16.mxu1 %v19868_v32  ;;  %10737 = vmatprep.mubr.msk.bf16.mxu0 %vm6902_vm5, %v11913_v5 }
 0x72a   :  { %10757 = vmatprep.mubr.msk.bf16.mxu1 %vm6902_vm5, %v11913_v5  ;;  %v17844_v5 = vld [vmem:[#allocation2 + $0x228] sm:$0xff] }
 0x72b   :  { %8396 = vmatpush1.bf16.msra.mxu0 %v17279_v12  ;;  %v11914_v12 = vld [vmem:[%s18896_s3 + $0x100] ss:$24 sps:$4 sm:$0xff]  }
 0x72c   :  { %9080 = vmatpush1.bf16.msra.mxu1 %v17288_v28  ;;  %8397 = vmatprep.subr.bf16.mxu0 %v19868_v32  ;;  %v11919_v28 = vld [vmem:[%s18896_s3 + $0x134] ss:$24 sps:$4 sm:$0xff]  }
 0x72d   :  { %9081 = vmatprep.subr.bf16.mxu1 %v19868_v32 }
 0x72e   :  { %7414 = vmatmul.mubr.bf16.gmra.mrb[224].mxu0 %v11911_v48 }
 0x72f   :  { %8148 = vmatmul.mubr.bf16.gmra.mrb[224].mxu1 %v11911_v48  ;;  %8398 = vmatpush1.bf16.msra.mxu0 %v17312_v45  ;;  %v11917_v45 = vld [vmem:[%s18896_s3 + $0x130] ss:$24 sps:$4 sm:$0xff]   ;;  %v8361_v48 = vld [vmem:[#allocation2 + $0x1b8] sm:$0xff] }
 0x730   :  { %9082 = vmatpush1.bf16.msra.mxu1 %v17320_v29  ;;  %8399 = vmatprep.subr.bf16.mxu0 %v19868_v32  ;;  %v11922_v29 = vld [vmem:[%s18896_s3 + $0x164] ss:$24 sps:$4 sm:$0xff]  }
 0x731   :  { %9083 = vmatprep.subr.bf16.mxu1 %v19868_v32  ;;  %10738 = vmatprep.mubr.msk.bf16.mxu0 %vm6902_vm5, %v11916_v49 }
 0x732   :  { %10758 = vmatprep.mubr.msk.bf16.mxu1 %vm6902_vm5, %v11916_v49  ;;  %v17852_v49 = vld [vmem:[#allocation2 + $0x230] sm:$0xff] }
 0x733   :  { %8400 = vmatpush1.bf16.msra.mxu0 %v17327_v33  ;;  %v11920_v33 = vld [vmem:[%s18896_s3 + $0x160] ss:$24 sps:$4 sm:$0xff]  }
 0x734   :  { %9084 = vmatpush1.bf16.msra.mxu1 %v17336_v35  ;;  %8401 = vmatprep.subr.bf16.mxu0 %v19868_v32  ;;  %v11925_v35 = vld [vmem:[%s18896_s3 + $0x194] ss:$24 sps:$4 sm:$0xff]  }
 0x735   :  { %9085 = vmatprep.subr.bf16.mxu1 %v19868_v32 }
 0x736   :  { %7422 = vmatmul.mubr.bf16.gmra.mrb[228].mxu0 %v11914_v12 }
 0x737   :  { %8156 = vmatmul.mubr.bf16.gmra.mrb[228].mxu1 %v11914_v12  ;;  %8402 = vmatpush1.bf16.msra.mxu0 %v17360_v36  ;;  %v11923_v36 = vld [vmem:[%s18896_s3 + $0x190] ss:$24 sps:$4 sm:$0xff]  }
 0x738   :  { %9086 = vmatpush1.bf16.msra.mxu1 %v17368_v46  ;;  %8403 = vmatprep.subr.bf16.mxu0 %v19868_v32  ;;  %v17680_v46 = vld [vmem:[#allocation2 + $0x1e0] sm:$0xff]  ;;  %v12250_v12 = vld [vmem:[%s18896_s3 + $0xf0] ss:$24 sps:$4 sm:$0xff]  }
 0x739   :  { %9087 = vmatprep.subr.bf16.mxu1 %v19868_v32  ;;  %10739 = vmatprep.mubr.msk.bf16.mxu0 %vm6902_vm5, %v11919_v28 }
 0x73a   :  { %10759 = vmatprep.mubr.msk.bf16.mxu1 %vm6902_vm5, %v11919_v28  ;;  %v8362_v28 = vld [vmem:[#allocation2 + $0x1c0] sm:$0xff] }
 0x73b   :  { %8404 = vmatpush1.bf16.msra.mxu0 %v17375_v34  ;;  %v11928_v34 = vld [vmem:[%s18896_s3 + $0x1c4] ss:$24 sps:$4 sm:$0xff]  }
 0x73c   :  { %9088 = vmatpush1.bf16.msra.mxu1 %v17384_v52  ;;  %8405 = vmatprep.subr.bf16.mxu0 %v19868_v32  ;;  %v11926_v52 = vld [vmem:[%s18896_s3 + $0x1c0] ss:$24 sps:$4 sm:$0xff]  }
 0x73d   :  { %9089 = vmatprep.subr.bf16.mxu1 %v19868_v32 }
 0x73e   :  { %7430 = vmatmul.mubr.bf16.gmra.mrb[232].mxu0 %v11917_v45 }
 0x73f   :  { %8164 = vmatmul.mubr.bf16.gmra.mrb[232].mxu1 %v11917_v45  ;;  %8406 = vmatpush1.bf16.msra.mxu0 %v17408_v22  ;;  %v11931_v22 = vld [vmem:[%s18896_s3 + $0x1f4] ss:$24 sps:$4 sm:$0xff]   ;;  %v17860_v45 = vld [vmem:[#allocation2 + $0x238] sm:$0xff] }
 0x740   :  { %9090 = vmatpush1.bf16.msra.mxu1 %v17416_v8  ;;  %8407 = vmatprep.subr.bf16.mxu0 %v19868_v32 }
 0x741   :  { %9091 = vmatprep.subr.bf16.mxu1 %v19868_v32  ;;  %10740 = vmatprep.mubr.msk.bf16.mxu0 %vm6902_vm5, %v11922_v29 }
 0x742   :  { %10760 = vmatprep.mubr.msk.bf16.mxu1 %vm6902_vm5, %v11922_v29  ;;  %v12251_v29 = vld [vmem:[%s18896_s3 + $0x124] ss:$24 sps:$4 sm:$0xff]  }
 0x743   :  { %8408 = vmatpush1.bf16.msra.mxu0 %v17423_v19  ;;  %v11929_v19 = vld [vmem:[%s18896_s3 + $0x1f0] ss:$24 sps:$4 sm:$0xff]  }
 0x744   :  { %9092 = vmatpush1.bf16.msra.mxu1 %v17430_v53  ;;  %8409 = vmatprep.subr.bf16.mxu0 %v19868_v32 }
 0x745   :  { %9093 = vmatprep.subr.bf16.mxu1 %v19868_v32 }
 0x746   :  { %7438 = vmatmul.mubr.bf16.gmra.mrb[236].mxu0 %v11920_v33 }
 0x747   :  { %8172 = vmatmul.mubr.bf16.gmra.mrb[236].mxu1 %v11920_v33  ;;  %8410 = vmatpush1.bf16.msra.mxu0 %v17453_v24  ;;  %v11934_v24 = vld [vmem:[%s18896_s3 + $0x224] ss:$24 sps:$4 sm:$0xff]  }
 0x748   :  { %9094 = vmatpush1.bf16.msra.mxu1 %v17461_v44  ;;  %8411 = vmatprep.subr.bf16.mxu0 %v19868_v32  ;;  %v17869_v33 = vld [vmem:[#allocation2 + $0x240] sm:$0xff] }
 0x749   :  { %9095 = vmatprep.subr.bf16.mxu1 %v19868_v32  ;;  %10741 = vmatprep.mubr.msk.bf16.mxu0 %vm6902_vm5, %v11925_v35  ;;  %20007 = vst [vmem:[#allocation9_spill] sm:$0xff] %v17869_v33 }
 0x74a   :  { %10761 = vmatprep.mubr.msk.bf16.mxu1 %vm6902_vm5, %v11925_v35  ;;  %v12252_v35 = vld [vmem:[%s18896_s3 + $0x120] ss:$24 sps:$4 sm:$0xff]  }
 0x74b   :  { %8412 = vmatpush1.bf16.msra.mxu0 %v17561_v57  ;;  %v17812_v57 = vld [vmem:[#allocation2 + $0x208] sm:$0xff] }
 0x74c   :  { %9096 = vmatpush1.bf16.msra.mxu1 %v17680_v46  ;;  %8574 = vmatprep.subr.bf16.mxu0 %v19868_v32 }
 0x74d   :  { %9258 = vmatprep.subr.bf16.mxu1 %v19868_v32 }
 0x74e   :  { %7446 = vmatmul.mubr.bf16.gmra.mrb[240].mxu0 %v11923_v36 }
 0x74f   :  { %8180 = vmatmul.mubr.bf16.gmra.mrb[240].mxu1 %v11923_v36  ;;  %10742 = vmatprep.mubr.msk.bf16.mxu0 %vm6902_vm5, %v11928_v34  ;;  %v17878_v36 = vld [vmem:[#allocation2 + $0x248] sm:$0xff] }
 0x750   :  { %10762 = vmatprep.mubr.msk.bf16.mxu1 %vm6902_vm5, %v11928_v34  ;;  %20008 = vst [vmem:[#allocation42_spill] sm:$0xff] %v17878_v36  ;;  %v12253_v34 = vld [vmem:[%s18896_s3 + $0x154] ss:$24 sps:$4 sm:$0xff]  }
 0x756   :  { %7454 = vmatmul.mubr.bf16.gmra.mrb[244].mxu0 %v11926_v52 }
 0x757   :  { %8188 = vmatmul.mubr.bf16.gmra.mrb[244].mxu1 %v11926_v52  ;;  %10743 = vmatprep.mubr.msk.bf16.mxu0 %vm6902_vm5, %v11931_v22 }
 0x758   :  { %10763 = vmatprep.mubr.msk.bf16.mxu1 %vm6902_vm5, %v11931_v22 }
 0x75e   :  { %7462 = vmatmul.mubr.bf16.gmra.mrb[248].mxu0 %v11929_v19 }
 0x75f   :  { %8196 = vmatmul.mubr.bf16.gmra.mrb[248].mxu1 %v11929_v19  ;;  %10744 = vmatprep.mubr.msk.bf16.mxu0 %vm6902_vm5, %v11934_v24  ;;  %v17891_v19 = vld [vmem:[#allocation2 + $0x250] sm:$0xff] }
 0x760   :  { %10764 = vmatprep.mubr.msk.bf16.mxu1 %vm6902_vm5, %v11934_v24  ;;  %20009 = vst [vmem:[#allocation43_spill] sm:$0xff] %v17891_v19 }
 0x766   :  { %7470 = vmatmul.mubr.bf16.gmra.mrb[252].mxu0 %v11932_v17 }
 0x767   :  { %8204 = vmatmul.mubr.bf16.gmra.mrb[252].mxu1 %v11932_v17  ;;  %10745 = vmatprep.mubr.msk.bf16.mxu0 %vm6902_vm5, %v11937_v0 }
 0x768   :  { %10765 = vmatprep.mubr.msk.bf16.mxu1 %vm6902_vm5, %v11937_v0 }
 0x76e   :  { %7478 = vmatmul.mubr.bf16.gmra.mrb[0].mxu0 %v11935_v51 }
 0x76f   :  { %8212 = vmatmul.mubr.bf16.gmra.mrb[0].mxu1 %v11935_v51  ;;  %10746 = vmatprep.mubr.msk.bf16.mxu0 %vm6902_vm5, %v11940_v61 }
 0x770   :  { %10766 = vmatprep.mubr.msk.bf16.mxu1 %vm6902_vm5, %v11940_v61  ;;  %v12254_v61 = vld [vmem:[%s18896_s3 + $0x150] ss:$24 sps:$4 sm:$0xff]  }
 0x776   :  { %7486 = vmatmul.mubr.bf16.gmra.mrb[4].mxu0 %v11938_v40 }
 0x777   :  { %8220 = vmatmul.mubr.bf16.gmra.mrb[4].mxu1 %v11938_v40  ;;  %10747 = vmatprep.mubr.msk.bf16.mxu0 %vm6902_vm5, %v11943_v13 }
 0x778   :  { %10767 = vmatprep.mubr.msk.bf16.mxu1 %vm6902_vm5, %v11943_v13  ;;  %v12255_v13 = vld [vmem:[%s18896_s3 + $0x184] ss:$24 sps:$4 sm:$0xff]  }
 0x77e   :  { %7494 = vmatmul.mubr.bf16.gmra.mrb[8].mxu0 %v11941_v60 }
 0x77f   :  { %8228 = vmatmul.mubr.bf16.gmra.mrb[8].mxu1 %v11941_v60  ;;  %10748 = vmatprep.mubr.msk.bf16.mxu0 %vm6902_vm5, %v11946_v59 }
 0x780   :  { %10768 = vmatprep.mubr.msk.bf16.mxu1 %vm6902_vm5, %v11946_v59 }
 0x786   :  { %7502 = vmatmul.mubr.bf16.gmra.mrb[12].mxu0 %v11944_v58 }
 0x787   :  { %8236 = vmatmul.mubr.bf16.gmra.mrb[12].mxu1 %v11944_v58  ;;  %10749 = vmatprep.mubr.msk.bf16.mxu0 %vm6902_vm5, %v11949_v38 }
 0x788   :  { %10769 = vmatprep.mubr.msk.bf16.mxu1 %vm6902_vm5, %v11949_v38 }
 0x78e   :  { %7510 = vmatmul.mubr.bf16.gmra.mrb[16].mxu0 %v11947_v20 }
 0x78f   :  { %8244 = vmatmul.mubr.bf16.gmra.mrb[16].mxu1 %v11947_v20  ;;  %10750 = vmatprep.mubr.msk.bf16.mxu0 %vm6902_vm5, %v11952_v3 }
 0x790   :  { %10770 = vmatprep.mubr.msk.bf16.mxu1 %vm6902_vm5, %v11952_v3 }
 0x796   :  { %7518 = vmatmul.mubr.bf16.gmra.mrb[20].mxu0 %v11950_v37 }
 0x797   :  { %8252 = vmatmul.mubr.bf16.gmra.mrb[20].mxu1 %v11950_v37  ;;  %10751 = vmatprep.mubr.msk.bf16.mxu0 %vm6902_vm5, %v11955_v31 }
 0x798   :  { %10771 = vmatprep.mubr.msk.bf16.mxu1 %vm6902_vm5, %v11955_v31  ;;  %v12256_v31 = vld [vmem:[%s18896_s3 + $0x180] ss:$24 sps:$4 sm:$0xff]  }
 0x79e   :  { %7526 = vmatmul.mubr.bf16.gmra.mrb[24].mxu0 %v11953_v62 }
 0x79f   :  { %8260 = vmatmul.mubr.bf16.gmra.mrb[24].mxu1 %v11953_v62  ;;  %10752 = vmatprep.mubr.msk.bf16.mxu0 %vm6902_vm5, %v11958_v43  ;;  %v12257_v62 = vld [vmem:[%s18896_s3 + $0x1b4] ss:$24 sps:$4 sm:$0xff]  }
 0x7a0   :  { %10772 = vmatprep.mubr.msk.bf16.mxu1 %vm6902_vm5, %v11958_v43 }
 0x7a6   :  { %7534 = vmatmul.mubr.bf16.gmra.mrb[28].mxu0 %v11956_v1 }
 0x7a7   :  { %8268 = vmatmul.mubr.bf16.gmra.mrb[28].mxu1 %v11956_v1  ;;  %8413 = vmatprep.mubr.bf16.mxu0 %v12239_v47 }
 0x7a8   :  { %9097 = vmatprep.mubr.bf16.mxu1 %v12239_v47 }
 0x7ae   :  { %8414 = vmatmul.mubr.bf16.vlgmr.msra.gmra.mrb[32].mxu0 %v12240_v41 }
 0x7af   :  { %8575 = vmatpush1.bf16.msra.mxu0 %v17571_v4  ;;  %9098 = vmatmul.mubr.bf16.vlgmr.msra.gmra.mrb[32].mxu1 %v12240_v41  ;;  %v17820_v4 = vld [vmem:[#allocation2 + $0x210] sm:$0xff] }
 0x7b0   :  { %9259 = vmatpush1.bf16.msra.mxu1 %v17780_v16  ;;  %8576 = vmatprep.subr.bf16.mxu0 %v19868_v32 }
 0x7b1   :  { %9260 = vmatprep.subr.bf16.mxu1 %v19868_v32  ;;  %8421 = vmatprep.mubr.bf16.mxu0 %v12241_v54 }
 0x7b2   :  { %9105 = vmatprep.mubr.bf16.mxu1 %v12241_v54 }
 0x7b3   :  { %8577 = vmatpush1.bf16.msra.mxu0 %v8353_v18 }
 0x7b4   :  { %9261 = vmatpush1.bf16.msra.mxu1 %v17788_v56  ;;  %8578 = vmatprep.subr.bf16.mxu0 %v19868_v32 }
 0x7b5   :  { %9262 = vmatprep.subr.bf16.mxu1 %v19868_v32 }
 0x7b6   :  { %8422 = vmatmul.mubr.bf16.gmra.mrb[36].mxu0 %v12242_v50 }
 0x7b7   :  { %8579 = vmatpush1.bf16.msra.mxu0 %v8354_v6  ;;  %9106 = vmatmul.mubr.bf16.gmra.mrb[36].mxu1 %v12242_v50  ;;  %v12258_v6 = vld [vmem:[%s18896_s3 + $0x1b0] ss:$24 sps:$4 sm:$0xff]  }
 0x7b8   :  { %9263 = vmatpush1.bf16.msra.mxu1 %v17796_v21  ;;  %8580 = vmatprep.subr.bf16.mxu0 %v19868_v32 }
 0x7b9   :  { %9264 = vmatprep.subr.bf16.mxu1 %v19868_v32  ;;  %8429 = vmatprep.mubr.bf16.mxu0 %v12243_v26 }
 0x7ba   :  { %9113 = vmatprep.mubr.bf16.mxu1 %v12243_v26  ;;  %v12259_v26 = vld [vmem:[%s18896_s3 + $0x1e4] ss:$24 sps:$4 sm:$0xff]  }
 0x7bb   :  { %8581 = vmatpush1.bf16.msra.mxu0 %v8355_v63 }
 0x7bc   :  { %9265 = vmatpush1.bf16.msra.mxu1 %v17804_v27  ;;  %8582 = vmatprep.subr.bf16.mxu0 %v19868_v32 }
 0x7bd   :  { %9266 = vmatprep.subr.bf16.mxu1 %v19868_v32 }
 0x7be   :  { %8430 = vmatmul.mubr.bf16.gmra.mrb[40].mxu0 %v12244_v2 }
 0x7bf   :  { %8583 = vmatpush1.bf16.msra.mxu0 %v8356_v42  ;;  %9114 = vmatmul.mubr.bf16.gmra.mrb[40].mxu1 %v12244_v2 }
 0x7c0   :  { %9267 = vmatpush1.bf16.msra.mxu1 %v17812_v57  ;;  %8584 = vmatprep.subr.bf16.mxu0 %v19868_v32 }
 0x7c1   :  { %9268 = vmatprep.subr.bf16.mxu1 %v19868_v32  ;;  %8437 = vmatprep.mubr.bf16.mxu0 %v12245_v39 }
 0x7c2   :  { %9121 = vmatprep.mubr.bf16.mxu1 %v12245_v39 }
 0x7c3   :  { %8585 = vmatpush1.bf16.msra.mxu0 %v8357_v30 }
 0x7c4   :  { %9269 = vmatpush1.bf16.msra.mxu1 %v17820_v4  ;;  %8586 = vmatprep.subr.bf16.mxu0 %v19868_v32 }
 0x7c5   :  { %9270 = vmatprep.subr.bf16.mxu1 %v19868_v32 }
 0x7c6   :  { %8438 = vmatmul.mubr.bf16.gmra.mrb[44].mxu0 %v12246_v25 }
 0x7c7   :  { %8587 = vmatpush1.bf16.msra.mxu0 %v8358_v11  ;;  %9122 = vmatmul.mubr.bf16.gmra.mrb[44].mxu1 %v12246_v25 }
 0x7c8   :  { %9271 = vmatpush1.bf16.msra.mxu1 %v17828_v55  ;;  %8588 = vmatprep.subr.bf16.mxu0 %v19868_v32 }
 0x7c9   :  { %9272 = vmatprep.subr.bf16.mxu1 %v19868_v32  ;;  %8445 = vmatprep.mubr.bf16.mxu0 %v12247_v10 }
 0x7ca   :  { %9129 = vmatprep.mubr.bf16.mxu1 %v12247_v10 }
 0x7cb   :  { %8589 = vmatpush1.bf16.msra.mxu0 %v8359_v7  ;;  %v12260_v7 = vld [vmem:[%s18896_s3 + $0x1e0] ss:$24 sps:$4 sm:$0xff]  }
 0x7cc   :  { %9273 = vmatpush1.bf16.msra.mxu1 %v17836_v15  ;;  %8590 = vmatprep.subr.bf16.mxu0 %v19868_v32 }
 0x7cd   :  { %9274 = vmatprep.subr.bf16.mxu1 %v19868_v32 }
 0x7ce   :  { %8446 = vmatmul.mubr.bf16.gmra.mrb[48].mxu0 %v12248_v14 }
 0x7cf   :  { %8591 = vmatpush1.bf16.msra.mxu0 %v8360_v23  ;;  %9130 = vmatmul.mubr.bf16.gmra.mrb[48].mxu1 %v12248_v14  ;;  %v12261_v14 = vld [vmem:[%s18896_s3 + $0x214] ss:$24 sps:$4 sm:$0xff]  }
 0x7d0   :  { %9275 = vmatpush1.bf16.msra.mxu1 %v17844_v5  ;;  %8592 = vmatprep.subr.bf16.mxu0 %v19868_v32 }
 0x7d1   :  { %9276 = vmatprep.subr.bf16.mxu1 %v19868_v32  ;;  %8453 = vmatprep.mubr.bf16.mxu0 %v12249_v9 }
 0x7d2   :  { %9137 = vmatprep.mubr.bf16.mxu1 %v12249_v9 }
 0x7d3   :  { %8593 = vmatpush1.bf16.msra.mxu0 %v8361_v48 }
 0x7d4   :  { %9277 = vmatpush1.bf16.msra.mxu1 %v17852_v49  ;;  %8594 = vmatprep.subr.bf16.mxu0 %v19868_v32 }
 0x7d5   :  { %9278 = vmatprep.subr.bf16.mxu1 %v19868_v32 }
 0x7d6   :  { %8454 = vmatmul.mubr.bf16.gmra.mrb[52].mxu0 %v12250_v12 }
 0x7d7   :  { %8595 = vmatpush1.bf16.msra.mxu0 %v8362_v28  ;;  %9138 = vmatmul.mubr.bf16.gmra.mrb[52].mxu1 %v12250_v12 }
 0x7d8   :  { %9279 = vmatpush1.bf16.msra.mxu1 %v17860_v45  ;;  %8596 = vmatprep.subr.bf16.mxu0 %v19868_v32 }
 0x7d9   :  { %9280 = vmatprep.subr.bf16.mxu1 %v19868_v32  ;;  %8461 = vmatprep.mubr.bf16.mxu0 %v12251_v29 }
 0x7da   :  { %9145 = vmatprep.mubr.bf16.mxu1 %v12251_v29 }
 0x7db   :  { %8597 = vmatpush1.bf16.msra.mxu0 %v17416_v8 }
 0x7dc   :  { %9281 = vmatpush1.bf16.msra.mxu1 %v17869_v33  ;;  %8598 = vmatprep.subr.bf16.mxu0 %v19868_v32 }
 0x7dd   :  { %9282 = vmatprep.subr.bf16.mxu1 %v19868_v32 }
 0x7de   :  { %8462 = vmatmul.mubr.bf16.gmra.mrb[56].mxu0 %v12252_v35 }
 0x7df   :  { %8599 = vmatpush1.bf16.msra.mxu0 %v17430_v53  ;;  %9146 = vmatmul.mubr.bf16.gmra.mrb[56].mxu1 %v12252_v35 }
 0x7e0   :  { %9283 = vmatpush1.bf16.msra.mxu1 %v17878_v36  ;;  %8600 = vmatprep.subr.bf16.mxu0 %v19868_v32 }
 0x7e1   :  { %v17882_v8 = vpop.f32.mrb[208].mxu0  ;;  %9284 = vmatprep.subr.bf16.mxu1 %v19868_v32  ;;  %8469 = vmatprep.mubr.bf16.mxu0 %v12253_v34 }
 0x7e2   :  { %v17888_v52 = vpop.f32.mrb[208].mxu1  ;;  %v7385_v22 = vpop.f32.mrb[209].mxu0  ;;  %9153 = vmatprep.mubr.bf16.mxu1 %v12253_v34 }
 0x7e3   :  { %v8119_v53 = vpop.f32.mrb[209].mxu1  ;;  %8601 = vmatpush1.bf16.msra.mxu0 %v17461_v44  ;;  %v17893_v24 = vpop.f32.mrb[210].mxu0  ;;  %v9050_v44 = vld [vmem:[#allocation2 + $0x258] sm:$0xff]  ;;  %v12262_v22 = vld [vmem:[%s18896_s3 + $0x210] ss:$24 sps:$4 sm:$0xff]  }
 0x7e4   :  { %9285 = vmatpush1.bf16.msra.mxu1 %v17891_v19  ;;  %v17896_v17 = vpop.f32.mrb[210].mxu1  ;;  %v7388_v0 = vpop.f32.mrb[211].mxu0  ;;  %8602 = vmatprep.subr.bf16.mxu0 %v19868_v32  ;;  %v12263_v53 = vld [vmem:[%s18896_s3 + $0x244] ss:$24 sps:$4 sm:$0xff]  }
 0x7e5   :  { %v8122_v51 = vpop.f32.mrb[211].mxu1  ;;  %9286 = vmatprep.subr.bf16.mxu1 %v19868_v32 }
 0x7e6   :  { %8470 = vmatmul.mubr.bf16.gmra.mrb[60].mxu0 %v12254_v61 }
 0x7e7   :  { %8603 = vmatpush1.bf16.msra.mxu0 %v17680_v46  ;;  %9154 = vmatmul.mubr.bf16.gmra.mrb[60].mxu1 %v12254_v61  ;;  %v9051_v46 = vld [vmem:[#allocation2 + $0x260] sm:$0xff] }
 0x7e8   :  { %9287 = vmatpush1.bf16.msra.mxu1 %v9050_v44  ;;  %8604 = vmatprep.subr.bf16.mxu0 %v19868_v32 }
 0x7e9   :  { %v17905_v40 = vpop.f32.mrb[212].mxu0  ;;  %9288 = vmatprep.subr.bf16.mxu1 %v19868_v32  ;;  %8477 = vmatprep.mubr.bf16.mxu0 %v12255_v13 }
 0x7ea   :  { %v17911_v60 = vpop.f32.mrb[212].mxu1  ;;  %v7393_v59 = vpop.f32.mrb[213].mxu0  ;;  %9161 = vmatprep.mubr.bf16.mxu1 %v12255_v13 }
 0x7eb   :  { %v8127_v58 = vpop.f32.mrb[213].mxu1  ;;  %8605 = vmatpush1.bf16.msra.mxu0 %v17780_v16  ;;  %v17914_v38 = vpop.f32.mrb[214].mxu0 }
 0x7ec   :  { %9289 = vmatpush1.bf16.msra.mxu1 %v9051_v46  ;;  %v17916_v20 = vpop.f32.mrb[214].mxu1  ;;  %v7396_v3 = vpop.f32.mrb[215].mxu0  ;;  %8767 = vmatprep.subr.bf16.mxu0 %v19868_v32 }
 0x7ed   :  { %v8130_v37 = vpop.f32.mrb[215].mxu1  ;;  %9451 = vmatprep.subr.bf16.mxu1 %v19868_v32 }
 0x7ee   :  { %8478 = vmatmul.mubr.bf16.gmra.mrb[64].mxu0 %v12256_v31 }
 0x7ef   :  { %9162 = vmatmul.mubr.bf16.gmra.mrb[64].mxu1 %v12256_v31  ;;  %8485 = vmatprep.mubr.bf16.mxu0 %v12257_v62 }
 0x7f0   :  { %9169 = vmatprep.mubr.bf16.mxu1 %v12257_v62 }
 0x7f1   :  { %v17926_v43 = vpop.f32.mrb[216].mxu0 }
 0x7f2   :  { %v17928_v1 = vpop.f32.mrb[216].mxu1  ;;  %v7401_v47 = vpop.f32.mrb[217].mxu0 }
 0x7f3   :  { %v8135_v41 = vpop.f32.mrb[217].mxu1  ;;  %v17930_v16 = vpop.f32.mrb[218].mxu0  ;;  %v12264_v47 = vld [vmem:[%s18896_s3 + $0x240] ss:$24 sps:$4 sm:$0xff]  }
 0x7f4   :  { %v17932_v54 = vpop.f32.mrb[218].mxu1  ;;  %v7404_v18 = vpop.f32.mrb[219].mxu0  ;;  %v12265_v41 = vld [vmem:[%s18896_s3 + $0x274] ss:$24 sps:$4 sm:$0xff]  }
 0x7f5   :  { %v8138_v50 = vpop.f32.mrb[219].mxu1 }
 0x7f6   :  { %8486 = vmatmul.mubr.bf16.gmra.mrb[68].mxu0 %v12258_v6 }
 0x7f7   :  { %9170 = vmatmul.mubr.bf16.gmra.mrb[68].mxu1 %v12258_v6  ;;  %8493 = vmatprep.mubr.bf16.mxu0 %v12259_v26 }
 0x7f8   :  { %9177 = vmatprep.mubr.bf16.mxu1 %v12259_v26 }
 0x7f9   :  { %v17940_v63 = vpop.f32.mrb[220].mxu0 }
 0x7fa   :  { %v17942_v2 = vpop.f32.mrb[220].mxu1  ;;  %v7409_v42 = vpop.f32.mrb[221].mxu0 }
 0x7fb   :  { %20010 = vst [vmem:[#allocation27_spill] sm:$0xff] %v17942_v2  ;;  %v8143_v39 = vpop.f32.mrb[221].mxu1  ;;  %v17944_v30 = vpop.f32.mrb[222].mxu0 }
 0x7fc   :  { %20011 = vst [vmem:[#allocation54_spill] sm:$0xff] %v17944_v30  ;;  %v17946_v25 = vpop.f32.mrb[222].mxu1  ;;  %v7412_v11 = vpop.f32.mrb[223].mxu0 }
 0x7fd   :  { %20012 = vst [vmem:[#allocation15_spill] sm:$0xff] %v17946_v25  ;;  %v8146_v10 = vpop.f32.mrb[223].mxu1  ;;  %v18132_v25 = vpop.permute.xlu0 %7609 }
 0x7fe   :  { %8494 = vmatmul.mubr.bf16.gmra.mrb[72].mxu0 %v12260_v7  ;;  %20026 = vst [vmem:[#allocation10_spill] sm:$0xff] %v18132_v25 }
 0x7ff   :  { %9178 = vmatmul.mubr.bf16.gmra.mrb[72].mxu1 %v12260_v7  ;;  %8501 = vmatprep.mubr.bf16.mxu0 %v12261_v14 }
 0x800   :  { %9185 = vmatprep.mubr.bf16.mxu1 %v12261_v14 }
 0x801   :  { %v17954_v23 = vpop.f32.mrb[224].mxu0 }
 0x802   :  { %20013 = vst [vmem:[#allocation13_spill] sm:$0xff] %v17954_v23  ;;  %v17956_v9 = vpop.f32.mrb[224].mxu1  ;;  %v7417_v48 = vpop.f32.mrb[225].mxu0 }
 0x803   :  { %20014 = vst [vmem:[#allocation20_spill] sm:$0xff] %v17956_v9  ;;  %v8151_v12 = vpop.f32.mrb[225].mxu1  ;;  %v17958_v28 = vpop.f32.mrb[226].mxu0 }
 0x804   :  { %20015 = vst [vmem:[#allocation51_spill] sm:$0xff] %v17958_v28  ;;  %v17960_v29 = vpop.f32.mrb[226].mxu1  ;;  %v7420_v35 = vpop.f32.mrb[227].mxu0 }
 0x805   :  { %20016 = vst [vmem:[#allocation53_spill] sm:$0xff] %v17960_v29  ;;  %v8154_v34 = vpop.f32.mrb[227].mxu1  ;;  %v12266_v35 = vld [vmem:[%s18896_s3 + $0x270] ss:$24 sps:$4 sm:$0xff]  }
 0x806   :  { %8502 = vmatmul.mubr.bf16.gmra.mrb[76].mxu0 %v12262_v22  ;;  %v12267_v34 = vld [vmem:[%s18896_s3 + $0x2a4] ss:$24 sps:$4 sm:$0xff]  }
 0x807   :  { %9186 = vmatmul.mubr.bf16.gmra.mrb[76].mxu1 %v12262_v22  ;;  %8509 = vmatprep.mubr.bf16.mxu0 %v12263_v53 }
 0x808   :  { %9193 = vmatprep.mubr.bf16.mxu1 %v12263_v53 }
 0x809   :  { %v17968_v0 = vpop.f32.mrb[228].mxu0 }
 0x80a   :  { %v17972_v61 = vpop.f32.mrb[228].mxu1  ;;  %v7425_v44 = vpop.f32.mrb[229].mxu0 }
 0x80b   :  { %v8159_v59 = vpop.f32.mrb[229].mxu1  ;;  %v17976_v58 = vpop.f32.mrb[230].mxu0 }
 0x80c   :  { %v17980_v3 = vpop.f32.mrb[230].mxu1  ;;  %v7428_v37 = vpop.f32.mrb[231].mxu0 }
 0x80d   :  { %v8162_v62 = vpop.f32.mrb[231].mxu1 }
 0x80e   :  { %8510 = vmatmul.mubr.bf16.gmra.mrb[80].mxu0 %v12264_v47 }
 0x80f   :  { %9194 = vmatmul.mubr.bf16.gmra.mrb[80].mxu1 %v12264_v47  ;;  %8517 = vmatprep.mubr.bf16.mxu0 %v12265_v41 }
 0x810   :  { %9201 = vmatprep.mubr.bf16.mxu1 %v12265_v41 }
 0x811   :  { %v17990_v18 = vpop.f32.mrb[232].mxu0 }
 0x812   :  { %v17994_v6 = vpop.f32.mrb[232].mxu1  ;;  %v7433_v26 = vpop.f32.mrb[233].mxu0 }
 0x813   :  { %v8167_v39 = vpop.f32.mrb[233].mxu1  ;;  %v17998_v11 = vpop.f32.mrb[234].mxu0 }
 0x814   :  { %v18002_v7 = vpop.f32.mrb[234].mxu1  ;;  %v7436_v14 = vpop.f32.mrb[235].mxu0 }
 0x815   :  { %v8170_v12 = vpop.f32.mrb[235].mxu1 }
 0x816   :  { %8518 = vmatmul.mubr.bf16.gmra.mrb[84].mxu0 %v12266_v35 }
 0x817   :  { %9202 = vmatmul.mubr.bf16.gmra.mrb[84].mxu1 %v12266_v35  ;;  %8525 = vmatprep.mubr.bf16.mxu0 %v12267_v34  ;;  %v12268_v35 = vld [vmem:[%s18896_s3 + $0x2a0] ss:$24 sps:$4 sm:$0xff]  }
 0x818   :  { %9209 = vmatprep.mubr.bf16.mxu1 %v12267_v34  ;;  %v12269_v34 = vld [vmem:[%s18896_s3 + $0x2d4] ss:$24 sps:$4 sm:$0xff]  }
 0x819   :  { %v18012_v22 = vpop.f32.mrb[236].mxu0 }
 0x81a   :  { %v18016_v44 = vpop.f32.mrb[236].mxu1  ;;  %v7441_v59 = vpop.f32.mrb[237].mxu0 }
 0x81b   :  { %v8175_v62 = vpop.f32.mrb[237].mxu1  ;;  %v18020_v47 = vpop.f32.mrb[238].mxu0 }
 0x81c   :  { %v18024_v26 = vpop.f32.mrb[238].mxu1  ;;  %v7444_v39 = vpop.f32.mrb[239].mxu0 }
 0x81d   :  { %v8178_v12 = vpop.f32.mrb[239].mxu1 }
 0x81e   :  { %8526 = vmatmul.mubr.bf16.gmra.mrb[88].mxu0 %v12268_v35 }
 0x81f   :  { %9210 = vmatmul.mubr.bf16.gmra.mrb[88].mxu1 %v12268_v35  ;;  %8533 = vmatprep.mubr.bf16.mxu0 %v12269_v34 }
 0x820   :  { %9217 = vmatprep.mubr.bf16.mxu1 %v12269_v34 }
 0x821   :  { %v18034_v59 = vpop.f32.mrb[240].mxu0 }
 0x822   :  { %v18038_v39 = vpop.f32.mrb[240].mxu1  ;;  %v7449_v12 = vpop.f32.mrb[241].mxu0 }
 0x823   :  { %20017 = vst [vmem:[#allocation6_spill] sm:$0xff] %v18038_v39  ;;  %v8183_v41 = vpop.f32.mrb[241].mxu1  ;;  %v18042_v37 = vpop.f32.mrb[242].mxu0  ;;  %v12270_v12 = vld [vmem:[%s18896_s3 + $0x2d0] ss:$24 sps:$4 sm:$0xff]  }
 0x824   :  { %20018 = vst [vmem:[#allocation4_spill] sm:$0xff] %v18042_v37  ;;  %v18046_v53 = vpop.f32.mrb[242].mxu1  ;;  %v7452_v34 = vpop.f32.mrb[243].mxu0  ;;  %v12271_v41 = vld [vmem:[%s18896_s3 + $0x304] ss:$24 sps:$4 sm:$0xff]  }
 0x825   :  { %20019 = vst [vmem:[#allocation29_spill] sm:$0xff] %v18046_v53  ;;  %v8186_v10 = vpop.f32.mrb[243].mxu1 }
 0x826   :  { %8534 = vmatmul.mubr.bf16.gmra.mrb[92].mxu0 %v12270_v12 }
 0x827   :  { %9218 = vmatmul.mubr.bf16.gmra.mrb[92].mxu1 %v12270_v12  ;;  %8541 = vmatprep.mubr.bf16.mxu0 %v12271_v41 }
 0x828   :  { %9225 = vmatprep.mubr.bf16.mxu1 %v12271_v41 }
 0x829   :  { %v18056_v35 = vpop.f32.mrb[244].mxu0 }
 0x82a   :  { %20020 = vst [vmem:[#allocation57_spill] sm:$0xff] %v18056_v35  ;;  %v18060_v14 = vpop.f32.mrb[244].mxu1  ;;  %v7457_v10 = vpop.f32.mrb[245].mxu0 }
 0x82b   :  { %20021 = vst [vmem:[#allocation14_spill] sm:$0xff] %v18060_v14  ;;  %v8191_v62 = vpop.f32.mrb[245].mxu1  ;;  %v18064_v42 = vpop.f32.mrb[246].mxu0  ;;  %v12272_v10 = vld [vmem:[%s18896_s3 + $0x300] ss:$24 sps:$4 sm:$0xff]  }
 0x82c   :  { %20022 = vst [vmem:[#allocation24_spill] sm:$0xff] %v18064_v42  ;;  %v18068_v50 = vpop.f32.mrb[246].mxu1  ;;  %v7460_v41 = vpop.f32.mrb[247].mxu0  ;;  %v12273_v62 = vld [vmem:[%s18896_s3 + $0x334] ss:$24 sps:$4 sm:$0xff]  }
 0x82d   :  { %20023 = vst [vmem:[#allocation55_spill] sm:$0xff] %v18068_v50  ;;  %v8194_v46 = vpop.f32.mrb[247].mxu1 }
 0x82e   :  { %8542 = vmatmul.mubr.bf16.gmra.mrb[96].mxu0 %v12272_v10 }
 0x82f   :  { %9226 = vmatmul.mubr.bf16.gmra.mrb[96].mxu1 %v12272_v10  ;;  %8549 = vmatprep.mubr.bf16.mxu0 %v12273_v62  ;;  %v12274_v10 = vld [vmem:[%s18896_s3 + $0x330] ss:$24 sps:$4 sm:$0xff]  }
 0x830   :  { %9233 = vmatprep.mubr.bf16.mxu1 %v12273_v62  ;;  %v12275_v62 = vld [vmem:[%s18896_s3 + $0x364] ss:$24 sps:$4 sm:$0xff]  }
 0x831   :  { %v18078_v12 = vpop.f32.mrb[248].mxu0 }
 0x832   :  { %v18080_v48 = vpop.f32.mrb[248].mxu1  ;;  %v7465_v41 = vpop.f32.mrb[249].mxu0 }
 0x833   :  { %v8199_v34 = vpop.f32.mrb[249].mxu1  ;;  %v18082_v31 = vpop.f32.mrb[250].mxu0 }
 0x834   :  { %v18084_v46 = vpop.f32.mrb[250].mxu1  ;;  %v7468_v13 = vpop.f32.mrb[251].mxu0 }
 0x835   :  { %v8202_v51 = vpop.f32.mrb[251].mxu1 }
 0x836   :  { %8550 = vmatmul.mubr.bf16.gmra.mrb[100].mxu0 %v12274_v10 }
 0x837   :  { %9234 = vmatmul.mubr.bf16.gmra.mrb[100].mxu1 %v12274_v10  ;;  %8557 = vmatprep.mubr.bf16.mxu0 %v12275_v62  ;;  %v12276_v10 = vld [vmem:[%s18896_s3 + $0x360] ss:$24 sps:$4 sm:$0xff]  }
 0x838   :  { %9241 = vmatprep.mubr.bf16.mxu1 %v12275_v62  ;;  %v12277_v62 = vld [vmem:[%s18896_s3 + $0x394] ss:$24 sps:$4 sm:$0xff]  }
 0x839   :  { %v18092_v41 = vpop.f32.mrb[252].mxu0 }
 0x83a   :  { %v18094_v34 = vpop.f32.mrb[252].mxu1  ;;  %v7473_v19 = vpop.f32.mrb[253].mxu0 }
 0x83b   :  { %v8207_v50 = vpop.f32.mrb[253].mxu1  ;;  %v18096_v13 = vpop.f32.mrb[254].mxu0 }
 0x83c   :  { %v18098_v51 = vpop.f32.mrb[254].mxu1  ;;  %v7476_v29 = vpop.f32.mrb[255].mxu0 }
 0x83d   :  { %v8210_v42 = vpop.f32.mrb[255].mxu1 }
 0x83e   :  { %8558 = vmatmul.mubr.bf16.gmra.mrb[104].mxu0 %v12276_v10 }
 0x83f   :  { %9242 = vmatmul.mubr.bf16.gmra.mrb[104].mxu1 %v12276_v10  ;;  %8565 = vmatprep.mubr.bf16.mxu0 %v12277_v62  ;;  %v12278_v10 = vld [vmem:[%s18896_s3 + $0x390] ss:$24 sps:$4 sm:$0xff]  }
 0x840   :  { %9249 = vmatprep.mubr.bf16.mxu1 %v12277_v62  ;;  %v12279_v62 = vld [vmem:[%s18896_s3 + $0xc] ss:$24 sps:$4 sm:$0xff]  }
 0x841   :  { %v18106_v19 = vpop.f32.mrb[0].mxu0 }
 0x842   :  { %v18108_v50 = vpop.f32.mrb[0].mxu1  ;;  %v7481_v28 = vpop.f32.mrb[1].mxu0 }
 0x843   :  { %v8215_v14 = vpop.f32.mrb[1].mxu1  ;;  %v18110_v29 = vpop.f32.mrb[2].mxu0 }
 0x844   :  { %v18112_v42 = vpop.f32.mrb[2].mxu1  ;;  %v7484_v9 = vpop.f32.mrb[3].mxu0 }
 0x845   :  { %v8218_v35 = vpop.f32.mrb[3].mxu1 }
 0x846   :  { %8566 = vmatmul.mubr.bf16.gmra.mrb[108].mxu0 %v12278_v10 }
 0x847   :  { %9250 = vmatmul.mubr.bf16.gmra.mrb[108].mxu1 %v12278_v10  ;;  %8606 = vmatprep.mubr.bf16.mxu0 %v12279_v62  ;;  %v12280_v10 = vld [vmem:[%s18896_s3 + $0x8] ss:$24 sps:$4 sm:$0xff]  }
 0x848   :  { %9290 = vmatprep.mubr.bf16.mxu1 %v12279_v62  ;;  %v9052_v62 = vld [vmem:[#allocation2 + $0x268] sm:$0xff] }
 0x849   :  { %v18120_v28 = vpop.f32.mrb[4].mxu0 }
 0x84a   :  { %v18122_v14 = vpop.f32.mrb[4].mxu1  ;;  %v7489_v23 = vpop.f32.mrb[5].mxu0 }
 0x84b   :  { %v8223_v36 = vpop.f32.mrb[5].mxu1  ;;  %v18124_v9 = vpop.f32.mrb[6].mxu0 }
 0x84c   :  { %20024 = vst [vmem:[#allocation22_spill] sm:$0xff] %v18124_v9  ;;  %v18126_v35 = vpop.f32.mrb[6].mxu1  ;;  %v7492_v33 = vpop.f32.mrb[7].mxu0 }
 0x84d   :  { %20025 = vst [vmem:[#allocation37_spill] sm:$0xff] %v18126_v35  ;;  %v8226_v53 = vpop.f32.mrb[7].mxu1  ;;  %v18135_v36 = vpop.permute.xlu1 %7604  ;;  %v12281_v33 = vld [vmem:[%s18896_s3 + $0x3c] ss:$24 sps:$4 sm:$0xff]  }
 0x84e   :  { %8607 = vmatmul.mubr.bf16.vlgmr.msra.gmra.mrb[32].mxu0 %v12280_v10  ;;  %20027 = vst [vmem:[#allocation49_spill] sm:$0xff] %v18135_v36  ;;  %v20032_v36 = vmax.f32 %v17882_v8, %v17968_v0  ;;  %v20034_v8 = vmax.f32 %v17893_v24, %v17976_v58  ;;  %v12284_v0 = vld [vmem:[%s18896_s3 + $0x68] ss:$24 sps:$4 sm:$0xff]  }
 0x84f   :  { %8768 = vmatpush1.bf16.msra.mxu0 %v17788_v56  ;;  %9291 = vmatmul.mubr.bf16.vlgmr.msra.gmra.mrb[32].mxu1 %v12280_v10 }
 0x850   :  { %9452 = vmatpush1.bf16.msra.mxu1 %v9052_v62  ;;  %8769 = vmatprep.subr.bf16.mxu0 %v19868_v32  ;;  %v9053_v62 = vld [vmem:[#allocation2 + $0x270] sm:$0xff] }
 0x851   :  { %v18137_v23 = vpop.f32.mrb[8].mxu0  ;;  %9453 = vmatprep.subr.bf16.mxu1 %v19868_v32  ;;  %8614 = vmatprep.mubr.bf16.mxu0 %v12281_v33 }
 0x852   :  { %20028 = vst [vmem:[#allocation36_spill] sm:$0xff] %v18137_v23  ;;  %v18143_v53 = vpop.f32.mrb[8].mxu1  ;;  %v7497_v56 = vpop.f32.mrb[9].mxu0  ;;  %9298 = vmatprep.mubr.bf16.mxu1 %v12281_v33 }
 0x853   :  { %20029 = vst [vmem:[#allocation17_spill] sm:$0xff] %v18143_v53  ;;  %v8231_v10 = vpop.f32.mrb[9].mxu1  ;;  %8770 = vmatpush1.bf16.msra.mxu0 %v17796_v21  ;;  %v18146_v25 = vpop.f32.mrb[10].mxu0  ;;  %v12282_v56 = vld [vmem:[%s18896_s3 + $0x38] ss:$24 sps:$4 sm:$0xff]  }
 0x854   :  { %20030 = vst [vmem:[#allocation40_spill] sm:$0xff] %v18146_v25  ;;  %9454 = vmatpush1.bf16.msra.mxu1 %v9053_v62  ;;  %v18148_v37 = vpop.f32.mrb[10].mxu1  ;;  %v7500_v23 = vpop.f32.mrb[11].mxu0  ;;  %8771 = vmatprep.subr.bf16.mxu0 %v19868_v32  ;;  %v9054_v21 = vld [vmem:[#allocation2 + $0x278] sm:$0xff]  ;;  %v9055_v25 = vld [vmem:[#allocation2 + $0x280] sm:$0xff] }
 0x855   :  { %20031 = vst [vmem:[#allocation26_spill] sm:$0xff] %v18148_v37  ;;  %v8234_v30 = vpop.f32.mrb[11].mxu1  ;;  %9455 = vmatprep.subr.bf16.mxu1 %v19868_v32  ;;  %v18156_v33 = vpop.permute.xlu0 %7579 }
 0x856   :  { %8615 = vmatmul.mubr.bf16.gmra.mrb[36].mxu0 %v12282_v56  ;;  %v18159_v23 = vpop.permute.xlu1 %7574  ;;  %v12283_v30 = vld [vmem:[%s18896_s3 + $0x6c] ss:$24 sps:$4 sm:$0xff]  }
 0x857   :  { %8772 = vmatpush1.bf16.msra.mxu0 %v17804_v27  ;;  %9299 = vmatmul.mubr.bf16.gmra.mrb[36].mxu1 %v12282_v56 }
 0x858   :  { %9456 = vmatpush1.bf16.msra.mxu1 %v9054_v21  ;;  %8773 = vmatprep.subr.bf16.mxu0 %v19868_v32 }
 0x859   :  { %v7503_v10 = vpop.f32.mrb[12].mxu0  ;;  %9457 = vmatprep.subr.bf16.mxu1 %v19868_v32  ;;  %8622 = vmatprep.mubr.bf16.mxu0 %v12283_v30  ;;  %v18194_v58 = vpop.permute.xlu0 %7619 }
 0x85a   :  { %v7552_v62 = vmax.f32 %v18078_v12, %v7503_v10  ;;  %v8237_v27 = vpop.f32.mrb[12].mxu1  ;;  %v7505_v56 = vpop.f32.mrb[13].mxu0  ;;  %9306 = vmatprep.mubr.bf16.mxu1 %v12283_v30  ;;  %v20033_v12 = vmax.f32 %v17888_v52, %v17972_v61  ;;  %20037 = vst [vmem:[#allocation30_spill] sm:$0xff] %v18194_v58 }
 0x85b   :  { %v8286_v37 = vmax.f32 %v18080_v48, %v8237_v27  ;;  %v8239_v21 = vpop.f32.mrb[13].mxu1  ;;  %8774 = vmatpush1.bf16.msra.mxu0 %v17812_v57  ;;  %v7506_v53 = vpop.f32.mrb[14].mxu0 }
 0x85c   :  { %v7562_v35 = vmax.f32 %v20032_v36, %v7552_v62  ;;  %9458 = vmatpush1.bf16.msra.mxu1 %v9055_v25  ;;  %v7553_v39 = vmax.f32 %v18082_v31, %v7506_v53  ;;  %v8240_v2 = vpop.f32.mrb[14].mxu1  ;;  %v7508_v9 = vpop.f32.mrb[15].mxu0  ;;  %8775 = vmatprep.subr.bf16.mxu0 %v19868_v32  ;;  %v9057_v21 = vld [vmem:[#allocation2 + $0x290] sm:$0xff] }
 0x85d   :  { %v8296_v48 = vmax.f32 %v20033_v12, %v8286_v37  ;;  %v8287_v10 = vmax.f32 %v18084_v46, %v8240_v2  ;;  %v8242_v57 = vpop.f32.mrb[15].mxu1  ;;  %9459 = vmatprep.subr.bf16.mxu1 %v19868_v32  ;;  %v18185_v31 = vpop.permute.xlu1 %7614  ;;  %v20036_v2 = vmax.f32 %v17896_v17, %v17980_v3  ;;  %v9056_v37 = vld [vmem:[#allocation2 + $0x288] sm:$0xff]  ;;  %v12285_v17 = vld [vmem:[%s18896_s3 + $0x9c] ss:$24 sps:$4 sm:$0xff]  }
 0x85e   :  { %v7622_v30 = vadd.f32 %v18159_v23, %v7562_v35  ;;  %v7563_v25 = vmax.f32 %v20034_v8, %v7553_v39  ;;  %8623 = vmatmul.mubr.bf16.gmra.mrb[40].mxu0 %v12284_v0  ;;  %20035 = vst [vmem:[#allocation56_spill] sm:$0xff] %v18185_v31 }
 0x85f   :  { %v8306_v52 = vadd.f32 %v8296_v48, %v18159_v23  ;;  %v8297_v61 = vmax.f32 %v20036_v2, %v8287_v10  ;;  %8776 = vmatpush1.bf16.msra.mxu0 %v17820_v4  ;;  %9307 = vmatmul.mubr.bf16.gmra.mrb[40].mxu1 %v12284_v0  ;;  %v20038_v10 = vmax.f32 %v17905_v40, %v17990_v18 }
 0x860   :  { %v7623_v24 = vadd.f32 %v18156_v33, %v7563_v25  ;;  %9460 = vmatpush1.bf16.msra.mxu1 %v9056_v37  ;;  %8777 = vmatprep.subr.bf16.mxu0 %v19868_v32  ;;  %v7632_v4 = vmax.f32 %v7622_v30, 0.0  ;;  %v20040_v18 = vmax.f32 %v17914_v38, %v17998_v11  ;;  %v9058_v38 = vld [vmem:[#allocation2 + $0x298] sm:$0xff] }
 0x861   :  { %v8307_v39 = vadd.f32 %v8297_v61, %v18156_v33  ;;  %v7511_v46 = vpop.f32.mrb[16].mxu0  ;;  %9461 = vmatprep.subr.bf16.mxu1 %v19868_v32  ;;  %8630 = vmatprep.mubr.bf16.mxu0 %v12285_v17  ;;  %v8316_v53 = vmax.f32 %v8306_v52, 0.0  ;;  %v18209_v25 = vpop.permute.xlu1 %7584  ;;  %v12286_v61 = vld [vmem:[%s18896_s3 + $0x98] ss:$24 sps:$4 sm:$0xff]  }
 0x862   :  { %v7633_v3 = vmax.f32 %v7623_v24, 0.0  ;;  %v7554_v9 = vmax.f32 %v18092_v41, %v7511_v46  ;;  %v8245_v35 = vpop.f32.mrb[16].mxu1  ;;  %v7513_v36 = vpop.f32.mrb[17].mxu0  ;;  %9314 = vmatprep.mubr.bf16.mxu1 %v12285_v17  ;;  %v12287_v46 = vld [vmem:[%s18896_s3 + $0xcc] ss:$24 sps:$4 sm:$0xff]  }
 0x863   :  { %v8317_v62 = vmax.f32 %v8307_v39, 0.0  ;;  %v8288_v27 = vmax.f32 %v18094_v34, %v8245_v35  ;;  %v8247_v56 = vpop.f32.mrb[17].mxu1  ;;  %8778 = vmatpush1.bf16.msra.mxu0 %v17828_v55  ;;  %v7514_v12 = vpop.f32.mrb[18].mxu0  ;;  %v20039_v55 = vmax.f32 %v17911_v60, %v17994_v6 }
 0x864   :  { %v7642_v48 = vpack.c.bf16 %v7633_v3, %v7632_v4  ;;  %v7564_v57 = vmax.f32 %v20038_v10, %v7554_v9  ;;  %9462 = vmatpush1.bf16.msra.mxu1 %v9057_v21  ;;  %v7555_v41 = vmax.f32 %v18096_v13, %v7514_v12  ;;  %v8248_v30 = vpop.f32.mrb[18].mxu1  ;;  %v7516_v8 = vpop.f32.mrb[19].mxu0  ;;  %8779 = vmatprep.subr.bf16.mxu0 %v19868_v32 }
 0x865   :  { %v8326_v34 = vpack.c.bf16 %v8317_v62, %v8316_v53  ;;  %v8298_v0 = vmax.f32 %v20039_v55, %v8288_v27  ;;  %v8289_v52 = vmax.f32 %v18098_v51, %v8248_v30  ;;  %v8250_v2 = vpop.f32.mrb[19].mxu1  ;;  %9463 = vmatprep.subr.bf16.mxu1 %v19868_v32  ;;  %v18224_v60 = vpop.permute.xlu0 %7589  ;;  %v20041_v51 = vmax.f32 %v17916_v20, %v18002_v7  ;;  %v9059_v53 = vld [vmem:[#allocation2 + $0x2a0] sm:$0xff] }
 0x866   :  { %7647 = vst.msk [vmem:[#allocation3] sm:$0xff] %vm988_vm2, %v7642_v48  ;;  %v7624_v40 = vadd.f32 %v18209_v25, %v7564_v57  ;;  %v7565_v13 = vmax.f32 %v20040_v18, %v7555_v41  ;;  %8631 = vmatmul.mubr.bf16.gmra.mrb[44].mxu0 %v12286_v61  ;;  %v20042_v56 = vmax.f32 %v17926_v43, %v18012_v22  ;;  %v18247_v10 = vpop.permute.xlu1 %7594  ;;  %v12288_v8 = vld [vmem:[%s18896_s3 + $0xc8] ss:$24 sps:$4 sm:$0xff]  }
 0x867   :  { %8331 = vst.msk [vmem:[#allocation3 + $0x28] sm:$0xff] %vm988_vm2, %v8326_v34  ;;  %v8308_v6 = vadd.f32 %v8298_v0, %v18209_v25  ;;  %v8299_v37 = vmax.f32 %v20041_v51, %v8289_v52  ;;  %8780 = vmatpush1.bf16.msra.mxu0 %v17836_v15  ;;  %9315 = vmatmul.mubr.bf16.gmra.mrb[44].mxu1 %v12286_v61  ;;  %v12289_v52 = vld [vmem:[%s18896_s3 + $0xfc] ss:$24 sps:$4 sm:$0xff]  }
 0x868   :  { %v7625_v11 = vadd.f32 %v18224_v60, %v7565_v13  ;;  %9464 = vmatpush1.bf16.msra.mxu1 %v9058_v38  ;;  %8781 = vmatprep.subr.bf16.mxu0 %v19868_v32  ;;  %v7634_v20 = vmax.f32 %v7624_v40, 0.0  ;;  %v20044_v22 = vmax.f32 %v17930_v16, %v18020_v47  ;;  %v9060_v16 = vld [vmem:[#allocation2 + $0x2a8] sm:$0xff]  ;;  %v9061_v51 = vld [vmem:[#allocation2 + $0x2b0] sm:$0xff] }
 0x869   :  { %v8309_v24 = vadd.f32 %v8299_v37, %v18224_v60  ;;  %v7519_v39 = vpop.f32.mrb[20].mxu0  ;;  %9465 = vmatprep.subr.bf16.mxu1 %v19868_v32  ;;  %8638 = vmatprep.mubr.bf16.mxu0 %v12287_v46  ;;  %v8318_v3 = vmax.f32 %v8308_v6, 0.0 }
 0x86a   :  { %v7635_v7 = vmax.f32 %v7625_v11, 0.0  ;;  %v7556_v15 = vmax.f32 %v18106_v19, %v7519_v39  ;;  %v8253_v17 = vpop.f32.mrb[20].mxu1  ;;  %v7521_v4 = vpop.f32.mrb[21].mxu0  ;;  %9322 = vmatprep.mubr.bf16.mxu1 %v12287_v46  ;;  %v20046_v11 = vmax.f32 %v17940_v63, %v18034_v59  ;;  %v20047_v39 = vld [vmem:[#allocation22_spill] sm:$0xff]  ;;  %v20052_v63 = vld [vmem:[#allocation49_spill] sm:$0xff] }
 0x86b   :  { %v8319_v9 = vmax.f32 %v8309_v24, 0.0  ;;  %v8290_v35 = vmax.f32 %v18108_v50, %v8253_v17  ;;  %v8255_v36 = vpop.f32.mrb[21].mxu1  ;;  %8782 = vmatpush1.bf16.msra.mxu0 %v17844_v5  ;;  %v7522_v62 = vpop.f32.mrb[22].mxu0  ;;  %v20043_v5 = vmax.f32 %v17928_v1, %v18016_v44 }
 0x86c   :  { %v7643_v27 = vpack.c.bf16 %v7635_v7, %v7634_v20  ;;  %v7566_v21 = vmax.f32 %v20042_v56, %v7556_v15  ;;  %9466 = vmatpush1.bf16.msra.mxu1 %v9059_v53  ;;  %v7557_v19 = vmax.f32 %v18110_v29, %v7522_v62  ;;  %v8256_v12 = vpop.f32.mrb[22].mxu1  ;;  %v7524_v48 = vpop.f32.mrb[23].mxu0  ;;  %8783 = vmatprep.subr.bf16.mxu0 %v19868_v32  ;;  %v20048_v15 = vld [vmem:[#allocation27_spill] sm:$0xff]  ;;  %v20054_v36 = vld [vmem:[#allocation4_spill] sm:$0xff] }
 0x86d   :  { %v8327_v50 = vpack.c.bf16 %v8319_v9, %v8318_v3  ;;  %v8300_v57 = vmax.f32 %v20043_v5, %v8290_v35  ;;  %v8291_v41 = vmax.f32 %v18112_v42, %v8256_v12  ;;  %v8258_v30 = vpop.f32.mrb[23].mxu1  ;;  %9467 = vmatprep.subr.bf16.mxu1 %v19868_v32  ;;  %v18262_v1 = vpop.permute.xlu0 %7599  ;;  %v20045_v42 = vmax.f32 %v17932_v54, %v18024_v26  ;;  %v20053_v35 = vld [vmem:[#allocation54_spill] sm:$0xff]  ;;  %v9062_v5 = vld [vmem:[#allocation2 + $0x2b8] sm:$0xff] }
 0x86e   :  { %7648 = vst.msk [vmem:[#allocation3 + $0x8] sm:$0xff] %vm988_vm2, %v7643_v27  ;;  %v7626_v43 = vadd.f32 %v18247_v10, %v7566_v21  ;;  %v7567_v29 = vmax.f32 %v20044_v22, %v7557_v19  ;;  %8639 = vmatmul.mubr.bf16.gmra.mrb[48].mxu0 %v12288_v8  ;;  %v20055_v53 = vmax.f32 %v20053_v35, %v20054_v36  ;;  %v12290_v27 = vld [vmem:[%s18896_s3 + $0xf8] ss:$24 sps:$4 sm:$0xff]   ;;  %v20056_v21 = vld [vmem:[#allocation15_spill] sm:$0xff] }
 0x86f   :  { %8332 = vst.msk [vmem:[#allocation3 + $0x30] sm:$0xff] %vm988_vm2, %v8327_v50  ;;  %v8310_v44 = vadd.f32 %v8300_v57, %v18247_v10  ;;  %v8301_v34 = vmax.f32 %v20045_v42, %v8291_v41  ;;  %8784 = vmatpush1.bf16.msra.mxu0 %v17852_v49  ;;  %9323 = vmatmul.mubr.bf16.gmra.mrb[48].mxu1 %v12288_v8  ;;  %v20057_v19 = vld [vmem:[#allocation29_spill] sm:$0xff]  ;;  %v20060_v57 = vld [vmem:[#allocation10_spill] sm:$0xff] }
 0x870   :  { %v7627_v47 = vadd.f32 %v18262_v1, %v7567_v29  ;;  %9468 = vmatpush1.bf16.msra.mxu1 %v9060_v16  ;;  %8785 = vmatprep.subr.bf16.mxu0 %v19868_v32  ;;  %v7636_v54 = vmax.f32 %v7626_v43, 0.0  ;;  %v20058_v12 = vmax.f32 %v20056_v21, %v20057_v19  ;;  %v20059_v50 = vld [vmem:[#allocation9_spill] sm:$0xff]  ;;  %v12291_v22 = vld [vmem:[%s18896_s3 + $0x12c] ss:$24 sps:$4 sm:$0xff]  }
 0x871   :  { %v8311_v55 = vadd.f32 %v8301_v34, %v18262_v1  ;;  %v7527_v0 = vpop.f32.mrb[24].mxu0  ;;  %9469 = vmatprep.subr.bf16.mxu1 %v19868_v32  ;;  %8646 = vmatprep.mubr.bf16.mxu0 %v12289_v52  ;;  %v8320_v18 = vmax.f32 %v8310_v44, 0.0  ;;  %v20061_v44 = vld [vmem:[#allocation36_spill] sm:$0xff]  ;;  %v20075_v36 = vld [vmem:[#allocation53_spill] sm:$0xff] }
 0x872   :  { %v7637_v26 = vmax.f32 %v7627_v47, 0.0  ;;  %v7558_v49 = vmax.f32 %v18120_v28, %v7527_v0  ;;  %v8261_v2 = vpop.f32.mrb[24].mxu1  ;;  %v7529_v40 = vpop.f32.mrb[25].mxu0  ;;  %9330 = vmatprep.mubr.bf16.mxu1 %v12289_v52  ;;  %v20062_v0 = vld [vmem:[#allocation17_spill] sm:$0xff] }
 0x873   :  { %v8321_v13 = vmax.f32 %v8311_v55, 0.0  ;;  %v8292_v61 = vmax.f32 %v18122_v14, %v8261_v2  ;;  %v8263_v6 = vpop.f32.mrb[25].mxu1  ;;  %8786 = vmatpush1.bf16.msra.mxu0 %v17860_v45  ;;  %v7530_v37 = vpop.f32.mrb[26].mxu0  ;;  %v20049_v14 = vld [vmem:[#allocation6_spill] sm:$0xff]  ;;  %v20051_v45 = vld [vmem:[#allocation37_spill] sm:$0xff] }
 0x874   :  { %v7644_v38 = vpack.c.bf16 %v7637_v26, %v7636_v54  ;;  %v7568_v24 = vmax.f32 %v20046_v11, %v7558_v49  ;;  %9470 = vmatpush1.bf16.msra.mxu1 %v9061_v51  ;;  %v7559_v28 = vmax.f32 %v20047_v39, %v7530_v37  ;;  %v8264_v46 = vpop.f32.mrb[26].mxu1  ;;  %v7532_v20 = vpop.f32.mrb[27].mxu0  ;;  %8787 = vmatprep.subr.bf16.mxu0 %v19868_v32  ;;  %v20063_v26 = vld [vmem:[#allocation42_spill] sm:$0xff]  ;;  %v20067_v51 = vld [vmem:[#allocation40_spill] sm:$0xff] }
 0x875   :  { %v8328_v7 = vpack.c.bf16 %v8321_v13, %v8320_v18  ;;  %v20050_v17 = vmax.f32 %v20048_v15, %v20049_v14  ;;  %v8293_v3 = vmax.f32 %v20051_v45, %v8264_v46  ;;  %v8266_v9 = vpop.f32.mrb[27].mxu1  ;;  %9471 = vmatprep.subr.bf16.mxu1 %v19868_v32  ;;  %v9063_v49 = vld [vmem:[#allocation2 + $0x2c0] sm:$0xff]  ;;  %v20064_v18 = vld [vmem:[#allocation13_spill] sm:$0xff]  ;;  %v20068_v39 = vld [vmem:[#allocation20_spill] sm:$0xff] }
 0x876   :  { %7649 = vst.msk [vmem:[#allocation3 + $0x10] sm:$0xff] %vm988_vm2, %v7644_v38  ;;  %v7628_v59 = vadd.f32 %v20052_v63, %v7568_v24  ;;  %v7569_v62 = vmax.f32 %v20055_v53, %v7559_v28  ;;  %8647 = vmatmul.mubr.bf16.gmra.mrb[52].mxu0 %v12290_v27  ;;  %v20065_v13 = vld [vmem:[#allocation57_spill] sm:$0xff]  ;;  %v20069_v28 = vld [vmem:[#allocation14_spill] sm:$0xff]  ;;  %v20073_v45 = vld [vmem:[#allocation24_spill] sm:$0xff] }
 0x877   :  { %v8302_v4 = vmax.f32 %v20050_v17, %v8292_v61  ;;  %8333 = vst.msk [vmem:[#allocation3 + $0x38] sm:$0xff] %vm988_vm2, %v8328_v7  ;;  %v8303_v48 = vmax.f32 %v20058_v12, %v8293_v3  ;;  %8788 = vmatpush1.bf16.msra.mxu0 %v20059_v50  ;;  %9331 = vmatmul.mubr.bf16.gmra.mrb[52].mxu1 %v12290_v27  ;;  %v20071_v7 = vld [vmem:[#allocation26_spill] sm:$0xff]  ;;  %v20076_v53 = vld [vmem:[#allocation55_spill] sm:$0xff]  ;;  %v12293_v19 = vld [vmem:[%s18896_s3 + $0x15c] ss:$24 sps:$4 sm:$0xff]  }
 0x878   :  { %v7629_v41 = vadd.f32 %v20060_v57, %v7569_v62  ;;  %9472 = vmatpush1.bf16.msra.mxu1 %v9062_v5  ;;  %8789 = vmatprep.subr.bf16.mxu0 %v19868_v32  ;;  %v7638_v29 = vmax.f32 %v7628_v59, 0.0  ;;  %v20066_v61 = vmax.f32 %v20064_v18, %v20065_v13  ;;  %v20070_v46 = vmax.f32 %v20068_v39, %v20069_v28  ;;  %v12292_v59 = vld [vmem:[%s18896_s3 + $0x128] ss:$24 sps:$4 sm:$0xff]   ;;  %v12309_v18 = vld [vmem:[%s18896_s3 + $0x2dc] ss:$24 sps:$4 sm:$0xff]  }
 0x879   :  { %v8312_v56 = vadd.f32 %v8302_v4, %v20052_v63  ;;  %v8313_v30 = vadd.f32 %v8303_v48, %v20060_v57  ;;  %v7535_v43 = vpop.f32.mrb[28].mxu0  ;;  %9473 = vmatprep.subr.bf16.mxu1 %v19868_v32  ;;  %8654 = vmatprep.mubr.bf16.mxu0 %v12291_v22  ;;  %v20072_v4 = vld [vmem:[#allocation51_spill] sm:$0xff]  ;;  %v12310_v13 = vld [vmem:[%s18896_s3 + $0x2d8] ss:$24 sps:$4 sm:$0xff]  }
 0x87a   :  { %v7639_v8 = vmax.f32 %v7629_v41, 0.0  ;;  %v7560_v42 = vmax.f32 %v20061_v44, %v7535_v43  ;;  %v8269_v34 = vpop.f32.mrb[28].mxu1  ;;  %v7537_v16 = vpop.f32.mrb[29].mxu0  ;;  %9338 = vmatprep.mubr.bf16.mxu1 %v12291_v22  ;;  %v20074_v3 = vmax.f32 %v20072_v4, %v20073_v45  ;;  %v20078_v27 = vld [vmem:[#allocation43_spill] sm:$0xff]  ;;  %v12294_v22 = vld [vmem:[%s18896_s3 + $0x158] ss:$24 sps:$4 sm:$0xff]  }
 0x87b   :  { %v8322_v47 = vmax.f32 %v8312_v56, 0.0  ;;  %v8323_v55 = vmax.f32 %v8313_v30, 0.0  ;;  %v8294_v52 = vmax.f32 %v20062_v0, %v8269_v34  ;;  %v8271_v54 = vpop.f32.mrb[29].mxu1  ;;  %8790 = vmatpush1.bf16.msra.mxu0 %v20063_v26  ;;  %v7538_v2 = vpop.f32.mrb[30].mxu0  ;;  %v9064_v56 = vld [vmem:[#allocation2 + $0x2c8] sm:$0xff] }
 0x87c   :  { %v7645_v40 = vpack.c.bf16 %v7639_v8, %v7638_v29  ;;  %v7570_v6 = vmax.f32 %v20066_v61, %v7560_v42  ;;  %9474 = vmatpush1.bf16.msra.mxu1 %v9063_v49  ;;  %v7561_v37 = vmax.f32 %v20067_v51, %v7538_v2  ;;  %v8272_v38 = vpop.f32.mrb[30].mxu1  ;;  %v7540_v11 = vpop.f32.mrb[31].mxu0  ;;  %8791 = vmatprep.subr.bf16.mxu0 %v19868_v32  ;;  %v12295_v8 = vld [vmem:[%s18896_s3 + $0x18c] ss:$24 sps:$4 sm:$0xff]   ;;  %v12296_v44 = vld [vmem:[%s18896_s3 + $0x188] ss:$24 sps:$4 sm:$0xff]  }
 0x87d   :  { %v8329_v24 = vpack.c.bf16 %v8323_v55, %v8322_v47  ;;  %v8304_v20 = vmax.f32 %v20070_v46, %v8294_v52  ;;  %v8295_v15 = vmax.f32 %v20071_v7, %v8272_v38  ;;  %v8274_v14 = vpop.f32.mrb[31].mxu1  ;;  %9475 = vmatprep.subr.bf16.mxu1 %v19868_v32  ;;  %v20077_v32 = vmax.f32 %v20075_v36, %v20076_v53  ;;  %v12297_v42 = vld [vmem:[%s18896_s3 + $0x1bc] ss:$24 sps:$4 sm:$0xff]   ;;  %v12298_v34 = vld [vmem:[%s18896_s3 + $0x1b8] ss:$24 sps:$4 sm:$0xff]  }
 0x87e   :  { %7650 = vst.msk [vmem:[#allocation3 + $0x18] sm:$0xff] %vm988_vm2, %v7645_v40  ;;  %v7630_v17 = vadd.f32 %v18185_v31, %v7570_v6  ;;  %v7571_v9 = vmax.f32 %v20074_v3, %v7561_v37  ;;  %8655 = vmatmul.mubr.bf16.gmra.mrb[56].mxu0 %v12292_v59  ;;  %v12299_v16 = vld [vmem:[%s18896_s3 + $0x1ec] ss:$24 sps:$4 sm:$0xff]   ;;  %v12300_v47 = vld [vmem:[%s18896_s3 + $0x1e8] ss:$24 sps:$4 sm:$0xff]   ;;  %v9719_v14 = vld [vmem:[#allocation3 + $0x8] sm:$0xff] }
 0x87f   :  { %8334 = vst.msk [vmem:[#allocation3 + $0x40] sm:$0xff] %vm988_vm2, %v8329_v24  ;;  %v8314_v35 = vadd.f32 %v8304_v20, %v18185_v31  ;;  %v8305_v62 = vmax.f32 %v20077_v32, %v8295_v15  ;;  %8792 = vmatpush1.bf16.msra.mxu0 %v20078_v27  ;;  %9339 = vmatmul.mubr.bf16.gmra.mrb[56].mxu1 %v12292_v59  ;;  %v12301_v55 = vld [vmem:[%s18896_s3 + $0x21c] ss:$24 sps:$4 sm:$0xff]   ;;  %v12302_v0 = vld [vmem:[%s18896_s3 + $0x218] ss:$24 sps:$4 sm:$0xff]  }
 0x880   :  { %v7631_v21 = vadd.f32 %v18194_v58, %v7571_v9  ;;  %9476 = vmatpush1.bf16.msra.mxu1 %v9064_v56  ;;  %8662 = vmatprep.mubr.bf16.mxu0 %v12293_v19  ;;  %v7640_v48 = vmax.f32 %v7630_v17, 0.0  ;;  %v12303_v52 = vld [vmem:[%s18896_s3 + $0x24c] ss:$24 sps:$4 sm:$0xff]   ;;  %v12304_v54 = vld [vmem:[%s18896_s3 + $0x248] ss:$24 sps:$4 sm:$0xff]   ;;  %v9718_v20 = vld [vmem:[#allocation3] sm:$0xff] }
 0x881   :  { %v8315_v12 = vadd.f32 %v8305_v62, %v18194_v58  ;;  %9346 = vmatprep.mubr.bf16.mxu1 %v12293_v19  ;;  %v8324_v5 = vmax.f32 %v8314_v35, 0.0  ;;  %v12305_v26 = vld [vmem:[%s18896_s3 + $0x27c] ss:$24 sps:$4 sm:$0xff]   ;;  %v12306_v49 = vld [vmem:[%s18896_s3 + $0x278] ss:$24 sps:$4 sm:$0xff]  }
 0x882   :  { %v7641_v50 = vmax.f32 %v7631_v21, 0.0  ;;  %v12307_v2 = vld [vmem:[%s18896_s3 + $0x2ac] ss:$24 sps:$4 sm:$0xff]   ;;  %v12308_v40 = vld [vmem:[%s18896_s3 + $0x2a8] ss:$24 sps:$4 sm:$0xff]  }
 0x883   :  { %v8325_v41 = vmax.f32 %v8315_v12, 0.0  ;;  %v12311_v61 = vld [vmem:[%s18896_s3 + $0x30c] ss:$24 sps:$4 sm:$0xff]   ;;  %v12312_v6 = vld [vmem:[%s18896_s3 + $0x308] ss:$24 sps:$4 sm:$0xff]  }
 0x884   :  { %v7646_v30 = vpack.c.bf16 %v7641_v50, %v7640_v48  ;;  %v12313_v51 = vld [vmem:[%s18896_s3 + $0x33c] ss:$24 sps:$4 sm:$0xff]   ;;  %v12314_v37 = vld [vmem:[%s18896_s3 + $0x338] ss:$24 sps:$4 sm:$0xff]   ;;  %v12315_v38 = vld [vmem:[%s18896_s3 + $0x36c] ss:$24 sps:$4 sm:$0xff]  }
 0x885   :  { %v8330_v43 = vpack.c.bf16 %v8325_v41, %v8324_v5  ;;  %v12316_v11 = vld [vmem:[%s18896_s3 + $0x368] ss:$24 sps:$4 sm:$0xff]   ;;  %v12317_v24 = vld [vmem:[%s18896_s3 + $0x39c] ss:$24 sps:$4 sm:$0xff]   ;;  %v12318_v39 = vld [vmem:[%s18896_s3 + $0x398] ss:$24 sps:$4 sm:$0xff]  }
 0x886   :  { %7651 = vst.msk [vmem:[#allocation3 + $0x20] sm:$0xff] %vm988_vm2, %v7646_v30  ;;  %8663 = vmatmul.mubr.bf16.gmra.mrb[60].mxu0 %v12294_v22  ;;  %v9726_v29 = vld [vmem:[#allocation3 + $0x40] sm:$0xff]  ;;  %v12321_v15 = vld [vmem:[%s18896_s3 + $0x44] ss:$24 sps:$4 sm:$0xff]   ;;  %v12322_v17 = vld [vmem:[%s18896_s3 + $0x40] ss:$24 sps:$4 sm:$0xff]  }
 0x887   :  { %8335 = vst.msk [vmem:[#allocation3 + $0x48] sm:$0xff] %vm988_vm2, %v8330_v43  ;;  %9347 = vmatmul.mubr.bf16.gmra.mrb[60].mxu1 %v12294_v22  ;;  %10831 = vmatprep.subr.bf16.mxu0 %v9726_v29  ;;  %v12319_v28 = vld [vmem:[%s18896_s3 + $0x14] ss:$24 sps:$4 sm:$0xff]   ;;  %v12320_v46 = vld [vmem:[%s18896_s3 + $0x10] ss:$24 sps:$4 sm:$0xff]  }
 0x888   :  { %8670 = vmatprep.mubr.bf16.mxu0 %v12295_v8  ;;  %9354 = vmatprep.mubr.bf16.mxu1 %v12295_v8  ;;  %v12323_v4 = vld [vmem:[%s18896_s3 + $0x74] ss:$24 sps:$4 sm:$0xff]   ;;  %v12324_v45 = vld [vmem:[%s18896_s3 + $0x70] ss:$24 sps:$4 sm:$0xff]   ;;  %v12325_v3 = vld [vmem:[%s18896_s3 + $0xa4] ss:$24 sps:$4 sm:$0xff]  }
 0x889   :  { %v12326_v9 = vld [vmem:[%s18896_s3 + $0xa0] ss:$24 sps:$4 sm:$0xff]   ;;  %v12327_v59 = vld [vmem:[%s18896_s3 + $0xd4] ss:$24 sps:$4 sm:$0xff]   ;;  %v12328_v35 = vld [vmem:[%s18896_s3 + $0xd0] ss:$24 sps:$4 sm:$0xff]  }
 0x88a   :  { %v12329_v36 = vld [vmem:[%s18896_s3 + $0x104] ss:$24 sps:$4 sm:$0xff]   ;;  %v12330_v53 = vld [vmem:[%s18896_s3 + $0x100] ss:$24 sps:$4 sm:$0xff]   ;;  %v12331_v32 = vld [vmem:[%s18896_s3 + $0x134] ss:$24 sps:$4 sm:$0xff]  }
 0x88b   :  { %v12332_v62 = vld [vmem:[%s18896_s3 + $0x130] ss:$24 sps:$4 sm:$0xff]   ;;  %v12333_v27 = vld [vmem:[%s18896_s3 + $0x164] ss:$24 sps:$4 sm:$0xff]   ;;  %v12334_v56 = vld [vmem:[%s18896_s3 + $0x160] ss:$24 sps:$4 sm:$0xff]  }
 0x88c   :  { %v12335_v21 = vld [vmem:[%s18896_s3 + $0x194] ss:$24 sps:$4 sm:$0xff]   ;;  %v12336_v19 = vld [vmem:[%s18896_s3 + $0x190] ss:$24 sps:$4 sm:$0xff]   ;;  %v12337_v12 = vld [vmem:[%s18896_s3 + $0x1c4] ss:$24 sps:$4 sm:$0xff]  }
 0x88d   :  { %v12338_v48 = vld [vmem:[%s18896_s3 + $0x1c0] ss:$24 sps:$4 sm:$0xff]   ;;  %v12339_v50 = vld [vmem:[%s18896_s3 + $0x1f4] ss:$24 sps:$4 sm:$0xff]   ;;  %v12340_v5 = vld [vmem:[%s18896_s3 + $0x1f0] ss:$24 sps:$4 sm:$0xff]  }
 0x88e   :  { %8671 = vmatmul.mubr.bf16.gmra.mrb[64].mxu0 %v12296_v44  ;;  %v9727_v7 = vld [vmem:[#allocation3 + $0x48] sm:$0xff]  ;;  %v12343_v43 = vld [vmem:[%s18896_s3 + $0x254] ss:$24 sps:$4 sm:$0xff]   ;;  %v12344_v22 = vld [vmem:[%s18896_s3 + $0x250] ss:$24 sps:$4 sm:$0xff]  }
 0x88f   :  { %9355 = vmatmul.mubr.bf16.gmra.mrb[64].mxu1 %v12296_v44  ;;  %8678 = vmatprep.mubr.bf16.mxu0 %v12297_v42  ;;  %v12341_v41 = vld [vmem:[%s18896_s3 + $0x224] ss:$24 sps:$4 sm:$0xff]   ;;  %v12342_v30 = vld [vmem:[%s18896_s3 + $0x220] ss:$24 sps:$4 sm:$0xff]   ;;  %v12347_v44 = vld [vmem:[%s18896_s3 + $0x2b4] ss:$24 sps:$4 sm:$0xff]  }
 0x890   :  { %9362 = vmatprep.mubr.bf16.mxu1 %v12297_v42  ;;  %v12345_v29 = vld [vmem:[%s18896_s3 + $0x284] ss:$24 sps:$4 sm:$0xff]   ;;  %v12346_v8 = vld [vmem:[%s18896_s3 + $0x280] ss:$24 sps:$4 sm:$0xff]   ;;  %v12348_v42 = vld [vmem:[%s18896_s3 + $0x2b0] ss:$24 sps:$4 sm:$0xff]  }
 0x896   :  { %8679 = vmatmul.mubr.bf16.gmra.mrb[68].mxu0 %v12298_v34 }
 0x897   :  { %9363 = vmatmul.mubr.bf16.gmra.mrb[68].mxu1 %v12298_v34  ;;  %8686 = vmatprep.mubr.bf16.mxu0 %v12299_v16  ;;  %v12349_v34 = vld [vmem:[%s18896_s3 + $0x2e4] ss:$24 sps:$4 sm:$0xff]  }
 0x898   :  { %9370 = vmatprep.mubr.bf16.mxu1 %v12299_v16  ;;  %v12350_v16 = vld [vmem:[%s18896_s3 + $0x2e0] ss:$24 sps:$4 sm:$0xff]  }
 0x89e   :  { %8687 = vmatmul.mubr.bf16.gmra.mrb[72].mxu0 %v12300_v47 }
 0x89f   :  { %9371 = vmatmul.mubr.bf16.gmra.mrb[72].mxu1 %v12300_v47  ;;  %8694 = vmatprep.mubr.bf16.mxu0 %v12301_v55  ;;  %v12351_v47 = vld [vmem:[%s18896_s3 + $0x314] ss:$24 sps:$4 sm:$0xff]  }
 0x8a0   :  { %9378 = vmatprep.mubr.bf16.mxu1 %v12301_v55  ;;  %v12352_v55 = vld [vmem:[%s18896_s3 + $0x310] ss:$24 sps:$4 sm:$0xff]  }
 0x8a6   :  { %8695 = vmatmul.mubr.bf16.gmra.mrb[76].mxu0 %v12302_v0 }
 0x8a7   :  { %9379 = vmatmul.mubr.bf16.gmra.mrb[76].mxu1 %v12302_v0  ;;  %8702 = vmatprep.mubr.bf16.mxu0 %v12303_v52  ;;  %v12353_v0 = vld [vmem:[%s18896_s3 + $0x344] ss:$24 sps:$4 sm:$0xff]  }
 0x8a8   :  { %9386 = vmatprep.mubr.bf16.mxu1 %v12303_v52  ;;  %v12354_v52 = vld [vmem:[%s18896_s3 + $0x340] ss:$24 sps:$4 sm:$0xff]  }
 0x8ae   :  { %8703 = vmatmul.mubr.bf16.gmra.mrb[80].mxu0 %v12304_v54 }
 0x8af   :  { %9387 = vmatmul.mubr.bf16.gmra.mrb[80].mxu1 %v12304_v54  ;;  %8710 = vmatprep.mubr.bf16.mxu0 %v12305_v26  ;;  %v12355_v54 = vld [vmem:[%s18896_s3 + $0x374] ss:$24 sps:$4 sm:$0xff]  }
 0x8b0   :  { %9394 = vmatprep.mubr.bf16.mxu1 %v12305_v26  ;;  %v12356_v26 = vld [vmem:[%s18896_s3 + $0x370] ss:$24 sps:$4 sm:$0xff]  }
 0x8b6   :  { %8711 = vmatmul.mubr.bf16.gmra.mrb[84].mxu0 %v12306_v49 }
 0x8b7   :  { %9395 = vmatmul.mubr.bf16.gmra.mrb[84].mxu1 %v12306_v49  ;;  %8718 = vmatprep.mubr.bf16.mxu0 %v12307_v2  ;;  %v12357_v49 = vld [vmem:[%s18896_s3 + $0x3a4] ss:$24 sps:$4 sm:$0xff]  }
 0x8b8   :  { %9402 = vmatprep.mubr.bf16.mxu1 %v12307_v2  ;;  %v12358_v2 = vld [vmem:[%s18896_s3 + $0x3a0] ss:$24 sps:$4 sm:$0xff]  }
 0x8be   :  { %8719 = vmatmul.mubr.bf16.gmra.mrb[88].mxu0 %v12308_v40 }
 0x8bf   :  { %9403 = vmatmul.mubr.bf16.gmra.mrb[88].mxu1 %v12308_v40  ;;  %8726 = vmatprep.mubr.bf16.mxu0 %v12309_v18 }
 0x8c0   :  { %9410 = vmatprep.mubr.bf16.mxu1 %v12309_v18 }
 0x8c6   :  { %8727 = vmatmul.mubr.bf16.gmra.mrb[92].mxu0 %v12310_v13 }
 0x8c7   :  { %9411 = vmatmul.mubr.bf16.gmra.mrb[92].mxu1 %v12310_v13  ;;  %8734 = vmatprep.mubr.bf16.mxu0 %v12311_v61 }
 0x8c8   :  { %9418 = vmatprep.mubr.bf16.mxu1 %v12311_v61 }
 0x8ce   :  { %8735 = vmatmul.mubr.bf16.gmra.mrb[96].mxu0 %v12312_v6 }
 0x8cf   :  { %9419 = vmatmul.mubr.bf16.gmra.mrb[96].mxu1 %v12312_v6  ;;  %8742 = vmatprep.mubr.bf16.mxu0 %v12313_v51 }
 0x8d0   :  { %9426 = vmatprep.mubr.bf16.mxu1 %v12313_v51 }
 0x8d6   :  { %8743 = vmatmul.mubr.bf16.gmra.mrb[100].mxu0 %v12314_v37 }
 0x8d7   :  { %9427 = vmatmul.mubr.bf16.gmra.mrb[100].mxu1 %v12314_v37  ;;  %8750 = vmatprep.mubr.bf16.mxu0 %v12315_v38 }
 0x8d8   :  { %9434 = vmatprep.mubr.bf16.mxu1 %v12315_v38 }
 0x8de   :  { %8751 = vmatmul.mubr.bf16.gmra.mrb[104].mxu0 %v12316_v11 }
 0x8df   :  { %9435 = vmatmul.mubr.bf16.gmra.mrb[104].mxu1 %v12316_v11  ;;  %8758 = vmatprep.mubr.bf16.mxu0 %v12317_v24 }
 0x8e0   :  { %9442 = vmatprep.mubr.bf16.mxu1 %v12317_v24 }
 0x8e6   :  { %8759 = vmatmul.mubr.bf16.gmra.mrb[108].mxu0 %v12318_v39 }
 0x8e7   :  { %9443 = vmatmul.mubr.bf16.gmra.mrb[108].mxu1 %v12318_v39  ;;  %10773 = vmatprep.mubr.msk.bf16.mxu0 %vm6902_vm5, %v12319_v28 }
 0x8e8   :  { %10793 = vmatprep.mubr.msk.bf16.mxu1 %vm6902_vm5, %v12319_v28 }
 0x8ee   :  { %8800 = vmatmul.mubr.bf16.vlgmr.msra.gmra.mrb[32].mxu0 %v12320_v46 }
 0x8ef   :  { %9484 = vmatmul.mubr.bf16.vlgmr.msra.gmra.mrb[32].mxu1 %v12320_v46  ;;  %10832 = vmatpush3.bf16.msra.mxu0 %v9718_v20 }
 0x8f0   :  { %10833 = vmatprep.subr.bf16.mxu0 %v9727_v7  ;;  %10774 = vmatprep.mubr.msk.bf16.mxu0 %vm6902_vm5, %v12321_v15 }
 0x8f1   :  { %10794 = vmatprep.mubr.msk.bf16.mxu1 %vm6902_vm5, %v12321_v15 }
 0x8f3   :  { %10834 = vmatpush3.bf16.msra.mxu0 %v9719_v14 }
 0x8f6   :  { %8808 = vmatmul.mubr.bf16.gmra.mrb[36].mxu0 %v12322_v17 }
 0x8f7   :  { %9492 = vmatmul.mubr.bf16.gmra.mrb[36].mxu1 %v12322_v17  ;;  %10775 = vmatprep.mubr.msk.bf16.mxu0 %vm6902_vm5, %v12323_v4 }
 0x8f8   :  { %10795 = vmatprep.mubr.msk.bf16.mxu1 %vm6902_vm5, %v12323_v4 }
 0x8fe   :  { %8816 = vmatmul.mubr.bf16.gmra.mrb[40].mxu0 %v12324_v45 }
 0x8ff   :  { %9500 = vmatmul.mubr.bf16.gmra.mrb[40].mxu1 %v12324_v45  ;;  %10776 = vmatprep.mubr.msk.bf16.mxu0 %vm6902_vm5, %v12325_v3 }
 0x900   :  { %10796 = vmatprep.mubr.msk.bf16.mxu1 %vm6902_vm5, %v12325_v3 }
 0x906   :  { %8824 = vmatmul.mubr.bf16.gmra.mrb[44].mxu0 %v12326_v9 }
 0x907   :  { %9508 = vmatmul.mubr.bf16.gmra.mrb[44].mxu1 %v12326_v9  ;;  %10777 = vmatprep.mubr.msk.bf16.mxu0 %vm6902_vm5, %v12327_v59 }
 0x908   :  { %10797 = vmatprep.mubr.msk.bf16.mxu1 %vm6902_vm5, %v12327_v59 }
 0x90e   :  { %8832 = vmatmul.mubr.bf16.gmra.mrb[48].mxu0 %v12328_v35 }
 0x90f   :  { %9516 = vmatmul.mubr.bf16.gmra.mrb[48].mxu1 %v12328_v35  ;;  %10778 = vmatprep.mubr.msk.bf16.mxu0 %vm6902_vm5, %v12329_v36 }
 0x910   :  { %10798 = vmatprep.mubr.msk.bf16.mxu1 %vm6902_vm5, %v12329_v36 }
 0x916   :  { %8840 = vmatmul.mubr.bf16.gmra.mrb[52].mxu0 %v12330_v53 }
 0x917   :  { %9524 = vmatmul.mubr.bf16.gmra.mrb[52].mxu1 %v12330_v53  ;;  %10779 = vmatprep.mubr.msk.bf16.mxu0 %vm6902_vm5, %v12331_v32 }
 0x918   :  { %10799 = vmatprep.mubr.msk.bf16.mxu1 %vm6902_vm5, %v12331_v32 }
 0x91e   :  { %8848 = vmatmul.mubr.bf16.gmra.mrb[56].mxu0 %v12332_v62 }
 0x91f   :  { %9532 = vmatmul.mubr.bf16.gmra.mrb[56].mxu1 %v12332_v62  ;;  %10780 = vmatprep.mubr.msk.bf16.mxu0 %vm6902_vm5, %v12333_v27 }
 0x920   :  { %10800 = vmatprep.mubr.msk.bf16.mxu1 %vm6902_vm5, %v12333_v27 }
 0x926   :  { %8856 = vmatmul.mubr.bf16.gmra.mrb[60].mxu0 %v12334_v56 }
 0x927   :  { %9540 = vmatmul.mubr.bf16.gmra.mrb[60].mxu1 %v12334_v56  ;;  %10781 = vmatprep.mubr.msk.bf16.mxu0 %vm6902_vm5, %v12335_v21 }
 0x928   :  { %10801 = vmatprep.mubr.msk.bf16.mxu1 %vm6902_vm5, %v12335_v21 }
 0x92e   :  { %8864 = vmatmul.mubr.bf16.gmra.mrb[64].mxu0 %v12336_v19 }
 0x92f   :  { %9548 = vmatmul.mubr.bf16.gmra.mrb[64].mxu1 %v12336_v19  ;;  %10782 = vmatprep.mubr.msk.bf16.mxu0 %vm6902_vm5, %v12337_v12 }
 0x930   :  { %10802 = vmatprep.mubr.msk.bf16.mxu1 %vm6902_vm5, %v12337_v12 }
 0x936   :  { %8872 = vmatmul.mubr.bf16.gmra.mrb[68].mxu0 %v12338_v48 }
 0x937   :  { %9556 = vmatmul.mubr.bf16.gmra.mrb[68].mxu1 %v12338_v48  ;;  %10783 = vmatprep.mubr.msk.bf16.mxu0 %vm6902_vm5, %v12339_v50 }
 0x938   :  { %10803 = vmatprep.mubr.msk.bf16.mxu1 %vm6902_vm5, %v12339_v50 }
 0x93e   :  { %8880 = vmatmul.mubr.bf16.gmra.mrb[72].mxu0 %v12340_v5 }
 0x93f   :  { %9564 = vmatmul.mubr.bf16.gmra.mrb[72].mxu1 %v12340_v5  ;;  %10784 = vmatprep.mubr.msk.bf16.mxu0 %vm6902_vm5, %v12341_v41 }
 0x940   :  { %10804 = vmatprep.mubr.msk.bf16.mxu1 %vm6902_vm5, %v12341_v41 }
 0x946   :  { %8888 = vmatmul.mubr.bf16.gmra.mrb[76].mxu0 %v12342_v30 }
 0x947   :  { %9572 = vmatmul.mubr.bf16.gmra.mrb[76].mxu1 %v12342_v30  ;;  %10785 = vmatprep.mubr.msk.bf16.mxu0 %vm6902_vm5, %v12343_v43 }
 0x948   :  { %10805 = vmatprep.mubr.msk.bf16.mxu1 %vm6902_vm5, %v12343_v43 }
 0x94e   :  { %8896 = vmatmul.mubr.bf16.gmra.mrb[80].mxu0 %v12344_v22 }
 0x94f   :  { %9580 = vmatmul.mubr.bf16.gmra.mrb[80].mxu1 %v12344_v22  ;;  %10786 = vmatprep.mubr.msk.bf16.mxu0 %vm6902_vm5, %v12345_v29 }
 0x950   :  { %10806 = vmatprep.mubr.msk.bf16.mxu1 %vm6902_vm5, %v12345_v29 }
 0x956   :  { %8904 = vmatmul.mubr.bf16.gmra.mrb[84].mxu0 %v12346_v8 }
 0x957   :  { %9588 = vmatmul.mubr.bf16.gmra.mrb[84].mxu1 %v12346_v8  ;;  %10787 = vmatprep.mubr.msk.bf16.mxu0 %vm6902_vm5, %v12347_v44 }
 0x958   :  { %10807 = vmatprep.mubr.msk.bf16.mxu1 %vm6902_vm5, %v12347_v44 }
 0x95e   :  { %8912 = vmatmul.mubr.bf16.gmra.mrb[88].mxu0 %v12348_v42 }
 0x95f   :  { %9596 = vmatmul.mubr.bf16.gmra.mrb[88].mxu1 %v12348_v42  ;;  %10788 = vmatprep.mubr.msk.bf16.mxu0 %vm6902_vm5, %v12349_v34 }
 0x960   :  { %10808 = vmatprep.mubr.msk.bf16.mxu1 %vm6902_vm5, %v12349_v34 }
 0x966   :  { %8920 = vmatmul.mubr.bf16.gmra.mrb[92].mxu0 %v12350_v16 }
 0x967   :  { %9604 = vmatmul.mubr.bf16.gmra.mrb[92].mxu1 %v12350_v16  ;;  %10789 = vmatprep.mubr.msk.bf16.mxu0 %vm6902_vm5, %v12351_v47 }
 0x968   :  { %10809 = vmatprep.mubr.msk.bf16.mxu1 %vm6902_vm5, %v12351_v47 }
 0x96e   :  { %8928 = vmatmul.mubr.bf16.gmra.mrb[96].mxu0 %v12352_v55 }
 0x96f   :  { %9612 = vmatmul.mubr.bf16.gmra.mrb[96].mxu1 %v12352_v55  ;;  %10790 = vmatprep.mubr.msk.bf16.mxu0 %vm6902_vm5, %v12353_v0 }
 0x970   :  { %10810 = vmatprep.mubr.msk.bf16.mxu1 %vm6902_vm5, %v12353_v0 }
 0x976   :  { %8936 = vmatmul.mubr.bf16.gmra.mrb[100].mxu0 %v12354_v52 }
 0x977   :  { %9620 = vmatmul.mubr.bf16.gmra.mrb[100].mxu1 %v12354_v52  ;;  %10791 = vmatprep.mubr.msk.bf16.mxu0 %vm6902_vm5, %v12355_v54 }
 0x978   :  { %10811 = vmatprep.mubr.msk.bf16.mxu1 %vm6902_vm5, %v12355_v54 }
 0x97e   :  { %8944 = vmatmul.mubr.bf16.gmra.mrb[104].mxu0 %v12356_v26 }
 0x97f   :  { %9628 = vmatmul.mubr.bf16.gmra.mrb[104].mxu1 %v12356_v26  ;;  %10792 = vmatprep.mubr.msk.bf16.mxu0 %vm6902_vm5, %v12357_v49 }
 0x980   :  { %10812 = vmatprep.mubr.msk.bf16.mxu1 %vm6902_vm5, %v12357_v49 }
 0x986   :  { %8952 = vmatmul.mubr.bf16.gmra.mrb[108].mxu0 %v12358_v2 }
 0x987   :  { %9636 = vmatmul.mubr.bf16.gmra.mrb[108].mxu1 %v12358_v2 }
 0x9c1   :  { %v18580_v40 = vpop.f32.mrb[32].mxu0 }
 0x9c2   :  { %v18582_v18 = vpop.f32.mrb[32].mxu1  ;;  %v8803_v13 = vpop.f32.mrb[33].mxu0 }
 0x9c3   :  { %v9487_v61 = vpop.f32.mrb[33].mxu1  ;;  %v18584_v6 = vpop.f32.mrb[34].mxu0 }
 0x9c4   :  { %v18586_v51 = vpop.f32.mrb[34].mxu1  ;;  %v8806_v37 = vpop.f32.mrb[35].mxu0 }
 0x9c5   :  { %v9490_v38 = vpop.f32.mrb[35].mxu1 }
 0x9c9   :  { %v18588_v11 = vpop.f32.mrb[36].mxu0 }
 0x9ca   :  { %v18590_v24 = vpop.f32.mrb[36].mxu1  ;;  %v8811_v39 = vpop.f32.mrb[37].mxu0 }
 0x9cb   :  { %v9495_v28 = vpop.f32.mrb[37].mxu1  ;;  %v18592_v46 = vpop.f32.mrb[38].mxu0 }
 0x9cc   :  { %v18594_v20 = vpop.f32.mrb[38].mxu1  ;;  %v8814_v7 = vpop.f32.mrb[39].mxu0 }
 0x9cd   :  { %v9498_v15 = vpop.f32.mrb[39].mxu1 }
 0x9d1   :  { %v18596_v14 = vpop.f32.mrb[40].mxu0 }
 0x9d2   :  { %v18598_v17 = vpop.f32.mrb[40].mxu1  ;;  %v8819_v4 = vpop.f32.mrb[41].mxu0 }
 0x9d3   :  { %v9503_v45 = vpop.f32.mrb[41].mxu1  ;;  %v18600_v3 = vpop.f32.mrb[42].mxu0 }
 0x9d4   :  { %v18602_v9 = vpop.f32.mrb[42].mxu1  ;;  %v8822_v59 = vpop.f32.mrb[43].mxu0 }
 0x9d5   :  { %v9506_v35 = vpop.f32.mrb[43].mxu1  ;;  %v11961_v59 = vld [vmem:[%s18897_s5 + $0x4] ss:$12 sps:$4 sm:$0xff]  }
 0x9d6   :  { %v11962_v35 = vld [vmem:[%s18897_s5 + $0x8] ss:$12 sps:$4 sm:$0xff]   ;;  %9879 = vmatprep.mubr.bf16.mxu0 %v11961_v59 }
 0x9d7   :  { %10892 = vmatprep.mubr.msk.bf16.mxu1 %vm988_vm2, %v11962_v35 }
 0x9d9   :  { %v18604_v36 = vpop.f32.mrb[44].mxu0 }
 0x9da   :  { %v18606_v53 = vpop.f32.mrb[44].mxu1  ;;  %v8827_v32 = vpop.f32.mrb[45].mxu0 }
 0x9db   :  { %v9511_v62 = vpop.f32.mrb[45].mxu1  ;;  %v18608_v27 = vpop.f32.mrb[46].mxu0 }
 0x9dc   :  { %20079 = vst [vmem:[#allocation28_spill] sm:$0xff] %v18608_v27  ;;  %v18610_v56 = vpop.f32.mrb[46].mxu1  ;;  %v8830_v21 = vpop.f32.mrb[47].mxu0 }
 0x9dd   :  { %20080 = vst [vmem:[#allocation39_spill] sm:$0xff] %v18610_v56  ;;  %v9514_v19 = vpop.f32.mrb[47].mxu1 }
 0x9e1   :  { %v18612_v12 = vpop.f32.mrb[48].mxu0 }
 0x9e2   :  { %20081 = vst [vmem:[#allocation8_spill] sm:$0xff] %v18612_v12  ;;  %v18614_v48 = vpop.f32.mrb[48].mxu1  ;;  %v8835_v50 = vpop.f32.mrb[49].mxu0 }
 0x9e3   :  { %20082 = vst [vmem:[#allocation33_spill] sm:$0xff] %v18614_v48  ;;  %v9519_v5 = vpop.f32.mrb[49].mxu1  ;;  %v18616_v41 = vpop.f32.mrb[50].mxu0 }
 0x9e4   :  { %20083 = vst [vmem:[#allocation25_spill] sm:$0xff] %v18616_v41  ;;  %v18618_v30 = vpop.f32.mrb[50].mxu1  ;;  %v8838_v43 = vpop.f32.mrb[51].mxu0 }
 0x9e5   :  { %20084 = vst [vmem:[#allocation48_spill] sm:$0xff] %v18618_v30  ;;  %v9522_v22 = vpop.f32.mrb[51].mxu1 }
 0x9e9   :  { %v18620_v29 = vpop.f32.mrb[52].mxu0 }
 0x9ea   :  { %v18624_v44 = vpop.f32.mrb[52].mxu1  ;;  %v8843_v42 = vpop.f32.mrb[53].mxu0 }
 0x9eb   :  { %v9527_v16 = vpop.f32.mrb[53].mxu1  ;;  %v18628_v47 = vpop.f32.mrb[54].mxu0 }
 0x9ec   :  { %v18632_v0 = vpop.f32.mrb[54].mxu1  ;;  %v8846_v52 = vpop.f32.mrb[55].mxu0 }
 0x9ed   :  { %v9530_v26 = vpop.f32.mrb[55].mxu1 }
 0x9f1   :  { %v18636_v49 = vpop.f32.mrb[56].mxu0 }
 0x9f2   :  { %v18640_v13 = vpop.f32.mrb[56].mxu1  ;;  %v8851_v61 = vpop.f32.mrb[57].mxu0 }
 0x9f3   :  { %v9535_v38 = vpop.f32.mrb[57].mxu1  ;;  %v18644_v39 = vpop.f32.mrb[58].mxu0 }
 0x9f4   :  { %v18648_v7 = vpop.f32.mrb[58].mxu1  ;;  %v8854_v15 = vpop.f32.mrb[59].mxu0 }
 0x9f5   :  { %v9538_v45 = vpop.f32.mrb[59].mxu1 }
 0x9f9   :  { %v18659_v32 = vpop.f32.mrb[60].mxu0 }
 0x9fa   :  { %v18663_v21 = vpop.f32.mrb[60].mxu1  ;;  %v8859_v19 = vpop.f32.mrb[61].mxu0 }
 0x9fb   :  { %v9543_v5 = vpop.f32.mrb[61].mxu1  ;;  %v18667_v43 = vpop.f32.mrb[62].mxu0 }
 0x9fc   :  { %v18671_v42 = vpop.f32.mrb[62].mxu1  ;;  %v8862_v16 = vpop.f32.mrb[63].mxu0 }
 0x9fd   :  { %v9546_v26 = vpop.f32.mrb[63].mxu1 }
 0xa01   :  { %v18675_v61 = vpop.f32.mrb[64].mxu0 }
 0xa02   :  { %v18679_v15 = vpop.f32.mrb[64].mxu1  ;;  %v8867_v45 = vpop.f32.mrb[65].mxu0 }
 0xa03   :  { %20085 = vst [vmem:[#allocation31_spill] sm:$0xff] %v18679_v15  ;;  %v9551_v35 = vpop.f32.mrb[65].mxu1  ;;  %v18683_v19 = vpop.f32.mrb[66].mxu0 }
 0xa04   :  { %20086 = vst [vmem:[#allocation23_spill] sm:$0xff] %v18683_v19  ;;  %v18687_v16 = vpop.f32.mrb[66].mxu1  ;;  %v8870_v26 = vpop.f32.mrb[67].mxu0 }
 0xa05   :  { %20087 = vst [vmem:[#allocation38_spill] sm:$0xff] %v18687_v16  ;;  %v9554_v22 = vpop.f32.mrb[67].mxu1 }
 0xa09   :  { %v18691_v38 = vpop.f32.mrb[68].mxu0 }
 0xa0a   :  { %20088 = vst [vmem:[#allocation58_spill] sm:$0xff] %v18691_v38  ;;  %v18695_v50 = vpop.f32.mrb[68].mxu1  ;;  %v8875_v35 = vpop.f32.mrb[69].mxu0 }
 0xa0b   :  { %20089 = vst [vmem:[#allocation47_spill] sm:$0xff] %v18695_v50  ;;  %v9559_v62 = vpop.f32.mrb[69].mxu1  ;;  %v18699_v5 = vpop.f32.mrb[70].mxu0 }
 0xa0c   :  { %20090 = vst [vmem:[#allocation52_spill] sm:$0xff] %v18699_v5  ;;  %v18703_v4 = vpop.f32.mrb[70].mxu1  ;;  %v8878_v22 = vpop.f32.mrb[71].mxu0 }
 0xa0d   :  { %20091 = vst [vmem:[#allocation59_spill] sm:$0xff] %v18703_v4  ;;  %v9562_v28 = vpop.f32.mrb[71].mxu1 }
 0xa11   :  { %v8881_v45 = vpop.f32.mrb[72].mxu0 }
 0xa12   :  { %v9565_v37 = vpop.f32.mrb[72].mxu1  ;;  %v8883_v2 = vpop.f32.mrb[73].mxu0 }
 0xa13   :  { %v9567_v35 = vpop.f32.mrb[73].mxu1  ;;  %v8884_v54 = vpop.f32.mrb[74].mxu0 }
 0xa14   :  { %v9568_v55 = vpop.f32.mrb[74].mxu1  ;;  %v8886_v59 = vpop.f32.mrb[75].mxu0 }
 0xa15   :  { %v9570_v62 = vpop.f32.mrb[75].mxu1 }
 0xa19   :  { %v18707_v34 = vpop.f32.mrb[76].mxu0 }
 0xa1a   :  { %v18709_v8 = vpop.f32.mrb[76].mxu1  ;;  %v8891_v26 = vpop.f32.mrb[77].mxu0 }
 0xa1b   :  { %v9575_v58 = vpop.f32.mrb[77].mxu1  ;;  %v18711_v5 = vpop.f32.mrb[78].mxu0 }
 0xa1c   :  { %v18713_v22 = vpop.f32.mrb[78].mxu1  ;;  %v8894_v52 = vpop.f32.mrb[79].mxu0 }
 0xa1d   :  { %v9578_v28 = vpop.f32.mrb[79].mxu1 }
 0xa21   :  { %v18715_v4 = vpop.f32.mrb[80].mxu0 }
 0xa22   :  { %v18717_v2 = vpop.f32.mrb[80].mxu1  ;;  %v8899_v35 = vpop.f32.mrb[81].mxu0 }
 0xa23   :  { %v9583_v30 = vpop.f32.mrb[81].mxu1  ;;  %v18719_v59 = vpop.f32.mrb[82].mxu0 }
 0xa24   :  { %v18721_v62 = vpop.f32.mrb[82].mxu1  ;;  %v8902_v41 = vpop.f32.mrb[83].mxu0 }
 0xa25   :  { %v9586_v31 = vpop.f32.mrb[83].mxu1 }
 0xa29   :  { %v18723_v26 = vpop.f32.mrb[84].mxu0 }
 0xa2a   :  { %v18725_v58 = vpop.f32.mrb[84].mxu1  ;;  %v8907_v50 = vpop.f32.mrb[85].mxu0 }
 0xa2b   :  { %v9591_v48 = vpop.f32.mrb[85].mxu1  ;;  %v18727_v52 = vpop.f32.mrb[86].mxu0 }
 0xa2c   :  { %v18729_v28 = vpop.f32.mrb[86].mxu1  ;;  %v8910_v38 = vpop.f32.mrb[87].mxu0 }
 0xa2d   :  { %20092 = vst [vmem:[#allocation11_spill] sm:$0xff] %v18729_v28  ;;  %v9594_v12 = vpop.f32.mrb[87].mxu1 }
 0xa2e   :  { %v20097_v12 = vmax.f32 %v18580_v40, %v18620_v29  ;;  %v20100_v40 = vmax.f32 %v18586_v51, %v18632_v0  ;;  %v20101_v51 = vmax.f32 %v18588_v11, %v18636_v49  ;;  %v20103_v11 = vmax.f32 %v18592_v46, %v18644_v39 }
 0xa31   :  { %v18731_v35 = vpop.f32.mrb[88].mxu0 }
 0xa32   :  { %20093 = vst [vmem:[#allocation35_spill] sm:$0xff] %v18731_v35  ;;  %v18733_v30 = vpop.f32.mrb[88].mxu1  ;;  %v8915_v57 = vpop.f32.mrb[89].mxu0 }
 0xa33   :  { %20094 = vst [vmem:[#allocation34_spill] sm:$0xff] %v18733_v30  ;;  %v9599_v16 = vpop.f32.mrb[89].mxu1  ;;  %v18735_v41 = vpop.f32.mrb[90].mxu0 }
 0xa34   :  { %20095 = vst [vmem:[#allocation50_spill] sm:$0xff] %v18735_v41  ;;  %v18737_v31 = vpop.f32.mrb[90].mxu1  ;;  %v8918_v56 = vpop.f32.mrb[91].mxu0  ;;  %v20098_v41 = vmax.f32 %v18582_v18, %v18624_v44 }
 0xa35   :  { %20096 = vst [vmem:[#allocation45_spill] sm:$0xff] %v18737_v31  ;;  %v9602_v19 = vpop.f32.mrb[91].mxu1 }
 0xa39   :  { %v8921_v50 = vpop.f32.mrb[92].mxu0 }
 0xa3a   :  { %v8970_v48 = vmax.f32 %v8881_v45, %v8921_v50  ;;  %v9605_v27 = vpop.f32.mrb[92].mxu1  ;;  %v8923_v63 = vpop.f32.mrb[93].mxu0 }
 0xa3b   :  { %v9654_v15 = vmax.f32 %v9565_v37, %v9605_v27  ;;  %v9607_v28 = vpop.f32.mrb[93].mxu1  ;;  %v8924_v38 = vpop.f32.mrb[94].mxu0  ;;  %v20099_v63 = vmax.f32 %v18584_v6, %v18628_v47 }
 0xa3c   :  { %v8980_v35 = vmax.f32 %v20097_v12, %v8970_v48  ;;  %v8971_v30 = vmax.f32 %v8884_v54, %v8924_v38  ;;  %v9608_v57 = vpop.f32.mrb[94].mxu1  ;;  %v8926_v16 = vpop.f32.mrb[95].mxu0 }
 0xa3d   :  { %v9664_v31 = vmax.f32 %v20098_v41, %v9654_v15  ;;  %v9655_v56 = vmax.f32 %v9568_v55, %v9608_v57  ;;  %v9610_v19 = vpop.f32.mrb[95].mxu1 }
 0xa3e   :  { %v8990_v45 = vadd.f32 %v8980_v35, %v18159_v23  ;;  %v8981_v27 = vmax.f32 %v20099_v63, %v8971_v30  ;;  %v20104_v19 = vmax.f32 %v18594_v20, %v18648_v7  ;;  %v20105_v20 = vmax.f32 %v18596_v14, %v18659_v32 }
 0xa3f   :  { %v9674_v37 = vadd.f32 %v9664_v31, %v18159_v23  ;;  %v9665_v29 = vmax.f32 %v20100_v40, %v9655_v56  ;;  %v20107_v14 = vmax.f32 %v18600_v3, %v18667_v43 }
 0xa40   :  { %v8991_v54 = vadd.f32 %v8981_v27, %v18156_v33  ;;  %v9000_v44 = vmax.f32 %v8990_v45, 0.0 }
 0xa41   :  { %v9675_v28 = vadd.f32 %v9665_v29, %v18156_v33  ;;  %v8929_v18 = vpop.f32.mrb[96].mxu0  ;;  %v9684_v50 = vmax.f32 %v9674_v37, 0.0 }
 0xa42   :  { %v9001_v55 = vmax.f32 %v8991_v54, 0.0  ;;  %v8972_v15 = vmax.f32 %v18707_v34, %v8929_v18  ;;  %v9613_v35 = vpop.f32.mrb[96].mxu1  ;;  %v8931_v41 = vpop.f32.mrb[97].mxu0  ;;  %v20102_v34 = vmax.f32 %v18590_v24, %v18640_v13 }
 0xa43   :  { %v9685_v6 = vmax.f32 %v9675_v28, 0.0  ;;  %v9656_v47 = vmax.f32 %v18709_v8, %v9613_v35  ;;  %v9615_v23 = vpop.f32.mrb[97].mxu1  ;;  %v8932_v30 = vpop.f32.mrb[98].mxu0 }
 0xa44   :  { %v9010_v31 = vpack.c.bf16 %v9001_v55, %v9000_v44  ;;  %v8982_v0 = vmax.f32 %v20101_v51, %v8972_v15  ;;  %v8973_v33 = vmax.f32 %v18711_v5, %v8932_v30  ;;  %v9616_v48 = vpop.f32.mrb[98].mxu1  ;;  %v8934_v38 = vpop.f32.mrb[99].mxu0 }
 0xa45   :  { %v9694_v12 = vpack.c.bf16 %v9685_v6, %v9684_v50  ;;  %v9666_v57 = vmax.f32 %v20102_v34, %v9656_v47  ;;  %v9657_v16 = vmax.f32 %v18713_v22, %v9616_v48  ;;  %v9618_v56 = vpop.f32.mrb[99].mxu1 }
 0xa46   :  { %9015 = vst.msk [vmem:[#allocation3 + $0x50] sm:$0xff] %vm988_vm2, %v9010_v31  ;;  %v8992_v8 = vadd.f32 %v8982_v0, %v18209_v25  ;;  %v8983_v49 = vmax.f32 %v20103_v11, %v8973_v33 }
 0xa47   :  { %9699 = vst.msk [vmem:[#allocation3 + $0x78] sm:$0xff] %vm988_vm2, %v9694_v12  ;;  %v9676_v5 = vadd.f32 %v9666_v57, %v18209_v25  ;;  %v9667_v24 = vmax.f32 %v20104_v19, %v9657_v16 }
 0xa48   :  { %v8993_v13 = vadd.f32 %v8983_v49, %v18224_v60  ;;  %v9002_v63 = vmax.f32 %v8992_v8, 0.0  ;;  %v20112_v49 = vld [vmem:[#allocation11_spill] sm:$0xff] }
 0xa49   :  { %v9677_v22 = vadd.f32 %v9667_v24, %v18224_v60  ;;  %v8937_v45 = vpop.f32.mrb[100].mxu0  ;;  %v9686_v39 = vmax.f32 %v9676_v5, 0.0  ;;  %v20113_v24 = vld [vmem:[#allocation49_spill] sm:$0xff] }
 0xa4a   :  { %v9003_v27 = vmax.f32 %v8993_v13, 0.0  ;;  %v8974_v37 = vmax.f32 %v18715_v4, %v8937_v45  ;;  %v9621_v40 = vpop.f32.mrb[100].mxu1  ;;  %v8939_v46 = vpop.f32.mrb[101].mxu0  ;;  %v20106_v4 = vmax.f32 %v18598_v17, %v18663_v21  ;;  %v20108_v17 = vmax.f32 %v18602_v9, %v18671_v42 }
 0xa4b   :  { %v9687_v29 = vmax.f32 %v9677_v22, 0.0  ;;  %v9658_v54 = vmax.f32 %v18717_v2, %v9621_v40  ;;  %v9623_v25 = vpop.f32.mrb[101].mxu1  ;;  %v8940_v28 = vpop.f32.mrb[102].mxu0  ;;  %v20109_v42 = vmax.f32 %v18604_v36, %v18675_v61  ;;  %v20114_v22 = vld [vmem:[#allocation28_spill] sm:$0xff]  ;;  %v20115_v36 = vld [vmem:[#allocation23_spill] sm:$0xff] }
 0xa4c   :  { %v9011_v18 = vpack.c.bf16 %v9003_v27, %v9002_v63  ;;  %v8984_v7 = vmax.f32 %v20105_v20, %v8974_v37  ;;  %v8975_v60 = vmax.f32 %v18719_v59, %v8940_v28  ;;  %v9624_v44 = vpop.f32.mrb[102].mxu1  ;;  %v8942_v55 = vpop.f32.mrb[103].mxu0  ;;  %v9720_v59 = vld [vmem:[#allocation3 + $0x10] sm:$0xff]  ;;  %v20116_v61 = vmax.f32 %v20114_v22, %v20115_v36  ;;  %v9721_v63 = vld [vmem:[#allocation3 + $0x18] sm:$0xff] }
 0xa4d   :  { %v9695_v15 = vpack.c.bf16 %v9687_v29, %v9686_v39  ;;  %v9668_v35 = vmax.f32 %v20106_v4, %v9658_v54  ;;  %v9659_v41 = vmax.f32 %v18721_v62, %v9624_v44  ;;  %v9626_v50 = vpop.f32.mrb[103].mxu1  ;;  %v9728_v2 = vld [vmem:[#allocation3 + $0x50] sm:$0xff]  ;;  %v20117_v27 = vld [vmem:[#allocation39_spill] sm:$0xff] }
 0xa4e   :  { %9016 = vst.msk [vmem:[#allocation3 + $0x58] sm:$0xff] %vm988_vm2, %v9011_v18  ;;  %v8994_v6 = vadd.f32 %v8984_v7, %v18247_v10  ;;  %v8985_v32 = vmax.f32 %v20107_v14, %v8975_v60  ;;  %10835 = vmatprep.subr.bf16.mxu0 %v9728_v2  ;;  %v20118_v37 = vld [vmem:[#allocation38_spill] sm:$0xff]  ;;  %v20121_v20 = vld [vmem:[#allocation35_spill] sm:$0xff] }
 0xa4f   :  { %9700 = vst.msk [vmem:[#allocation3 + $0x80] sm:$0xff] %vm988_vm2, %v9695_v15  ;;  %v9678_v47 = vadd.f32 %v9668_v35, %v18247_v10  ;;  %v9669_v21 = vmax.f32 %v20108_v17, %v9659_v41  ;;  %10836 = vmatpush3.bf16.msra.mxu0 %v9720_v59  ;;  %v20119_v40 = vmax.f32 %v20117_v27, %v20118_v37  ;;  %v20120_v39 = vld [vmem:[#allocation10_spill] sm:$0xff] }
 0xa50   :  { %v8995_v62 = vadd.f32 %v8985_v32, %v18262_v1  ;;  %v9004_v31 = vmax.f32 %v8994_v6, 0.0  ;;  %v20122_v4 = vld [vmem:[#allocation34_spill] sm:$0xff]  ;;  %v20123_v6 = vld [vmem:[#allocation8_spill] sm:$0xff] }
 0xa51   :  { %v9679_v23 = vadd.f32 %v9669_v21, %v18262_v1  ;;  %v8945_v30 = vpop.f32.mrb[104].mxu0  ;;  %v9688_v33 = vmax.f32 %v9678_v47, 0.0  ;;  %v20124_v14 = vld [vmem:[#allocation58_spill] sm:$0xff] }
 0xa52   :  { %v9005_v51 = vmax.f32 %v8995_v62, 0.0  ;;  %v8976_v3 = vmax.f32 %v18723_v26, %v8945_v30  ;;  %v9629_v43 = vpop.f32.mrb[104].mxu1  ;;  %v8947_v0 = vpop.f32.mrb[105].mxu0  ;;  %v20110_v26 = vld [vmem:[#allocation31_spill] sm:$0xff]  ;;  %v20125_v32 = vmax.f32 %v20123_v6, %v20124_v14  ;;  %v20126_v47 = vld [vmem:[#allocation50_spill] sm:$0xff]  ;;  %v20127_v30 = vld [vmem:[#allocation33_spill] sm:$0xff] }
 0xa53   :  { %v9689_v48 = vmax.f32 %v9679_v23, 0.0  ;;  %v9660_v10 = vmax.f32 %v18725_v58, %v9629_v43  ;;  %v9631_v38 = vpop.f32.mrb[105].mxu1  ;;  %v8948_v12 = vpop.f32.mrb[106].mxu0  ;;  %v20111_v8 = vmax.f32 %v18606_v53, %v20110_v26  ;;  %v20130_v43 = vld [vmem:[#allocation45_spill] sm:$0xff]  ;;  %v20136_v26 = vld [vmem:[#allocation59_spill] sm:$0xff]  ;;  %v9724_v37 = vld [vmem:[#allocation3 + $0x30] sm:$0xff] }
 0xa54   :  { %v9012_v9 = vpack.c.bf16 %v9005_v51, %v9004_v31  ;;  %v8986_v34 = vmax.f32 %v20109_v42, %v8976_v3  ;;  %v8977_v1 = vmax.f32 %v18727_v52, %v8948_v12  ;;  %v9632_v57 = vpop.f32.mrb[106].mxu1  ;;  %v8950_v16 = vpop.f32.mrb[107].mxu0  ;;  %v20128_v31 = vld [vmem:[#allocation47_spill] sm:$0xff]  ;;  %v20132_v12 = vld [vmem:[#allocation25_spill] sm:$0xff] }
 0xa55   :  { %v9696_v56 = vpack.c.bf16 %v9689_v48, %v9688_v33  ;;  %v9670_v11 = vmax.f32 %v20111_v8, %v9660_v10  ;;  %v9661_v5 = vmax.f32 %v20112_v49, %v9632_v57  ;;  %v9634_v19 = vpop.f32.mrb[107].mxu1  ;;  %v9729_v58 = vld [vmem:[#allocation3 + $0x58] sm:$0xff]  ;;  %v20129_v51 = vmax.f32 %v20127_v30, %v20128_v31  ;;  %v20131_v10 = vld [vmem:[#allocation56_spill] sm:$0xff]  ;;  %v20138_v49 = vld [vmem:[#allocation30_spill] sm:$0xff] }
 0xa56   :  { %9017 = vst.msk [vmem:[#allocation3 + $0x60] sm:$0xff] %vm988_vm2, %v9012_v9  ;;  %v8996_v13 = vadd.f32 %v8986_v34, %v20113_v24  ;;  %v8987_v45 = vmax.f32 %v20116_v61, %v8977_v1  ;;  %10837 = vmatprep.subr.bf16.mxu0 %v9729_v58  ;;  %v9734_v52 = vld [vmem:[#allocation3 + $0x80] sm:$0xff] }
 0xa57   :  { %9701 = vst.msk [vmem:[#allocation3 + $0x88] sm:$0xff] %vm988_vm2, %v9696_v56  ;;  %v9680_v53 = vadd.f32 %v9670_v11, %v20113_v24  ;;  %v9671_v46 = vmax.f32 %v20119_v40, %v9661_v5  ;;  %10884 = vmatprep.subr.bf16.mxu1 %v9734_v52  ;;  %10838 = vmatpush3.bf16.msra.mxu0 %v9721_v63  ;;  %v20133_v9 = vld [vmem:[#allocation52_spill] sm:$0xff]  ;;  %v9723_v63 = vld [vmem:[#allocation3 + $0x28] sm:$0xff]  ;;  %v9733_v40 = vld [vmem:[#allocation3 + $0x78] sm:$0xff] }
 0xa58   :  { %v8997_v29 = vadd.f32 %v8987_v45, %v20120_v39  ;;  %10885 = vmatpush3.bf16.msra.mxu1 %v9734_v52  ;;  %v9006_v28 = vmax.f32 %v8996_v13, 0.0  ;;  %v20134_v42 = vmax.f32 %v20132_v12, %v20133_v9  ;;  %v9722_v57 = vld [vmem:[#allocation3 + $0x20] sm:$0xff] }
 0xa59   :  { %v9681_v54 = vadd.f32 %v9671_v46, %v20120_v39  ;;  %v8953_v25 = vpop.f32.mrb[108].mxu0  ;;  %v9690_v55 = vmax.f32 %v9680_v53, 0.0  ;;  %v20135_v56 = vld [vmem:[#allocation48_spill] sm:$0xff]  ;;  %v11963_v46 = vld [vmem:[%s18897_s5 + $0x20] ss:$12 sps:$4 sm:$0xff]  }
 0xa5a   :  { %v9007_v18 = vmax.f32 %v8997_v29, 0.0  ;;  %v8978_v7 = vmax.f32 %v20121_v20, %v8953_v25  ;;  %v9637_v60 = vpop.f32.mrb[108].mxu1  ;;  %v8955_v44 = vpop.f32.mrb[109].mxu0  ;;  %v20137_v8 = vmax.f32 %v20135_v56, %v20136_v26  ;;  %v11970_v39 = vld [vmem:[%s18897_s5 + $0x38] ss:$12 sps:$4 sm:$0xff]   ;;  %v9725_v29 = vld [vmem:[#allocation3 + $0x38] sm:$0xff] }
 0xa5b   :  { %v9691_v15 = vmax.f32 %v9681_v54, 0.0  ;;  %v9662_v35 = vmax.f32 %v20122_v4, %v9637_v60  ;;  %v9639_v41 = vpop.f32.mrb[109].mxu1  ;;  %v8956_v50 = vpop.f32.mrb[110].mxu0  ;;  %v11959_v54 = vld [vmem:[%s18897_s5] ss:$12 sps:$4 sm:$0xff]  }
 0xa5c   :  { %v9013_v2 = vpack.c.bf16 %v9007_v18, %v9006_v28  ;;  %v8988_v59 = vmax.f32 %v20125_v32, %v8978_v7  ;;  %v8979_v17 = vmax.f32 %v20126_v47, %v8956_v50  ;;  %v9640_v21 = vpop.f32.mrb[110].mxu1  ;;  %v8958_v62 = vpop.f32.mrb[111].mxu0  ;;  %v11966_v25 = vld [vmem:[%s18897_s5 + $0x1c] ss:$12 sps:$4 sm:$0xff]   ;;  %v11964_v18 = vld [vmem:[%s18897_s5 + $0x18] ss:$12 sps:$4 sm:$0xff]  }
 0xa5d   :  { %v9697_v23 = vpack.c.bf16 %v9691_v15, %v9690_v55  ;;  %v9672_v3 = vmax.f32 %v20129_v51, %v9662_v35  ;;  %v9663_v0 = vmax.f32 %v20130_v43, %v9640_v21  ;;  %v9642_v33 = vpop.f32.mrb[111].mxu1  ;;  %v9730_v48 = vld [vmem:[#allocation3 + $0x60] sm:$0xff]  ;;  %v9716_v7 = vld [vmem:[%s18897_s5 + $0x48] sm:$0x11]  ;;  %v12360_v15 = vmov 0.0   ;;  %v9753_v62 = vpop.permute.xlu0 %9752 }
 0xa5e   :  { %9018 = vst.msk [vmem:[#allocation3 + $0x68] sm:$0xff] %vm988_vm2, %v9013_v2  ;;  %v8998_v38 = vadd.f32 %v8988_v59, %v20131_v10  ;;  %v8989_v34 = vmax.f32 %v20134_v42, %v8979_v17  ;;  %10839 = vmatprep.subr.bf16.mxu0 %v9730_v48  ;;  %v9735_v1 = vld [vmem:[#allocation3 + $0x88] sm:$0xff]  ;;  %v11971_v28 = vld [vmem:[%s18897_s5 + $0x50] ss:$0 sps:$4 sm:$0x11]   ;;  %v10823_v44 = vcombine.high %v9716_v7, %v9716_v7  ;;  %v9748_v59 = vpop.permute.xlu1 %9747 }
 0xa5f   :  { %9702 = vst.msk [vmem:[#allocation3 + $0x90] sm:$0xff] %vm988_vm2, %v9697_v23  ;;  %v9682_v16 = vadd.f32 %v9672_v3, %v20131_v10  ;;  %v9673_v11 = vmax.f32 %v20137_v8, %v9663_v0  ;;  %10886 = vmatprep.subr.bf16.mxu1 %v9735_v1  ;;  %10840 = vmatpush3.bf16.msra.mxu0 %v9722_v57  ;;  %v11969_v20 = vld [vmem:[%s18897_s5 + $0x34] ss:$12 sps:$4 sm:$0xff]   ;;  %v11967_v60 = vld [vmem:[%s18897_s5 + $0x30] ss:$12 sps:$4 sm:$0xff]  }
 0xa60   :  { %v8999_v5 = vadd.f32 %v8989_v34, %v20138_v49  ;;  %10887 = vmatpush3.bf16.msra.mxu1 %v9735_v1  ;;  %v9008_v58 = vmax.f32 %v8998_v38, 0.0  ;;  %v10822_v55 = vcombine.low %v9716_v7, %v9716_v7 }
 0xa61   :  { %v9683_v19 = vadd.f32 %v9673_v11, %v20138_v49  ;;  %v9692_v13 = vmax.f32 %v9682_v16, 0.0  ;;  %v9763_v56 = vpop.permute.xlu0 %9762 }
 0xa62   :  { %v9009_v24 = vmax.f32 %v8999_v5, 0.0  ;;  %v9758_v42 = vpop.permute.xlu1 %9757 }
 0xa63   :  { %v9693_v22 = vmax.f32 %v9683_v19, 0.0 }
 0xa64   :  { %v9014_v36 = vpack.c.bf16 %v9009_v24, %v9008_v58 }
 0xa65   :  { %v9698_v61 = vpack.c.bf16 %v9693_v22, %v9692_v13  ;;  %v9731_v45 = vld [vmem:[#allocation3 + $0x68] sm:$0xff] }
 0xa66   :  { %9019 = vst.msk [vmem:[#allocation3 + $0x70] sm:$0xff] %vm988_vm2, %v9014_v36  ;;  %10841 = vmatprep.subr.bf16.mxu0 %v9731_v45  ;;  %v9736_v52 = vld [vmem:[#allocation3 + $0x90] sm:$0xff]  ;;  %v9768_v22 = vpop.permute.xlu1 %9767 }
 0xa67   :  { %9703 = vst.msk [vmem:[#allocation3 + $0x98] sm:$0xff] %vm988_vm2, %v9698_v61  ;;  %10888 = vmatprep.subr.bf16.mxu1 %v9736_v52  ;;  %10842 = vmatpush3.bf16.msra.mxu0 %v9723_v63  ;;  %v9773_v63 = vpop.permute.xlu0 %9772 }
 0xa68   :  { %10889 = vmatpush3.bf16.msra.mxu1 %v9736_v52 }
 0xa6d   :  { %v9732_v53 = vld [vmem:[#allocation3 + $0x70] sm:$0xff] }
 0xa6e   :  { %10843 = vmatprep.subr.bf16.mxu0 %v9732_v53  ;;  %v9737_v27 = vld [vmem:[#allocation3 + $0x98] sm:$0xff] }
 0xa6f   :  { %10890 = vmatprep.subr.bf16.mxu1 %v9737_v27  ;;  %10844 = vmatpush3.bf16.msra.mxu0 %v9724_v37 }
 0xa70   :  { %10891 = vmatpush3.bf16.msra.mxu1 %v9737_v27  ;;  %10845 = vmatprep.subr.bf16.mxu0 %v9733_v40 }
 0xa71   :  { %10900 = vmatprep.subr.bf16.mxu1 %v12360_v15 }
 0xa73   :  { %10846 = vmatpush3.bf16.msra.mxu0 %v9725_v29  ;;  %10893 = vmatmul.mubr.msk.bf16.vlgmr.msra.gmra.mrb[112].mxu1 %vm988_vm2, %v11963_v46 }
 0xa74   :  { %10896 = vmatprep.mubr.msk.bf16.mxu1 %vm988_vm2, %v11970_v39 }
 0xa76   :  { %9880 = vmatmul.mubr.bf16.vlgmr.msra.gmra.mrb[112].mxu0 %v11959_v54 }
 0xa77   :  { %9887 = vmatprep.mubr.bf16.mxu0 %v11966_v25 }
 0xa7b   :  { %10897 = vmatmul.mubr.msk.bf16.gmra.mrb[116].mxu1 %vm988_vm2, %v11971_v28  ;;  %v9778_v28 = vpop.permute.xlu1 %9777 }
 0xa7c   :  { %10908 = vmatprep.mubr.msk.bf16.mxu1 %vm12361_vm6, %v12360_v15 }
 0xa7e   :  { %9888 = vmatmul.mubr.bf16.gmra.mrb[116].mxu0 %v11964_v18 }
 0xa7f   :  { %9895 = vmatprep.mubr.bf16.mxu0 %v11969_v20 }
 0xa86   :  { %9896 = vmatmul.mubr.bf16.gmra.mrb[120].mxu0 %v11967_v60 }
 0xa87   :  { %9903 = vmatprep.mubr.bf16.mxu0 %v10823_v44 }
 0xa8e   :  { %9904 = vmatmul.mubr.bf16.gmra.mrb[124].mxu0 %v10822_v55 }
 0xb46   :  { %v10894_v4 = vpop.f32.mrb[112].mxu1 }
 0xb47   :  { %v9945_v35 = vpop.f32.mrb[113].mxu1 }
 0xb48   :  { %v10895_v41 = vpop.f32.mrb[114].mxu1 }
 0xb49   :  { %v10847_v50 = vpop.f32.mrb[112].mxu0  ;;  %v9948_v2 = vpop.f32.mrb[115].mxu1 }
 0xb4a   :  { %v10848_v6 = vpop.f32.mrb[113].mxu0 }
 0xb4b   :  { %v10849_v14 = vadd.f32 %v10848_v6, %v10847_v50  ;;  %v10850_v32 = vpop.f32.mrb[114].mxu0 }
 0xb4c   :  { %v10851_v47 = vpop.f32.mrb[115].mxu0 }
 0xb4d   :  { %v10852_v17 = vadd.f32 %v10851_v47, %v10850_v32  ;;  %v9882_v21 = vadd.f32 %v10849_v14, %v9748_v59  ;;  %v9998_v14 = vpop.permute.xlu1 %9997 }
 0xb4e   :  { %v10898_v23 = vpop.f32.mrb[116].mxu1 }
 0xb4f   :  { %v9946_v30 = vadd.f32 %v9945_v35, %v9882_v21  ;;  %v9885_v31 = vadd.f32 %v10852_v17, %v9753_v62  ;;  %v9961_v51 = vpop.f32.mrb[117].mxu1  ;;  %v11974_v35 = vld [vmem:[%s18898_s7] sm:$0x1f]  }
 0xb50   :  { %v10899_v3 = vpop.f32.mrb[118].mxu1 }
 0xb51   :  { %v9949_v43 = vadd.f32 %v9948_v2, %v9885_v31  ;;  %v10853_v0 = vpop.f32.mrb[116].mxu0  ;;  %v9964_v33 = vpop.f32.mrb[119].mxu1  ;;  %v9975_v10 = vmax.f32 %v9946_v30, 0.0 }
 0xb52   :  { %v10854_v48 = vpop.f32.mrb[117].mxu0 }
 0xb53   :  { %v9976_v38 = vmax.f32 %v9949_v43, 0.0  ;;  %v10855_v12 = vadd.f32 %v10854_v48, %v10853_v0  ;;  %v10856_v9 = vpop.f32.mrb[118].mxu0 }
 0xb54   :  { %v10857_v34 = vpop.f32.mrb[119].mxu0 }
 0xb55   :  { %v9982_v1 = vpack.c.bf16 %v9976_v38, %v9975_v10  ;;  %v9890_v57 = vadd.f32 %v10855_v12, %v9758_v42  ;;  %v10858_v16 = vadd.f32 %v10857_v34, %v10856_v9 }
 0xb57   :  { %v9954_v26 = vadd.f32 %v10894_v4, %v9890_v57  ;;  %v9893_v8 = vadd.f32 %v10858_v16, %v9763_v56  ;;  %10901 = vmatpush3.bf16.msra.mxu1 %v9982_v1 }
 0xb58   :  { %10902 = vmatprep.subr.bf16.mxu1 %v12360_v15 }
 0xb59   :  { %v9957_v11 = vadd.f32 %v10895_v41, %v9893_v8  ;;  %v10859_v49 = vpop.f32.mrb[120].mxu0  ;;  %v9977_v19 = vmax.f32 %v9954_v26, 0.0  ;;  %v9993_v41 = vpop.permute.xlu0 %9992 }
 0xb5a   :  { %v10860_v5 = vpop.f32.mrb[121].mxu0 }
 0xb5b   :  { %v9978_v58 = vmax.f32 %v9957_v11, 0.0  ;;  %v10861_v24 = vadd.f32 %v10860_v5, %v10859_v49  ;;  %v10862_v13 = vpop.f32.mrb[122].mxu0 }
 0xb5c   :  { %v10863_v36 = vpop.f32.mrb[123].mxu0 }
 0xb5d   :  { %v9983_v61 = vpack.c.bf16 %v9978_v58, %v9977_v19  ;;  %v10864_v45 = vadd.f32 %v10863_v36, %v10862_v13  ;;  %v9898_v52 = vadd.f32 %v10861_v24, %v9768_v22 }
 0xb5f   :  { %v9962_v53 = vadd.f32 %v9961_v51, %v9898_v52  ;;  %10903 = vmatpush3.bf16.msra.mxu1 %v9983_v61  ;;  %v9901_v27 = vadd.f32 %v10864_v45, %v9773_v63 }
 0xb60   :  { %10904 = vmatprep.subr.bf16.mxu1 %v12360_v15 }
 0xb61   :  { %v9965_v37 = vadd.f32 %v9964_v33, %v9901_v27  ;;  %v10865_v40 = vpop.f32.mrb[124].mxu0  ;;  %v9979_v39 = vmax.f32 %v9962_v53, 0.0 }
 0xb62   :  { %v10866_v46 = vpop.f32.mrb[125].mxu0 }
 0xb63   :  { %v9980_v29 = vmax.f32 %v9965_v37, 0.0  ;;  %v10867_v54 = vadd.f32 %v10866_v46, %v10865_v40  ;;  %v10868_v25 = vpop.f32.mrb[126].mxu0 }
 0xb64   :  { %v10869_v18 = vpop.f32.mrb[127].mxu0 }
 0xb65   :  { %v9984_v20 = vpack.c.bf16 %v9980_v29, %v9979_v39  ;;  %v9906_v7 = vadd.f32 %v10867_v54, %v9778_v28 }
 0xb67   :  { %v9970_v60 = vadd.f32 %v10898_v23, %v9906_v7  ;;  %10905 = vmatpush3.bf16.msra.mxu1 %v9984_v20 }
 0xb68   :  { %10906 = vmatprep.subr.bf16.mxu1 %v12360_v15 }
 0xb69   :  { %v9981_v44 = vmax.f32 %v9970_v60, 0.0 }
 0xb6b   :  { %v9985_v55 = vpack.c.bf16 %v9981_v44, %v9981_v44 }
 0xb6d   :  { %v10011_v4 = vsel %vm10009_vm7, %v9985_v55, 0 }
 0xb6e   :  { %10907 = vmatpush3.bf16.msra.mxu1 %v10011_v4 }
 0xb71   :  { %10909 = vmatmul.mubr.msk.bf16.vlgmr.msra.gmra.mrb[120].mxu1 %vm10005_vm8, %v11974_v35 }
 0xc44   :  { %v10047_v50 = vpop.f32.mrb[120].mxu1 }
 0xc45   :  { %v10048_v2 = vadd.f32 %v10047_v50, %v9993_v41  ;;  %v10910_v6 = vpop.f32.mrb[121].mxu1 }
 0xc46   :  { %v10050_v32 = vpop.f32.mrb[122].mxu1 }
 0xc47   :  { %10054 = vst.msk [vmem:[%s18899_s9] sm:$0xff] %vm988_vm2, %v10048_v2  ;;  %v10051_v15 = vadd.f32 %v10050_v32, %v9998_v14  ;;  %v10911_v59 = vpop.f32.mrb[123].mxu1 }
 0xc49   :  { %10056 = vst.msk [vmem:[%s18899_s9 + $0x8] sm:$0x3] %vm10055_vm9, %v10051_v15 }

</bundles_post_ra>
